<compile_context>
chip_gen: v7x
topology: tpu7x:2x2x1
jax: 0.10.0
libtpu: 0.0.40
codegen_flags: <defaults>
</compile_context>

<pallas_src>
import numpy as np
import jax
import jax.numpy as jnp
from jax.experimental import pallas as pl
from jax.experimental.pallas import tpu as pltpu


# ----------------------------- kernel helpers ------------------------------

def _bn_relu(v, s_ref, b_ref):
    """Folded BatchNorm (inference) + ReLU, kept in f32. v: (H, W, C); s/b refs: (1, 1, C)."""
    return jnp.maximum(v * s_ref[...] + b_ref[...], 0.0)


def _conv3x3_same(a, w_ref):
    """3x3, stride 1, SAME-padding conv as a single im2col MXU matmul.

    a:      (H, W, Cin) f32 value (registers)
    w_ref:  (9*Cin, Cout) bf16 VMEM ref, flattened from HWIO (ky, kx, cin, cout)
    returns (H*W, Cout) f32.

    The 9 shifted taps are built with static slices + zero concat (H shifts touch only
    the un-tiled leading dim; W shifts are sublane shifts handled by the XLU), stacked
    along lanes, then contracted in one matmul (K = 9*Cin) with f32 accumulation.
    """
    H, W, C = a.shape
    zrow = jnp.zeros((1, W, C), a.dtype)
    zcol = jnp.zeros((H, 1, C), a.dtype)
    taps = []
    for dy in (-1, 0, 1):            # dy = ky - 1  (ky slowest, matches weight reshape)
        if dy == 0:
            ah = a
        elif dy > 0:                 # tap[h] = a[h + 1], zero at bottom edge
            ah = jnp.concatenate([a[1:], zrow], axis=0)
        else:                        # tap[h] = a[h - 1], zero at top edge
            ah = jnp.concatenate([zrow, a[:-1]], axis=0)
        for dx in (-1, 0, 1):        # dx = kx - 1
            if dx == 0:
                t = ah
            elif dx > 0:             # tap[:, w] = ah[:, w + 1], zero at right edge
                t = jnp.concatenate([ah[:, 1:, :], zcol], axis=1)
            else:                    # tap[:, w] = ah[:, w - 1], zero at left edge
                t = jnp.concatenate([zcol, ah[:, :-1, :]], axis=1)
            taps.append(t)
    cols = jnp.concatenate(taps, axis=-1)                  # (H, W, 9*C), registers only
    cols = cols.reshape(H * W, 9 * C).astype(jnp.bfloat16)  # sublane-merge reshape (cheap)
    return jnp.dot(cols, w_ref[...], preferred_element_type=jnp.float32)


def _to_lane_dense(y):
    """(H, W, C) -> (H, W*C) so the output store is fully lane-dense (W*C % 128 == 0).

    Built as a lane-axis concat of per-w slabs (result[h, w*C + c] == y[h, w, c]) to
    avoid an unaligned lane-merging reshape.
    """
    H, W, C = y.shape
    return jnp.concatenate([y[:, w, :] for w in range(W)], axis=-1)


# --------------------------------- kernel ----------------------------------

def convblock_kernel(x_ref,
                     s1_ref, b1_ref, w1_ref,
                     s2_ref, b2_ref, w2_ref,
                     s3_ref, b3_ref, w3_ref,
                     sd_ref, bd_ref, wd_ref,
                     out_ref):
    x = x_ref[...]                                           # (H, W, Cin) f32
    H, W, Cin = x.shape

    # branch 1: BN1 -> ReLU -> conv3x3 (Cin -> Cout/2)
    a1 = _bn_relu(x, s1_ref, b1_ref)
    o1 = _conv3x3_same(a1, w1_ref)                           # (H*W, Cmid) f32
    cmid = o1.shape[-1]

    # branch 2: BN2 -> ReLU -> conv3x3 (Cout/2 -> Cout/4)
    a2 = _bn_relu(o1.reshape(H, W, cmid), s2_ref, b2_ref)
    o2 = _conv3x3_same(a2, w2_ref)                           # (H*W, Cq)
    cq = o2.shape[-1]

    # branch 3: BN3 -> ReLU -> conv3x3 (Cout/4 -> Cout/4)
    a3 = _bn_relu(o2.reshape(H, W, cq), s3_ref, b3_ref)
    o3 = _conv3x3_same(a3, w3_ref)                           # (H*W, Cq)

    # downsample residual: BN -> ReLU -> 1x1 conv (Cin -> Cout), one matmul
    ad = _bn_relu(x, sd_ref, bd_ref)
    res = jnp.dot(ad.reshape(H * W, Cin).astype(jnp.bfloat16), wd_ref[...],
                  preferred_element_type=jnp.float32)        # (H*W, Cout)

    # out = concat([o1, o2, o3], channel) + residual -> one lane-dense store
    y = jnp.concatenate([o1, o2, o3], axis=-1) + res         # (H*W, Cout) f32, registers
    cout = y.shape[-1]
    out_ref[...] = _to_lane_dense(y.reshape(H, W, cout))     # (H, W*Cout) single store


# -------------------------------- wrapper -----------------------------------

def conv_block_forward(x_nchw, p):
    """NCHW in / NCHW out. Grid over batch ("parallel" for v7x dual-TC), one image per step."""
    x = jnp.transpose(x_nchw, (0, 2, 3, 1)).astype(jnp.float32)   # NHWC
    N, H, W, Cin = x.shape
    Cmid = p['w1'].shape[-1]          # out_planes // 2
    Cq = p['w2'].shape[-1]            # out_planes // 4
    Cout = Cmid + 2 * Cq

    # Weight prep (wrapper-side): HWIO (3,3,Cin,Cout) -> (9*Cin, Cout), bf16 for the MXU.
    w1 = p['w1'].reshape(9 * Cin, Cmid).astype(jnp.bfloat16)
    w2 = p['w2'].reshape(9 * Cmid, Cq).astype(jnp.bfloat16)
    w3 = p['w3'].reshape(9 * Cq, Cq).astype(jnp.bfloat16)
    wd = p['wd'].astype(jnp.bfloat16)

    args = (x,
            p['s1'], p['b1'], w1,
            p['s2'], p['b2'], w2,
            p['s3'], p['b3'], w3,
            p['sd'], p['bd'], wd)

    def _const_spec(a):
        zeros = (0,) * a.ndim
        return pl.BlockSpec(a.shape, lambda n: zeros)

    in_specs = ([pl.BlockSpec((None, H, W, Cin), lambda n: (n, 0, 0, 0))]
                + [_const_spec(a) for a in args[1:]])
    out_specs = pl.BlockSpec((None, H, W * Cout), lambda n: (n, 0, 0))

    flops = 2 * N * H * W * (9 * Cin * Cmid + 9 * Cmid * Cq + 9 * Cq * Cq + Cin * Cout)
    bytes_accessed = int(x.size * 4 + N * H * W * Cout * 4
                         + sum(int(a.size) * a.dtype.itemsize for a in args[1:]))

    out_wide = pl.pallas_call(
        convblock_kernel,
        out_shape=jax.ShapeDtypeStruct((N, H, W * Cout), jnp.float32),
        grid=(N,),
        in_specs=in_specs,
        out_specs=out_specs,
        compiler_params=pltpu.CompilerParams(
            dimension_semantics=("parallel",),
            vmem_limit_bytes=32 * 1024 * 1024),
        cost_estimate=pl.CostEstimate(flops=int(flops), transcendentals=0,
                                      bytes_accessed=bytes_accessed),
    )(*args)

    out = out_wide.reshape(N, H, W, Cout)                    # wrapper-side relayout
    return jnp.transpose(out, (0, 3, 1, 2))                  # back to NCHW


# ---------------- deterministic parameter construction (glue) ----------------

def _folded_bn(key, c, eps=1e-5):
    k1, k2, k3, k4 = jax.random.split(key, 4)
    gamma = jax.random.uniform(k1, (c,), minval=0.5, maxval=1.5)
    beta = 0.1 * jax.random.normal(k2, (c,))
    mean = 0.1 * jax.random.normal(k3, (c,))
    var = jax.random.uniform(k4, (c,), minval=0.5, maxval=1.5)
    scale = gamma / jnp.sqrt(var + eps)
    bias = beta - mean * scale
    return (scale.reshape(1, 1, c).astype(jnp.float32),
            bias.reshape(1, 1, c).astype(jnp.float32))


def make_params(key, in_planes, out_planes):
    cmid = out_planes // 2
    cq = out_planes // 4
    ks = jax.random.split(key, 8)
    p = {}
    p['s1'], p['b1'] = _folded_bn(ks[0], in_planes)
    p['w1'] = (0.1 * jax.random.normal(ks[1], (3, 3, in_planes, cmid))).astype(jnp.float32)
    p['s2'], p['b2'] = _folded_bn(ks[2], cmid)
    p['w2'] = (0.1 * jax.random.normal(ks[3], (3, 3, cmid, cq))).astype(jnp.float32)
    p['s3'], p['b3'] = _folded_bn(ks[4], cq)
    p['w3'] = (0.1 * jax.random.normal(ks[5], (3, 3, cq, cq))).astype(jnp.float32)
    # downsample branch (in_planes != out_planes)
    p['sd'], p['bd'] = _folded_bn(ks[6], in_planes)
    p['wd'] = (0.1 * jax.random.normal(ks[7], (in_planes, out_planes))).astype(jnp.float32)
    return p


# ---------------- pure-JAX reference for correctness check ----------------
# Matches the kernel's MXU precision: conv/matmul inputs cast to bf16, f32 accumulation.

def ref_forward(x_nchw, p):
    x = jnp.transpose(x_nchw, (0, 2, 3, 1)).astype(jnp.float32)

    def conv(a, w):
        return jax.lax.conv_general_dilated(
            a.astype(jnp.bfloat16), w.astype(jnp.bfloat16),
            window_strides=(1, 1), padding='SAME',
            dimension_numbers=('NHWC', 'HWIO', 'NHWC'),
            preferred_element_type=jnp.float32)

    a1 = jax.nn.relu(x * p['s1'] + p['b1'])
    o1 = conv(a1, p['w1'])
    a2 = jax.nn.relu(o1 * p['s2'] + p['b2'])
    o2 = conv(a2, p['w2'])
    a3 = jax.nn.relu(o2 * p['s3'] + p['b3'])
    o3 = conv(a3, p['w3'])
    ad = jax.nn.relu(x * p['sd'] + p['bd'])
    res = jnp.einsum('nhwc,co->nhwo', ad.astype(jnp.bfloat16),
                     p['wd'].astype(jnp.bfloat16),
                     preferred_element_type=jnp.float32)
    out = jnp.concatenate([o1, o2, o3], axis=-1) + res
    return jnp.transpose(out, (0, 3, 1, 2))


if __name__ == "__main__":
    key = jax.random.PRNGKey(0)
    k_x, k_p = jax.random.split(key)

    # W * OUT_PLANES = 512 (multiple of 128) -> fully lane-dense output store;
    # H, W multiples of 8 keep every in-kernel reshape tile-aligned.
    N, IN_PLANES, H, W = 2, 16, 16, 16
    OUT_PLANES = 32  # != in_planes -> downsample branch active

    x_nchw = jax.random.normal(k_x, (N, IN_PLANES, H, W), dtype=jnp.float32)
    params = make_params(k_p, IN_PLANES, OUT_PLANES)

    out = jax.block_until_ready(conv_block_forward(x_nchw, params))
    ref = jax.block_until_ready(ref_forward(x_nchw, params))

    # Tolerance accounts for bf16 MXU inputs (f32 accumulation) in both paths.
    np.testing.assert_allclose(np.asarray(out), np.asarray(ref),
                               rtol=1e-2, atol=1e-2)
    print("KERNEL_OK")
</pallas_src>

<mosaic_0001>
module attributes {stable_mosaic.version = 11 : i64} {
  func.func @convblock_kernel(%arg0: i32, %arg1: memref<1x16x16x16xf32, #tpu.memory_space<vmem>>, %arg2: memref<1x1x16xf32, #tpu.memory_space<vmem>>, %arg3: memref<1x1x16xf32, #tpu.memory_space<vmem>>, %arg4: memref<144x16xbf16, #tpu.memory_space<vmem>>, %arg5: memref<1x1x16xf32, #tpu.memory_space<vmem>>, %arg6: memref<1x1x16xf32, #tpu.memory_space<vmem>>, %arg7: memref<144x8xbf16, #tpu.memory_space<vmem>>, %arg8: memref<1x1x8xf32, #tpu.memory_space<vmem>>, %arg9: memref<1x1x8xf32, #tpu.memory_space<vmem>>, %arg10: memref<72x8xbf16, #tpu.memory_space<vmem>>, %arg11: memref<1x1x16xf32, #tpu.memory_space<vmem>>, %arg12: memref<1x1x16xf32, #tpu.memory_space<vmem>>, %arg13: memref<16x32xbf16, #tpu.memory_space<vmem>>, %arg14: memref<1x16x512xf32, #tpu.memory_space<vmem>>) attributes {dimension_semantics = [#tpu.dimension_semantics<parallel>], iteration_bounds = array<i64: 2>, scalar_prefetch = 0 : i64, scratch_operands = 0 : i64, tpu.core_type = #tpu.core_type<tc>, window_params = [{transform_indices = @transform_0, window_bounds = array<i64: 1, 16, 16, 16>}, {pipeline_mode = #tpu.pipeline_mode<synchronous>, transform_indices = @transform_1, window_bounds = array<i64: 1, 1, 16>}, {pipeline_mode = #tpu.pipeline_mode<synchronous>, transform_indices = @transform_2, window_bounds = array<i64: 1, 1, 16>}, {pipeline_mode = #tpu.pipeline_mode<synchronous>, transform_indices = @transform_3, window_bounds = array<i64: 144, 16>}, {pipeline_mode = #tpu.pipeline_mode<synchronous>, transform_indices = @transform_4, window_bounds = array<i64: 1, 1, 16>}, {pipeline_mode = #tpu.pipeline_mode<synchronous>, transform_indices = @transform_5, window_bounds = array<i64: 1, 1, 16>}, {pipeline_mode = #tpu.pipeline_mode<synchronous>, transform_indices = @transform_6, window_bounds = array<i64: 144, 8>}, {pipeline_mode = #tpu.pipeline_mode<synchronous>, transform_indices = @transform_7, window_bounds = array<i64: 1, 1, 8>}, {pipeline_mode = #tpu.pipeline_mode<synchronous>, transform_indices = @transform_8, window_bounds = array<i64: 1, 1, 8>}, {pipeline_mode = #tpu.pipeline_mode<synchronous>, transform_indices = @transform_9, window_bounds = array<i64: 72, 8>}, {pipeline_mode = #tpu.pipeline_mode<synchronous>, transform_indices = @transform_10, window_bounds = array<i64: 1, 1, 16>}, {pipeline_mode = #tpu.pipeline_mode<synchronous>, transform_indices = @transform_11, window_bounds = array<i64: 1, 1, 16>}, {pipeline_mode = #tpu.pipeline_mode<synchronous>, transform_indices = @transform_12, window_bounds = array<i64: 16, 32>}, {transform_indices = @transform_13, window_bounds = array<i64: 1, 16, 512>}]} {
    %c0 = arith.constant 0 : index
    %c0_0 = arith.constant 0 : index
    %c0_1 = arith.constant 0 : index
    %c0_2 = arith.constant 0 : index
    %0 = vector.load %arg1[%c0, %c0_0, %c0_1, %c0_2] : memref<1x16x16x16xf32, #tpu.memory_space<vmem>>, vector<1x16x16x16xf32>
    %1 = vector.shape_cast %0 : vector<1x16x16x16xf32> to vector<16x16x16xf32>
    %c0_3 = arith.constant 0 : index
    %c0_4 = arith.constant 0 : index
    %c0_5 = arith.constant 0 : index
    %2 = vector.load %arg2[%c0_3, %c0_4, %c0_5] : memref<1x1x16xf32, #tpu.memory_space<vmem>>, vector<1x1x16xf32>
    %3 = vector.broadcast %2 : vector<1x1x16xf32> to vector<16x16x16xf32>
    %4 = arith.mulf %1, %3 : vector<16x16x16xf32>
    %c0_6 = arith.constant 0 : index
    %c0_7 = arith.constant 0 : index
    %c0_8 = arith.constant 0 : index
    %5 = vector.load %arg3[%c0_6, %c0_7, %c0_8] : memref<1x1x16xf32, #tpu.memory_space<vmem>>, vector<1x1x16xf32>
    %6 = vector.broadcast %5 : vector<1x1x16xf32> to vector<16x16x16xf32>
    %7 = arith.addf %4, %6 : vector<16x16x16xf32>
    %cst = arith.constant 0.000000e+00 : f32
    %8 = vector.broadcast %cst : f32 to vector<16x16x16xf32>
    %9 = arith.maximumf %7, %8 : vector<16x16x16xf32>
    %cst_9 = arith.constant 0.000000e+00 : f32
    %10 = vector.broadcast %cst_9 : f32 to vector<1x16x16xf32>
    %cst_10 = arith.constant 0.000000e+00 : f32
    %11 = vector.broadcast %cst_10 : f32 to vector<16x1x16xf32>
    %12 = vector.extract_strided_slice %9 {offsets = [0, 0, 0], sizes = [15, 16, 16], strides = [1, 1, 1]} : vector<16x16x16xf32> to vector<15x16x16xf32>
    %13 = tpu.concatenate %10, %12 in 0 : vector<1x16x16xf32>, vector<15x16x16xf32> -> vector<16x16x16xf32>
    %14 = vector.extract_strided_slice %13 {offsets = [0, 0, 0], sizes = [16, 15, 16], strides = [1, 1, 1]} : vector<16x16x16xf32> to vector<16x15x16xf32>
    %15 = tpu.concatenate %11, %14 in 1 : vector<16x1x16xf32>, vector<16x15x16xf32> -> vector<16x16x16xf32>
    %16 = vector.extract_strided_slice %13 {offsets = [0, 1, 0], sizes = [16, 15, 16], strides = [1, 1, 1]} : vector<16x16x16xf32> to vector<16x15x16xf32>
    %17 = tpu.concatenate %16, %11 in 1 : vector<16x15x16xf32>, vector<16x1x16xf32> -> vector<16x16x16xf32>
    %18 = vector.extract_strided_slice %9 {offsets = [0, 0, 0], sizes = [16, 15, 16], strides = [1, 1, 1]} : vector<16x16x16xf32> to vector<16x15x16xf32>
    %19 = tpu.concatenate %11, %18 in 1 : vector<16x1x16xf32>, vector<16x15x16xf32> -> vector<16x16x16xf32>
    %20 = vector.extract_strided_slice %9 {offsets = [0, 1, 0], sizes = [16, 15, 16], strides = [1, 1, 1]} : vector<16x16x16xf32> to vector<16x15x16xf32>
    %21 = tpu.concatenate %20, %11 in 1 : vector<16x15x16xf32>, vector<16x1x16xf32> -> vector<16x16x16xf32>
    %22 = vector.extract_strided_slice %9 {offsets = [1, 0, 0], sizes = [15, 16, 16], strides = [1, 1, 1]} : vector<16x16x16xf32> to vector<15x16x16xf32>
    %23 = tpu.concatenate %22, %10 in 0 : vector<15x16x16xf32>, vector<1x16x16xf32> -> vector<16x16x16xf32>
    %24 = vector.extract_strided_slice %23 {offsets = [0, 0, 0], sizes = [16, 15, 16], strides = [1, 1, 1]} : vector<16x16x16xf32> to vector<16x15x16xf32>
    %25 = tpu.concatenate %11, %24 in 1 : vector<16x1x16xf32>, vector<16x15x16xf32> -> vector<16x16x16xf32>
    %26 = vector.extract_strided_slice %23 {offsets = [0, 1, 0], sizes = [16, 15, 16], strides = [1, 1, 1]} : vector<16x16x16xf32> to vector<16x15x16xf32>
    %27 = tpu.concatenate %26, %11 in 1 : vector<16x15x16xf32>, vector<16x1x16xf32> -> vector<16x16x16xf32>
    %28 = tpu.concatenate %15, %13, %17, %19, %9, %21, %25, %23, %27 in 2 : vector<16x16x16xf32>, vector<16x16x16xf32>, vector<16x16x16xf32>, vector<16x16x16xf32>, vector<16x16x16xf32>, vector<16x16x16xf32>, vector<16x16x16xf32>, vector<16x16x16xf32>, vector<16x16x16xf32> -> vector<16x16x144xf32>
    %29 = vector.shape_cast %28 : vector<16x16x144xf32> to vector<256x144xf32>
    %30 = arith.truncf %29 : vector<256x144xf32> to vector<256x144xbf16>
    %c0_11 = arith.constant 0 : index
    %c0_12 = arith.constant 0 : index
    %31 = vector.load %arg4[%c0_11, %c0_12] : memref<144x16xbf16, #tpu.memory_space<vmem>>, vector<144x16xbf16>
    %cst_13 = arith.constant dense<0.000000e+00> : vector<256x16xf32>
    %32 = tpu.matmul %30, %31, %cst_13 {dimension_numbers = #tpu.dot_dimension_numbers<[1], [0], [0], [1], [0, 0, 1, 1], [], []>} : vector<256x144xbf16>, vector<144x16xbf16>, vector<256x16xf32> -> vector<256x16xf32>
    %33 = vector.shape_cast %32 : vector<256x16xf32> to vector<16x16x16xf32>
    %c0_14 = arith.constant 0 : index
    %c0_15 = arith.constant 0 : index
    %c0_16 = arith.constant 0 : index
    %34 = vector.load %arg5[%c0_14, %c0_15, %c0_16] : memref<1x1x16xf32, #tpu.memory_space<vmem>>, vector<1x1x16xf32>
    %35 = vector.broadcast %34 : vector<1x1x16xf32> to vector<16x16x16xf32>
    %36 = arith.mulf %33, %35 : vector<16x16x16xf32>
    %c0_17 = arith.constant 0 : index
    %c0_18 = arith.constant 0 : index
    %c0_19 = arith.constant 0 : index
    %37 = vector.load %arg6[%c0_17, %c0_18, %c0_19] : memref<1x1x16xf32, #tpu.memory_space<vmem>>, vector<1x1x16xf32>
    %38 = vector.broadcast %37 : vector<1x1x16xf32> to vector<16x16x16xf32>
    %39 = arith.addf %36, %38 : vector<16x16x16xf32>
    %cst_20 = arith.constant 0.000000e+00 : f32
    %40 = vector.broadcast %cst_20 : f32 to vector<16x16x16xf32>
    %41 = arith.maximumf %39, %40 : vector<16x16x16xf32>
    %cst_21 = arith.constant 0.000000e+00 : f32
    %42 = vector.broadcast %cst_21 : f32 to vector<1x16x16xf32>
    %cst_22 = arith.constant 0.000000e+00 : f32
    %43 = vector.broadcast %cst_22 : f32 to vector<16x1x16xf32>
    %44 = vector.extract_strided_slice %41 {offsets = [0, 0, 0], sizes = [15, 16, 16], strides = [1, 1, 1]} : vector<16x16x16xf32> to vector<15x16x16xf32>
    %45 = tpu.concatenate %42, %44 in 0 : vector<1x16x16xf32>, vector<15x16x16xf32> -> vector<16x16x16xf32>
    %46 = vector.extract_strided_slice %45 {offsets = [0, 0, 0], sizes = [16, 15, 16], strides = [1, 1, 1]} : vector<16x16x16xf32> to vector<16x15x16xf32>
    %47 = tpu.concatenate %43, %46 in 1 : vector<16x1x16xf32>, vector<16x15x16xf32> -> vector<16x16x16xf32>
    %48 = vector.extract_strided_slice %45 {offsets = [0, 1, 0], sizes = [16, 15, 16], strides = [1, 1, 1]} : vector<16x16x16xf32> to vector<16x15x16xf32>
    %49 = tpu.concatenate %48, %43 in 1 : vector<16x15x16xf32>, vector<16x1x16xf32> -> vector<16x16x16xf32>
    %50 = vector.extract_strided_slice %41 {offsets = [0, 0, 0], sizes = [16, 15, 16], strides = [1, 1, 1]} : vector<16x16x16xf32> to vector<16x15x16xf32>
    %51 = tpu.concatenate %43, %50 in 1 : vector<16x1x16xf32>, vector<16x15x16xf32> -> vector<16x16x16xf32>
    %52 = vector.extract_strided_slice %41 {offsets = [0, 1, 0], sizes = [16, 15, 16], strides = [1, 1, 1]} : vector<16x16x16xf32> to vector<16x15x16xf32>
    %53 = tpu.concatenate %52, %43 in 1 : vector<16x15x16xf32>, vector<16x1x16xf32> -> vector<16x16x16xf32>
    %54 = vector.extract_strided_slice %41 {offsets = [1, 0, 0], sizes = [15, 16, 16], strides = [1, 1, 1]} : vector<16x16x16xf32> to vector<15x16x16xf32>
    %55 = tpu.concatenate %54, %42 in 0 : vector<15x16x16xf32>, vector<1x16x16xf32> -> vector<16x16x16xf32>
    %56 = vector.extract_strided_slice %55 {offsets = [0, 0, 0], sizes = [16, 15, 16], strides = [1, 1, 1]} : vector<16x16x16xf32> to vector<16x15x16xf32>
    %57 = tpu.concatenate %43, %56 in 1 : vector<16x1x16xf32>, vector<16x15x16xf32> -> vector<16x16x16xf32>
    %58 = vector.extract_strided_slice %55 {offsets = [0, 1, 0], sizes = [16, 15, 16], strides = [1, 1, 1]} : vector<16x16x16xf32> to vector<16x15x16xf32>
    %59 = tpu.concatenate %58, %43 in 1 : vector<16x15x16xf32>, vector<16x1x16xf32> -> vector<16x16x16xf32>
    %60 = tpu.concatenate %47, %45, %49, %51, %41, %53, %57, %55, %59 in 2 : vector<16x16x16xf32>, vector<16x16x16xf32>, vector<16x16x16xf32>, vector<16x16x16xf32>, vector<16x16x16xf32>, vector<16x16x16xf32>, vector<16x16x16xf32>, vector<16x16x16xf32>, vector<16x16x16xf32> -> vector<16x16x144xf32>
    %61 = vector.shape_cast %60 : vector<16x16x144xf32> to vector<256x144xf32>
    %62 = arith.truncf %61 : vector<256x144xf32> to vector<256x144xbf16>
    %c0_23 = arith.constant 0 : index
    %c0_24 = arith.constant 0 : index
    %63 = vector.load %arg7[%c0_23, %c0_24] : memref<144x8xbf16, #tpu.memory_space<vmem>>, vector<144x8xbf16>
    %cst_25 = arith.constant dense<0.000000e+00> : vector<256x8xf32>
    %64 = tpu.matmul %62, %63, %cst_25 {dimension_numbers = #tpu.dot_dimension_numbers<[1], [0], [0], [1], [0, 0, 1, 1], [], []>} : vector<256x144xbf16>, vector<144x8xbf16>, vector<256x8xf32> -> vector<256x8xf32>
    %65 = vector.shape_cast %64 : vector<256x8xf32> to vector<16x16x8xf32>
    %c0_26 = arith.constant 0 : index
    %c0_27 = arith.constant 0 : index
    %c0_28 = arith.constant 0 : index
    %66 = vector.load %arg8[%c0_26, %c0_27, %c0_28] : memref<1x1x8xf32, #tpu.memory_space<vmem>>, vector<1x1x8xf32>
    %67 = vector.broadcast %66 : vector<1x1x8xf32> to vector<16x16x8xf32>
    %68 = arith.mulf %65, %67 : vector<16x16x8xf32>
    %c0_29 = arith.constant 0 : index
    %c0_30 = arith.constant 0 : index
    %c0_31 = arith.constant 0 : index
    %69 = vector.load %arg9[%c0_29, %c0_30, %c0_31] : memref<1x1x8xf32, #tpu.memory_space<vmem>>, vector<1x1x8xf32>
    %70 = vector.broadcast %69 : vector<1x1x8xf32> to vector<16x16x8xf32>
    %71 = arith.addf %68, %70 : vector<16x16x8xf32>
    %cst_32 = arith.constant 0.000000e+00 : f32
    %72 = vector.broadcast %cst_32 : f32 to vector<16x16x8xf32>
    %73 = arith.maximumf %71, %72 : vector<16x16x8xf32>
    %cst_33 = arith.constant 0.000000e+00 : f32
    %74 = vector.broadcast %cst_33 : f32 to vector<1x16x8xf32>
    %cst_34 = arith.constant 0.000000e+00 : f32
    %75 = vector.broadcast %cst_34 : f32 to vector<16x1x8xf32>
    %76 = vector.extract_strided_slice %73 {offsets = [0, 0, 0], sizes = [15, 16, 8], strides = [1, 1, 1]} : vector<16x16x8xf32> to vector<15x16x8xf32>
    %77 = tpu.concatenate %74, %76 in 0 : vector<1x16x8xf32>, vector<15x16x8xf32> -> vector<16x16x8xf32>
    %78 = vector.extract_strided_slice %77 {offsets = [0, 0, 0], sizes = [16, 15, 8], strides = [1, 1, 1]} : vector<16x16x8xf32> to vector<16x15x8xf32>
    %79 = tpu.concatenate %75, %78 in 1 : vector<16x1x8xf32>, vector<16x15x8xf32> -> vector<16x16x8xf32>
    %80 = vector.extract_strided_slice %77 {offsets = [0, 1, 0], sizes = [16, 15, 8], strides = [1, 1, 1]} : vector<16x16x8xf32> to vector<16x15x8xf32>
    %81 = tpu.concatenate %80, %75 in 1 : vector<16x15x8xf32>, vector<16x1x8xf32> -> vector<16x16x8xf32>
    %82 = vector.extract_strided_slice %73 {offsets = [0, 0, 0], sizes = [16, 15, 8], strides = [1, 1, 1]} : vector<16x16x8xf32> to vector<16x15x8xf32>
    %83 = tpu.concatenate %75, %82 in 1 : vector<16x1x8xf32>, vector<16x15x8xf32> -> vector<16x16x8xf32>
    %84 = vector.extract_strided_slice %73 {offsets = [0, 1, 0], sizes = [16, 15, 8], strides = [1, 1, 1]} : vector<16x16x8xf32> to vector<16x15x8xf32>
    %85 = tpu.concatenate %84, %75 in 1 : vector<16x15x8xf32>, vector<16x1x8xf32> -> vector<16x16x8xf32>
    %86 = vector.extract_strided_slice %73 {offsets = [1, 0, 0], sizes = [15, 16, 8], strides = [1, 1, 1]} : vector<16x16x8xf32> to vector<15x16x8xf32>
    %87 = tpu.concatenate %86, %74 in 0 : vector<15x16x8xf32>, vector<1x16x8xf32> -> vector<16x16x8xf32>
    %88 = vector.extract_strided_slice %87 {offsets = [0, 0, 0], sizes = [16, 15, 8], strides = [1, 1, 1]} : vector<16x16x8xf32> to vector<16x15x8xf32>
    %89 = tpu.concatenate %75, %88 in 1 : vector<16x1x8xf32>, vector<16x15x8xf32> -> vector<16x16x8xf32>
    %90 = vector.extract_strided_slice %87 {offsets = [0, 1, 0], sizes = [16, 15, 8], strides = [1, 1, 1]} : vector<16x16x8xf32> to vector<16x15x8xf32>
    %91 = tpu.concatenate %90, %75 in 1 : vector<16x15x8xf32>, vector<16x1x8xf32> -> vector<16x16x8xf32>
    %92 = tpu.concatenate %79, %77, %81, %83, %73, %85, %89, %87, %91 in 2 : vector<16x16x8xf32>, vector<16x16x8xf32>, vector<16x16x8xf32>, vector<16x16x8xf32>, vector<16x16x8xf32>, vector<16x16x8xf32>, vector<16x16x8xf32>, vector<16x16x8xf32>, vector<16x16x8xf32> -> vector<16x16x72xf32>
    %93 = vector.shape_cast %92 : vector<16x16x72xf32> to vector<256x72xf32>
    %94 = arith.truncf %93 : vector<256x72xf32> to vector<256x72xbf16>
    %c0_35 = arith.constant 0 : index
    %c0_36 = arith.constant 0 : index
    %95 = vector.load %arg10[%c0_35, %c0_36] : memref<72x8xbf16, #tpu.memory_space<vmem>>, vector<72x8xbf16>
    %cst_37 = arith.constant dense<0.000000e+00> : vector<256x8xf32>
    %96 = tpu.matmul %94, %95, %cst_37 {dimension_numbers = #tpu.dot_dimension_numbers<[1], [0], [0], [1], [0, 0, 1, 1], [], []>} : vector<256x72xbf16>, vector<72x8xbf16>, vector<256x8xf32> -> vector<256x8xf32>
    %c0_38 = arith.constant 0 : index
    %c0_39 = arith.constant 0 : index
    %c0_40 = arith.constant 0 : index
    %97 = vector.load %arg11[%c0_38, %c0_39, %c0_40] : memref<1x1x16xf32, #tpu.memory_space<vmem>>, vector<1x1x16xf32>
    %98 = vector.broadcast %97 : vector<1x1x16xf32> to vector<16x16x16xf32>
    %99 = arith.mulf %1, %98 : vector<16x16x16xf32>
    %c0_41 = arith.constant 0 : index
    %c0_42 = arith.constant 0 : index
    %c0_43 = arith.constant 0 : index
    %100 = vector.load %arg12[%c0_41, %c0_42, %c0_43] : memref<1x1x16xf32, #tpu.memory_space<vmem>>, vector<1x1x16xf32>
    %101 = vector.broadcast %100 : vector<1x1x16xf32> to vector<16x16x16xf32>
    %102 = arith.addf %99, %101 : vector<16x16x16xf32>
    %cst_44 = arith.constant 0.000000e+00 : f32
    %103 = vector.broadcast %cst_44 : f32 to vector<16x16x16xf32>
    %104 = arith.maximumf %102, %103 : vector<16x16x16xf32>
    %105 = vector.shape_cast %104 : vector<16x16x16xf32> to vector<256x16xf32>
    %106 = arith.truncf %105 : vector<256x16xf32> to vector<256x16xbf16>
    %c0_45 = arith.constant 0 : index
    %c0_46 = arith.constant 0 : index
    %107 = vector.load %arg13[%c0_45, %c0_46] : memref<16x32xbf16, #tpu.memory_space<vmem>>, vector<16x32xbf16>
    %cst_47 = arith.constant dense<0.000000e+00> : vector<256x32xf32>
    %108 = tpu.matmul %106, %107, %cst_47 {dimension_numbers = #tpu.dot_dimension_numbers<[1], [0], [0], [1], [0, 0, 1, 1], [], []>} : vector<256x16xbf16>, vector<16x32xbf16>, vector<256x32xf32> -> vector<256x32xf32>
    %109 = tpu.concatenate %32, %64, %96 in 1 : vector<256x16xf32>, vector<256x8xf32>, vector<256x8xf32> -> vector<256x32xf32>
    %110 = arith.addf %109, %108 : vector<256x32xf32>
    %111 = vector.shape_cast %110 : vector<256x32xf32> to vector<16x16x32xf32>
    %112 = vector.extract_strided_slice %111 {offsets = [0, 0, 0], sizes = [16, 1, 32], strides = [1, 1, 1]} : vector<16x16x32xf32> to vector<16x1x32xf32>
    %113 = vector.shape_cast %112 : vector<16x1x32xf32> to vector<16x32xf32>
    %114 = vector.extract_strided_slice %111 {offsets = [0, 1, 0], sizes = [16, 1, 32], strides = [1, 1, 1]} : vector<16x16x32xf32> to vector<16x1x32xf32>
    %115 = vector.shape_cast %114 : vector<16x1x32xf32> to vector<16x32xf32>
    %116 = vector.extract_strided_slice %111 {offsets = [0, 2, 0], sizes = [16, 1, 32], strides = [1, 1, 1]} : vector<16x16x32xf32> to vector<16x1x32xf32>
    %117 = vector.shape_cast %116 : vector<16x1x32xf32> to vector<16x32xf32>
    %118 = vector.extract_strided_slice %111 {offsets = [0, 3, 0], sizes = [16, 1, 32], strides = [1, 1, 1]} : vector<16x16x32xf32> to vector<16x1x32xf32>
    %119 = vector.shape_cast %118 : vector<16x1x32xf32> to vector<16x32xf32>
    %120 = vector.extract_strided_slice %111 {offsets = [0, 4, 0], sizes = [16, 1, 32], strides = [1, 1, 1]} : vector<16x16x32xf32> to vector<16x1x32xf32>
    %121 = vector.shape_cast %120 : vector<16x1x32xf32> to vector<16x32xf32>
    %122 = vector.extract_strided_slice %111 {offsets = [0, 5, 0], sizes = [16, 1, 32], strides = [1, 1, 1]} : vector<16x16x32xf32> to vector<16x1x32xf32>
    %123 = vector.shape_cast %122 : vector<16x1x32xf32> to vector<16x32xf32>
    %124 = vector.extract_strided_slice %111 {offsets = [0, 6, 0], sizes = [16, 1, 32], strides = [1, 1, 1]} : vector<16x16x32xf32> to vector<16x1x32xf32>
    %125 = vector.shape_cast %124 : vector<16x1x32xf32> to vector<16x32xf32>
    %126 = vector.extract_strided_slice %111 {offsets = [0, 7, 0], sizes = [16, 1, 32], strides = [1, 1, 1]} : vector<16x16x32xf32> to vector<16x1x32xf32>
    %127 = vector.shape_cast %126 : vector<16x1x32xf32> to vector<16x32xf32>
    %128 = vector.extract_strided_slice %111 {offsets = [0, 8, 0], sizes = [16, 1, 32], strides = [1, 1, 1]} : vector<16x16x32xf32> to vector<16x1x32xf32>
    %129 = vector.shape_cast %128 : vector<16x1x32xf32> to vector<16x32xf32>
    %130 = vector.extract_strided_slice %111 {offsets = [0, 9, 0], sizes = [16, 1, 32], strides = [1, 1, 1]} : vector<16x16x32xf32> to vector<16x1x32xf32>
    %131 = vector.shape_cast %130 : vector<16x1x32xf32> to vector<16x32xf32>
    %132 = vector.extract_strided_slice %111 {offsets = [0, 10, 0], sizes = [16, 1, 32], strides = [1, 1, 1]} : vector<16x16x32xf32> to vector<16x1x32xf32>
    %133 = vector.shape_cast %132 : vector<16x1x32xf32> to vector<16x32xf32>
    %134 = vector.extract_strided_slice %111 {offsets = [0, 11, 0], sizes = [16, 1, 32], strides = [1, 1, 1]} : vector<16x16x32xf32> to vector<16x1x32xf32>
    %135 = vector.shape_cast %134 : vector<16x1x32xf32> to vector<16x32xf32>
    %136 = vector.extract_strided_slice %111 {offsets = [0, 12, 0], sizes = [16, 1, 32], strides = [1, 1, 1]} : vector<16x16x32xf32> to vector<16x1x32xf32>
    %137 = vector.shape_cast %136 : vector<16x1x32xf32> to vector<16x32xf32>
    %138 = vector.extract_strided_slice %111 {offsets = [0, 13, 0], sizes = [16, 1, 32], strides = [1, 1, 1]} : vector<16x16x32xf32> to vector<16x1x32xf32>
    %139 = vector.shape_cast %138 : vector<16x1x32xf32> to vector<16x32xf32>
    %140 = vector.extract_strided_slice %111 {offsets = [0, 14, 0], sizes = [16, 1, 32], strides = [1, 1, 1]} : vector<16x16x32xf32> to vector<16x1x32xf32>
    %141 = vector.shape_cast %140 : vector<16x1x32xf32> to vector<16x32xf32>
    %142 = vector.extract_strided_slice %111 {offsets = [0, 15, 0], sizes = [16, 1, 32], strides = [1, 1, 1]} : vector<16x16x32xf32> to vector<16x1x32xf32>
    %143 = vector.shape_cast %142 : vector<16x1x32xf32> to vector<16x32xf32>
    %144 = tpu.concatenate %113, %115, %117, %119, %121, %123, %125, %127, %129, %131, %133, %135, %137, %139, %141, %143 in 1 : vector<16x32xf32>, vector<16x32xf32>, vector<16x32xf32>, vector<16x32xf32>, vector<16x32xf32>, vector<16x32xf32>, vector<16x32xf32>, vector<16x32xf32>, vector<16x32xf32>, vector<16x32xf32>, vector<16x32xf32>, vector<16x32xf32>, vector<16x32xf32>, vector<16x32xf32>, vector<16x32xf32>, vector<16x32xf32> -> vector<16x512xf32>
    %c0_48 = arith.constant 0 : index
    %c0_49 = arith.constant 0 : index
    %c0_50 = arith.constant 0 : index
    %145 = vector.load %arg14[%c0_48, %c0_49, %c0_50] : memref<1x16x512xf32, #tpu.memory_space<vmem>>, vector<1x16x512xf32>
    %146 = vector.shape_cast %145 : vector<1x16x512xf32> to vector<16x512xf32>
    %147 = vector.shape_cast %144 : vector<16x512xf32> to vector<1x16x512xf32>
    tpu.vector_store %arg14[%c0_48, %c0_49, %c0_50], %147 {strides = array<i32>} : memref<1x16x512xf32, #tpu.memory_space<vmem>>, vector<1x16x512xf32>,
    return
  }
  func.func @transform_0(%arg0: i32) -> (i32, i32, i32, i32) {
    %c0_i32 = arith.constant 0 : i32
    %c0_i32_0 = arith.constant 0 : i32
    %c0_i32_1 = arith.constant 0 : i32
    %c0_i32_2 = arith.constant 0 : i32
    return %arg0, %c0_i32, %c0_i32_0, %c0_i32_1 : i32, i32, i32, i32
  }
  func.func @transform_1(%arg0: i32) -> (i32, i32, i32) {
    %c0_i32 = arith.constant 0 : i32
    %c0_i32_0 = arith.constant 0 : i32
    %c0_i32_1 = arith.constant 0 : i32
    %c0_i32_2 = arith.constant 0 : i32
    return %c0_i32, %c0_i32_0, %c0_i32_1 : i32, i32, i32
  }
  func.func @transform_2(%arg0: i32) -> (i32, i32, i32) {
    %c0_i32 = arith.constant 0 : i32
    %c0_i32_0 = arith.constant 0 : i32
    %c0_i32_1 = arith.constant 0 : i32
    %c0_i32_2 = arith.constant 0 : i32
    return %c0_i32, %c0_i32_0, %c0_i32_1 : i32, i32, i32
  }
  func.func @transform_3(%arg0: i32) -> (i32, i32) {
    %c0_i32 = arith.constant 0 : i32
    %c0_i32_0 = arith.constant 0 : i32
    %c0_i32_1 = arith.constant 0 : i32
    return %c0_i32, %c0_i32_0 : i32, i32
  }
  func.func @transform_4(%arg0: i32) -> (i32, i32, i32) {
    %c0_i32 = arith.constant 0 : i32
    %c0_i32_0 = arith.constant 0 : i32
    %c0_i32_1 = arith.constant 0 : i32
    %c0_i32_2 = arith.constant 0 : i32
    return %c0_i32, %c0_i32_0, %c0_i32_1 : i32, i32, i32
  }
  func.func @transform_5(%arg0: i32) -> (i32, i32, i32) {
    %c0_i32 = arith.constant 0 : i32
    %c0_i32_0 = arith.constant 0 : i32
    %c0_i32_1 = arith.constant 0 : i32
    %c0_i32_2 = arith.constant 0 : i32
    return %c0_i32, %c0_i32_0, %c0_i32_1 : i32, i32, i32
  }
  func.func @transform_6(%arg0: i32) -> (i32, i32) {
    %c0_i32 = arith.constant 0 : i32
    %c0_i32_0 = arith.constant 0 : i32
    %c0_i32_1 = arith.constant 0 : i32
    return %c0_i32, %c0_i32_0 : i32, i32
  }
  func.func @transform_7(%arg0: i32) -> (i32, i32, i32) {
    %c0_i32 = arith.constant 0 : i32
    %c0_i32_0 = arith.constant 0 : i32
    %c0_i32_1 = arith.constant 0 : i32
    %c0_i32_2 = arith.constant 0 : i32
    return %c0_i32, %c0_i32_0, %c0_i32_1 : i32, i32, i32
  }
  func.func @transform_8(%arg0: i32) -> (i32, i32, i32) {
    %c0_i32 = arith.constant 0 : i32
    %c0_i32_0 = arith.constant 0 : i32
    %c0_i32_1 = arith.constant 0 : i32
    %c0_i32_2 = arith.constant 0 : i32
    return %c0_i32, %c0_i32_0, %c0_i32_1 : i32, i32, i32
  }
  func.func @transform_9(%arg0: i32) -> (i32, i32) {
    %c0_i32 = arith.constant 0 : i32
    %c0_i32_0 = arith.constant 0 : i32
    %c0_i32_1 = arith.constant 0 : i32
    return %c0_i32, %c0_i32_0 : i32, i32
  }
  func.func @transform_10(%arg0: i32) -> (i32, i32, i32) {
    %c0_i32 = arith.constant 0 : i32
    %c0_i32_0 = arith.constant 0 : i32
    %c0_i32_1 = arith.constant 0 : i32
    %c0_i32_2 = arith.constant 0 : i32
    return %c0_i32, %c0_i32_0, %c0_i32_1 : i32, i32, i32
  }
  func.func @transform_11(%arg0: i32) -> (i32, i32, i32) {
    %c0_i32 = arith.constant 0 : i32
    %c0_i32_0 = arith.constant 0 : i32
    %c0_i32_1 = arith.constant 0 : i32
    %c0_i32_2 = arith.constant 0 : i32
    return %c0_i32, %c0_i32_0, %c0_i32_1 : i32, i32, i32
  }
  func.func @transform_12(%arg0: i32) -> (i32, i32) {
    %c0_i32 = arith.constant 0 : i32
    %c0_i32_0 = arith.constant 0 : i32
    %c0_i32_1 = arith.constant 0 : i32
    return %c0_i32, %c0_i32_0 : i32, i32
  }
  func.func @transform_13(%arg0: i32) -> (i32, i32, i32) {
    %c0_i32 = arith.constant 0 : i32
    %c0_i32_0 = arith.constant 0 : i32
    %c0_i32_1 = arith.constant 0 : i32
    return %arg0, %c0_i32, %c0_i32_0 : i32, i32, i32
  }
}

</mosaic_0001>

<bundles_post_ra>
// kernel: tpu_custom_call.1
= control target key start
LH: loop header
LB: loop body
LE: loop exit
PB: predicated region body
PF: predicated region fallthrough
CT: control target
= control target key end

     0   :  { %s14559_s0 = inlined_call_operand.hbm [shape: f32[2,16,16,16], index: 0, kind: input, shape index: {}]   ;;  %s14560_s1 = inlined_call_operand.vmem [shape: f32[1,1,16], index: 1, kind: input, shape index: {}]   ;;  %s14561_s2 = inlined_call_operand.vmem [shape: f32[1,1,16], index: 2, kind: input, shape index: {}]   ;;  %s14562_s3 = inlined_call_operand.vmem [shape: bf16[144,16], index: 3, kind: input, shape index: {}]   ;;  %s14563_s4 = inlined_call_operand.vmem [shape: f32[1,1,16], index: 4, kind: input, shape index: {}]   ;;  %s14564_s5 = inlined_call_operand.vmem [shape: f32[1,1,16], index: 5, kind: input, shape index: {}]   ;;  %s14565_s6 = inlined_call_operand.vmem [shape: bf16[144,8], index: 6, kind: input, shape index: {}]   ;;  %s14566_s7 = inlined_call_operand.vmem [shape: f32[1,1,8], index: 7, kind: input, shape index: {}]   ;;  %s14567_s8 = inlined_call_operand.vmem [shape: f32[1,1,8], index: 8, kind: input, shape index: {}]   ;;  %s14568_s9 = inlined_call_operand.vmem [shape: bf16[72,8], index: 9, kind: input, shape index: {}]   ;;  %s14569_s10 = inlined_call_operand.vmem [shape: f32[1,1,16], index: 10, kind: input, shape index: {}]   ;;  %s14570_s11 = inlined_call_operand.vmem [shape: f32[1,1,16], index: 11, kind: input, shape index: {}]   ;;  %s14571_s12 = inlined_call_operand.vmem [shape: bf16[16,32], index: 12, kind: input, shape index: {}]   ;;  %s14572_s13 = inlined_call_operand.hbm [shape: f32[2,16,512], index: 13, kind: output, shape index: {}]  }
   0x1   :  { %14828 = sst [smem:[#allocation126_spill]] %s14559_s0 }
   0x2   :  { %18 = vsyncpa [#allocation3], 0 }
   0x3   :  { %20 = vsyncpa [#allocation3 + $0x1], 0 }
   0x4   :  { %21 = vsyncpa [#allocation4], 0 }
   0x5   :  { %23 = vsyncpa [#allocation4 + $0x1], 0  ;;  %s8899_s25 = smov 0   ;;  %s8901_s26 = smov 0  }
   0x6   :  { %s8903_s27 = smov 0   ;;  %s8905_s28 = smov 0  }
   0x7 LB: > { %14829 = sst [smem:[#allocation8_spill]] %s8797_s25  ;;  %s8920_s29 = sadd.s32 4294967295, %s8809_s28   ;;  %s8809_s28 = sphi %s8905_s28, %s15359_s28   ;;  %s8805_s27 = sphi %s8903_s27, %s15361_s27   ;;  %s8801_s26 = sphi %s8901_s26, %s15363_s26   ;;  %s8797_s25 = sphi %s8899_s25, %s15362_s25  }
   0x8   : > { %14830 = sst [smem:[#allocation9_spill]] %s8805_s27  ;;  %s6640_s30 = sadd.s32 4294967294, %s8809_s28  }
   0x9   : > { %s8924_s14 = sadd.s32 1, %s8809_s28   ;;  %s36_s15 = sadd.s32 1, %s8805_s27 }
   0xa   : > { %14831 = sst [smem:[#allocation10_spill]] %s8924_s14  ;;  %s33_s16 = ssub.s32 %s8809_s28, %s8924_s14 }
   0xb   : > { %p43_p0 = scmp.ne.s32.totalorder %s8805_s27, %s8801_s26  ;;  %p34_p1 = scmp.eq.s32.totalorder %s33_s16, 0 }
   0xc   : > { %p44_p2 = scmp.eq.s32.totalorder %s8809_s28, 0  ;;  %p49_p3 = scmp.ne.s32.totalorder %s8801_s26, %s8797_s25 }
   0xd   : > { %p50_p4 = scmp.eq.s32.totalorder %s8920_s29, 0  ;;  %p325_p7 = scmp.eq.s32.totalorder %s8920_s29, 1 }
   0xe   : > { %s8936_s17 = scalar_select %p34_p1, %s8805_s27, %s36_s15  }
   0xf   : > { %p8938_p5 = por %p44_p2, %p43_p0  ;;  %p8942_p6 = por %p50_p4, %p49_p3 }
  0x10   : > { %14832 = sst [smem:[#allocation11_spill]] %s8936_s17  ;;  %p331_p8 = scmp.eq.s32.totalorder %s6640_s30, 1 }
  0x11   : > { %p6879_p10 = scmp.lt.s32.totalorder %s8809_s28, 2  ;;  %p8949_p11 = por %p325_p7, %p43_p0 }
  0x12   : > { %p8953_p12 = por %p331_p8, %p49_p3  ;;  %s387_s22 = sand.u32 1, %s8805_s27  }
  0x13   : > { %s14835_s20 = scalar_select %p8949_p11, 1, 0 }
  0x14   : > { %s14836_s21 = scalar_select %p8953_p12, 1, 0 }
  0x15   : > { %s6750_s23 = sshll.u32 %s8809_s28, 12  ;;  %s6643_s24 = sshll.u32 %s387_s22, 8 }
  0x16   : > { %s14837_s0 = sld [smem:[#allocation126_spill]]  ;;  %s391_s30 = scalar_lea.vmem [#allocation2], %s6643_s24 }
  0x17   : > { %s398_s14 = sshll.u32 %s391_s30, 4  ;;  %p8966_p13 = pnand %p6879_p10, %p8938_p5  ;;  %s8970_s14 = int_to_ptr.vmem [resolvable:$true] %s398_s14 }
  0x18   : > { %s8972_s27 = scalar_lea.sflag [#allocation3], %s387_s22 }
  0x19   : > { %p8715_p1 = pneg %p8966_p13 }
  0x1c   : > { %s8962_s17 = scalar_lea.hbm %s14837_s0, %s6750_s23  ;;  %s8718_s24 = scalar_lea.hbm %s14837_s0, 8192 }
  0x1d   : > { %s8713_s15 = scalar_lea.hbm %s8962_s17, 4096  ;;  %p8719_p4 = scmp.lt.u32.totalorder %s8962_s17, %s14837_s0 }
  0x1e   : > { %p8714_p0 = scmp.ne.s32.totalorder %s8962_s17, %s8713_s15  ;;  %p8720_p5 = scmp.lt.u32.totalorder %s8718_s24, %s8713_s15 }
  0x1f   : > { %p8722_p8 = scmp.lt.u32.totalorder %s8713_s15, %s8962_s17 }
  0x20   : > { %p8716_p2 = pnand %p8715_p1, %p8714_p0  ;;  %p8721_p7 = por %p8720_p5, %p8719_p4 }
  0x22   : > { %p8717_p3 = pneg %p8716_p2  ;;  %p8723_p10 = por %p8722_p8, %p8721_p7 }
  0x24   : > { %p8724_p9 = pnand %p8723_p10, %p8717_p3 }
  0x26   : > { %8727 = shalt.err (!%p8724_p9)
}
  0x27   : > { %s8728_s22 = scalar_lea.vmem %s8970_s14, 4096  ;;  %s8811_s23 = smov [#allocation2]  }
  0x28   : > { %p8729_p0 = scmp.ne.s32.totalorder %s8970_s14, %s8728_s22  ;;  %s8733_s18 = sshll.u32 %s8811_s23, 4  ;;  %s8734_s18 = int_to_ptr.vmem [resolvable:$false] %s8733_s18 }
  0x29   : > { %s8735_s16 = scalar_lea.vmem %s8734_s18, 8192  ;;  %p8736_p11 = scmp.lt.s32.totalorder %s8970_s14, %s8734_s18 }
  0x2a   : > { %p8731_p2 = pnand %p8729_p0, %p8715_p1  ;;  %p8737_p4 = scmp.lt.s32.totalorder %s8735_s16, %s8728_s22 }
  0x2c   : > { %p8732_p12 = pneg %p8731_p2  ;;  %p8738_p5 = por %p8737_p4, %p8736_p11 }
  0x2e   : > { %p8739_p7 = pnand %p8738_p5, %p8732_p12 }
  0x30   : > { %8742 = shalt.err (!%p8739_p7)
}
  0x31   : > { %s8812_s15 = smov 128   ;;  %s8813_s24 = smov 8  }
  0x32   : > { %6874 = dma.hbm_to_vmem [thread:$0]  (!%p8966_p13), %s8962_s17, 4096, %s8970_s14, %s8972_s27, %s8812_s15, %s8812_s15, %s8813_s24  }
  0x33   : > { %p6646_p9 = scmp.ge.s32.totalorder %s8809_s28, 1  ;;  %p406_p1 = scmp.lt.s32.totalorder %s8809_s28, 3 }
  0x35   : > { %p407_p3 = pnand %p6646_p9, %p406_p1 }
  0x37   : > { %410 = sbr.rel (%p407_p3) target bundleno = 1979 (0x7bb), region = 72 }
  0x3e   : > { %s9003_s30 = sand.u32 1, %s8801_s26  }
  0x3f   : > { %s6647_s22 = sshll.u32 %s9003_s30, 8  ;;  %s413_s23 = scalar_lea.sflag [#allocation3], %s9003_s30 }
  0x40   : > { %s9007_s18 = scalar_lea.vmem [#allocation2], %s6647_s22 }
  0x41   : > { %8788 = dma.done.wait (%p8942_p6), %s413_s23, 4096  }
  0x42   : > { %8790 = vsyncadd (%p8942_p6), %s413_s23, 4294963200  ;;  %v463_v0 = vld [vmem:[%s9007_s18 + $0x18] sm:$0xff]  ;;  %v464_v1 = vld [vmem:[%s9007_s18 + $0x20] sm:$0xff]  ;;  %v14578_v37 = vmov 0.0   ;;  %s14826_s19 = smov 16   ;;  %vm729_vm0 = vcmask 1046528  }
  0x43   : > { %v9018_v2 = vld [vmem:[%s14560_s1] ss:$0 sm:$0xff]  ;;  %v465_v8 = vld [vmem:[%s9007_s18 + $0x28] sm:$0xff]  ;;  %v466_v9 = vld [vmem:[%s9007_s18 + $0x30] sm:$0xff]  ;;  %s14711_s16 = smov 32   ;;  %vm633_vm1 = vcmask 1040384  }
  0x44   : > { %v502_v3 = vmul.f32 %v9018_v2, %v463_v0  ;;  %v503_v4 = vmul.f32 %v9018_v2, %v464_v1  ;;  %v9025_v5 = vld [vmem:[%s14561_s2] ss:$0 sm:$0xff]  ;;  %v461_v10 = vld [vmem:[%s9007_s18 + $0x8] sm:$0xff]  ;;  %v504_v13 = vmul.f32 %v9018_v2, %v465_v8  ;;  %v505_v14 = vmul.f32 %v9018_v2, %v466_v9  ;;  %v462_v15 = vld [vmem:[%s9007_s18 + $0x10] sm:$0xff]  ;;  %s14791_s15 = smov 48   ;;  %s14797_s24 = smov 64  }
  0x45   : > { %v460_v6 = vld [vmem:[%s9007_s18] sm:$0xff]  ;;  %v469_v16 = vld [vmem:[%s9007_s18 + $0x48] sm:$0xff]  ;;  %v500_v18 = vmul.f32 %v9018_v2, %v461_v10  ;;  %v501_v19 = vmul.f32 %v9018_v2, %v462_v15  ;;  %v470_v20 = vld [vmem:[%s9007_s18 + $0x50] sm:$0xff]  ;;  %s14709_s22 = smov 80   ;;  %s14707_s25 = smov 96   ;;  %vm1537_vm2 = vcmask 130048  }
  0x46   : > { %v499_v7 = vmul.f32 %v9018_v2, %v460_v6  ;;  %v541_v11 = vadd.f32 %v9025_v5, %v502_v3  ;;  %v542_v12 = vadd.f32 %v9025_v5, %v503_v4  ;;  %v543_v23 = vadd.f32 %v9025_v5, %v504_v13  ;;  %v467_v29 = vld [vmem:[%s9007_s18 + $0x38] sm:$0xff]  ;;  %v468_v30 = vld [vmem:[%s9007_s18 + $0x40] sm:$0xff]  ;;  %v473_v35 = vld [vmem:[%s9007_s18 + $0x68] sm:$0xff]  ;;  %s8822_s27 = smov 112   ;;  %s15090_s17 = smov 80  }
  0x47   : > { %v544_v24 = vadd.f32 %v9025_v5, %v505_v14  ;;  %v539_v26 = vadd.f32 %v9025_v5, %v500_v18  ;;  %v540_v27 = vadd.f32 %v9025_v5, %v501_v19  ;;  %v508_v28 = vmul.f32 %v9018_v2, %v469_v16  ;;  %v474_v36 = vld [vmem:[%s9007_s18 + $0x70] sm:$0xff]  ;;  %v471_v42 = vld [vmem:[%s9007_s18 + $0x58] sm:$0xff]  ;;  %v472_v47 = vld [vmem:[%s9007_s18 + $0x60] sm:$0xff]  ;;  %s14817_s23 = smov 40   ;;  %s15275_s0 = smov 16  }
  0x48   : > { %v538_v17 = vadd.f32 %v9025_v5, %v499_v7  ;;  %v9042_v21 = vmax.f32 %v541_v11, 0.0  ;;  %v9044_v22 = vmax.f32 %v542_v12, 0.0  ;;  %v9057_v32 = vmax.f32 %v543_v23, 0.0  ;;  %v477_v48 = vld [vmem:[%s9007_s18 + $0x88] sm:$0xff]  ;;  %v478_v53 = vld [vmem:[%s9007_s18 + $0x90] sm:$0xff]  ;;  %v475_v58 = vld [vmem:[%s9007_s18 + $0x78] sm:$0xff] }
  0x49   : > { %v9059_v33 = vmax.f32 %v544_v24, 0.0  ;;  %v509_v34 = vmul.f32 %v9018_v2, %v470_v20  ;;  %v9066_v39 = vmax.f32 %v539_v26, 0.0  ;;  %v9068_v40 = vmax.f32 %v540_v27, 0.0  ;;  %v476_v59 = vld [vmem:[%s9007_s18 + $0x80] sm:$0xff]  ;;  %v481_v0 = vld [vmem:[%s9007_s18 + $0xa8] sm:$0xff]  ;;  %v482_v1 = vld [vmem:[%s9007_s18 + $0xb0] sm:$0xff] }
  0x4a   : > { %v9048_v25 = vmax.f32 %v538_v17, 0.0  ;;  %v6939_v31 = vpack.i.bf16 %v9044_v22, %v9042_v21  ;;  %v547_v41 = vadd.f32 %v9025_v5, %v508_v28  ;;  %v506_v45 = vmul.f32 %v9018_v2, %v467_v29  ;;  %v479_v8 = vld [vmem:[%s9007_s18 + $0x98] sm:$0xff]  ;;  %v480_v13 = vld [vmem:[%s9007_s18 + $0xa0] sm:$0xff]  ;;  %v485_v18 = vld [vmem:[%s9007_s18 + $0xc8] sm:$0xff]  ;;  %p15355_p11 = scmp.ne.s32.totalorder %s14835_s20, 0 }
  0x4b   : > { %v6944_v43 = vpack.i.bf16 %v9059_v33, %v9057_v32  ;;  %v548_v44 = vadd.f32 %v9025_v5, %v509_v34  ;;  %v507_v46 = vmul.f32 %v9018_v2, %v468_v30  ;;  %v6934_v49 = vpack.i.bf16 %v9068_v40, %v9066_v39  ;;  %v486_v26 = vld [vmem:[%s9007_s18 + $0xd0] sm:$0xff] }
  0x4c   : > { %v6929_v38 = vpack.i.bf16 %v9048_v25, %v14578_v37  ;;  %6940 = vrot.lane.b32.xlu1 %v6939_v31, %s14826_s19  ;;  %v9083_v50 = vmax.f32 %v547_v41, 0.0  ;;  %v512_v51 = vmul.f32 %v9018_v2, %v473_v35  ;;  %v513_v52 = vmul.f32 %v9018_v2, %v474_v36  ;;  %v483_v31 = vld [vmem:[%s9007_s18 + $0xb8] sm:$0xff]  ;;  %v484_v41 = vld [vmem:[%s9007_s18 + $0xc0] sm:$0xff] }
  0x4d   : > { %v9088_v54 = vmax.f32 %v548_v44, 0.0  ;;  %v545_v55 = vadd.f32 %v9025_v5, %v506_v45  ;;  %v546_v56 = vadd.f32 %v9025_v5, %v507_v46  ;;  %v510_v57 = vmul.f32 %v9018_v2, %v471_v42  ;;  %v489_v46 = vld [vmem:[%s9007_s18 + $0xe8] sm:$0xff] }
  0x4e   : > { %6930 = vrot.lane.b32.xlu0 %v6929_v38, %s14826_s19  ;;  %v551_v60 = vadd.f32 %v9025_v5, %v512_v51  ;;  %v552_v61 = vadd.f32 %v9025_v5, %v513_v52  ;;  %v511_v62 = vmul.f32 %v9018_v2, %v472_v47  ;;  %v516_v63 = vmul.f32 %v9018_v2, %v477_v48  ;;  %v487_v52 = vld [vmem:[%s9007_s18 + $0xd8] sm:$0xff] }
  0x4f   : > { %v6954_v3 = vpack.i.bf16 %v9088_v54, %v9083_v50  ;;  %v9104_v4 = vmax.f32 %v545_v55, 0.0  ;;  %v9106_v6 = vmax.f32 %v546_v56, 0.0  ;;  %v549_v7 = vadd.f32 %v9025_v5, %v510_v57 }
  0x50   : > { %6945 = vrot.lane.b32.xlu1 %v6944_v43, %s14826_s19  ;;  %v9111_v9 = vmax.f32 %v551_v60, 0.0  ;;  %v9113_v10 = vmax.f32 %v552_v61, 0.0  ;;  %v550_v11 = vadd.f32 %v9025_v5, %v511_v62  ;;  %v517_v12 = vmul.f32 %v9018_v2, %v478_v53  ;;  %v488_v62 = vld [vmem:[%s9007_s18 + $0xe0] sm:$0xff] }
  0x51   : > { %v6949_v14 = vpack.i.bf16 %v9106_v6, %v9104_v4  ;;  %v9120_v15 = vmax.f32 %v549_v7, 0.0  ;;  %v555_v16 = vadd.f32 %v9025_v5, %v516_v63  ;;  %v514_v17 = vmul.f32 %v9018_v2, %v475_v58 }
  0x52   : > { %6935 = vrot.lane.b32.xlu0 %v6934_v49, %s14826_s19  ;;  %v6964_v19 = vpack.i.bf16 %v9113_v10, %v9111_v9  ;;  %v9127_v20 = vmax.f32 %v550_v11, 0.0  ;;  %v556_v23 = vadd.f32 %v9025_v5, %v517_v12  ;;  %v515_v24 = vmul.f32 %v9018_v2, %v476_v59 }
  0x53   : > { %v9133_v27 = vmax.f32 %v555_v16, 0.0  ;;  %v553_v28 = vadd.f32 %v9025_v5, %v514_v17  ;;  %v520_v29 = vmul.f32 %v9018_v2, %v481_v0  ;;  %v521_v30 = vmul.f32 %v9018_v2, %v482_v1 }
  0x54   : > { %6955 = vrot.lane.b32.xlu1 %v6954_v3, %s14826_s19  ;;  %v6959_v34 = vpack.i.bf16 %v9127_v20, %v9120_v15  ;;  %v9142_v35 = vmax.f32 %v556_v23, 0.0  ;;  %v554_v36 = vadd.f32 %v9025_v5, %v515_v24  ;;  %v518_v38 = vmul.f32 %v9018_v2, %v479_v8 }
  0x55   : > { %v9147_v42 = vmax.f32 %v553_v28, 0.0  ;;  %v559_v43 = vadd.f32 %v9025_v5, %v520_v29  ;;  %v560_v44 = vadd.f32 %v9025_v5, %v521_v30  ;;  %v519_v45 = vmul.f32 %v9018_v2, %v480_v13 }
  0x56   : > { %6950 = vrot.lane.b32.xlu0 %v6949_v14, %s14826_s19  ;;  %v6974_v47 = vpack.i.bf16 %v9142_v35, %v9133_v27  ;;  %v9155_v48 = vmax.f32 %v554_v36, 0.0  ;;  %v557_v49 = vadd.f32 %v9025_v5, %v518_v38  ;;  %v524_v51 = vmul.f32 %v9018_v2, %v485_v18 }
  0x57   : > { %v9161_v53 = vmax.f32 %v559_v43, 0.0  ;;  %v9163_v55 = vmax.f32 %v560_v44, 0.0  ;;  %v558_v56 = vadd.f32 %v9025_v5, %v519_v45  ;;  %v525_v57 = vmul.f32 %v9018_v2, %v486_v26 }
  0x58   : > { %6965 = vrot.lane.b32.xlu1 %v6964_v19, %s14826_s19  ;;  %v6969_v58 = vpack.i.bf16 %v9155_v48, %v9147_v42  ;;  %v9170_v59 = vmax.f32 %v557_v49, 0.0  ;;  %v563_v60 = vadd.f32 %v9025_v5, %v524_v51  ;;  %v522_v61 = vmul.f32 %v9018_v2, %v483_v31 }
  0x59   : > { %v9175_v63 = vmax.f32 %v558_v56, 0.0  ;;  %v564_v0 = vadd.f32 %v9025_v5, %v525_v57  ;;  %v523_v1 = vmul.f32 %v9018_v2, %v484_v41  ;;  %v6984_v3 = vpack.i.bf16 %v9163_v55, %v9161_v53 }
  0x5a   : > { %6960 = vrot.lane.b32.xlu0 %v6959_v34, %s14826_s19  ;;  %v561_v7 = vadd.f32 %v9025_v5, %v522_v61  ;;  %v528_v8 = vmul.f32 %v9018_v2, %v489_v46  ;;  %v526_v11 = vmul.f32 %v9018_v2, %v487_v52  ;;  %v9185_v12 = vmax.f32 %v563_v60, 0.0 }
  0x5b   : > { %v9187_v13 = vmax.f32 %v564_v0, 0.0  ;;  %v562_v14 = vadd.f32 %v9025_v5, %v523_v1  ;;  %v527_v16 = vmul.f32 %v9018_v2, %v488_v62  ;;  %v6979_v17 = vpack.i.bf16 %v9175_v63, %v9170_v59 }
  0x5c   : > { %6975 = vrot.lane.b32.xlu1 %v6974_v47, %s14826_s19  ;;  %v9194_v18 = vmax.f32 %v561_v7, 0.0  ;;  %v565_v19 = vadd.f32 %v9025_v5, %v526_v11  ;;  %v567_v26 = vadd.f32 %v9025_v5, %v528_v8  ;;  %v9202_v28 = vrot.slane %v14578_v37, 1 }
  0x5d   : > { %v9197_v23 = vmax.f32 %v562_v14, 0.0  ;;  %v566_v24 = vadd.f32 %v9025_v5, %v527_v16  ;;  %v6994_v29 = vpack.i.bf16 %v9187_v13, %v9185_v12  ;;  %v732_v30 = vrot.slane %v9048_v25, 1 }
  0x5e   : > { %6970 = vrot.lane.b32.xlu0 %v6969_v58, %s14826_s19  ;;  %14839 = vst [vmem:[#allocation12_spill] sm:$0xff] %v9202_v28  ;;  %v733_v31 = vrot.slane %v9066_v39, 1  ;;  %v9212_v36 = vmax.f32 %v565_v19, 0.0  ;;  %v9216_v41 = vmax.f32 %v567_v26, 0.0  ;;  %v9220_v43 = vsel %vm729_vm0, %v9202_v28, 0.0 }
  0x5f   : > { %v6989_v34 = vpack.i.bf16 %v9197_v23, %v9194_v18  ;;  %v9214_v38 = vmax.f32 %v566_v24, 0.0  ;;  %14840 = vst [vmem:[#allocation13_spill] sm:$0xff] %v9220_v43  ;;  %v735_v46 = vrot.slane %v9068_v40, 1  ;;  %v736_v47 = vrot.slane %v9042_v21, 1 }
  0x60   : > { %6985 = vrot.lane.b32.xlu1 %v6984_v3, %s14826_s19  ;;  %v734_v44 = vsel %vm729_vm0, %v732_v30, %v733_v31  ;;  %v794_v45 = vsel %vm729_vm0, %v733_v31, 0.0  ;;  %v738_v51 = vrot.slane %v9044_v22, 1  ;;  %v739_v52 = vrot.slane %v9057_v32, 1 }
  0x61   : > { %v6999_v49 = vpack.i.bf16 %v9214_v38, %v9212_v36  ;;  %v9234_v56 = vpack.i.bf16 %v9220_v43, %v9202_v28  ;;  %v9236_v57 = vpack.i.bf16 %v794_v45, %v734_v44  ;;  %v9241_v58 = vsel %vm729_vm0, %v735_v46, %v736_v47 }
  0x62   : > { %6980 = vrot.lane.b32.xlu0 %v6979_v17, %s14826_s19  ;;  %14842 = vst [vmem:[#allocation15_spill] sm:$0xff] %v9241_v58  ;;  %v9244_v60 = vsel %vm729_vm0, %v736_v47, 0.0  ;;  %v741_v61 = vrot.slane %v9059_v33, 1  ;;  %v742_v62 = vrot.slane %v9104_v4, 1  ;;  %v9250_v0 = vsel %vm729_vm0, %v738_v51, %v739_v52 }
  0x63   : > { %14841 = vst [vmem:[#allocation14_spill] sm:$0xff] %v9234_v56  ;;  %14843 = vst [vmem:[#allocation16_spill] sm:$0xff] %v9244_v60  ;;  %v9253_v1 = vsel %vm729_vm0, %v739_v52, 0.0  ;;  %v744_v3 = vrot.slane %v9106_v6, 1  ;;  %v745_v7 = vrot.slane %v9083_v50, 1  ;;  %v747_v8 = vrot.slane %v9088_v54, 1 }
  0x64   : > { %6995 = vrot.lane.b32.xlu1 %v6994_v29, %s14826_s19  ;;  %14844 = vst [vmem:[#allocation17_spill] sm:$0xff] %v9250_v0  ;;  %14845 = vst [vmem:[#allocation18_spill] sm:$0xff] %v9253_v1  ;;  %v748_v11 = vrot.slane %v9120_v15, 1  ;;  %v9263_v14 = vpack.i.bf16 %v9244_v60, %v9241_v58  ;;  %v9267_v16 = vpack.i.bf16 %v9253_v1, %v9250_v0  ;;  %v9273_v19 = vsel %vm729_vm0, %v742_v62, 0.0 }
  0x65   : > { %v9270_v17 = vsel %vm729_vm0, %v741_v61, %v742_v62  ;;  %14847 = vst [vmem:[#allocation20_spill] sm:$0xff] %v9273_v19  ;;  %v9278_v24 = vsel %vm729_vm0, %v744_v3, %v745_v7  ;;  %v9281_v26 = vsel %vm729_vm0, %v745_v7, 0.0  ;;  %v750_v29 = vrot.slane %v9127_v20, 1 }
  0x66   : > { %6990 = vrot.lane.b32.xlu0 %v6989_v34, %s14826_s19  ;;  %14846 = vst [vmem:[#allocation19_spill] sm:$0xff] %v9270_v17  ;;  %14848 = vst [vmem:[#allocation21_spill] sm:$0xff] %v9278_v24  ;;  %v751_v30 = vrot.slane %v9111_v9, 1  ;;  %v9287_v31 = vpack.i.bf16 %v9273_v19, %v9270_v17  ;;  %v9290_v34 = vsel %vm729_vm0, %v747_v8, %v748_v11  ;;  %v9299_v45 = vsel %vm729_vm0, %v748_v11, 0.0 }
  0x67   : > { %14849 = vst [vmem:[#allocation22_spill] sm:$0xff] %v9281_v26  ;;  %14850 = vst [vmem:[#allocation23_spill] sm:$0xff] %v9290_v34  ;;  %v9296_v44 = vpack.i.bf16 %v9281_v26, %v9278_v24  ;;  %v753_v46 = vrot.slane %v9113_v10, 1  ;;  %v754_v47 = vrot.slane %v9147_v42, 1  ;;  %v756_v52 = vrot.slane %v9155_v48, 1 }
  0x68   : > { %897 = vrot.lane.b32.xlu1 %v9216_v41, %s14826_s19  ;;  %14851 = vst [vmem:[#allocation24_spill] sm:$0xff] %v9299_v45  ;;  %v9309_v51 = vsel %vm729_vm0, %v751_v30, 0.0  ;;  %v757_v61 = vrot.slane %v9133_v27, 1  ;;  %v9315_v62 = vpack.i.bf16 %v9299_v45, %v9290_v34  ;;  %v759_v3 = vrot.slane %v9142_v35, 1 }
  0x69   : > { %14853 = vst [vmem:[#allocation26_spill] sm:$0xff] %v9309_v51  ;;  %v9325_v8 = vsel %vm729_vm0, %v753_v46, %v754_v47  ;;  %v760_v11 = vrot.slane %v9170_v59, 1  ;;  %v763_v43 = vrot.slane %v9161_v53, 1  ;;  %v772_v45 = vrot.slane %v9212_v36, 1 }
  0x6a   : > { %7000 = vrot.lane.b32.xlu0 %v6999_v49, %s14826_s19  ;;  %v9306_v49 = vsel %vm729_vm0, %v750_v29, %v751_v30  ;;  %14854 = vst [vmem:[#allocation27_spill] sm:$0xff] %v9325_v8  ;;  %v762_v29 = vrot.slane %v9175_v63, 1  ;;  %v9332_v30 = vsel %vm729_vm0, %v754_v47, 0.0  ;;  %v9335_v37 = vsel %vm729_vm0, %v756_v52, %v757_v61 }
  0x6b   : > { %14852 = vst [vmem:[#allocation25_spill] sm:$0xff] %v9306_v49  ;;  %v9322_v7 = vpack.i.bf16 %v9309_v51, %v9306_v49  ;;  %14855 = vst [vmem:[#allocation28_spill] sm:$0xff] %v9332_v30  ;;  %v9345_v46 = vpack.i.bf16 %v9332_v30, %v9325_v8  ;;  %v768_v47 = vrot.slane %v9197_v23, 1  ;;  %v769_v52 = vrot.slane %v9185_v12, 1 }
  0x6c   : > { %7010 = vrot.lane.b32.xlu1 %v9236_v57, %s14711_s16  ;;  %14856 = vst [vmem:[#allocation29_spill] sm:$0xff] %v9335_v37  ;;  %v9359_v51 = vsel %vm729_vm0, %v760_v11, 0.0  ;;  %v9362_v30 = vsel %vm729_vm0, %v762_v29, %v763_v43  ;;  %v9365_v8 = vsel %vm729_vm0, %v763_v43, 0.0  ;;  %v771_v49 = vrot.slane %v9187_v13, 1 }
  0x6d   : > { %14859 = vst [vmem:[#allocation32_spill] sm:$0xff] %v9359_v51  ;;  %14860 = vst [vmem:[#allocation33_spill] sm:$0xff] %v9362_v30  ;;  %v9379_v43 = vsel %vm729_vm0, %v768_v47, %v769_v52  ;;  %v9382_v29 = vsel %vm729_vm0, %v769_v52, 0.0  ;;  %v775_v34 = vrot.slane %v9216_v41, 1  ;;  %v490_v52 = vld [vmem:[%s9007_s18 + $0xf0] sm:$0xff]  ;;  %v9406_v19 = vsel %vm729_vm0, %v772_v45, 0.0 }
  0x6e   : > { %7005 = vrot.lane.b32.xlu0 %v9234_v56, %s14711_s16  ;;  %v9338_v56 = vsel %vm729_vm0, %v757_v61, 0.0  ;;  %v9356_v61 = vsel %vm729_vm0, %v759_v3, %v760_v11  ;;  %14861 = vst [vmem:[#allocation34_spill] sm:$0xff] %v9365_v8  ;;  %v774_v3 = vrot.slane %v9214_v38, 1  ;;  %v9376_v11 = vpack.i.bf16 %v9365_v8, %v9362_v30  ;;  %14863 = vst [vmem:[#allocation36_spill] sm:$0xff] %v9379_v43 }
  0x6f   : > { %14857 = vst [vmem:[#allocation30_spill] sm:$0xff] %v9338_v56  ;;  %v9349_v28 = vpack.i.bf16 %v9338_v56, %v9335_v37  ;;  %14858 = vst [vmem:[#allocation31_spill] sm:$0xff] %v9356_v61  ;;  %v765_v56 = vrot.slane %v9163_v55, 1  ;;  %v766_v37 = vrot.slane %v9194_v18, 1  ;;  %v9389_v26 = vpack.i.bf16 %v9359_v51, %v9356_v61  ;;  %v491_v61 = vld [vmem:[%s9007_s18 + $0xf8] sm:$0xff] }
  0x70   : > { %7020 = vrot.lane.b32.xlu1 %v9267_v16, %s14711_s16  ;;  %14862 = vst [vmem:[#allocation35_spill] sm:$0xff] %v9376_v11  ;;  %14864 = vst [vmem:[#allocation37_spill] sm:$0xff] %v9382_v29  ;;  %v9398_v47 = vsel %vm729_vm0, %v771_v49, %v772_v45  ;;  %v9403_v30 = vpack.i.bf16 %v9382_v29, %v9379_v43  ;;  %v639_v51 = vrot.slane %v9068_v40, 7  ;;  %v9417_v49 = vsel %vm729_vm0, %v775_v34, 0.0 }
  0x71   : > { %v9392_v24 = vsel %vm729_vm0, %v765_v56, %v766_v37  ;;  %v9395_v8 = vsel %vm729_vm0, %v766_v37, 0.0  ;;  %14867 = vst [vmem:[#allocation40_spill] sm:$0xff] %v9398_v47  ;;  %14869 = vst [vmem:[#allocation42_spill] sm:$0xff] %v9406_v19  ;;  %v640_v56 = vrot.slane %v9042_v21, 7  ;;  %v9414_v37 = vsel %vm729_vm0, %v774_v3, %v775_v34 }
  0x72   : > { %7015 = vrot.lane.b32.xlu0 %v9263_v14, %s14711_s16  ;;  %14865 = vst [vmem:[#allocation38_spill] sm:$0xff] %v9392_v24  ;;  %14866 = vst [vmem:[#allocation39_spill] sm:$0xff] %v9395_v8  ;;  %v636_v29 = vrot.slane %v9048_v25, 7  ;;  %v637_v43 = vrot.slane %v9066_v39, 7  ;;  %v9425_v45 = vpack.i.bf16 %v9395_v8, %v9392_v24  ;;  %v645_v17 = vrot.slane %v9059_v33, 7 }
  0x73   : > { %14868 = vst [vmem:[#allocation41_spill] sm:$0xff] %v9403_v30  ;;  %14870 = vst [vmem:[#allocation43_spill] sm:$0xff] %v9414_v37  ;;  %v646_v1 = vrot.slane %v9104_v4, 7  ;;  %v529_v3 = vmul.f32 %v9018_v2, %v490_v52  ;;  %v530_v34 = vmul.f32 %v9018_v2, %v491_v61  ;;  %v9433_v0 = vpack.i.bf16 %v9406_v19, %v9398_v47 }
  0x74   : > { %7030 = vrot.lane.b32.xlu1 %v9296_v44, %s14711_s16  ;;  %14871 = vst [vmem:[#allocation44_spill] sm:$0xff] %v9417_v49  ;;  %v9437_v60 = vpack.i.bf16 %v9417_v49, %v9414_v37  ;;  %v9440_v58 = vsel %vm633_vm1, 0.0, %v639_v51  ;;  %v9445_v8 = vsel %vm633_vm1, %v639_v51, %v640_v56  ;;  %v9448_v52 = vsel %vm633_vm1, %v636_v29, %v637_v43 }
  0x75   : > { %14872 = vst [vmem:[#allocation45_spill] sm:$0xff] %v9433_v0  ;;  %14874 = vst [vmem:[#allocation47_spill] sm:$0xff] %v9440_v58  ;;  %v568_v2 = vadd.f32 %v9025_v5, %v529_v3  ;;  %v569_v61 = vadd.f32 %v9025_v5, %v530_v34  ;;  %v9455_v49 = vsel %vm633_vm1, 0.0, %v636_v29  ;;  %v9458_v37 = vsel %vm633_vm1, %v645_v17, %v646_v1 }
  0x76   : > { %7025 = vrot.lane.b32.xlu0 %v9287_v31, %s14711_s16  ;;  %14873 = vst [vmem:[#allocation46_spill] sm:$0xff] %v9437_v60  ;;  %14875 = vst [vmem:[#allocation48_spill] sm:$0xff] %v9445_v8  ;;  %v9461_v19 = vsel %vm633_vm1, 0.0, %v645_v17  ;;  %v642_v43 = vrot.slane %v9044_v22, 7  ;;  %v643_v56 = vrot.slane %v9057_v32, 7  ;;  %v9469_v34 = vpack.i.bf16 %v9445_v8, %v9440_v58 }
  0x77   : > { %14876 = vst [vmem:[#allocation49_spill] sm:$0xff] %v9448_v52  ;;  %14877 = vst [vmem:[#allocation50_spill] sm:$0xff] %v9455_v49  ;;  %v600_v5 = vmax.f32 %v568_v2, 0.0  ;;  %v601_v3 = vmax.f32 %v569_v61, 0.0  ;;  %v651_v29 = vrot.slane %v9088_v54, 7  ;;  %v652_v1 = vrot.slane %v9120_v15, 7 }
  0x78   : > { %7040 = vrot.lane.b32.xlu1 %v9322_v7, %s14711_s16  ;;  %14878 = vst [vmem:[#allocation51_spill] sm:$0xff] %v9458_v37  ;;  %14879 = vst [vmem:[#allocation52_spill] sm:$0xff] %v9461_v19  ;;  %v648_v17 = vrot.slane %v9106_v6, 7  ;;  %v649_v51 = vrot.slane %v9083_v50, 7  ;;  %v7084_v2 = vpack.i.bf16 %v9448_v52, %v9455_v49  ;;  %v9483_v61 = vpack.i.bf16 %v9458_v37, %v9461_v19 }
  0x79   : > { %v811_v47 = vrot.slane %v600_v5, 7  ;;  %v812_v24 = vrot.slane %v601_v3, 7  ;;  %v657_v58 = vrot.slane %v9113_v10, 7  ;;  %v9488_v8 = vpack.i.bf16 %v9133_v27, %v9155_v48 }
  0x7a   : > { %7035 = vrot.lane.b32.xlu0 %v9315_v62, %s14711_s16  ;;  %v9499_v49 = vsel %vm633_vm1, 0.0, %v651_v29  ;;  %v658_v37 = vrot.slane %v9147_v42, 7  ;;  %vm1570_vm3 = vcmask 261120   ;;  %vm1603_vm4 = vcmask 392192  }
  0x7b   : > { %v815_v52 = vsel %vm633_vm1, 0.0, %v811_v47  ;;  %14882 = vst [vmem:[#allocation55_spill] sm:$0xff] %v9499_v49  ;;  %vm1636_vm5 = vcmask 523264   ;;  %vm1669_vm6 = vcmask 654336   ;;  %vm1702_vm7 = vcmask 785408  }
  0x7c   : > { %7050 = vrot.lane.b32.xlu1 %v9349_v28, %s14711_s16  ;;  %vm1735_vm8 = vcmask 916480   ;;  %vm5094_vm9 = vcmask 1043456   ;;  %vm4733_vm10 = vcmask 64512   ;;  %vm4798_vm11 = vcmask 195584  }
  0x7d   : > { %vm4863_vm12 = vcmask 326656   ;;  %vm4928_vm13 = vcmask 457728   ;;  %vm5045_vm14 = vcmask 588800   ;;  %vm5971_vm15 = vcmask 1041409  }
  0x7e   : > { %7045 = vrot.lane.b32.xlu0 %v9345_v46, %s14711_s16 }
  0x80   : > { %7060 = vrot.lane.b32.xlu1 %v9376_v11, %s14711_s16  ;;  %v9504_v11 = vpack.i.bf16 %v601_v3, %v600_v5 }
  0x82   : > { %7055 = vrot.lane.b32.xlu0 %v9389_v26, %s14711_s16 }
  0x84   : > { %7070 = vrot.lane.b32.xlu1 %v9403_v30, %s14711_s16  ;;  %v9494_v30 = vsel %vm633_vm1, 0.0, %v642_v43 }
  0x85   : > { %14881 = vst [vmem:[#allocation54_spill] sm:$0xff] %v9494_v30 }
  0x86   : > { %7065 = vrot.lane.b32.xlu0 %v9425_v45, %s14711_s16 }
  0x88   : > { %7080 = vrot.lane.b32.xlu1 %v9437_v60, %s14711_s16  ;;  %v9491_v60 = vsel %vm633_vm1, %v642_v43, %v643_v56  ;;  %v9509_v43 = vsel %vm633_vm1, %v651_v29, %v652_v1  ;;  %v655_v56 = vrot.slane %v9111_v9, 7  ;;  %v9533_v1 = vsel %vm633_vm1, %v657_v58, %v658_v37 }
  0x89   : > { %14880 = vst [vmem:[#allocation53_spill] sm:$0xff] %v9491_v60  ;;  %14883 = vst [vmem:[#allocation56_spill] sm:$0xff] %v9509_v43  ;;  %v9526_v29 = vpack.i.bf16 %v9509_v43, %v9499_v49  ;;  %v817_v43 = vrot.slane %v601_v3, 1 }
  0x8a   : > { %7075 = vrot.lane.b32.xlu0 %v9433_v0, %s14711_s16  ;;  %v813_v0 = vsel %vm633_vm1, %v811_v47, %v812_v24  ;;  %v9512_v24 = vsel %vm633_vm1, %v648_v17, %v649_v51  ;;  %v9515_v47 = vsel %vm633_vm1, 0.0, %v648_v17  ;;  %14887 = vst [vmem:[#allocation60_spill] sm:$0xff] %v9533_v1  ;;  %v816_v17 = vrot.slane %v600_v5, 1  ;;  %s15093_s16 = smov 96  }
  0x8b   : > { %v9502_v19 = vpack.i.bf16 %v813_v0, %v815_v52  ;;  %14884 = vst [vmem:[#allocation57_spill] sm:$0xff] %v9512_v24  ;;  %14885 = vst [vmem:[#allocation58_spill] sm:$0xff] %v9515_v47  ;;  %v9520_v0 = vpack.i.bf16 %v9491_v60, %v9494_v30  ;;  %v654_v52 = vrot.slane %v9127_v20, 7  ;;  %v9530_v51 = vpack.i.bf16 %v9512_v24, %v9515_v47 }
  0x8c   : > { %7090 = vrot.lane.b32.xlu1 %v9469_v34, %s14791_s15  ;;  %14886 = vst [vmem:[#allocation59_spill] sm:$0xff] %v9526_v29  ;;  %v663_v60 = vrot.slane %v9142_v35, 7  ;;  %v664_v30 = vrot.slane %v9170_v59, 7  ;;  %v660_v5 = vrot.slane %v9155_v48, 7  ;;  %v661_v47 = vrot.slane %v9133_v27, 7 }
  0x8d   : > { %v9545_v49 = vsel %vm633_vm1, %v654_v52, %v655_v56  ;;  %v9548_v37 = vsel %vm633_vm1, 0.0, %v654_v52  ;;  %v9556_v24 = vsel %vm729_vm0, %v817_v43, 0.0 }
  0x8e   : > { %7085 = vrot.lane.b32.xlu0 %v7084_v2, %s14791_s15  ;;  %v9538_v2 = vsel %vm633_vm1, 0.0, %v657_v58  ;;  %14889 = vst [vmem:[#allocation62_spill] sm:$0xff] %v9545_v49  ;;  %14890 = vst [vmem:[#allocation63_spill] sm:$0xff] %v9548_v37  ;;  %v9553_v58 = vsel %vm729_vm0, %v816_v17, %v817_v43  ;;  %v9570_v27 = vpack.i.bf16 %v9545_v49, %v9548_v37  ;;  %v9573_v48 = vsel %vm633_vm1, 0.0, %v663_v60 }
  0x8f   : > { %14888 = vst [vmem:[#allocation61_spill] sm:$0xff] %v9538_v2  ;;  %14891 = vst [vmem:[#allocation64_spill] sm:$0xff] %v9553_v58  ;;  %v9560_v3 = vpack.i.bf16 %v9533_v1, %v9538_v2  ;;  %v669_v43 = vrot.slane %v9163_v55, 7  ;;  %v670_v17 = vrot.slane %v9194_v18, 7  ;;  %v9580_v56 = vsel %vm633_vm1, %v663_v60, %v664_v30 }
  0x90   : > { %7100 = vrot.lane.b32.xlu1 %v9483_v61, %s14791_s15  ;;  %14892 = vst [vmem:[#allocation65_spill] sm:$0xff] %v9556_v24  ;;  %14894 = vst [vmem:[#allocation67_spill] sm:$0xff] %v9573_v48  ;;  %v9583_v52 = vsel %vm633_vm1, %v660_v5, %v661_v47  ;;  %v9586_v1 = vsel %vm633_vm1, 0.0, %v660_v5  ;;  %v666_v2 = vrot.slane %v9175_v63, 7  ;;  %v667_v37 = vrot.slane %v9161_v53, 7 }
  0x91   : > { %14893 = vst [vmem:[#allocation66_spill] sm:$0xff] %v9560_v3  ;;  %14895 = vst [vmem:[#allocation68_spill] sm:$0xff] %v9580_v56  ;;  %v9594_v49 = vpack.i.bf16 %v9580_v56, %v9573_v48  ;;  %v9598_v60 = vpack.i.bf16 %v9583_v52, %v9586_v1  ;;  %v9603_v30 = vsel %vm633_vm1, %v669_v43, %v670_v17  ;;  %v9606_v47 = vsel %vm633_vm1, 0.0, %v669_v43 }
  0x92   : > { %7095 = vrot.lane.b32.xlu0 %v9520_v0, %s14791_s15  ;;  %14896 = vst [vmem:[#allocation69_spill] sm:$0xff] %v9583_v52  ;;  %14897 = vst [vmem:[#allocation70_spill] sm:$0xff] %v9586_v1  ;;  %v675_v5 = vrot.slane %v9187_v13, 7  ;;  %v9611_v56 = vsel %vm633_vm1, %v666_v2, %v667_v37  ;;  %v9614_v48 = vsel %vm633_vm1, 0.0, %v666_v2  ;;  %v672_v1 = vrot.slane %v9197_v23, 7 }
  0x93   : > { %14898 = vst [vmem:[#allocation71_spill] sm:$0xff] %v9594_v49  ;;  %14899 = vst [vmem:[#allocation72_spill] sm:$0xff] %v9603_v30  ;;  %v673_v52 = vrot.slane %v9185_v12, 7  ;;  %v9622_v43 = vpack.i.bf16 %v9603_v30, %v9606_v47  ;;  %v9628_v37 = vpack.i.bf16 %v9611_v56, %v9614_v48  ;;  %v678_v30 = vrot.slane %v9214_v38, 7 }
  0x94   : > { %7110 = vrot.lane.b32.xlu1 %v9526_v29, %s14791_s15  ;;  %14900 = vst [vmem:[#allocation73_spill] sm:$0xff] %v9606_v47  ;;  %14901 = vst [vmem:[#allocation74_spill] sm:$0xff] %v9611_v56  ;;  %v9634_v17 = vsel %vm633_vm1, 0.0, %v675_v5  ;;  %v679_v47 = vrot.slane %v9216_v41, 7 }
  0x95   : > { %14902 = vst [vmem:[#allocation75_spill] sm:$0xff] %v9614_v48  ;;  %14904 = vst [vmem:[#allocation77_spill] sm:$0xff] %v9634_v17  ;;  %v9637_v29 = vsel %vm633_vm1, %v672_v1, %v673_v52 }
  0x96   : > { %7105 = vrot.lane.b32.xlu0 %v9530_v51, %s14791_s15  ;;  %14905 = vst [vmem:[#allocation78_spill] sm:$0xff] %v9637_v29 }
  0x98   : > { %7120 = vrot.lane.b32.xlu1 %v9560_v3, %s14791_s15  ;;  %v676_v3 = vrot.slane %v9212_v36, 7 }
  0x9a   : > { %7115 = vrot.lane.b32.xlu0 %v9570_v27, %s14791_s15  ;;  %v9631_v2 = vsel %vm633_vm1, %v675_v5, %v676_v3  ;;  %v9660_v5 = vsel %vm633_vm1, 0.0, %v678_v30 }
  0x9b   : > { %14903 = vst [vmem:[#allocation76_spill] sm:$0xff] %v9631_v2  ;;  %v9648_v3 = vpack.i.bf16 %v9631_v2, %v9634_v17  ;;  %14908 = vst [vmem:[#allocation81_spill] sm:$0xff] %v9660_v5 }
  0x9c   : > { %7130 = vrot.lane.b32.xlu1 %v9594_v49, %s14791_s15  ;;  %v9640_v49 = vsel %vm633_vm1, 0.0, %v672_v1  ;;  %v9657_v1 = vsel %vm633_vm1, %v678_v30, %v679_v47  ;;  %v9674_v47 = vpack.i.bf16 %v9042_v21, %v9068_v40  ;;  %v9682_v30 = vpack.i.bf16 %v9104_v4, %v9059_v33 }
  0x9d   : > { %14906 = vst [vmem:[#allocation79_spill] sm:$0xff] %v9640_v49  ;;  %v9654_v52 = vpack.i.bf16 %v9637_v29, %v9640_v49  ;;  %14907 = vst [vmem:[#allocation80_spill] sm:$0xff] %v9657_v1  ;;  %v9668_v2 = vpack.i.bf16 %v9657_v1, %v9660_v5  ;;  %v14909_v5 = vpack.i.bf16 %v9066_v39, %v9048_v25 }
  0x9e   : > { %7125 = vrot.lane.b32.xlu0 %v9598_v60, %s14791_s15  ;;  %v9690_v21 = vpack.i.bf16 %v9057_v32, %v9044_v22  ;;  %v9696_v40 = vpack.i.bf16 %v9120_v15, %v9088_v54  ;;  %v9702_v33 = vpack.i.bf16 %v9083_v50, %v9106_v6  ;;  %v9708_v22 = vpack.i.bf16 %v9147_v42, %v9113_v10 }
  0x9f   : > { %v9714_v25 = vpack.i.bf16 %v9111_v9, %v9127_v20  ;;  %v9720_v32 = vpack.i.bf16 %v9170_v59, %v9142_v35  ;;  %v9728_v39 = vpack.i.bf16 %v9194_v18, %v9163_v55  ;;  %v9734_v50 = vpack.i.bf16 %v9161_v53, %v9175_v63 }
  0xa0   : > { %7140 = vrot.lane.b32.xlu1 %v9622_v43, %s14791_s15  ;;  %v9744_v6 = vpack.i.bf16 %v9212_v36, %v9187_v13  ;;  %v9750_v9 = vpack.i.bf16 %v9185_v12, %v9197_v23  ;;  %v9762_v20 = vpack.i.bf16 %v9216_v41, %v9214_v38 }
  0xa2   : > { %7135 = vrot.lane.b32.xlu0 %v9628_v37, %s14791_s15 }
  0xa4   : > { %7150 = vrot.lane.b32.xlu1 %v9648_v3, %s14791_s15 }
  0xa6   : > { %7145 = vrot.lane.b32.xlu0 %v9654_v52, %s14791_s15 }
  0xa8   : > { %7160 = vrot.lane.b32.xlu1 %v9502_v19, %s14791_s15 }
  0xaa   : > { %7155 = vrot.lane.b32.xlu0 %v9668_v2, %s14791_s15 }
  0xac   : > { %7170 = vrot.lane.b32.xlu1 %v9674_v47, %s14797_s24 }
  0xae   : > { %7165 = vrot.lane.b32.xlu0 %v14909_v5, %s14797_s24  ;;  %v14921_v5 = vpack.i.bf16 %v9556_v24, %v9553_v58 }
  0xb0   : > { %7180 = vrot.lane.b32.xlu1 %v9682_v30, %s14797_s24 }
  0xb2   : > { %7175 = vrot.lane.b32.xlu0 %v9690_v21, %s14797_s24 }
  0xb4   : > { %7190 = vrot.lane.b32.xlu1 %v9696_v40, %s14797_s24 }
  0xb6   : > { %7185 = vrot.lane.b32.xlu0 %v9702_v33, %s14797_s24 }
  0xb8   : > { %7200 = vrot.lane.b32.xlu1 %v9708_v22, %s14797_s24 }
  0xba   : > { %7195 = vrot.lane.b32.xlu0 %v9714_v25, %s14797_s24 }
  0xbc   : > { %7210 = vrot.lane.b32.xlu1 %v9720_v32, %s14797_s24 }
  0xbe   : > { %7205 = vrot.lane.b32.xlu0 %v9488_v8, %s14797_s24  ;;  %v9736_v54 = vpop.permute.xlu1 %6940 }
  0xc0   : > { %v9738_v4 = vpop.permute.xlu0 %6930  ;;  %7220 = vrot.lane.b32.xlu1 %v9728_v39, %s14797_s24 }
  0xc2   : > { %7215 = vrot.lane.b32.xlu0 %v9734_v50, %s14797_s24  ;;  %v9752_v10 = vpop.permute.xlu1 %6945 }
  0xc4   : > { %v9754_v15 = vpop.permute.xlu0 %6935  ;;  %7230 = vrot.lane.b32.xlu1 %v9744_v6, %s14797_s24 }
  0xc6   : > { %7225 = vrot.lane.b32.xlu0 %v9750_v9, %s14797_s24  ;;  %v9764_v35 = vpop.permute.xlu1 %6955 }
  0xc8   : > { %v9766_v42 = vpop.permute.xlu0 %6950  ;;  %7240 = vrot.lane.b32.xlu1 %v9504_v11, %s14797_s24 }
  0xca   : > { %7235 = vrot.lane.b32.xlu0 %v9762_v20, %s14797_s24  ;;  %v9772_v53 = vpop.permute.xlu1 %6965 }
  0xcc   : > { %v9774_v55 = vpop.permute.xlu0 %6960  ;;  %7250 = vrot.lane.b32.xlu1 %v9263_v14, %s14709_s22  ;;  %v8649_v14 = vld [vmem:[%s14562_s3] sm:$0xff]  }
  0xce   : > { %7245 = vrot.lane.b32.xlu0 %v9236_v57, %s14709_s22  ;;  %v9780_v59 = vpop.permute.xlu1 %6975 }
  0xcf   : > { %14910 = vst [vmem:[#allocation82_spill] sm:$0xff] %v9780_v59 }
  0xd0   : > { %v9782_v63 = vpop.permute.xlu0 %6970  ;;  %7260 = vrot.lane.b32.xlu1 %v9287_v31, %s14709_s22  ;;  %v14647_v31 = vmov 0  }
  0xd1   : > { %14911 = vst [vmem:[#allocation83_spill] sm:$0xff] %v9782_v63  ;;  %1920 = vmatprep.subr.bf16.mxu0 %v14647_v31  ;;  %3461 = vmatprep.subr.bf16.mxu1 %v14647_v31 }
  0xd2   : > { %7255 = vrot.lane.b32.xlu0 %v9267_v16, %s14709_s22  ;;  %v9788_v12 = vpop.permute.xlu1 %6985  ;;  %v14918_v16 = vld [vmem:[#allocation35_spill] sm:$0xff]  ;;  %1921 = vmatpush1.bf16.msra.mxu0 %v8649_v14  ;;  %v8651_v14 = vld [vmem:[%s14562_s3 + $0x10] sm:$0xff]  }
  0xd3   : > { %14912 = vst [vmem:[#allocation84_spill] sm:$0xff] %v9788_v12  ;;  %1922 = vmatprep.subr.bf16.mxu0 %v14647_v31 }
  0xd4   : > { %v9790_v13 = vpop.permute.xlu0 %6980  ;;  %7270 = vrot.lane.b32.xlu1 %v9315_v62, %s14709_s22  ;;  %v8650_v62 = vld [vmem:[%s14562_s3 + $0x8] sm:$0xff]  }
  0xd5   : > { %14913 = vst [vmem:[#allocation85_spill] sm:$0xff] %v9790_v13 }
  0xd6   : > { %7265 = vrot.lane.b32.xlu0 %v9296_v44, %s14709_s22  ;;  %v9796_v18 = vpop.permute.xlu1 %6995  ;;  %v14919_v44 = vld [vmem:[#allocation45_spill] sm:$0xff]  ;;  %1923 = vmatpush1.bf16.msra.mxu0 %v8650_v62 }
  0xd7   : > { %14914 = vst [vmem:[#allocation86_spill] sm:$0xff] %v9796_v18  ;;  %1924 = vmatprep.subr.bf16.mxu0 %v14647_v31 }
  0xd8   : > { %v9798_v23 = vpop.permute.xlu0 %6990  ;;  %7280 = vrot.lane.b32.xlu1 %v9345_v46, %s14709_s22 }
  0xd9   : > { %14915 = vst [vmem:[#allocation87_spill] sm:$0xff] %v9798_v23 }
  0xda   : > { %7275 = vrot.lane.b32.xlu0 %v9322_v7, %s14709_s22  ;;  %v9804_v36 = vpop.permute.xlu1 %897  ;;  %v14920_v7 = vld [vmem:[#allocation41_spill] sm:$0xff]  ;;  %1925 = vmatpush1.bf16.msra.mxu0 %v8651_v14 }
  0xdb   : > { %14916 = vst [vmem:[#allocation88_spill] sm:$0xff] %v9804_v36  ;;  %1926 = vmatprep.subr.bf16.mxu0 %v14647_v31 }
  0xdc   : > { %v9806_v38 = vpop.permute.xlu0 %7000  ;;  %7290 = vrot.lane.b32.xlu1 %v9389_v26, %s14709_s22 }
  0xdd   : > { %14917 = vst [vmem:[#allocation89_spill] sm:$0xff] %v9806_v38 }
  0xde   : > { %7285 = vrot.lane.b32.xlu0 %v9349_v28, %s14709_s22  ;;  %v9812_v41 = vpop.permute.xlu1 %7010 }
  0xe0   : > { %v9814_v57 = vpop.permute.xlu0 %7005  ;;  %7300 = vrot.lane.b32.xlu1 %v9425_v45, %s14709_s22 }
  0xe2   : > { %7295 = vrot.lane.b32.xlu0 %v14918_v16, %s14709_s22  ;;  %v9824_v26 = vpop.permute.xlu1 %7020  ;;  %v14922_v16 = vld [vmem:[#allocation46_spill] sm:$0xff] }
  0xe4   : > { %v9827_v28 = vpop.permute.xlu0 %7015  ;;  %7310 = vrot.lane.b32.xlu1 %v14919_v44, %s14709_s22 }
  0xe6   : > { %7305 = vrot.lane.b32.xlu0 %v14920_v7, %s14709_s22  ;;  %v9837_v46 = vpop.permute.xlu1 %7030  ;;  %v8652_v7 = vld [vmem:[%s14562_s3 + $0x18] sm:$0xff]  }
  0xe7   : > { %1927 = vmatpush1.bf16.msra.mxu0 %v8652_v7  ;;  %v14927_v7 = vld [vmem:[#allocation59_spill] sm:$0xff] }
  0xe8   : > { %v9839_v45 = vpop.permute.xlu0 %7025  ;;  %7320 = vrot.lane.b32.xlu1 %v14921_v5, %s14709_s22  ;;  %1928 = vmatprep.subr.bf16.mxu0 %v14647_v31 }
  0xea   : > { %7315 = vrot.lane.b32.xlu0 %v14922_v16, %s14709_s22  ;;  %v9851_v44 = vpop.permute.xlu1 %7040  ;;  %s14799_s22 = smov 24  }
  0xec   : > { %v9853_v62 = vpop.permute.xlu0 %7035  ;;  %7330 = vrot.lane.b32.xlu1 %v9520_v0, %s14707_s25  ;;  %v8653_v0 = vld [vmem:[%s14562_s3 + $0x20] sm:$0xff]  }
  0xed   : > { %1929 = vmatpush1.bf16.msra.mxu0 %v8653_v0  ;;  %v14930_v0 = vld [vmem:[#allocation66_spill] sm:$0xff] }
  0xee   : > { %7325 = vrot.lane.b32.xlu0 %v9469_v34, %s14707_s25  ;;  %v9863_v5 = vpop.permute.xlu1 %7050  ;;  %1930 = vmatprep.subr.bf16.mxu0 %v14647_v31 }
  0xef   : > { %14923 = vst [vmem:[#allocation35_spill] sm:$0xff] %v9863_v5  ;;  %v6937_v5 = vunpack.i.l.bf16 %v9754_v15 }
  0xf0   : > { %v9865_v16 = vpop.permute.xlu0 %7045  ;;  %7340 = vrot.lane.b32.xlu1 %v9530_v51, %s14707_s25  ;;  %v8654_v51 = vld [vmem:[%s14562_s3 + $0x28] sm:$0xff]  }
  0xf1   : > { %14924 = vst [vmem:[#allocation45_spill] sm:$0xff] %v9865_v16  ;;  %1931 = vmatpush1.bf16.msra.mxu0 %v8654_v51  ;;  %v14933_v51 = vld [vmem:[#allocation71_spill] sm:$0xff] }
  0xf2   : > { %7335 = vrot.lane.b32.xlu0 %v9483_v61, %s14707_s25  ;;  %v9875_v14 = vpop.permute.xlu1 %7060  ;;  %1932 = vmatprep.subr.bf16.mxu0 %v14647_v31 }
  0xf3   : > { %14925 = vst [vmem:[#allocation41_spill] sm:$0xff] %v9875_v14 }
  0xf4   : > { %v9877_v34 = vpop.permute.xlu0 %7055  ;;  %7350 = vrot.lane.b32.xlu1 %v9570_v27, %s14707_s25  ;;  %v8655_v27 = vld [vmem:[%s14562_s3 + $0x30] sm:$0xff]  }
  0xf5   : > { %14926 = vst [vmem:[#allocation46_spill] sm:$0xff] %v9877_v34  ;;  %1933 = vmatpush1.bf16.msra.mxu0 %v8655_v27 }
  0xf6   : > { %7345 = vrot.lane.b32.xlu0 %v14927_v7, %s14707_s25  ;;  %v9887_v1 = vpop.permute.xlu1 %7070  ;;  %1934 = vmatprep.subr.bf16.mxu0 %v14647_v31 }
  0xf7   : > { %14928 = vst [vmem:[#allocation59_spill] sm:$0xff] %v9887_v1 }
  0xf8   : > { %v9889_v61 = vpop.permute.xlu0 %7065  ;;  %7360 = vrot.lane.b32.xlu1 %v9598_v60, %s14707_s25  ;;  %v8656_v60 = vld [vmem:[%s14562_s3 + $0x38] sm:$0xff]  }
  0xf9   : > { %14929 = vst [vmem:[#allocation90_spill] sm:$0xff] %v9889_v61  ;;  %1935 = vmatpush1.bf16.msra.mxu0 %v8656_v60  ;;  %v14936_v60 = vld [vmem:[#allocation15_spill] sm:$0xff] }
  0xfa   : > { %7355 = vrot.lane.b32.xlu0 %v14930_v0, %s14707_s25  ;;  %v9899_v36 = vpop.permute.xlu1 %7080  ;;  %v14934_v0 = vmov 0.0   ;;  %1936 = vmatprep.subr.bf16.mxu0 %v14647_v31 }
  0xfb   : > { %14931 = vst [vmem:[#allocation66_spill] sm:$0xff] %v9899_v36  ;;  %v9914_v36 = vrot.slane %v14934_v0, 7  ;;  %v14937_v0 = vld [vmem:[#allocation16_spill] sm:$0xff] }
  0xfc   : > { %v9901_v7 = vpop.permute.xlu0 %7075  ;;  %7370 = vrot.lane.b32.xlu1 %v9628_v37, %s14707_s25  ;;  %v8657_v37 = vld [vmem:[%s14562_s3 + $0x40] sm:$0xff]   ;;  %v1769_v24 = vpack.c.bf16 %v14937_v0, %v14936_v60 }
  0xfd   : > { %14932 = vst [vmem:[#allocation91_spill] sm:$0xff] %v9901_v7  ;;  %14935 = vst [vmem:[#allocation71_spill] sm:$0xff] %v9914_v36  ;;  %1937 = vmatpush1.bf16.msra.mxu0 %v8657_v37  ;;  %v9932_v31 = vsel %vm633_vm1, 0.0, %v9914_v36 }
  0xfe   : > { %7365 = vrot.lane.b32.xlu0 %v14933_v51, %s14707_s25  ;;  %v9911_v58 = vpop.permute.xlu1 %7090  ;;  %14938 = vst [vmem:[#allocation15_spill] sm:$0xff] %v9932_v31  ;;  %6660 = vmatprep.mubr.msk.bf16.mxu0 %vm1537_vm2, %v1769_v24 }
 0x100   : > { %v9916_v27 = vpop.permute.xlu0 %7085  ;;  %7380 = vrot.lane.b32.xlu1 %v9654_v52, %s14707_s25  ;;  %v9940_v52 = vpack.i.bf16 %v9914_v36, %v9932_v31 }
 0x102   : > { %7375 = vrot.lane.b32.xlu0 %v9622_v43, %s14707_s25  ;;  %v9926_v51 = vpop.permute.xlu1 %7100  ;;  %14939 = vst [vmem:[#allocation16_spill] sm:$0xff] %v9940_v52 }
 0x104   : > { %v9934_v17 = vpop.permute.xlu0 %7095  ;;  %7390 = vrot.lane.b32.xlu1 %v9668_v2, %s14707_s25 }
 0x106   : > { %7385 = vrot.lane.b32.xlu0 %v9648_v3, %s14707_s25  ;;  %v9945_v43 = vpop.permute.xlu1 %7110 }
 0x108   : > { %v9947_v0 = vpop.permute.xlu0 %7105  ;;  %7400 = vrot.lane.b32.xlu1 %v9940_v52, %s14707_s25 }
 0x10a   : > { %7395 = vrot.lane.b32.xlu0 %v9502_v19, %s14707_s25  ;;  %v9953_v2 = vpop.permute.xlu1 %7120  ;;  %s15089_s25 = smov 32  }
 0x10c   : > { %v9955_v37 = vpop.permute.xlu0 %7115  ;;  %7410 = vrot.lane.b32.xlu1 %v9690_v21, %s8822_s27 }
 0x10e   : > { %7405 = vrot.lane.b32.xlu0 %v9674_v47, %s8822_s27  ;;  %v9961_v24 = vpop.permute.xlu1 %7130 }
 0x10f   : > { %14940 = vst [vmem:[#allocation92_spill] sm:$0xff] %v9961_v24 }
 0x110   : > { %v9963_v3 = vpop.permute.xlu0 %7125  ;;  %7420 = vrot.lane.b32.xlu1 %v9702_v33, %s8822_s27 }
 0x111   : > { %14941 = vst [vmem:[#allocation93_spill] sm:$0xff] %v9963_v3  ;;  %v14974_v3 = vld [vmem:[#allocation49_spill] sm:$0xff] }
 0x112   : > { %7415 = vrot.lane.b32.xlu0 %v9682_v30, %s8822_s27  ;;  %v9969_v19 = vpop.permute.xlu1 %7140  ;;  %v1541_v16 = vsel %vm1537_vm2, %v14974_v3, %v6937_v5 }
 0x113   : > { %14942 = vst [vmem:[#allocation94_spill] sm:$0xff] %v9969_v19 }
 0x114   : > { %v9971_v60 = vpop.permute.xlu0 %7135  ;;  %7430 = vrot.lane.b32.xlu1 %v9714_v25, %s8822_s27 }
 0x115   : > { %14943 = vst [vmem:[#allocation95_spill] sm:$0xff] %v9971_v60 }
 0x116   : > { %7425 = vrot.lane.b32.xlu0 %v9696_v40, %s8822_s27  ;;  %v9977_v47 = vpop.permute.xlu1 %7150 }
 0x117   : > { %14944 = vst [vmem:[#allocation96_spill] sm:$0xff] %v9977_v47 }
 0x118   : > { %v9979_v21 = vpop.permute.xlu0 %7145  ;;  %7440 = vrot.lane.b32.xlu1 %v9488_v8, %s8822_s27 }
 0x119   : > { %14945 = vst [vmem:[#allocation97_spill] sm:$0xff] %v9979_v21 }
 0x11a   : > { %7435 = vrot.lane.b32.xlu0 %v9708_v22, %s8822_s27  ;;  %v9985_v30 = vpop.permute.xlu1 %7160 }
 0x11b   : > { %14946 = vst [vmem:[#allocation98_spill] sm:$0xff] %v9985_v30 }
 0x11c   : > { %v9987_v33 = vpop.permute.xlu0 %7155  ;;  %7450 = vrot.lane.b32.xlu1 %v9734_v50, %s8822_s27 }
 0x11d   : > { %14947 = vst [vmem:[#allocation99_spill] sm:$0xff] %v9987_v33 }
 0x11e   : > { %7445 = vrot.lane.b32.xlu0 %v9720_v32, %s8822_s27  ;;  %v9993_v40 = vpop.permute.xlu1 %7170 }
 0x120   : > { %v9995_v25 = vpop.permute.xlu0 %7165  ;;  %7460 = vrot.lane.b32.xlu1 %v9750_v9, %s8822_s27 }
 0x121   : > { %v7168_v63 = vunpack.i.h.bf16 %v9995_v25 }
 0x122   : > { %7455 = vrot.lane.b32.xlu0 %v9728_v39, %s8822_s27  ;;  %v10001_v8 = vpop.permute.xlu1 %7180 }
 0x124   : > { %v10003_v22 = vpop.permute.xlu0 %7175  ;;  %7470 = vrot.lane.b32.xlu1 %v9762_v20, %s8822_s27 }
 0x126   : > { %7465 = vrot.lane.b32.xlu0 %v9744_v6, %s8822_s27  ;;  %v10009_v32 = vpop.permute.xlu1 %7190 }
 0x128   : > { %v10011_v50 = vpop.permute.xlu0 %7185 }
 0x12a   : > { %7475 = vrot.lane.b32.xlu0 %v9504_v11, %s8822_s27  ;;  %v10015_v9 = vpop.permute.xlu1 %7200 }
 0x12b   : > { %14948 = vst [vmem:[#allocation100_spill] sm:$0xff] %v10015_v9 }
 0x12c   : > { %v10017_v39 = vpop.permute.xlu0 %7195 }
 0x12e   : > { %v10019_v52 = vpop.permute.xlu1 %7210 }
 0x12f   : > { %14949 = vst [vmem:[#allocation101_spill] sm:$0xff] %v10019_v52  ;;  %v6933_v52 = vunpack.i.h.bf16 %v9738_v4 }
 0x130   : > { %v10021_v30 = vpop.permute.xlu0 %7205 }
 0x131   : > { %14950 = vst [vmem:[#allocation102_spill] sm:$0xff] %v10021_v30  ;;  %v7087_v30 = vunpack.i.l.bf16 %v9916_v27 }
 0x132   : > { %v10023_v33 = vpop.permute.xlu1 %7220 }
 0x133   : > { %14951 = vst [vmem:[#allocation103_spill] sm:$0xff] %v10023_v33 }
 0x134   : > { %v10025_v20 = vpop.permute.xlu0 %7215 }
 0x135   : > { %14952 = vst [vmem:[#allocation104_spill] sm:$0xff] %v10025_v20 }
 0x136   : > { %v10027_v6 = vpop.permute.xlu1 %7230 }
 0x137   : > { %14953 = vst [vmem:[#allocation105_spill] sm:$0xff] %v10027_v6 }
 0x138   : > { %v10029_v7 = vpop.permute.xlu0 %7225 }
 0x139   : > { %14954 = vst [vmem:[#allocation106_spill] sm:$0xff] %v10029_v7 }
 0x13a   : > { %v10031_v38 = vpop.permute.xlu1 %7240 }
 0x13b   : > { %14955 = vst [vmem:[#allocation107_spill] sm:$0xff] %v10031_v38 }
 0x13c   : > { %v10033_v49 = vpop.permute.xlu0 %7235 }
 0x13d   : > { %14956 = vst [vmem:[#allocation108_spill] sm:$0xff] %v10033_v49 }
 0x13e   : > { %v10035_v11 = vpop.permute.xlu1 %7250 }
 0x140   : > { %v10037_v29 = vpop.permute.xlu0 %7245 }
 0x142   : > { %v10039_v47 = vpop.permute.xlu1 %7260 }
 0x144   : > { %v10041_v1 = vpop.permute.xlu0 %7255 }
 0x146   : > { %v10043_v18 = vpop.permute.xlu1 %7270 }
 0x148   : > { %v10045_v21 = vpop.permute.xlu0 %7265 }
 0x14a   : > { %v10047_v61 = vpop.permute.xlu1 %7280 }
 0x14b   : > { %14957 = vst [vmem:[#allocation109_spill] sm:$0xff] %v10047_v61 }
 0x14c   : > { %v10049_v6 = vpop.permute.xlu0 %7275 }
 0x14e   : > { %v10051_v7 = vpop.permute.xlu1 %7290 }
 0x14f   : > { %14958 = vst [vmem:[#allocation110_spill] sm:$0xff] %v10051_v7  ;;  %v6932_v7 = vunpack.i.l.bf16 %v9738_v4 }
 0x150   : > { %v10053_v38 = vpop.permute.xlu0 %7285 }
 0x151   : > { %14959 = vst [vmem:[#allocation111_spill] sm:$0xff] %v10053_v38  ;;  %v7012_v38 = vunpack.i.l.bf16 %v9812_v41  ;;  %v1539_v4 = vsel %vm1537_vm2, %v9914_v36, %v6932_v7  ;;  %v7092_v36 = vunpack.i.l.bf16 %v9911_v58 }
 0x152   : > { %v10055_v49 = vpop.permute.xlu1 %7300 }
 0x153   : > { %14960 = vst [vmem:[#allocation112_spill] sm:$0xff] %v10055_v49 }
 0x154   : > { %v10057_v23 = vpop.permute.xlu0 %7295 }
 0x155   : > { %14961 = vst [vmem:[#allocation113_spill] sm:$0xff] %v10057_v23 }
 0x156   : > { %v10059_v33 = vpop.permute.xlu1 %7310 }
 0x157   : > { %14962 = vst [vmem:[#allocation114_spill] sm:$0xff] %v10059_v33 }
 0x158   : > { %v10061_v48 = vpop.permute.xlu0 %7305 }
 0x159   : > { %14963 = vst [vmem:[#allocation115_spill] sm:$0xff] %v10061_v48 }
 0x15a   : > { %v10063_v56 = vpop.permute.xlu1 %7320 }
 0x15b   : > { %14964 = vst [vmem:[#allocation116_spill] sm:$0xff] %v10063_v56 }
 0x15c   : > { %v10065_v19 = vpop.permute.xlu0 %7315 }
 0x15d   : > { %14965 = vst [vmem:[#allocation117_spill] sm:$0xff] %v10065_v19 }
 0x15e   : > { %v10067_v14 = vpop.permute.xlu1 %7330 }
 0x160   : > { %v7326_v12 = vpop.permute.xlu0 %7325 }
 0x161   : > { %v7328_v5 = vunpack.i.h.bf16 %v7326_v12  ;;  %v7327_v3 = vunpack.i.l.bf16 %v7326_v12 }
 0x162   : > { %v10069_v20 = vpop.permute.xlu1 %7340 }
 0x164   : > { %v10071_v60 = vpop.permute.xlu0 %7335 }
 0x166   : > { %v10073_v34 = vpop.permute.xlu1 %7350 }
 0x168   : > { %v10075_v49 = vpop.permute.xlu0 %7345 }
 0x16a   : > { %v10077_v23 = vpop.permute.xlu1 %7360 }
 0x16b   : > { %14966 = vst [vmem:[#allocation118_spill] sm:$0xff] %v10077_v23 }
 0x16c   : > { %v10079_v33 = vpop.permute.xlu0 %7355 }
 0x16e   : > { %v10081_v48 = vpop.permute.xlu1 %7370 }
 0x16f   : > { %14967 = vst [vmem:[#allocation119_spill] sm:$0xff] %v10081_v48  ;;  %v7007_v48 = vunpack.i.l.bf16 %v9814_v57 }
 0x170   : > { %v10083_v56 = vpop.permute.xlu0 %7365 }
 0x171   : > { %14968 = vst [vmem:[#allocation120_spill] sm:$0xff] %v10083_v56 }
 0x172   : > { %v10085_v19 = vpop.permute.xlu1 %7380 }
 0x173   : > { %14969 = vst [vmem:[#allocation121_spill] sm:$0xff] %v10085_v19  ;;  %v1538_v19 = vsel %vm1537_vm2, %v9932_v31, %v6932_v7  ;;  %v7013_v31 = vunpack.i.h.bf16 %v9812_v41 }
 0x174   : > { %v10087_v13 = vpop.permute.xlu0 %7375 }
 0x175   : > { %14970 = vst [vmem:[#allocation122_spill] sm:$0xff] %v10087_v13  ;;  %v7008_v13 = vunpack.i.h.bf16 %v9814_v57  ;;  %v7167_v57 = vunpack.i.l.bf16 %v9995_v25  ;;  %v7093_v25 = vunpack.i.h.bf16 %v9911_v58 }
 0x176   : > { %v10091_v24 = vpop.permute.xlu1 %7390 }
 0x177   : > { %14971 = vst [vmem:[#allocation123_spill] sm:$0xff] %v10091_v24  ;;  %v14973_v24 = vld [vmem:[#allocation50_spill] sm:$0xff]  ;;  %v10123_v41 = vsel %vm1570_vm3, %v1539_v4, %v7008_v13  ;;  %v14978_v13 = vld [vmem:[#allocation17_spill] sm:$0xff] }
 0x178   : > { %v10094_v59 = vpop.permute.xlu0 %7385  ;;  %v1540_v56 = vsel %vm1537_vm2, %v14973_v24, %v6933_v52  ;;  %v7248_v52 = vunpack.i.h.bf16 %v10037_v29  ;;  %v7247_v24 = vunpack.i.l.bf16 %v10037_v29  ;;  %14977 = vst [vmem:[#allocation125_spill] sm:$0xff] %v10123_v41  ;;  %v14979_v4 = vld [vmem:[#allocation18_spill] sm:$0xff] }
 0x179   : > { %14972 = vst [vmem:[#allocation124_spill] sm:$0xff] %v10094_v59  ;;  %v7088_v59 = vunpack.i.h.bf16 %v9916_v27  ;;  %v1573_v7 = vsel %vm1570_vm3, %v1540_v56, %v7012_v38  ;;  %v10120_v27 = vsel %vm1570_vm3, %v1538_v19, %v7007_v48 }
 0x17a   : > { %v10112_v23 = vpop.permute.xlu1 %7400  ;;  %v1604_v38 = vsel %vm1603_vm4, %v10120_v27, %v7087_v30 }
 0x17b   : > { %14975 = vst [vmem:[#allocation50_spill] sm:$0xff] %v10112_v23  ;;  %v1605_v56 = vsel %vm1603_vm4, %v10123_v41, %v7088_v59  ;;  %v1637_v29 = vsel %vm1636_vm5, %v1604_v38, %v7167_v57  ;;  %v1771_v23 = vpack.c.bf16 %v14979_v4, %v14978_v13  ;;  %v7173_v59 = vunpack.i.h.bf16 %v9993_v40 }
 0x17c   : > { %v10114_v61 = vpop.permute.xlu0 %7395  ;;  %v1638_v48 = vsel %vm1636_vm5, %v1605_v56, %v7168_v63  ;;  %v1670_v12 = vsel %vm1669_vm6, %v1637_v29, %v7247_v24  ;;  %v7172_v41 = vunpack.i.l.bf16 %v9993_v40  ;;  %v7253_v56 = vunpack.i.h.bf16 %v10035_v11 }
 0x17d   : > { %14976 = vst [vmem:[#allocation49_spill] sm:$0xff] %v10114_v61  ;;  %v1671_v61 = vsel %vm1669_vm6, %v1638_v48, %v7248_v52  ;;  %v1703_v57 = vsel %vm1702_vm7, %v1670_v12, %v7327_v3  ;;  %v7252_v38 = vunpack.i.l.bf16 %v10035_v11  ;;  %v1574_v52 = vsel %vm1570_vm3, %v1541_v16, %v7013_v31 }
 0x17e   : > { %v7411_v30 = vpop.permute.xlu1 %7410  ;;  %v1704_v63 = vsel %vm1702_vm7, %v1671_v61, %v7328_v5  ;;  %v7333_v29 = vunpack.i.h.bf16 %v10067_v14  ;;  %v7332_v48 = vunpack.i.l.bf16 %v10067_v14  ;;  %v1607_v3 = vsel %vm1603_vm4, %v1574_v52, %v7093_v25  ;;  %v14982_v52 = vld [vmem:[#allocation19_spill] sm:$0xff] }
 0x17f   : > { %v7413_v61 = vunpack.i.h.bf16 %v7411_v30  ;;  %v7412_v5 = vunpack.i.l.bf16 %v7411_v30  ;;  %v6942_v4 = vunpack.i.l.bf16 %v9736_v54  ;;  %v6938_v11 = vunpack.i.h.bf16 %v9754_v15  ;;  %v14980_v30 = vld [vmem:[#allocation48_spill] sm:$0xff] }
 0x180   : > { %v7406_v19 = vpop.permute.xlu0 %7405  ;;  %v1640_v12 = vsel %vm1636_vm5, %v1607_v3, %v7173_v59  ;;  %v7018_v31 = vunpack.i.h.bf16 %v9827_v28  ;;  %v7098_v15 = vunpack.i.h.bf16 %v9934_v17  ;;  %v7337_v3 = vunpack.i.l.bf16 %v10071_v60 }
 0x181   : > { %v7408_v58 = vunpack.i.h.bf16 %v7406_v19  ;;  %v7407_v9 = vunpack.i.l.bf16 %v7406_v19  ;;  %v1606_v19 = vsel %vm1603_vm4, %v1573_v7, %v7092_v36  ;;  %v1673_v14 = vsel %vm1669_vm6, %v1640_v12, %v7253_v56 }
 0x182   : > { %v7017_v36 = vunpack.i.l.bf16 %v9827_v28  ;;  %v1706_v25 = vsel %vm1702_vm7, %v1673_v14, %v7333_v29  ;;  %v7178_v28 = vunpack.i.h.bf16 %v10003_v22  ;;  %v7177_v56 = vunpack.i.l.bf16 %v10003_v22  ;;  %v14983_v29 = vld [vmem:[#allocation20_spill] sm:$0xff] }
 0x183   : > { %v1736_v13 = vsel %vm1735_vm8, %v1703_v57, %v7407_v9  ;;  %v1737_v24 = vsel %vm1735_vm8, %v1704_v63, %v7408_v58  ;;  %v1639_v9 = vsel %vm1636_vm5, %v1606_v19, %v7172_v41  ;;  %v7097_v41 = vunpack.i.l.bf16 %v9934_v17  ;;  %v14981_v63 = vld [vmem:[#allocation47_spill] sm:$0xff] }
 0x184   : > { %v1768_v40 = vpack.c.bf16 %v1737_v24, %v1736_v13  ;;  %v1672_v16 = vsel %vm1669_vm6, %v1639_v9, %v7252_v38  ;;  %v1739_v59 = vsel %vm1735_vm8, %v1706_v25, %v7413_v61  ;;  %v1543_v57 = vsel %vm1537_vm2, %v14980_v30, %v6942_v4  ;;  %v7416_v38 = vpop.permute.xlu0 %7415 }
 0x185   : > { %v1705_v7 = vsel %vm1702_vm7, %v1672_v16, %v7332_v48  ;;  %v1576_v13 = vsel %vm1570_vm3, %v1543_v57, %v7018_v31  ;;  %v7258_v24 = vunpack.i.h.bf16 %v10041_v1  ;;  %v7257_v17 = vunpack.i.l.bf16 %v10041_v1  ;;  %v14985_v57 = vld [vmem:[#allocation53_spill] sm:$0xff] }
 0x186   : > { %1953 = vmatmul.mubr.bf16.vlgmr.msra.gmra.mrb[0].mxu0 %v1768_v40  ;;  %v1738_v58 = vsel %vm1735_vm8, %v1705_v7, %v7412_v5  ;;  %v1773_v48 = vpack.c.bf16 %v14983_v29, %v14982_v52  ;;  %v7338_v19 = vunpack.i.h.bf16 %v10071_v60  ;;  %v1609_v5 = vsel %vm1603_vm4, %v1576_v13, %v7098_v15  ;;  %v14986_v13 = vld [vmem:[#allocation21_spill] sm:$0xff] }
 0x187   : > { %6661 = vmatprep.mubr.msk.bf16.mxu0 %vm1537_vm2, %v1771_v23  ;;  %v1542_v23 = vsel %vm1537_vm2, %v14981_v63, %v6938_v11  ;;  %v1770_v61 = vpack.c.bf16 %v1739_v59, %v1738_v58  ;;  %v7418_v4 = vunpack.i.h.bf16 %v7416_v38  ;;  %v7417_v11 = vunpack.i.l.bf16 %v7416_v38  ;;  %v14984_v59 = vld [vmem:[#allocation54_spill] sm:$0xff] }
 0x188   : > { %v1575_v40 = vsel %vm1570_vm3, %v1542_v23, %v7017_v36  ;;  %v6943_v9 = vunpack.i.h.bf16 %v9736_v54  ;;  %v6947_v1 = vunpack.i.l.bf16 %v9752_v10  ;;  %v1642_v31 = vsel %vm1636_vm5, %v1609_v5, %v7178_v28  ;;  %v7421_v28 = vpop.permute.xlu1 %7420 }
 0x189   : > { %v1608_v22 = vsel %vm1603_vm4, %v1575_v40, %v7097_v41  ;;  %v7023_v16 = vunpack.i.h.bf16 %v9824_v26  ;;  %v1675_v14 = vsel %vm1669_vm6, %v1642_v31, %v7258_v24  ;;  %v7022_v36 = vunpack.i.l.bf16 %v9824_v26  ;;  %v14987_v24 = vld [vmem:[#allocation22_spill] sm:$0xff] }
 0x18a   : > { %v1641_v12 = vsel %vm1636_vm5, %v1608_v22, %v7177_v56  ;;  %v1708_v54 = vsel %vm1702_vm7, %v1675_v14, %v7338_v19  ;;  %v7103_v25 = vunpack.i.h.bf16 %v9926_v51  ;;  %v7102_v15 = vunpack.i.l.bf16 %v9926_v51 }
 0x18b   : > { %v1674_v60 = vsel %vm1669_vm6, %v1641_v12, %v7257_v17  ;;  %v1741_v58 = vsel %vm1735_vm8, %v1708_v54, %v7418_v4  ;;  %v1544_v30 = vsel %vm1537_vm2, %v14984_v59, %v6943_v9  ;;  %v1545_v63 = vsel %vm1537_vm2, %v14985_v57, %v6947_v1  ;;  %v14989_v54 = vld [vmem:[#allocation51_spill] sm:$0xff]  ;;  %v14991_v57 = vld [vmem:[#allocation24_spill] sm:$0xff] }
 0x18c   : > { %v1707_v7 = vsel %vm1702_vm7, %v1674_v60, %v7337_v3  ;;  %v7183_v26 = vunpack.i.h.bf16 %v10001_v8  ;;  %v7182_v23 = vunpack.i.l.bf16 %v10001_v8  ;;  %v1578_v56 = vsel %vm1570_vm3, %v1545_v63, %v7023_v16 }
 0x18d   : > { %v1740_v41 = vsel %vm1735_vm8, %v1707_v7, %v7417_v11  ;;  %v7263_v38 = vunpack.i.h.bf16 %v10039_v47  ;;  %v7262_v51 = vunpack.i.l.bf16 %v10039_v47  ;;  %v1775_v17 = vpack.c.bf16 %v14987_v24, %v14986_v13 }
 0x18e   : > { %1961 = vmatmul.mubr.bf16.gmra.mrb[4].mxu0 %v1770_v61  ;;  %v1577_v52 = vsel %vm1570_vm3, %v1544_v30, %v7022_v36  ;;  %v7343_v29 = vunpack.i.h.bf16 %v10069_v20  ;;  %v1772_v40 = vpack.c.bf16 %v1741_v58, %v1740_v41  ;;  %v1611_v8 = vsel %vm1603_vm4, %v1578_v56, %v7103_v25  ;;  %v14988_v36 = vld [vmem:[#allocation52_spill] sm:$0xff]  ;;  %v7426_v41 = vpop.permute.xlu0 %7425  ;;  %v14990_v30 = vld [vmem:[#allocation23_spill] sm:$0xff] }
 0x18f   : > { %6662 = vmatprep.mubr.msk.bf16.mxu0 %vm1537_vm2, %v1773_v48  ;;  %v7342_v48 = vunpack.i.l.bf16 %v10069_v20  ;;  %v1610_v19 = vsel %vm1603_vm4, %v1577_v52, %v7102_v15  ;;  %v7423_v3 = vunpack.i.h.bf16 %v7421_v28  ;;  %v7422_v61 = vunpack.i.l.bf16 %v7421_v28 }
 0x190   : > { %v6948_v5 = vunpack.i.h.bf16 %v9752_v10  ;;  %v6952_v47 = vunpack.i.l.bf16 %v9766_v42  ;;  %v1643_v22 = vsel %vm1636_vm5, %v1610_v19, %v7182_v23  ;;  %v1644_v4 = vsel %vm1636_vm5, %v1611_v8, %v7183_v26 }
 0x191   : > { %v7027_v11 = vunpack.i.l.bf16 %v9839_v45  ;;  %v1676_v20 = vsel %vm1669_vm6, %v1643_v22, %v7262_v51  ;;  %v1677_v9 = vsel %vm1669_vm6, %v1644_v4, %v7263_v38  ;;  %v7028_v1 = vunpack.i.h.bf16 %v9839_v45  ;;  %v14993_v4 = vld [vmem:[#allocation58_spill] sm:$0xff] }
 0x192   : > { %v1709_v12 = vsel %vm1702_vm7, %v1676_v20, %v7342_v48  ;;  %v1710_v10 = vsel %vm1702_vm7, %v1677_v9, %v7343_v29  ;;  %v7108_v31 = vunpack.i.h.bf16 %v9947_v0  ;;  %v7107_v16 = vunpack.i.l.bf16 %v9947_v0  ;;  %v7431_v9 = vpop.permute.xlu1 %7430 }
 0x193   : > { %v1742_v60 = vsel %vm1735_vm8, %v1709_v12, %v7422_v61  ;;  %v1743_v14 = vsel %vm1735_vm8, %v1710_v10, %v7423_v3  ;;  %v1546_v7 = vsel %vm1537_vm2, %v14988_v36, %v6948_v5  ;;  %v1547_v25 = vsel %vm1537_vm2, %v14989_v54, %v6952_v47  ;;  %v14992_v47 = vld [vmem:[#allocation57_spill] sm:$0xff] }
 0x194   : > { %v7188_v45 = vunpack.i.h.bf16 %v10011_v50  ;;  %v7187_v15 = vunpack.i.l.bf16 %v10011_v50  ;;  %v1579_v58 = vsel %vm1570_vm3, %v1546_v7, %v7027_v11  ;;  %v7268_v59 = vunpack.i.h.bf16 %v10045_v21  ;;  %v14994_v10 = vld [vmem:[#allocation25_spill] sm:$0xff] }
 0x195   : > { %v7267_v0 = vunpack.i.l.bf16 %v10045_v21  ;;  %v1777_v63 = vpack.c.bf16 %v14991_v57, %v14990_v30  ;;  %v1580_v26 = vsel %vm1570_vm3, %v1547_v25, %v7028_v1  ;;  %v7348_v23 = vunpack.i.h.bf16 %v10075_v49 }
 0x196   : > { %1969 = vmatmul.mubr.bf16.gmra.mrb[8].mxu0 %v1772_v40  ;;  %v7347_v28 = vunpack.i.l.bf16 %v10075_v49  ;;  %v1774_v56 = vpack.c.bf16 %v1743_v14, %v1742_v60  ;;  %v1613_v38 = vsel %vm1603_vm4, %v1580_v26, %v7108_v31  ;;  %v1612_v50 = vsel %vm1603_vm4, %v1579_v58, %v7107_v16  ;;  %v14995_v31 = vld [vmem:[#allocation26_spill] sm:$0xff] }
 0x197   : > { %6663 = vmatprep.mubr.msk.bf16.mxu0 %vm1537_vm2, %v1775_v17  ;;  %v7428_v51 = vunpack.i.h.bf16 %v7426_v41  ;;  %v7427_v13 = vunpack.i.l.bf16 %v7426_v41  ;;  %v6957_v24 = vunpack.i.l.bf16 %v9764_v35  ;;  %v6953_v21 = vunpack.i.h.bf16 %v9766_v42 }
 0x198   : > { %v1645_v17 = vsel %vm1636_vm5, %v1612_v50, %v7187_v15  ;;  %v1646_v52 = vsel %vm1636_vm5, %v1613_v38, %v7188_v45  ;;  %v7033_v29 = vunpack.i.h.bf16 %v9837_v46  ;;  %v7032_v40 = vunpack.i.l.bf16 %v9837_v46  ;;  %v14997_v50 = vld [vmem:[#allocation56_spill] sm:$0xff] }
 0x199   : > { %v1678_v49 = vsel %vm1669_vm6, %v1645_v17, %v7267_v0  ;;  %v1679_v48 = vsel %vm1669_vm6, %v1646_v52, %v7268_v59  ;;  %v7113_v42 = vunpack.i.h.bf16 %v9945_v43  ;;  %v7112_v3 = vunpack.i.l.bf16 %v9945_v43  ;;  %v14998_v52 = vld [vmem:[#allocation27_spill] sm:$0xff] }
 0x19a   : > { %v1711_v19 = vsel %vm1702_vm7, %v1678_v49, %v7347_v28  ;;  %v1712_v8 = vsel %vm1702_vm7, %v1679_v48, %v7348_v23  ;;  %v1549_v22 = vsel %vm1537_vm2, %v14992_v47, %v6957_v24  ;;  %v1548_v11 = vsel %vm1537_vm2, %v14993_v4, %v6953_v21  ;;  %v7436_v24 = vpop.permute.xlu0 %7435 }
 0x19b   : > { %v1744_v61 = vsel %vm1735_vm8, %v1711_v19, %v7427_v13  ;;  %v1745_v5 = vsel %vm1735_vm8, %v1712_v8, %v7428_v51  ;;  %v7193_v46 = vunpack.i.h.bf16 %v10009_v32  ;;  %v7192_v20 = vunpack.i.l.bf16 %v10009_v32 }
 0x19c   : > { %v1582_v1 = vsel %vm1570_vm3, %v1549_v22, %v7033_v29  ;;  %v7273_v12 = vunpack.i.h.bf16 %v10043_v18  ;;  %v7272_v43 = vunpack.i.l.bf16 %v10043_v18  ;;  %v1779_v16 = vpack.c.bf16 %v14995_v31, %v14994_v10  ;;  %v14999_v29 = vld [vmem:[#allocation28_spill] sm:$0xff]  ;;  %v15000_v10 = vld [vmem:[#allocation62_spill] sm:$0xff] }
 0x19d   : > { %v1581_v60 = vsel %vm1570_vm3, %v1548_v11, %v7032_v40  ;;  %v7353_v14 = vunpack.i.h.bf16 %v10073_v34  ;;  %v7352_v36 = vunpack.i.l.bf16 %v10073_v34  ;;  %v1776_v7 = vpack.c.bf16 %v1745_v5, %v1744_v61 }
 0x19e   : > { %1977 = vmatmul.mubr.bf16.gmra.mrb[12].mxu0 %v1774_v56  ;;  %v1614_v54 = vsel %vm1603_vm4, %v1581_v60, %v7112_v3  ;;  %v1615_v32 = vsel %vm1603_vm4, %v1582_v1, %v7113_v42  ;;  %v7433_v25 = vunpack.i.h.bf16 %v7431_v9  ;;  %v7432_v45 = vunpack.i.l.bf16 %v7431_v9  ;;  %v14996_v56 = vld [vmem:[#allocation55_spill] sm:$0xff] }
 0x19f   : > { %6664 = vmatprep.mubr.msk.bf16.mxu0 %vm1537_vm2, %v1777_v63  ;;  %v6958_v15 = vunpack.i.h.bf16 %v9764_v35  ;;  %v6962_v18 = vunpack.i.l.bf16 %v9774_v55  ;;  %v1647_v41 = vsel %vm1636_vm5, %v1614_v54, %v7192_v20  ;;  %v1648_v58 = vsel %vm1636_vm5, %v1615_v32, %v7193_v46  ;;  %v15003_v32 = vld [vmem:[#allocation109_spill] sm:$0xff] }
 0x1a0   : > { %v7037_v59 = vunpack.i.l.bf16 %v9853_v62  ;;  %v1680_v34 = vsel %vm1669_vm6, %v1647_v41, %v7272_v43  ;;  %v1681_v0 = vsel %vm1669_vm6, %v1648_v58, %v7273_v12  ;;  %v7038_v30 = vunpack.i.h.bf16 %v9853_v62  ;;  %v15006_v58 = vld [vmem:[#allocation118_spill] sm:$0xff] }
 0x1a1   : > { %v1713_v57 = vsel %vm1702_vm7, %v1680_v34, %v7352_v36  ;;  %v1714_v35 = vsel %vm1702_vm7, %v1681_v0, %v7353_v14  ;;  %v7118_v63 = vunpack.i.h.bf16 %v9955_v37  ;;  %v7117_v26 = vunpack.i.l.bf16 %v9955_v37  ;;  %v15002_v14 = vld [vmem:[#allocation100_spill] sm:$0xff] }
 0x1a2   : > { %v1746_v23 = vsel %vm1735_vm8, %v1713_v57, %v7432_v45  ;;  %v1747_v28 = vsel %vm1735_vm8, %v1714_v35, %v7433_v25  ;;  %v1550_v38 = vsel %vm1537_vm2, %v14996_v56, %v6958_v15  ;;  %v1551_v51 = vsel %vm1537_vm2, %v14997_v50, %v6962_v18  ;;  %v15004_v45 = vld [vmem:[#allocation29_spill] sm:$0xff]  ;;  %v15005_v15 = vld [vmem:[#allocation30_spill] sm:$0xff] }
 0x1a3   : > { %v7198_v62 = vunpack.i.h.bf16 %v10017_v39  ;;  %v7197_v13 = vunpack.i.l.bf16 %v10017_v39  ;;  %v1583_v21 = vsel %vm1570_vm3, %v1550_v38, %v7037_v59  ;;  %v7278_v17 = vunpack.i.h.bf16 %v10049_v6  ;;  %v15008_v50 = vld [vmem:[#allocation45_spill] sm:$0xff] }
 0x1a4   : > { %v7277_v37 = vunpack.i.l.bf16 %v10049_v6  ;;  %v1781_v49 = vpack.c.bf16 %v14999_v29, %v14998_v52  ;;  %v1584_v48 = vsel %vm1570_vm3, %v1551_v51, %v7038_v30  ;;  %v7358_v40 = vunpack.i.h.bf16 %v10079_v33 }
 0x1a5   : > { %v7357_v19 = vunpack.i.l.bf16 %v10079_v33  ;;  %v1778_v8 = vpack.c.bf16 %v1747_v28, %v1746_v23  ;;  %v1617_v42 = vsel %vm1603_vm4, %v1584_v48, %v7118_v63  ;;  %v1616_v39 = vsel %vm1603_vm4, %v1583_v21, %v7117_v26  ;;  %v15007_v23 = vld [vmem:[#allocation83_spill] sm:$0xff]  ;;  %v15010_v48 = vld [vmem:[#allocation61_spill] sm:$0xff] }
 0x1a6   : > { %1985 = vmatmul.mubr.bf16.gmra.mrb[16].mxu0 %v1776_v7  ;;  %v7438_v3 = vunpack.i.h.bf16 %v7436_v24  ;;  %v7437_v61 = vunpack.i.l.bf16 %v7436_v24  ;;  %v6967_v5 = vunpack.i.l.bf16 %v9772_v53  ;;  %v6963_v6 = vunpack.i.h.bf16 %v9774_v55  ;;  %v7441_v7 = vpop.permute.xlu1 %7440 }
 0x1a7   : > { %6665 = vmatprep.mubr.msk.bf16.mxu0 %vm1537_vm2, %v1779_v16  ;;  %v1649_v47 = vsel %vm1636_vm5, %v1616_v39, %v7197_v13  ;;  %v1650_v22 = vsel %vm1636_vm5, %v1617_v42, %v7198_v62  ;;  %v7043_v4 = vunpack.i.h.bf16 %v9851_v44  ;;  %v7042_v46 = vunpack.i.l.bf16 %v9851_v44  ;;  %v15001_v16 = vld [vmem:[#allocation63_spill] sm:$0xff]  ;;  %v15012_v42 = vld [vmem:[#allocation102_spill] sm:$0xff] }
 0x1a8   : > { %v1682_v33 = vsel %vm1669_vm6, %v1649_v47, %v7277_v37  ;;  %v1683_v11 = vsel %vm1669_vm6, %v1650_v22, %v7278_v17  ;;  %v7123_v55 = vunpack.i.h.bf16 %v9953_v2  ;;  %v7122_v1 = vunpack.i.l.bf16 %v9953_v2  ;;  %v15009_v17 = vld [vmem:[#allocation93_spill] sm:$0xff] }
 0x1a9   : > { %v1715_v20 = vsel %vm1702_vm7, %v1682_v33, %v7357_v19  ;;  %v1716_v9 = vsel %vm1702_vm7, %v1683_v11, %v7358_v40  ;;  %v1553_v31 = vsel %vm1537_vm2, %v15000_v10, %v6967_v5  ;;  %v1552_v60 = vsel %vm1537_vm2, %v15001_v16, %v6963_v6  ;;  %v15011_v19 = vld [vmem:[#allocation60_spill] sm:$0xff]  ;;  %v15013_v6 = vld [vmem:[#allocation111_spill] sm:$0xff]  ;;  %v15017_v16 = vld [vmem:[#allocation82_spill] sm:$0xff] }
 0x1aa   : > { %v1748_v12 = vsel %vm1735_vm8, %v1715_v20, %v7437_v61  ;;  %v1749_v43 = vsel %vm1735_vm8, %v1716_v9, %v7438_v3  ;;  %v7203_v44 = vunpack.i.h.bf16 %v15002_v14  ;;  %v7202_v36 = vunpack.i.l.bf16 %v15002_v14  ;;  %v7446_v61 = vpop.permute.xlu0 %7445  ;;  %v15015_v33 = vld [vmem:[#allocation32_spill] sm:$0xff] }
 0x1ab   : > { %v1586_v54 = vsel %vm1570_vm3, %v1553_v31, %v7043_v4  ;;  %v7283_v25 = vunpack.i.h.bf16 %v15003_v32  ;;  %v7282_v2 = vunpack.i.l.bf16 %v15003_v32  ;;  %v1783_v18 = vpack.c.bf16 %v15005_v15, %v15004_v45  ;;  %v15014_v4 = vld [vmem:[#allocation31_spill] sm:$0xff]  ;;  %v15016_v20 = vld [vmem:[#allocation120_spill] sm:$0xff] }
 0x1ac   : > { %v1585_v41 = vsel %vm1570_vm3, %v1552_v60, %v7042_v46  ;;  %v7363_v59 = vunpack.i.h.bf16 %v15006_v58  ;;  %v7362_v34 = vunpack.i.l.bf16 %v15006_v58  ;;  %v1780_v0 = vpack.c.bf16 %v1749_v43, %v1748_v12 }
 0x1ad   : > { %v1618_v30 = vsel %vm1603_vm4, %v1585_v41, %v7122_v1  ;;  %v1619_v57 = vsel %vm1603_vm4, %v1586_v54, %v7123_v55  ;;  %v7443_v35 = vunpack.i.h.bf16 %v7441_v7  ;;  %v7442_v63 = vunpack.i.l.bf16 %v7441_v7  ;;  %v15018_v7 = vld [vmem:[#allocation35_spill] sm:$0xff] }
 0x1ae   : > { %1993 = vmatmul.mubr.bf16.gmra.mrb[20].mxu0 %v1778_v8  ;;  %v6968_v26 = vunpack.i.h.bf16 %v9772_v53  ;;  %v6972_v28 = vunpack.i.l.bf16 %v15007_v23  ;;  %v1651_v56 = vsel %vm1636_vm5, %v1618_v30, %v7202_v36  ;;  %v1652_v38 = vsel %vm1636_vm5, %v1619_v57, %v7203_v44  ;;  %v15021_v57 = vld [vmem:[#allocation70_spill] sm:$0xff] }
 0x1af   : > { %6666 = vmatprep.mubr.msk.bf16.mxu0 %vm1537_vm2, %v1781_v49  ;;  %v7047_v51 = vunpack.i.l.bf16 %v15008_v50  ;;  %v1684_v62 = vsel %vm1669_vm6, %v1651_v56, %v7282_v2  ;;  %v1685_v13 = vsel %vm1669_vm6, %v1652_v38, %v7283_v25  ;;  %v7048_v24 = vunpack.i.h.bf16 %v15008_v50  ;;  %v15023_v38 = vld [vmem:[#allocation110_spill] sm:$0xff] }
 0x1b0   : > { %v1717_v21 = vsel %vm1702_vm7, %v1684_v62, %v7362_v34  ;;  %v1718_v53 = vsel %vm1702_vm7, %v1685_v13, %v7363_v59  ;;  %v7128_v37 = vunpack.i.h.bf16 %v15009_v17  ;;  %v7127_v52 = vunpack.i.l.bf16 %v15009_v17  ;;  %v15024_v62 = vld [vmem:[#allocation33_spill] sm:$0xff]  ;;  %v15025_v13 = vld [vmem:[#allocation34_spill] sm:$0xff] }
 0x1b1   : > { %v1750_v29 = vsel %vm1735_vm8, %v1717_v21, %v7442_v63  ;;  %v1751_v49 = vsel %vm1735_vm8, %v1718_v53, %v7443_v35  ;;  %v1554_v40 = vsel %vm1537_vm2, %v15010_v48, %v6968_v26  ;;  %v1555_v8 = vsel %vm1537_vm2, %v15011_v19, %v6972_v28  ;;  %v15022_v63 = vld [vmem:[#allocation101_spill] sm:$0xff]  ;;  %v7451_v28 = vpop.permute.xlu1 %7450  ;;  %v15026_v53 = vld [vmem:[#allocation119_spill] sm:$0xff] }
 0x1b2   : > { %v7208_v39 = vunpack.i.h.bf16 %v15012_v42  ;;  %v7207_v3 = vunpack.i.l.bf16 %v15012_v42  ;;  %v1587_v5 = vsel %vm1570_vm3, %v1554_v40, %v7047_v51  ;;  %v7288_v47 = vunpack.i.h.bf16 %v15013_v6 }
 0x1b3   : > { %v7287_v22 = vunpack.i.l.bf16 %v15013_v6  ;;  %v1785_v11 = vpack.c.bf16 %v15015_v33, %v15014_v4  ;;  %v1588_v46 = vsel %vm1570_vm3, %v1555_v8, %v7048_v24  ;;  %v7368_v9 = vunpack.i.h.bf16 %v15016_v20  ;;  %v15027_v8 = vld [vmem:[#allocation85_spill] sm:$0xff] }
 0x1b4   : > { %v7367_v55 = vunpack.i.l.bf16 %v15016_v20  ;;  %v1782_v1 = vpack.c.bf16 %v1751_v49, %v1750_v29  ;;  %v1621_v12 = vsel %vm1603_vm4, %v1588_v46, %v7128_v37  ;;  %v1620_v43 = vsel %vm1603_vm4, %v1587_v5, %v7127_v52 }
 0x1b5   : > { %v7448_v10 = vunpack.i.h.bf16 %v7446_v61  ;;  %v7447_v31 = vunpack.i.l.bf16 %v7446_v61  ;;  %v6977_v60 = vunpack.i.l.bf16 %v15017_v16  ;;  %v6973_v14 = vunpack.i.h.bf16 %v15007_v23  ;;  %v15028_v61 = vld [vmem:[#allocation46_spill] sm:$0xff] }
 0x1b6   : > { %2001 = vmatmul.mubr.bf16.gmra.mrb[24].mxu0 %v1780_v0  ;;  %v1653_v44 = vsel %vm1636_vm5, %v1620_v43, %v7207_v3  ;;  %v1654_v36 = vsel %vm1636_vm5, %v1621_v12, %v7208_v39  ;;  %v7053_v54 = vunpack.i.h.bf16 %v15018_v7  ;;  %v7052_v2 = vunpack.i.l.bf16 %v15018_v7  ;;  %v15020_v0 = vld [vmem:[#allocation69_spill] sm:$0xff]  ;;  %v15031_v43 = vld [vmem:[#allocation68_spill] sm:$0xff] }
 0x1b7   : > { %6667 = vmatprep.mubr.msk.bf16.mxu0 %vm1537_vm2, %v1783_v18  ;;  %v1686_v32 = vsel %vm1669_vm6, %v1653_v44, %v7287_v22  ;;  %v1687_v25 = vsel %vm1669_vm6, %v1654_v36, %v7288_v47  ;;  %v15019_v18 = vld [vmem:[#allocation92_spill] sm:$0xff]  ;;  %v1557_v30 = vsel %vm1537_vm2, %v15020_v0, %v6977_v60  ;;  %v1556_v35 = vsel %vm1537_vm2, %v15021_v57, %v6973_v14  ;;  %v7456_v14 = vpop.permute.xlu0 %7455  ;;  %v15033_v36 = vld [vmem:[#allocation113_spill] sm:$0xff] }
 0x1b8   : > { %v1719_v45 = vsel %vm1702_vm7, %v1686_v32, %v7367_v55  ;;  %v1720_v15 = vsel %vm1702_vm7, %v1687_v25, %v7368_v9  ;;  %v7133_v41 = vunpack.i.h.bf16 %v15019_v18  ;;  %v7132_v58 = vunpack.i.l.bf16 %v15019_v18  ;;  %v15034_v32 = vld [vmem:[#allocation38_spill] sm:$0xff]  ;;  %v15035_v25 = vld [vmem:[#allocation39_spill] sm:$0xff]  ;;  %v15037_v57 = vld [vmem:[#allocation84_spill] sm:$0xff] }
 0x1b9   : > { %v1752_v59 = vsel %vm1735_vm8, %v1719_v45, %v7447_v31  ;;  %v1753_v34 = vsel %vm1735_vm8, %v1720_v15, %v7448_v10  ;;  %v7213_v26 = vunpack.i.h.bf16 %v15022_v63  ;;  %v7212_v23 = vunpack.i.l.bf16 %v15022_v63  ;;  %v15032_v31 = vld [vmem:[#allocation104_spill] sm:$0xff]  ;;  %v15036_v15 = vld [vmem:[#allocation122_spill] sm:$0xff] }
 0x1ba   : > { %v1590_v56 = vsel %vm1570_vm3, %v1557_v30, %v7053_v54  ;;  %v7293_v50 = vunpack.i.h.bf16 %v15023_v38  ;;  %v7292_v51 = vunpack.i.l.bf16 %v15023_v38  ;;  %v1787_v24 = vpack.c.bf16 %v15025_v13, %v15024_v62 }
 0x1bb   : > { %v1589_v21 = vsel %vm1570_vm3, %v1556_v35, %v7052_v2  ;;  %v7373_v17 = vunpack.i.h.bf16 %v15026_v53  ;;  %v7372_v37 = vunpack.i.l.bf16 %v15026_v53  ;;  %v1784_v52 = vpack.c.bf16 %v1753_v34, %v1752_v59 }
 0x1bc   : > { %v1622_v29 = vsel %vm1603_vm4, %v1589_v21, %v7132_v58  ;;  %v1623_v49 = vsel %vm1603_vm4, %v1590_v56, %v7133_v41  ;;  %v7453_v48 = vunpack.i.h.bf16 %v7451_v28  ;;  %v7452_v40 = vunpack.i.l.bf16 %v7451_v28  ;;  %v15038_v28 = vld [vmem:[#allocation41_spill] sm:$0xff] }
 0x1bd   : > { %v6978_v19 = vunpack.i.h.bf16 %v15017_v16  ;;  %v6982_v42 = vunpack.i.l.bf16 %v15027_v8  ;;  %v1655_v39 = vsel %vm1636_vm5, %v1622_v29, %v7212_v23  ;;  %v1656_v3 = vsel %vm1636_vm5, %v1623_v49, %v7213_v26  ;;  %v15041_v49 = vld [vmem:[#allocation75_spill] sm:$0xff] }
 0x1be   : > { %2009 = vmatmul.mubr.bf16.gmra.mrb[28].mxu0 %v1782_v1  ;;  %v7057_v5 = vunpack.i.l.bf16 %v15028_v61  ;;  %v1688_v6 = vsel %vm1669_vm6, %v1655_v39, %v7292_v51  ;;  %v1689_v47 = vsel %vm1669_vm6, %v1656_v3, %v7293_v50  ;;  %v7058_v22 = vunpack.i.h.bf16 %v15028_v61  ;;  %v15030_v1 = vld [vmem:[#allocation67_spill] sm:$0xff]  ;;  %v15043_v3 = vld [vmem:[#allocation112_spill] sm:$0xff] }
 0x1bf   : > { %6668 = vmatprep.mubr.msk.bf16.mxu0 %vm1537_vm2, %v1785_v11  ;;  %v1721_v4 = vsel %vm1702_vm7, %v1688_v6, %v7372_v37  ;;  %v1722_v33 = vsel %vm1702_vm7, %v1689_v47, %v7373_v17  ;;  %v15029_v11 = vld [vmem:[#allocation95_spill] sm:$0xff]  ;;  %v1558_v12 = vsel %vm1537_vm2, %v15030_v1, %v6978_v19  ;;  %v1559_v10 = vsel %vm1537_vm2, %v15031_v43, %v6982_v42  ;;  %v7461_v42 = vpop.permute.xlu1 %7460  ;;  %v15044_v6 = vld [vmem:[#allocation36_spill] sm:$0xff]  ;;  %v15045_v47 = vld [vmem:[#allocation37_spill] sm:$0xff] }
 0x1c0   : > { %v7138_v46 = vunpack.i.h.bf16 %v15029_v11  ;;  %v7137_v20 = vunpack.i.l.bf16 %v15029_v11  ;;  %v1754_v9 = vsel %vm1735_vm8, %v1721_v4, %v7452_v40  ;;  %v1755_v55 = vsel %vm1735_vm8, %v1722_v33, %v7453_v48  ;;  %v15042_v40 = vld [vmem:[#allocation103_spill] sm:$0xff]  ;;  %v15046_v33 = vld [vmem:[#allocation121_spill] sm:$0xff] }
 0x1c1   : > { %v7218_v16 = vunpack.i.h.bf16 %v15032_v31  ;;  %v7217_v60 = vunpack.i.l.bf16 %v15032_v31  ;;  %v1591_v44 = vsel %vm1570_vm3, %v1558_v12, %v7057_v5  ;;  %v7298_v7 = vunpack.i.h.bf16 %v15033_v36 }
 0x1c2   : > { %v7297_v54 = vunpack.i.l.bf16 %v15033_v36  ;;  %v1789_v2 = vpack.c.bf16 %v15035_v25, %v15034_v32  ;;  %v1592_v45 = vsel %vm1570_vm3, %v1559_v10, %v7058_v22  ;;  %v7378_v18 = vunpack.i.h.bf16 %v15036_v15  ;;  %v15047_v10 = vld [vmem:[#allocation87_spill] sm:$0xff] }
 0x1c3   : > { %v7377_v41 = vunpack.i.l.bf16 %v15036_v15  ;;  %v1786_v58 = vpack.c.bf16 %v1755_v55, %v1754_v9  ;;  %v1625_v59 = vsel %vm1603_vm4, %v1592_v45, %v7138_v46  ;;  %v1624_v34 = vsel %vm1603_vm4, %v1591_v44, %v7137_v20 }
 0x1c4   : > { %v7458_v0 = vunpack.i.h.bf16 %v7456_v14  ;;  %v7457_v30 = vunpack.i.l.bf16 %v7456_v14  ;;  %v6987_v35 = vunpack.i.l.bf16 %v15037_v57  ;;  %v6983_v63 = vunpack.i.h.bf16 %v15027_v8  ;;  %v15048_v14 = vld [vmem:[#allocation90_spill] sm:$0xff] }
 0x1c5   : > { %v1657_v26 = vsel %vm1636_vm5, %v1624_v34, %v7217_v60  ;;  %v1658_v23 = vsel %vm1636_vm5, %v1625_v59, %v7218_v16  ;;  %v7063_v56 = vunpack.i.h.bf16 %v15038_v28  ;;  %v7062_v51 = vunpack.i.l.bf16 %v15038_v28  ;;  %v15051_v34 = vld [vmem:[#allocation72_spill] sm:$0xff] }
 0x1c6   : > { %2017 = vmatmul.mubr.bf16.gmra.mrb[32].mxu0 %v1784_v52  ;;  %v1690_v38 = vsel %vm1669_vm6, %v1657_v26, %v7297_v54  ;;  %v1691_v50 = vsel %vm1669_vm6, %v1658_v23, %v7298_v7  ;;  %v15040_v52 = vld [vmem:[#allocation74_spill] sm:$0xff]  ;;  %v1560_v48 = vsel %vm1537_vm2, %v15041_v49, %v6983_v63  ;;  %v7223_v19 = vunpack.i.h.bf16 %v15042_v40  ;;  %v7466_v63 = vpop.permute.xlu0 %7465  ;;  %v15053_v23 = vld [vmem:[#allocation115_spill] sm:$0xff] }
 0x1c7   : > { %6669 = vmatprep.mubr.msk.bf16.mxu0 %vm1537_vm2, %v1787_v24  ;;  %v1723_v62 = vsel %vm1702_vm7, %v1690_v38, %v7377_v41  ;;  %v1724_v13 = vsel %vm1702_vm7, %v1691_v50, %v7378_v18  ;;  %v15039_v24 = vld [vmem:[#allocation94_spill] sm:$0xff]  ;;  %v1561_v29 = vsel %vm1537_vm2, %v15040_v52, %v6987_v35  ;;  %v7222_v8 = vunpack.i.l.bf16 %v15042_v40  ;;  %v15054_v38 = vld [vmem:[#allocation40_spill] sm:$0xff] }
 0x1c8   : > { %v7143_v21 = vunpack.i.h.bf16 %v15039_v24  ;;  %v7142_v53 = vunpack.i.l.bf16 %v15039_v24  ;;  %v1756_v17 = vsel %vm1735_vm8, %v1723_v62, %v7457_v30  ;;  %v1757_v37 = vsel %vm1735_vm8, %v1724_v13, %v7458_v0  ;;  %v15052_v30 = vld [vmem:[#allocation106_spill] sm:$0xff]  ;;  %v15056_v13 = vld [vmem:[#allocation124_spill] sm:$0xff] }
 0x1c9   : > { %v1594_v39 = vsel %vm1570_vm3, %v1561_v29, %v7063_v56  ;;  %v7303_v61 = vunpack.i.h.bf16 %v15043_v3  ;;  %v7302_v5 = vunpack.i.l.bf16 %v15043_v3  ;;  %v1791_v22 = vpack.c.bf16 %v15045_v47, %v15044_v6  ;;  %v15055_v50 = vld [vmem:[#allocation42_spill] sm:$0xff] }
 0x1ca   : > { %v1593_v4 = vsel %vm1570_vm3, %v1560_v48, %v7062_v51  ;;  %v7383_v11 = vunpack.i.h.bf16 %v15046_v33  ;;  %v7382_v46 = vunpack.i.l.bf16 %v15046_v33  ;;  %v1788_v20 = vpack.c.bf16 %v1757_v37, %v1756_v17  ;;  %v15057_v49 = vld [vmem:[#allocation86_spill] sm:$0xff] }
 0x1cb   : > { %v1626_v9 = vsel %vm1603_vm4, %v1593_v4, %v7142_v53  ;;  %v1627_v55 = vsel %vm1603_vm4, %v1594_v39, %v7143_v21  ;;  %v7463_v1 = vunpack.i.h.bf16 %v7461_v42  ;;  %v7462_v12 = vunpack.i.l.bf16 %v7461_v42  ;;  %v15058_v42 = vld [vmem:[#allocation59_spill] sm:$0xff] }
 0x1cc   : > { %v6988_v43 = vunpack.i.h.bf16 %v15037_v57  ;;  %v6992_v31 = vunpack.i.l.bf16 %v15047_v10  ;;  %v1659_v16 = vsel %vm1636_vm5, %v1626_v9, %v7222_v8  ;;  %v1660_v60 = vsel %vm1636_vm5, %v1627_v55, %v7223_v19  ;;  %v15061_v55 = vld [vmem:[#allocation79_spill] sm:$0xff] }
 0x1cd   : > { %v7067_v44 = vunpack.i.l.bf16 %v15048_v14  ;;  %v1692_v36 = vsel %vm1669_vm6, %v1659_v16, %v7302_v5  ;;  %v1693_v7 = vsel %vm1669_vm6, %v1660_v60, %v7303_v61  ;;  %v7068_v54 = vunpack.i.h.bf16 %v15048_v14  ;;  %v15063_v60 = vld [vmem:[#allocation114_spill] sm:$0xff] }
 0x1ce   : > { %2025 = vmatmul.mubr.bf16.gmra.mrb[36].mxu0 %v1786_v58  ;;  %v1725_v32 = vsel %vm1702_vm7, %v1692_v36, %v7382_v46  ;;  %v1726_v25 = vsel %vm1702_vm7, %v1693_v7, %v7383_v11  ;;  %v15050_v58 = vld [vmem:[#allocation73_spill] sm:$0xff]  ;;  %v1563_v0 = vsel %vm1537_vm2, %v15051_v34, %v6992_v31  ;;  %v7228_v57 = vunpack.i.h.bf16 %v15052_v30  ;;  %v7471_v31 = vpop.permute.xlu1 %7470  ;;  %v15064_v36 = vld [vmem:[#allocation43_spill] sm:$0xff]  ;;  %v15065_v7 = vld [vmem:[#allocation44_spill] sm:$0xff] }
 0x1cf   : > { %6670 = vmatprep.mubr.msk.bf16.mxu0 %vm1537_vm2, %v1789_v2  ;;  %v15049_v2 = vld [vmem:[#allocation97_spill] sm:$0xff]  ;;  %v1758_v18 = vsel %vm1735_vm8, %v1725_v32, %v7462_v12  ;;  %v1759_v41 = vsel %vm1735_vm8, %v1726_v25, %v7463_v1  ;;  %v1562_v59 = vsel %vm1537_vm2, %v15050_v58, %v6988_v43  ;;  %v7227_v35 = vunpack.i.l.bf16 %v15052_v30  ;;  %v15066_v25 = vld [vmem:[#allocation123_spill] sm:$0xff] }
 0x1d0   : > { %v7148_v45 = vunpack.i.h.bf16 %v15049_v2  ;;  %v7147_v15 = vunpack.i.l.bf16 %v15049_v2  ;;  %v1595_v26 = vsel %vm1570_vm3, %v1562_v59, %v7067_v44  ;;  %v7308_v28 = vunpack.i.h.bf16 %v15053_v23  ;;  %v15062_v12 = vld [vmem:[#allocation105_spill] sm:$0xff] }
 0x1d1   : > { %v7307_v56 = vunpack.i.l.bf16 %v15053_v23  ;;  %v1793_v51 = vpack.c.bf16 %v15055_v50, %v15054_v38  ;;  %v1596_v62 = vsel %vm1570_vm3, %v1563_v0, %v7068_v54  ;;  %v7388_v24 = vunpack.i.h.bf16 %v15056_v13 }
 0x1d2   : > { %v7387_v21 = vunpack.i.l.bf16 %v15056_v13  ;;  %v1790_v53 = vpack.c.bf16 %v1759_v41, %v1758_v18  ;;  %v1629_v17 = vsel %vm1603_vm4, %v1596_v62, %v7148_v45  ;;  %v1628_v37 = vsel %vm1603_vm4, %v1595_v26, %v7147_v15 }
 0x1d3   : > { %v7468_v52 = vunpack.i.h.bf16 %v7466_v63  ;;  %v7467_v29 = vunpack.i.l.bf16 %v7466_v63  ;;  %v6997_v48 = vunpack.i.l.bf16 %v15057_v49  ;;  %v6993_v40 = vunpack.i.h.bf16 %v15047_v10  ;;  %v15068_v63 = vld [vmem:[#allocation91_spill] sm:$0xff] }
 0x1d4   : > { %v1661_v19 = vsel %vm1636_vm5, %v1628_v37, %v7227_v35  ;;  %v1662_v8 = vsel %vm1636_vm5, %v1629_v17, %v7228_v57  ;;  %v7073_v39 = vunpack.i.h.bf16 %v15058_v42  ;;  %v7072_v5 = vunpack.i.l.bf16 %v15058_v42  ;;  %v15067_v57 = vld [vmem:[#allocation89_spill] sm:$0xff]  ;;  %v15071_v37 = vld [vmem:[#allocation108_spill] sm:$0xff] }
 0x1d5   : > { %v1694_v3 = vsel %vm1669_vm6, %v1661_v19, %v7307_v56  ;;  %v1695_v61 = vsel %vm1669_vm6, %v1662_v8, %v7308_v28  ;;  %v1564_v1 = vsel %vm1537_vm2, %v15061_v55, %v6993_v40  ;;  %v7233_v43 = vunpack.i.h.bf16 %v15062_v12  ;;  %v15073_v8 = vld [vmem:[#allocation117_spill] sm:$0xff] }
 0x1d6   : > { %2033 = vmatmul.mubr.bf16.gmra.mrb[40].mxu0 %v1788_v20  ;;  %v1727_v6 = vsel %vm1702_vm7, %v1694_v3, %v7387_v21  ;;  %v1728_v47 = vsel %vm1702_vm7, %v1695_v61, %v7388_v24  ;;  %v15060_v20 = vld [vmem:[#allocation78_spill] sm:$0xff]  ;;  %v7232_v10 = vunpack.i.l.bf16 %v15062_v12  ;;  %v7313_v14 = vunpack.i.h.bf16 %v15063_v60  ;;  %v15074_v61 = vld [vmem:[#allocation49_spill] sm:$0xff]  ;;  %v15076_v12 = vld [vmem:[#allocation64_spill] sm:$0xff] }
 0x1d7   : > { %6671 = vmatprep.mubr.msk.bf16.mxu0 %vm1537_vm2, %v1791_v22  ;;  %v15059_v22 = vld [vmem:[#allocation96_spill] sm:$0xff]  ;;  %v1760_v11 = vsel %vm1735_vm8, %v1727_v6, %v7467_v29  ;;  %v1761_v46 = vsel %vm1735_vm8, %v1728_v47, %v7468_v52  ;;  %v1565_v9 = vsel %vm1537_vm2, %v15060_v20, %v6997_v48  ;;  %v7312_v44 = vunpack.i.l.bf16 %v15063_v60 }
 0x1d8   : > { %v7153_v4 = vunpack.i.h.bf16 %v15059_v22  ;;  %v7152_v33 = vunpack.i.l.bf16 %v15059_v22  ;;  %v1598_v16 = vsel %vm1570_vm3, %v1565_v9, %v7073_v39  ;;  %v1795_v54 = vpack.c.bf16 %v15065_v7, %v15064_v36  ;;  %v15072_v48 = vld [vmem:[#allocation76_spill] sm:$0xff] }
 0x1d9   : > { %v1597_v32 = vsel %vm1570_vm3, %v1564_v1, %v7072_v5  ;;  %v7393_v2 = vunpack.i.h.bf16 %v15066_v25  ;;  %v7392_v45 = vunpack.i.l.bf16 %v15066_v25  ;;  %v1792_v15 = vpack.c.bf16 %v1761_v46, %v1760_v11  ;;  %v15075_v1 = vld [vmem:[#allocation65_spill] sm:$0xff]  ;;  %v10569_v36 = vld [vmem:[%s14563_s4] ss:$0 sm:$0xff] }
 0x1da   : > { %v1630_v18 = vsel %vm1603_vm4, %v1597_v32, %v7152_v33  ;;  %v1631_v41 = vsel %vm1603_vm4, %v1598_v16, %v7153_v4  ;;  %v7473_v58 = vunpack.i.h.bf16 %v7471_v31  ;;  %v7472_v59 = vunpack.i.l.bf16 %v7471_v31 }
 0x1db   : > { %v6998_v34 = vunpack.i.h.bf16 %v15057_v49  ;;  %v1663_v0 = vsel %vm1636_vm5, %v1630_v18, %v7232_v10  ;;  %v1664_v30 = vsel %vm1636_vm5, %v1631_v41, %v7233_v43  ;;  %v7002_v35 = vunpack.i.l.bf16 %v15067_v57  ;;  %v7476_v49 = vpop.permute.xlu0 %7475 }
 0x1dc   : > { %v7077_v26 = vunpack.i.l.bf16 %v15068_v63  ;;  %v1696_v23 = vsel %vm1669_vm6, %v1663_v0, %v7312_v44  ;;  %v1697_v28 = vsel %vm1669_vm6, %v1664_v30, %v7313_v14  ;;  %v7078_v56 = vunpack.i.h.bf16 %v15068_v63  ;;  %v8658_v44 = vld [vmem:[%s14565_s6] sm:$0xff]   ;;  %v8660_v0 = vld [vmem:[%s14565_s6 + $0x10] sm:$0xff]  }
 0x1dd   : > { %v1729_v38 = vsel %vm1702_vm7, %v1696_v23, %v7392_v45  ;;  %v1730_v50 = vsel %vm1702_vm7, %v1697_v28, %v7393_v2  ;;  %v7238_v52 = vunpack.i.h.bf16 %v15071_v37  ;;  %v7237_v29 = vunpack.i.l.bf16 %v15071_v37  ;;  %3462 = vmatpush1.bf16.msra.mxu1 %v8658_v44  ;;  %v8659_v45 = vld [vmem:[%s14565_s6 + $0x8] sm:$0xff]   ;;  %v15081_v63 = vld [vmem:[#allocation12_spill] sm:$0xff] }
 0x1de   : > { %2041 = vmatmul.mubr.bf16.gmra.mrb[44].mxu0 %v1790_v53  ;;  %v1762_v24 = vsel %vm1735_vm8, %v1729_v38, %v7472_v59  ;;  %v1763_v21 = vsel %vm1735_vm8, %v1730_v50, %v7473_v58  ;;  %v15070_v53 = vld [vmem:[#allocation77_spill] sm:$0xff]  ;;  %v1567_v40 = vsel %vm1537_vm2, %v15072_v48, %v7002_v35  ;;  %v7318_v42 = vunpack.i.h.bf16 %v15073_v8 }
 0x1df   : > { %6672 = vmatprep.mubr.msk.bf16.mxu0 %vm1537_vm2, %v1793_v51  ;;  %v15069_v51 = vld [vmem:[#allocation99_spill] sm:$0xff]  ;;  %v1566_v17 = vsel %vm1537_vm2, %v15070_v53, %v6998_v34  ;;  %v7317_v39 = vunpack.i.l.bf16 %v15073_v8  ;;  %v1600_v3 = vsel %vm1570_vm3, %v1567_v40, %v7078_v56  ;;  %v7398_v5 = vunpack.i.h.bf16 %v15074_v61 }
 0x1e0   : > { %v7158_v62 = vunpack.i.h.bf16 %v15069_v51  ;;  %v7157_v13 = vunpack.i.l.bf16 %v15069_v51  ;;  %v1599_v19 = vsel %vm1570_vm3, %v1566_v17, %v7077_v26  ;;  %v7397_v6 = vunpack.i.l.bf16 %v15074_v61  ;;  %v15082_v26 = vld [vmem:[#allocation13_spill] sm:$0xff] }
 0x1e1   : > { %v1794_v47 = vpack.c.bf16 %v1763_v21, %v1762_v24  ;;  %v7478_v33 = vunpack.i.h.bf16 %v7476_v49  ;;  %v7477_v11 = vunpack.i.l.bf16 %v7476_v49  ;;  %v15077_v43 = vpack.c.bf16 %v15075_v1, %v15076_v12 }
 0x1e2   : > { %v1633_v22 = vsel %vm1603_vm4, %v1600_v3, %v7158_v62  ;;  %v1632_v4 = vsel %vm1603_vm4, %v1599_v19, %v7157_v13  ;;  %v15079_v32 = vmov 0   ;;  %v10596_v23 = vpack.c.bf16 %v15082_v26, %v15081_v63  ;;  %v8661_v62 = vld [vmem:[%s14565_s6 + $0x18] sm:$0xff]  }
 0x1e3   : > { %v1665_v46 = vsel %vm1636_vm5, %v1632_v4, %v7237_v29  ;;  %v1666_v20 = vsel %vm1636_vm5, %v1633_v22, %v7238_v52  ;;  %3463 = vmatprep.subr.bf16.mxu1 %v15079_v32  ;;  %v15086_v61 = vmov 0.0  }
 0x1e4   : > { %v1698_v9 = vsel %vm1669_vm6, %v1665_v46, %v7317_v39  ;;  %v1699_v55 = vsel %vm1669_vm6, %v1666_v20, %v7318_v42  ;;  %3464 = vmatpush1.bf16.msra.mxu1 %v8659_v45  ;;  %15083 = vst [vmem:[#allocation48_spill] sm:$0xff] %v10596_v23  ;;  %v8662_v39 = vld [vmem:[%s14565_s6 + $0x20] sm:$0xff]   ;;  %v8663_v46 = vld [vmem:[%s14565_s6 + $0x28] sm:$0xff]  }
 0x1e5   : > { %v1731_v10 = vsel %vm1702_vm7, %v1698_v9, %v7397_v6  ;;  %v1732_v31 = vsel %vm1702_vm7, %v1699_v55, %v7398_v5  ;;  %3465 = vmatprep.subr.bf16.mxu1 %v15079_v32 }
 0x1e6   : > { %2049 = vmatmul.mubr.bf16.gmra.mrb[48].mxu0 %v1792_v15  ;;  %v1764_v16 = vsel %vm1735_vm8, %v1731_v10, %v7477_v11  ;;  %v1765_v60 = vsel %vm1735_vm8, %v1732_v31, %v7478_v33 }
 0x1e7   : > { %6673 = vmatprep.mubr.msk.bf16.mxu0 %vm1537_vm2, %v1795_v54  ;;  %v1796_v14 = vpack.c.bf16 %v1765_v60, %v1764_v16  ;;  %v10576_v54 = vld [vmem:[%s14564_s5] ss:$0 sm:$0xff] }
 0x1e8   : > { %3466 = vmatpush1.bf16.msra.mxu1 %v8660_v0 }
 0x1e9   : > { %3467 = vmatprep.subr.bf16.mxu1 %v15079_v32 }
 0x1ec   : > { %3468 = vmatpush1.bf16.msra.mxu1 %v8661_v62 }
 0x1ed   : > { %3469 = vmatprep.subr.bf16.mxu1 %v15079_v32 }
 0x1ee   : > { %2057 = vmatmul.mubr.bf16.gmra.mrb[52].mxu0 %v1794_v47 }
 0x1ef   : > { %6674 = vmatprep.mubr.msk.bf16.mxu0 %vm1537_vm2, %v15077_v43 }
 0x1f0   : > { %3470 = vmatpush1.bf16.msra.mxu1 %v8662_v39 }
 0x1f1   : > { %3471 = vmatprep.subr.bf16.mxu1 %v15079_v32 }
 0x1f4   : > { %3472 = vmatpush1.bf16.msra.mxu1 %v8663_v46 }
 0x1f5   : > { %3473 = vmatprep.subr.bf16.mxu1 %v15079_v32 }
 0x1f6   : > { %2065 = vmatmul.mubr.bf16.gmra.mrb[56].mxu0 %v1796_v14 }
 0x1f7   : > { %6675 = vmatprep.mubr.msk.bf16.mxu0 %vm1537_vm2, %v10596_v23 }
 0x259   : > { %v10571_v7 = vpop.f32.mrb[0].mxu0 }
 0x25a   : > { %15078 = vst [vmem:[#allocation17_spill] sm:$0xff] %v10571_v7  ;;  %v2088_v25 = vmul.f32 %v10569_v36, %v10571_v7  ;;  %v1956_v2 = vpop.f32.mrb[1].mxu0 }
 0x25b   : > { %v10584_v15 = vpop.f32.mrb[2].mxu0  ;;  %v8664_v2 = vld [vmem:[%s14565_s6 + $0x30] sm:$0xff]  }
 0x25c   : > { %15080 = vst [vmem:[#allocation18_spill] sm:$0xff] %v10584_v15  ;;  %v2127_v18 = vadd.f32 %v10576_v54, %v2088_v25  ;;  %v2089_v41 = vmul.f32 %v10569_v36, %v10584_v15  ;;  %v1959_v58 = vpop.f32.mrb[3].mxu0  ;;  %3474 = vmatpush1.bf16.msra.mxu1 %v8664_v2 }
 0x25d   : > { %3475 = vmatprep.subr.bf16.mxu1 %v15079_v32 }
 0x25e   : > { %v2159_v59 = vmax.f32 %v2127_v18, 0.0  ;;  %v2128_v34 = vadd.f32 %v10576_v54, %v2089_v41 }
 0x260   : > { %v2160_v30 = vmax.f32 %v2128_v34, 0.0  ;;  %v2221_v35 = vrot.slane %v2159_v59, 7  ;;  %v2311_v13 = vrot.slane %v2159_v59, 1 }
 0x261   : > { %v10598_v28 = vpop.f32.mrb[4].mxu0 }
 0x262   : > { %15084 = vst [vmem:[#allocation47_spill] sm:$0xff] %v10598_v28  ;;  %v2222_v56 = vrot.slane %v2160_v30, 7  ;;  %v2090_v38 = vmul.f32 %v10569_v36, %v10598_v28  ;;  %v1964_v50 = vpop.f32.mrb[5].mxu0  ;;  %v7484_v51 = vpack.i.bf16 %v2160_v30, %v2159_v59  ;;  %v2312_v21 = vrot.slane %v2160_v30, 1 }
 0x263   : > { %v10608_v24 = vpop.f32.mrb[6].mxu0  ;;  %v10618_v29 = vsel %vm633_vm1, 0.0, %v2221_v35 }
 0x264   : > { %15085 = vst [vmem:[#allocation19_spill] sm:$0xff] %v10608_v24  ;;  %v2129_v53 = vadd.f32 %v10576_v54, %v2090_v38  ;;  %v2091_v17 = vmul.f32 %v10569_v36, %v10608_v24  ;;  %7485 = vrot.lane.b32.xlu0 %v7484_v51, %s14826_s19  ;;  %v1967_v37 = vpop.f32.mrb[7].mxu0  ;;  %v10615_v52 = vsel %vm633_vm1, %v2221_v35, %v2222_v56  ;;  %v2371_v40 = vsel %vm729_vm0, %v2312_v21, 0.0  ;;  %v8665_v35 = vld [vmem:[%s14565_s6 + $0x38] sm:$0xff]  }
 0x265   : > { %v7494_v49 = vpack.i.bf16 %v10615_v52, %v10618_v29  ;;  %v2313_v48 = vsel %vm729_vm0, %v2311_v13, %v2312_v21  ;;  %3476 = vmatpush1.bf16.msra.mxu1 %v8665_v35 }
 0x266   : > { %v2161_v19 = vmax.f32 %v2129_v53, 0.0  ;;  %v2130_v8 = vadd.f32 %v10576_v54, %v2091_v17  ;;  %v7489_v42 = vpack.i.bf16 %v2371_v40, %v2313_v48  ;;  %3477 = vmatprep.subr.bf16.mxu1 %v15079_v32  ;;  %v8666_v40 = vld [vmem:[%s14565_s6 + $0x40] sm:$0xff]  }
 0x268   : > { %v10629_v3 = vmax.f32 %v2130_v8, 0.0  ;;  %7495 = vrot.lane.b32.xlu0 %v7494_v49, %s14791_s15  ;;  %v7479_v5 = vpack.i.bf16 %v2161_v19, %v15086_v61  ;;  %v2314_v47 = vrot.slane %v2161_v19, 1  ;;  %v2224_v9 = vrot.slane %v2161_v19, 7 }
 0x269   : > { %v10633_v6 = vpop.f32.mrb[8].mxu0  ;;  %3478 = vmatpush1.bf16.msra.mxu1 %v8666_v40 }
 0x26a   : > { %15087 = vst [vmem:[#allocation20_spill] sm:$0xff] %v10633_v6  ;;  %v2092_v22 = vmul.f32 %v10569_v36, %v10633_v6  ;;  %7480 = vrot.lane.b32.xlu1 %v7479_v5, %s8822_s27  ;;  %v1972_v4 = vpop.f32.mrb[9].mxu0  ;;  %v2315_v33 = vrot.slane %v10629_v3, 1  ;;  %v7509_v11 = vpack.i.bf16 %v10629_v3, %v2161_v19  ;;  %v2225_v55 = vrot.slane %v10629_v3, 7 }
 0x26b   : > { %v10644_v20 = vpop.f32.mrb[10].mxu0  ;;  %v10695_v62 = vsel %vm633_vm1, 0.0, %v2224_v9 }
 0x26c   : > { %15088 = vst [vmem:[#allocation54_spill] sm:$0xff] %v10644_v20  ;;  %v2131_v1 = vadd.f32 %v10576_v54, %v2092_v22  ;;  %v2093_v12 = vmul.f32 %v10569_v36, %v10644_v20  ;;  %7500 = vrot.lane.b32.xlu0 %v7484_v51, %s14797_s24  ;;  %v1975_v43 = vpop.f32.mrb[11].mxu0  ;;  %v2316_v10 = vsel %vm729_vm0, %v2314_v47, %v2315_v33  ;;  %v2372_v31 = vsel %vm729_vm0, %v2315_v33, 0.0 }
 0x26d   : > { %v10653_v16 = vpack.i.bf16 %v2372_v31, %v2316_v10  ;;  %v3314_v60 = vpack.c.bf16 %v2372_v31, %v2316_v10  ;;  %v10656_v14 = vsel %vm633_vm1, %v2224_v9, %v2225_v55 }
 0x26e   : > { %v10659_v44 = vmax.f32 %v2131_v1, 0.0  ;;  %v2132_v25 = vadd.f32 %v10576_v54, %v2093_v12  ;;  %7490 = vrot.lane.b32.xlu1 %v7489_v42, %s15089_s25  ;;  %v7534_v21 = vpack.i.bf16 %v10656_v14, %v10695_v62 }
 0x26f   : > { %6687 = vmatprep.mubr.msk.bf16.mxu1 %vm1537_vm2, %v3314_v60 }
 0x270   : > { %v10667_v45 = vmax.f32 %v2132_v25, 0.0  ;;  %7505 = vrot.lane.b32.xlu0 %v7489_v42, %s15090_s17  ;;  %v7539_v18 = vpack.i.bf16 %v10659_v44, %v10629_v3  ;;  %v2227_v58 = vrot.slane %v10659_v44, 7  ;;  %v2317_v26 = vrot.slane %v10659_v44, 1 }
 0x271   : > { %v10672_v41 = vpop.f32.mrb[12].mxu0 }
 0x272   : > { %15091 = vst [vmem:[#allocation53_spill] sm:$0xff] %v10672_v41  ;;  %v2094_v59 = vmul.f32 %v10569_v36, %v10672_v41  ;;  %7510 = vrot.lane.b32.xlu1 %v7509_v11, %s14826_s19  ;;  %v1980_v34 = vpop.f32.mrb[13].mxu0  ;;  %v7544_v0 = vpack.i.bf16 %v10667_v45, %v10659_v44  ;;  %v2228_v30 = vrot.slane %v10667_v45, 7  ;;  %v2318_v56 = vrot.slane %v10667_v45, 1 }
 0x273   : > { %v10685_v63 = vpop.f32.mrb[14].mxu0 }
 0x274   : > { %15092 = vst [vmem:[#allocation21_spill] sm:$0xff] %v10685_v63  ;;  %v2133_v38 = vadd.f32 %v10576_v54, %v2094_v59  ;;  %v2095_v50 = vmul.f32 %v10569_v36, %v10685_v63  ;;  %7520 = vrot.lane.b32.xlu0 %v10653_v16, %s15089_s25  ;;  %v1983_v51 = vpop.f32.mrb[15].mxu0  ;;  %v10698_v13 = vsel %vm633_vm1, %v2227_v58, %v2228_v30  ;;  %v10706_v17 = vsel %vm729_vm0, %v2318_v56, 0.0 }
 0x275   : > { %v10703_v53 = vsel %vm729_vm0, %v2317_v26, %v2318_v56  ;;  %v10770_v59 = vsel %vm633_vm1, 0.0, %v2227_v58 }
 0x276   : > { %v10709_v37 = vmax.f32 %v2133_v38, 0.0  ;;  %v2134_v49 = vadd.f32 %v10576_v54, %v2095_v50  ;;  %7515 = vrot.lane.b32.xlu1 %v7509_v11, %s14797_s24  ;;  %v7554_v48 = vpack.i.bf16 %v10706_v17, %v10703_v53  ;;  %v7559_v35 = vpack.i.bf16 %v10698_v13, %v10770_v59 }
 0x278   : > { %v10720_v8 = vmax.f32 %v2134_v49, 0.0  ;;  %7535 = vrot.lane.b32.xlu0 %v7534_v21, %s15093_s16  ;;  %v7574_v32 = vpack.i.bf16 %v10709_v37, %v10667_v45  ;;  %v2320_v39 = vrot.slane %v10709_v37, 1  ;;  %v2230_v11 = vrot.slane %v10709_v37, 7 }
 0x279   : > { %v10725_v42 = vpop.f32.mrb[16].mxu0 }
 0x27a   : > { %15094 = vst [vmem:[#allocation22_spill] sm:$0xff] %v10725_v42  ;;  %v2096_v5 = vmul.f32 %v10569_v36, %v10725_v42  ;;  %7525 = vrot.lane.b32.xlu1 %v7534_v21, %s14791_s15  ;;  %v1988_v47 = vpop.f32.mrb[17].mxu0  ;;  %v10733_v22 = vpack.i.bf16 %v10720_v8, %v10709_v37  ;;  %v2321_v4 = vrot.slane %v10720_v8, 1  ;;  %v2231_v46 = vrot.slane %v10720_v8, 7 }
 0x27b   : > { %v10736_v33 = vpop.f32.mrb[18].mxu0 }
 0x27c   : > { %15095 = vst [vmem:[#allocation52_spill] sm:$0xff] %v10736_v33  ;;  %v2135_v9 = vadd.f32 %v10576_v54, %v2096_v5  ;;  %v2097_v55 = vmul.f32 %v10569_v36, %v10736_v33  ;;  %7545 = vrot.lane.b32.xlu0 %v7544_v0, %s14826_s19  ;;  %v1991_v1 = vpop.f32.mrb[19].mxu0  ;;  %v10745_v12 = vsel %vm729_vm0, %v2320_v39, %v2321_v4  ;;  %v10748_v43 = vsel %vm729_vm0, %v2321_v4, 0.0 }
 0x27d   : > { %v10752_v10 = vpack.i.bf16 %v10748_v43, %v10745_v12  ;;  %v10757_v31 = vsel %vm633_vm1, %v2230_v11, %v2231_v46 }
 0x27e   : > { %15096 = vst [vmem:[#allocation51_spill] sm:$0xff] %v10757_v31  ;;  %v10761_v25 = vmax.f32 %v2135_v9, 0.0  ;;  %v2136_v2 = vadd.f32 %v10576_v54, %v2097_v55  ;;  %7530 = vrot.lane.b32.xlu1 %v10653_v16, %s15090_s17 }
 0x280   : > { %v10766_v45 = vmax.f32 %v2136_v2, 0.0  ;;  %7550 = vrot.lane.b32.xlu0 %v7544_v0, %s14797_s24  ;;  %v14714_v26 = vrot.slane %v10761_v25, 7  ;;  %v2323_v50 = vrot.slane %v10761_v25, 1 }
 0x281   : > { %v10774_v30 = vpop.f32.mrb[20].mxu0 }
 0x282   : > { %15097 = vst [vmem:[#allocation23_spill] sm:$0xff] %v10774_v30  ;;  %v2098_v16 = vmul.f32 %v10569_v36, %v10774_v30  ;;  %7540 = vrot.lane.b32.xlu1 %v7539_v18, %s8822_s27  ;;  %v1996_v58 = vpop.f32.mrb[21].mxu0  ;;  %v10787_v0 = vpack.i.bf16 %v10766_v45, %v10761_v25  ;;  %v2234_v56 = vrot.slane %v10766_v45, 7  ;;  %v2324_v51 = vrot.slane %v10766_v45, 1 }
 0x283   : > { %v10790_v38 = vpop.f32.mrb[22].mxu0 }
 0x284   : > { %15098 = vst [vmem:[#allocation24_spill] sm:$0xff] %v10790_v38  ;;  %v2137_v21 = vadd.f32 %v10576_v54, %v2098_v16  ;;  %v2099_v49 = vmul.f32 %v10569_v36, %v10790_v38  ;;  %7560 = vrot.lane.b32.xlu0 %v7559_v35, %s14791_s15  ;;  %v1999_v3 = vpop.f32.mrb[23].mxu0  ;;  %v10801_v44 = vsel %vm633_vm1, %v14714_v26, %v2234_v56  ;;  %v10807_v40 = vsel %vm729_vm0, %v2324_v51, 0.0 }
 0x285   : > { %15099 = vst [vmem:[#allocation57_spill] sm:$0xff] %v10801_v44  ;;  %v10804_v18 = vsel %vm729_vm0, %v2323_v50, %v2324_v51 }
 0x286   : > { %v10809_v39 = vmax.f32 %v2137_v21, 0.0  ;;  %v2138_v5 = vadd.f32 %v10576_v54, %v2099_v49  ;;  %7555 = vrot.lane.b32.xlu1 %v7554_v48, %s15089_s25  ;;  %v10815_v47 = vpack.i.bf16 %v10807_v40, %v10804_v18 }
 0x288   : > { %v10819_v46 = vmax.f32 %v2138_v5, 0.0  ;;  %7565 = vrot.lane.b32.xlu0 %v7554_v48, %s15090_s17  ;;  %v2326_v1 = vrot.slane %v10809_v39, 1  ;;  %v14713_v50 = vrot.slane %v10809_v39, 7 }
 0x289   : > { %v10824_v55 = vpop.f32.mrb[24].mxu0 }
 0x28a   : > { %15100 = vst [vmem:[#allocation58_spill] sm:$0xff] %v10824_v55  ;;  %v2100_v2 = vmul.f32 %v10569_v36, %v10824_v55  ;;  %7575 = vrot.lane.b32.xlu1 %v7574_v32, %s8822_s27  ;;  %v2004_v16 = vpop.f32.mrb[25].mxu0  ;;  %v10832_v58 = vpack.i.bf16 %v10819_v46, %v10809_v39  ;;  %v2327_v56 = vrot.slane %v10819_v46, 1  ;;  %v2237_v51 = vrot.slane %v10819_v46, 7 }
 0x28b   : > { %v10835_v48 = vpop.f32.mrb[26].mxu0 }
 0x28c   : > { %15101 = vst [vmem:[#allocation25_spill] sm:$0xff] %v10835_v48  ;;  %v2139_v21 = vadd.f32 %v10576_v54, %v2100_v2  ;;  %v2101_v49 = vmul.f32 %v10569_v36, %v10835_v48  ;;  %7570 = vrot.lane.b32.xlu0 %v7559_v35, %s15093_s16  ;;  %v2007_v32 = vpop.f32.mrb[27].mxu0  ;;  %v10844_v3 = vsel %vm729_vm0, %v2326_v1, %v2327_v56  ;;  %v10847_v5 = vsel %vm729_vm0, %v2327_v56, 0.0 }
 0x28d   : > { %15102 = vst [vmem:[#allocation26_spill] sm:$0xff] %v10844_v3  ;;  %15103 = vst [vmem:[#allocation55_spill] sm:$0xff] %v10847_v5  ;;  %v10851_v16 = vpack.i.bf16 %v10847_v5, %v10844_v3  ;;  %v10856_v2 = vsel %vm633_vm1, %v14713_v50, %v2237_v51  ;;  %v10872_v51 = vsel %vm633_vm1, 0.0, %v2230_v11  ;;  %v15166_v3 = vld [vmem:[#allocation80_spill] sm:$0xff] }
 0x28e   : > { %15104 = vst [vmem:[#allocation56_spill] sm:$0xff] %v10856_v2  ;;  %v10860_v35 = vmax.f32 %v2139_v21, 0.0  ;;  %v2140_v1 = vadd.f32 %v10576_v54, %v2101_v49  ;;  %7580 = vrot.lane.b32.xlu1 %v10733_v22, %s14826_s19  ;;  %15105 = vst [vmem:[#allocation27_spill] sm:$0xff] %v10872_v51  ;;  %v7604_v49 = vpack.i.bf16 %v10757_v31, %v10872_v51  ;;  %v15165_v31 = vld [vmem:[#allocation88_spill] sm:$0xff] }
 0x290   : > { %v10865_v56 = vmax.f32 %v2140_v1, 0.0  ;;  %7590 = vrot.lane.b32.xlu0 %v10752_v10, %s15089_s25  ;;  %v14717_v4 = vrot.slane %v10860_v35, 7  ;;  %v2329_v32 = vrot.slane %v10860_v35, 1 }
 0x291   : > { %v10876_v21 = vpop.f32.mrb[28].mxu0 }
 0x292   : > { %15106 = vst [vmem:[#allocation28_spill] sm:$0xff] %v10876_v21  ;;  %v2102_v1 = vmul.f32 %v10569_v36, %v10876_v21  ;;  %7585 = vrot.lane.b32.xlu1 %v10733_v22, %s14797_s24  ;;  %v2012_v37 = vpop.f32.mrb[29].mxu0  ;;  %v10887_v11 = vpack.i.bf16 %v10865_v56, %v10860_v35  ;;  %v2240_v60 = vrot.slane %v10865_v56, 7  ;;  %v2330_v50 = vrot.slane %v10865_v56, 1 }
 0x293   : > { %v10890_v19 = vpop.f32.mrb[30].mxu0 }
 0x294   : > { %15107 = vst [vmem:[#allocation62_spill] sm:$0xff] %v10890_v19  ;;  %v2141_v9 = vadd.f32 %v10576_v54, %v2102_v1  ;;  %v2103_v34 = vmul.f32 %v10569_v36, %v10890_v19  ;;  %7605 = vrot.lane.b32.xlu0 %v7604_v49, %s15093_s16  ;;  %v2015_v22 = vpop.f32.mrb[31].mxu0  ;;  %v10901_v37 = vsel %vm633_vm1, %v14717_v4, %v2240_v60  ;;  %v10907_v21 = vsel %vm729_vm0, %v2330_v50, 0.0 }
 0x295   : > { %15108 = vst [vmem:[#allocation63_spill] sm:$0xff] %v10901_v37  ;;  %v10904_v26 = vsel %vm729_vm0, %v2329_v32, %v2330_v50  ;;  %15110 = vst [vmem:[#allocation109_spill] sm:$0xff] %v10907_v21 }
 0x296   : > { %15109 = vst [vmem:[#allocation100_spill] sm:$0xff] %v10904_v26  ;;  %v10909_v48 = vmax.f32 %v2141_v9, 0.0  ;;  %v2142_v1 = vadd.f32 %v10576_v54, %v2103_v34  ;;  %7595 = vrot.lane.b32.xlu1 %v7604_v49, %s14791_s15  ;;  %v10915_v22 = vpack.i.bf16 %v10907_v21, %v10904_v26  ;;  %v15113_v9 = vrot.slane %v10761_v25, 7 }
 0x298   : > { %v10919_v4 = vmax.f32 %v2142_v1, 0.0  ;;  %7615 = vrot.lane.b32.xlu0 %v10787_v0, %s14826_s19  ;;  %v2332_v34 = vrot.slane %v10909_v48, 1  ;;  %v10942_v38 = vsel %vm633_vm1, 0.0, %v15113_v9  ;;  %v14727_v55 = vrot.slane %v10909_v48, 7 }
 0x299   : > { %v10925_v50 = vpop.f32.mrb[32].mxu0  ;;  %15114 = vst [vmem:[#allocation118_spill] sm:$0xff] %v10942_v38 }
 0x29a   : > { %15111 = vst [vmem:[#allocation29_spill] sm:$0xff] %v10925_v50  ;;  %v2104_v32 = vmul.f32 %v10569_v36, %v10925_v50  ;;  %7600 = vrot.lane.b32.xlu1 %v10752_v10, %s15090_s17  ;;  %v2020_v49 = vpop.f32.mrb[33].mxu0  ;;  %v10934_v1 = vpack.i.bf16 %v10919_v4, %v10909_v48  ;;  %v2333_v60 = vrot.slane %v10919_v4, 1  ;;  %v2243_v50 = vrot.slane %v10919_v4, 7 }
 0x29b   : > { %v10937_v19 = vpop.f32.mrb[34].mxu0 }
 0x29c   : > { %15112 = vst [vmem:[#allocation30_spill] sm:$0xff] %v10937_v19  ;;  %v2143_v10 = vadd.f32 %v10576_v54, %v2104_v32  ;;  %v2105_v49 = vmul.f32 %v10569_v36, %v10937_v19  ;;  %7620 = vrot.lane.b32.xlu0 %v10787_v0, %s14797_s24  ;;  %v2023_v33 = vpop.f32.mrb[35].mxu0  ;;  %v10952_v30 = vsel %vm729_vm0, %v2332_v34, %v2333_v60  ;;  %v10955_v63 = vsel %vm729_vm0, %v2333_v60, 0.0 }
 0x29d   : > { %15115 = vst [vmem:[#allocation83_spill] sm:$0xff] %v10952_v30  ;;  %15116 = vst [vmem:[#allocation45_spill] sm:$0xff] %v10955_v63  ;;  %v10959_v9 = vpack.i.bf16 %v10955_v63, %v10952_v30  ;;  %v10964_v32 = vsel %vm633_vm1, %v14727_v55, %v2243_v50  ;;  %v15118_v60 = vpack.i.bf16 %v10761_v25, %v10720_v8 }
 0x29e   : > { %15117 = vst [vmem:[#allocation93_spill] sm:$0xff] %v10964_v32  ;;  %v10968_v0 = vmax.f32 %v2143_v10, 0.0  ;;  %v2144_v33 = vadd.f32 %v10576_v54, %v2105_v49  ;;  %v7629_v34 = vpack.i.bf16 %v10801_v44, %v10942_v38  ;;  %v15164_v38 = vld [vmem:[#allocation107_spill] sm:$0xff] }
 0x29f   : > { %7610 = vrot.lane.b32.xlu1 %v15118_v60, %s8822_s27 }
 0x2a0   : > { %v10977_v42 = vmax.f32 %v2144_v33, 0.0  ;;  %7630 = vrot.lane.b32.xlu0 %v7629_v34, %s14791_s15  ;;  %v2335_v50 = vrot.slane %v10968_v0, 1  ;;  %v15121_v20 = vrot.slane %v10968_v0, 7 }
 0x2a1   : > { %v10982_v19 = vpop.f32.mrb[36].mxu0 }
 0x2a2   : > { %15119 = vst [vmem:[#allocation61_spill] sm:$0xff] %v10982_v19  ;;  %v2106_v49 = vmul.f32 %v10569_v36, %v10982_v19  ;;  %v2028_v8 = vpop.f32.mrb[37].mxu0  ;;  %v10991_v25 = vpack.i.bf16 %v10977_v42, %v10968_v0  ;;  %v2246_v33 = vrot.slane %v10977_v42, 7  ;;  %v2336_v55 = vrot.slane %v10977_v42, 1 }
 0x2a3   : > { %7625 = vrot.lane.b32.xlu1 %v10815_v47, %s15089_s25  ;;  %v10994_v60 = vpop.f32.mrb[38].mxu0 }
 0x2a4   : > { %15120 = vst [vmem:[#allocation60_spill] sm:$0xff] %v10994_v60  ;;  %v2145_v10 = vadd.f32 %v10576_v54, %v2106_v49  ;;  %v2107_v19 = vmul.f32 %v10569_v36, %v10994_v60  ;;  %7635 = vrot.lane.b32.xlu0 %v10815_v47, %s15090_s17  ;;  %v2031_v8 = vpop.f32.mrb[39].mxu0  ;;  %v11006_v41 = vsel %vm633_vm1, %v15121_v20, %v2246_v33  ;;  %v11012_v6 = vsel %vm729_vm0, %v2336_v55, 0.0 }
 0x2a5   : > { %15122 = vst [vmem:[#allocation102_spill] sm:$0xff] %v11006_v41  ;;  %v11009_v24 = vsel %vm729_vm0, %v2335_v50, %v2336_v55  ;;  %15124 = vst [vmem:[#allocation31_spill] sm:$0xff] %v11012_v6  ;;  %v15125_v47 = vpack.i.bf16 %v10809_v39, %v10766_v45  ;;  %v15128_v20 = vrot.slane %v10809_v39, 7 }
 0x2a6   : > { %15123 = vst [vmem:[#allocation111_spill] sm:$0xff] %v11009_v24  ;;  %v11014_v15 = vmax.f32 %v2145_v10, 0.0  ;;  %v2146_v49 = vadd.f32 %v10576_v54, %v2107_v19  ;;  %v11023_v8 = vpack.i.bf16 %v11012_v6, %v11009_v24 }
 0x2a7   : > { %7645 = vrot.lane.b32.xlu1 %v15125_v47, %s8822_s27  ;;  %v11049_v55 = vsel %vm633_vm1, 0.0, %v15128_v20 }
 0x2a8   : > { %v11027_v50 = vmax.f32 %v2146_v49, 0.0  ;;  %7640 = vrot.lane.b32.xlu0 %v7629_v34, %s15093_s16  ;;  %v2338_v10 = vrot.slane %v11014_v15, 1  ;;  %15129 = vst [vmem:[#allocation82_spill] sm:$0xff] %v11049_v55  ;;  %v14740_v60 = vrot.slane %v11014_v15, 7 }
 0x2a9   : > { %v11032_v19 = vpop.f32.mrb[40].mxu0 }
 0x2aa   : > { %15126 = vst [vmem:[#allocation32_spill] sm:$0xff] %v11032_v19  ;;  %v2108_v45 = vmul.f32 %v10569_v36, %v11032_v19  ;;  %v2036_v33 = vpop.f32.mrb[41].mxu0  ;;  %v11041_v49 = vpack.i.bf16 %v11027_v50, %v11014_v15  ;;  %v2339_v34 = vrot.slane %v11027_v50, 1  ;;  %v2249_v19 = vrot.slane %v11027_v50, 7 }
 0x2ab   : > { %7650 = vrot.lane.b32.xlu1 %v10832_v58, %s14826_s19  ;;  %v11044_v47 = vpop.f32.mrb[42].mxu0 }
 0x2ac   : > { %15127 = vst [vmem:[#allocation120_spill] sm:$0xff] %v11044_v47  ;;  %v2147_v28 = vadd.f32 %v10576_v54, %v2108_v45  ;;  %v2109_v33 = vmul.f32 %v10569_v36, %v11044_v47  ;;  %7660 = vrot.lane.b32.xlu0 %v10851_v16, %s15089_s25  ;;  %v2039_v7 = vpop.f32.mrb[43].mxu0  ;;  %v11059_v23 = vsel %vm729_vm0, %v2338_v10, %v2339_v34  ;;  %v11062_v39 = vsel %vm729_vm0, %v2339_v34, 0.0 }
 0x2ad   : > { %15130 = vst [vmem:[#allocation35_spill] sm:$0xff] %v11059_v23  ;;  %15131 = vst [vmem:[#allocation92_spill] sm:$0xff] %v11062_v39  ;;  %v11066_v20 = vpack.i.bf16 %v11062_v39, %v11059_v23  ;;  %v11071_v45 = vsel %vm633_vm1, %v14740_v60, %v2249_v19  ;;  %v7674_v10 = vpack.i.bf16 %v10856_v2, %v11049_v55 }
 0x2ae   : > { %v11075_v61 = vmax.f32 %v2147_v28, 0.0  ;;  %v2148_v7 = vadd.f32 %v10576_v54, %v2109_v33 }
 0x2af   : > { %7655 = vrot.lane.b32.xlu1 %v10832_v58, %s14797_s24 }
 0x2b0   : > { %v11082_v34 = vmax.f32 %v2148_v7, 0.0  ;;  %7675 = vrot.lane.b32.xlu0 %v7674_v10, %s15093_s16  ;;  %v2341_v19 = vrot.slane %v11075_v61, 1 }
 0x2b1   : > { %v11087_v60 = vpop.f32.mrb[44].mxu0 }
 0x2b2   : > { %15132 = vst [vmem:[#allocation69_spill] sm:$0xff] %v11087_v60  ;;  %v2110_v33 = vmul.f32 %v10569_v36, %v11087_v60  ;;  %v2044_v58 = vpop.f32.mrb[45].mxu0  ;;  %v11095_v47 = vpack.i.bf16 %v11082_v34, %v11075_v61  ;;  %v2252_v7 = vrot.slane %v11082_v34, 7  ;;  %v2342_v39 = vrot.slane %v11082_v34, 1 }
 0x2b3   : > { %7665 = vrot.lane.b32.xlu1 %v7674_v10, %s14791_s15  ;;  %v11098_v23 = vpop.f32.mrb[46].mxu0  ;;  %v15134_v58 = vrot.slane %v11075_v61, 7 }
 0x2b4   : > { %15133 = vst [vmem:[#allocation70_spill] sm:$0xff] %v11098_v23  ;;  %v2149_v28 = vadd.f32 %v10576_v54, %v2110_v33  ;;  %v2111_v60 = vmul.f32 %v10569_v36, %v11098_v23  ;;  %7685 = vrot.lane.b32.xlu0 %v10887_v11, %s14826_s19  ;;  %v2047_v10 = vpop.f32.mrb[47].mxu0  ;;  %v11113_v6 = vsel %vm729_vm0, %v2341_v19, %v2342_v39  ;;  %v11116_v2 = vsel %vm729_vm0, %v2342_v39, 0.0 }
 0x2b5   : > { %v11110_v24 = vsel %vm633_vm1, %v15134_v58, %v2252_v7  ;;  %15135 = vst [vmem:[#allocation101_spill] sm:$0xff] %v11113_v6  ;;  %15136 = vst [vmem:[#allocation110_spill] sm:$0xff] %v11116_v2  ;;  %v11125_v10 = vpack.i.bf16 %v11116_v2, %v11113_v6  ;;  %v15137_v39 = vrot.slane %v10860_v35, 7 }
 0x2b6   : > { %v11118_v30 = vmax.f32 %v2149_v28, 0.0  ;;  %v2150_v33 = vadd.f32 %v10576_v54, %v2111_v60 }
 0x2b7   : > { %7670 = vrot.lane.b32.xlu1 %v10851_v16, %s15090_s17  ;;  %v11136_v19 = vsel %vm633_vm1, 0.0, %v15137_v39 }
 0x2b8   : > { %v11129_v58 = vmax.f32 %v2150_v33, 0.0  ;;  %7690 = vrot.lane.b32.xlu0 %v10887_v11, %s14797_s24  ;;  %15138 = vst [vmem:[#allocation33_spill] sm:$0xff] %v11136_v19  ;;  %v7699_v28 = vpack.i.bf16 %v10901_v37, %v11136_v19  ;;  %v2344_v7 = vrot.slane %v11118_v30, 1  ;;  %v15140_v11 = vpack.i.bf16 %v10860_v35, %v10819_v46 }
 0x2b9   : > { %v11140_v60 = vpop.f32.mrb[48].mxu0  ;;  %v14756_v2 = vrot.slane %v11118_v30, 7 }
 0x2ba   : > { %15139 = vst [vmem:[#allocation34_spill] sm:$0xff] %v11140_v60  ;;  %v2112_v33 = vmul.f32 %v10569_v36, %v11140_v60  ;;  %v2052_v39 = vpop.f32.mrb[49].mxu0  ;;  %v11153_v23 = vpack.i.bf16 %v11129_v58, %v11118_v30  ;;  %v2345_v16 = vrot.slane %v11129_v58, 1  ;;  %v2255_v37 = vrot.slane %v11129_v58, 7 }
 0x2bb   : > { %7680 = vrot.lane.b32.xlu1 %v15140_v11, %s8822_s27  ;;  %v11156_v6 = vpop.f32.mrb[50].mxu0 }
 0x2bc   : > { %15141 = vst [vmem:[#allocation119_spill] sm:$0xff] %v11156_v6  ;;  %v2151_v60 = vadd.f32 %v10576_v54, %v2112_v33  ;;  %v2113_v19 = vmul.f32 %v10569_v36, %v11156_v6  ;;  %7700 = vrot.lane.b32.xlu0 %v7699_v28, %s14791_s15  ;;  %v2055_v46 = vpop.f32.mrb[51].mxu0  ;;  %v11165_v35 = vsel %vm729_vm0, %v2344_v7, %v2345_v16  ;;  %v11168_v11 = vsel %vm729_vm0, %v2345_v16, 0.0 }
 0x2bd   : > { %15142 = vst [vmem:[#allocation85_spill] sm:$0xff] %v11165_v35  ;;  %15143 = vst [vmem:[#allocation46_spill] sm:$0xff] %v11168_v11  ;;  %v11172_v39 = vpack.i.bf16 %v11168_v11, %v11165_v35  ;;  %v11177_v33 = vsel %vm633_vm1, %v14756_v2, %v2255_v37 }
 0x2be   : > { %v11181_v63 = vmax.f32 %v2151_v60, 0.0  ;;  %v2152_v7 = vadd.f32 %v10576_v54, %v2113_v19  ;;  %v15145_v19 = vpack.i.bf16 %v10909_v48, %v10865_v56 }
 0x2bf   : > { %7695 = vrot.lane.b32.xlu1 %v10915_v22, %s15089_s25 }
 0x2c0   : > { %v11186_v16 = vmax.f32 %v2152_v7, 0.0  ;;  %7705 = vrot.lane.b32.xlu0 %v10915_v22, %s15090_s17  ;;  %v2347_v35 = vrot.slane %v11181_v63, 1 }
 0x2c1   : > { %v11192_v37 = vpop.f32.mrb[52].mxu0 }
 0x2c2   : > { %15144 = vst [vmem:[#allocation95_spill] sm:$0xff] %v11192_v37  ;;  %v2114_v60 = vmul.f32 %v10569_v36, %v11192_v37  ;;  %v2060_v7 = vpop.f32.mrb[53].mxu0  ;;  %v11203_v6 = vpack.i.bf16 %v11186_v16, %v11181_v63  ;;  %v2258_v22 = vrot.slane %v11186_v16, 7  ;;  %v2348_v2 = vrot.slane %v11186_v16, 1 }
 0x2c3   : > { %7715 = vrot.lane.b32.xlu1 %v15145_v19, %s8822_s27  ;;  %v11206_v46 = vpop.f32.mrb[54].mxu0  ;;  %v15147_v19 = vrot.slane %v11181_v63, 7 }
 0x2c4   : > { %15146 = vst [vmem:[#allocation67_spill] sm:$0xff] %v11206_v46  ;;  %v2153_v37 = vadd.f32 %v10576_v54, %v2114_v60  ;;  %v2115_v11 = vmul.f32 %v10569_v36, %v11206_v46  ;;  %7710 = vrot.lane.b32.xlu0 %v7699_v28, %s15093_s16  ;;  %v2063_v56 = vpop.f32.mrb[55].mxu0  ;;  %v11220_v55 = vsel %vm729_vm0, %v2347_v35, %v2348_v2  ;;  %v11223_v26 = vsel %vm729_vm0, %v2348_v2, 0.0 }
 0x2c5   : > { %v11217_v7 = vsel %vm633_vm1, %v15147_v19, %v2258_v22  ;;  %15148 = vst [vmem:[#allocation68_spill] sm:$0xff] %v11220_v55  ;;  %15149 = vst [vmem:[#allocation104_spill] sm:$0xff] %v11223_v26  ;;  %v11232_v28 = vpack.i.bf16 %v11223_v26, %v11220_v55  ;;  %v15151_v2 = vrot.slane %v10909_v48, 7 }
 0x2c6   : > { %v11225_v21 = vmax.f32 %v2153_v37, 0.0  ;;  %v2154_v60 = vadd.f32 %v10576_v54, %v2115_v11 }
 0x2c7   : > { %7720 = vrot.lane.b32.xlu1 %v10934_v1, %s14826_s19  ;;  %v11243_v35 = vsel %vm633_vm1, 0.0, %v15151_v2 }
 0x2c8   : > { %v11236_v56 = vmax.f32 %v2154_v60, 0.0  ;;  %7730 = vrot.lane.b32.xlu0 %v10959_v9, %s15089_s25  ;;  %15152 = vst [vmem:[#allocation38_spill] sm:$0xff] %v11243_v35  ;;  %v7744_v19 = vpack.i.bf16 %v10964_v32, %v11243_v35  ;;  %v2350_v22 = vrot.slane %v11225_v21, 1  ;;  %v14771_v55 = vrot.slane %v11225_v21, 7 }
 0x2c9   : > { %v11247_v37 = vpop.f32.mrb[56].mxu0 }
 0x2ca   : > { %15150 = vst [vmem:[#allocation113_spill] sm:$0xff] %v11236_v56  ;;  %15153 = vst [vmem:[#allocation39_spill] sm:$0xff] %v11247_v37  ;;  %v2116_v60 = vmul.f32 %v10569_v36, %v11247_v37  ;;  %v2068_v48 = vpop.f32.mrb[57].mxu0  ;;  %v11258_v2 = vpack.i.bf16 %v11236_v56, %v11225_v21  ;;  %v2351_v11 = vrot.slane %v11236_v56, 1  ;;  %v2261_v26 = vrot.slane %v11236_v56, 7 }
 0x2cb   : > { %7725 = vrot.lane.b32.xlu1 %v10934_v1, %s14797_s24  ;;  %v11261_v46 = vpop.f32.mrb[58].mxu0  ;;  %v7243_v56 = vunpack.i.h.bf16 %v15164_v38 }
 0x2cc   : > { %15154 = vst [vmem:[#allocation122_spill] sm:$0xff] %v11261_v46  ;;  %v2155_v32 = vadd.f32 %v10576_v54, %v2116_v60  ;;  %v2117_v37 = vmul.f32 %v10569_v36, %v11261_v46  ;;  %7745 = vrot.lane.b32.xlu0 %v7744_v19, %s15093_s16  ;;  %v2071_v1 = vpop.f32.mrb[59].mxu0  ;;  %v11270_v48 = vsel %vm729_vm0, %v2350_v22, %v2351_v11  ;;  %v11273_v35 = vsel %vm729_vm0, %v2351_v11, 0.0 }
 0x2cd   : > { %15155 = vst [vmem:[#allocation84_spill] sm:$0xff] %v11270_v48  ;;  %15156 = vst [vmem:[#allocation41_spill] sm:$0xff] %v11273_v35  ;;  %v11277_v44 = vpack.i.bf16 %v11273_v35, %v11270_v48  ;;  %v11282_v60 = vsel %vm633_vm1, %v14771_v55, %v2261_v26 }
 0x2ce   : > { %v11286_v46 = vmax.f32 %v2155_v32, 0.0  ;;  %v2156_v22 = vadd.f32 %v10576_v54, %v2117_v37  ;;  %v7003_v54 = vunpack.i.h.bf16 %v15067_v57  ;;  %v15157_v37 = vrot.slane %v10968_v0, 7 }
 0x2cf   : > { %7735 = vrot.lane.b32.xlu1 %v7744_v19, %s14791_s15  ;;  %v15162_v57 = vpack.i.bf16 %v10968_v0, %v10919_v4  ;;  %v1569_v4 = vsel %vm1537_vm2, %v15166_v3, %v15165_v31  ;;  %v15167_v0 = vld [vmem:[#allocation81_spill] sm:$0xff] }
 0x2d0   : > { %v11290_v11 = vmax.f32 %v2156_v22, 0.0  ;;  %7755 = vrot.lane.b32.xlu0 %v10991_v25, %s14826_s19  ;;  %v2353_v26 = vrot.slane %v11286_v46, 1  ;;  %v11306_v19 = vsel %vm633_vm1, 0.0, %v15157_v37  ;;  %v15163_v37 = vld [vmem:[#allocation98_spill] sm:$0xff] }
 0x2d1   : > { %15158 = vst [vmem:[#allocation94_spill] sm:$0xff] %v11306_v19  ;;  %v7162_v35 = vunpack.i.l.bf16 %v15163_v37 }
 0x2d2   : > { %v2354_v32 = vrot.slane %v11290_v11, 1 }
 0x2d3   : > { %7740 = vrot.lane.b32.xlu1 %v10959_v9, %s15090_s17  ;;  %v15161_v9 = vld [vmem:[#allocation66_spill] sm:$0xff] }
 0x2d4   : > { %7760 = vrot.lane.b32.xlu0 %v10991_v25, %s14797_s24  ;;  %v11309_v22 = vsel %vm729_vm0, %v2353_v26, %v2354_v32  ;;  %v11312_v36 = vsel %vm729_vm0, %v2354_v32, 0.0  ;;  %v7083_v1 = vunpack.i.h.bf16 %v15161_v9  ;;  %v7082_v55 = vunpack.i.l.bf16 %v15161_v9 }
 0x2d5   : > { %15159 = vst [vmem:[#allocation74_spill] sm:$0xff] %v11309_v22  ;;  %15160 = vst [vmem:[#allocation75_spill] sm:$0xff] %v11312_v36  ;;  %v7769_v25 = vpack.i.bf16 %v11006_v41, %v11306_v19  ;;  %v7163_v32 = vunpack.i.h.bf16 %v15163_v37  ;;  %v7242_v9 = vunpack.i.l.bf16 %v15164_v38  ;;  %v15168_v41 = vld [vmem:[#allocation116_spill] sm:$0xff]  ;;  %v15169_v22 = vld [vmem:[#allocation50_spill] sm:$0xff] }
 0x2d6   : > { %v11316_v48 = vpop.permute.xlu0 %7485  ;;  %v7323_v19 = vunpack.i.h.bf16 %v15168_v41  ;;  %v7322_v26 = vunpack.i.l.bf16 %v15168_v41  ;;  %v1602_v36 = vsel %vm1570_vm3, %v1569_v4, %v7083_v1  ;;  %v14786_v5 = vunpack.i.h.bf16 %v15169_v22 }
 0x2d7   : > { %7750 = vrot.lane.b32.xlu1 %v15162_v57, %s8822_s27  ;;  %v1568_v57 = vsel %vm1537_vm2, %v15167_v0, %v7003_v54  ;;  %v14787_v38 = vunpack.i.l.bf16 %v15169_v22  ;;  %v1635_v3 = vsel %vm1603_vm4, %v1602_v36, %v7163_v32 }
 0x2d8   : > { %7770 = vrot.lane.b32.xlu0 %v7769_v25, %s14791_s15  ;;  %v1601_v37 = vsel %vm1570_vm3, %v1568_v57, %v7082_v55  ;;  %v1668_v41 = vsel %vm1636_vm5, %v1635_v3, %v7243_v56 }
 0x2d9   : > { %v1634_v31 = vsel %vm1603_vm4, %v1601_v37, %v7162_v35  ;;  %v1701_v1 = vsel %vm1669_vm6, %v1668_v41, %v7323_v19  ;;  %v15171_v35 = vpack.i.bf16 %v11014_v15, %v10977_v42  ;;  %v15172_v37 = vrot.slane %v11014_v15, 7 }
 0x2da   : > { %v7496_v51 = vpop.permute.xlu0 %7495  ;;  %v1667_v54 = vsel %vm1636_vm5, %v1634_v31, %v7242_v9 }
 0x2db   : > { %7765 = vrot.lane.b32.xlu1 %v11023_v8, %s15089_s25  ;;  %v1700_v55 = vsel %vm1669_vm6, %v1667_v54, %v7322_v26  ;;  %v11383_v31 = vsel %vm633_vm1, 0.0, %v15172_v37  ;;  %v7497_v15 = vunpack.i.l.bf16 %v7496_v51 }
 0x2dc   : > { %v11348_v0 = vpop.permute.xlu1 %7480  ;;  %7775 = vrot.lane.b32.xlu0 %v11023_v8, %s15090_s17  ;;  %v1733_v56 = vsel %vm1702_vm7, %v1700_v55, %v14787_v38  ;;  %v1734_v8 = vsel %vm1702_vm7, %v1701_v1, %v14786_v5 }
 0x2dd   : > { %v11355_v4 = vunpack.i.l.bf16 %v11348_v0 }
 0x2de   : > { %v7501_v57 = vpop.permute.xlu0 %7500 }
 0x2df   : > { %15170 = vst [vmem:[#allocation103_spill] sm:$0xff] %v11355_v4  ;;  %7785 = vrot.lane.b32.xlu1 %v15171_v35, %s8822_s27  ;;  %v1766_v36 = vsel %vm1735_vm8, %v1733_v56, %v11355_v4  ;;  %v1767_v19 = vsel %vm1735_vm8, %v1734_v8, %v11355_v4  ;;  %v7502_v1 = vunpack.i.l.bf16 %v7501_v57  ;;  %v7503_v8 = vunpack.i.h.bf16 %v7501_v57 }
 0x2e0   : > { %v11371_v26 = vpop.permute.xlu1 %7490  ;;  %7780 = vrot.lane.b32.xlu0 %v7769_v25, %s15093_s16  ;;  %v1798_v42 = vpack.c.bf16 %v1767_v19, %v1766_v36  ;;  %v7814_v25 = vpack.i.bf16 %v11071_v45, %v11383_v31  ;;  %v15174_v57 = vpack.i.bf16 %v11075_v61, %v11027_v50 }
 0x2e2   : > { %v7506_v32 = vpop.permute.xlu0 %7505  ;;  %2073 = vmatmul.mubr.bf16.gmra.mrb[60].mxu0 %v1798_v42  ;;  %v3153_v42 = vsel %vm1603_vm4, %v10120_v27, %v7497_v15  ;;  %v15175_v27 = vld [vmem:[#allocation125_spill] sm:$0xff] }
 0x2e3   : > { %7790 = vrot.lane.b32.xlu1 %v11041_v49, %s14826_s19  ;;  %v7507_v56 = vunpack.i.l.bf16 %v7506_v32  ;;  %v7508_v37 = vunpack.i.h.bf16 %v7506_v32  ;;  %v3185_v38 = vsel %vm1636_vm5, %v3153_v42, %v7502_v1  ;;  %v7483_v1 = vunpack.i.h.bf16 %v11348_v0 }
 0x2e4   : > { %v11376_v9 = vpop.permute.xlu1 %7510  ;;  %7800 = vrot.lane.b32.xlu0 %v11066_v20, %s15089_s25  ;;  %v7488_v42 = vunpack.i.h.bf16 %v11316_v48 }
 0x2e5   : > { %v3217_v15 = vsel %vm1669_vm6, %v3185_v38, %v7507_v56  ;;  %v7492_v56 = vunpack.i.l.bf16 %v11371_v26 }
 0x2e6   : > { %v11385_v3 = vpop.permute.xlu0 %7520 }
 0x2e7   : > { %7795 = vrot.lane.b32.xlu1 %v11041_v49, %s14797_s24  ;;  %v7498_v49 = vunpack.i.h.bf16 %v7496_v51 }
 0x2e8   : > { %v11391_v54 = vpop.permute.xlu1 %7515  ;;  %7815 = vrot.lane.b32.xlu0 %v7814_v25, %s15093_s16 }
 0x2e9   : > { %v3154_v32 = vsel %vm1603_vm4, %v15175_v27, %v7498_v49  ;;  %v7493_v49 = vunpack.i.h.bf16 %v11371_v26 }
 0x2ea   : > { %v7536_v41 = vpop.permute.xlu0 %7535 }
 0x2eb   : > { %7805 = vrot.lane.b32.xlu1 %v7814_v25, %s14791_s15  ;;  %v7537_v36 = vunpack.i.l.bf16 %v7536_v41  ;;  %v15173_v25 = vrot.slane %v11075_v61, 7 }
 0x2ec   : > { %v7526_v55 = vpop.permute.xlu1 %7525  ;;  %7825 = vrot.lane.b32.xlu0 %v11095_v47, %s14826_s19 }
 0x2ed   : > { %v11408_v5 = vsel %vm633_vm1, 0.0, %v15173_v25  ;;  %v3186_v25 = vsel %vm1636_vm5, %v3154_v32, %v7503_v8 }
 0x2ee   : > { %v11397_v35 = vpop.permute.xlu0 %7545  ;;  %v3218_v61 = vsel %vm1669_vm6, %v3186_v25, %v7508_v37  ;;  %v7527_v37 = vunpack.i.l.bf16 %v7526_v55 }
 0x2ef   : > { %7810 = vrot.lane.b32.xlu1 %v11066_v20, %s15090_s17  ;;  %v7538_v20 = vunpack.i.h.bf16 %v7536_v41  ;;  %v3249_v41 = vsel %vm1702_vm7, %v3217_v15, %v7537_v36  ;;  %v7528_v36 = vunpack.i.h.bf16 %v7526_v55  ;;  %v15176_v15 = vpack.i.bf16 %v11118_v30, %v11082_v34 }
 0x2f0   : > { %v7531_v19 = vpop.permute.xlu1 %7530  ;;  %7830 = vrot.lane.b32.xlu0 %v11095_v47, %s14797_s24  ;;  %v7839_v47 = vpack.i.bf16 %v11110_v24, %v11408_v5  ;;  %v3281_v0 = vsel %vm1735_vm8, %v3249_v41, %v7483_v1  ;;  %v7518_v34 = vunpack.i.h.bf16 %v11391_v54 }
 0x2f1   : > { %v3250_v38 = vsel %vm1702_vm7, %v3218_v61, %v7538_v20  ;;  %v3094_v20 = vsel %vm1537_vm2, %v10615_v52, %v7488_v42  ;;  %v7533_v41 = vunpack.i.h.bf16 %v7531_v19  ;;  %v7532_v1 = vunpack.i.l.bf16 %v7531_v19 }
 0x2f2   : > { %v11411_v51 = vpop.permute.xlu0 %7550  ;;  %v3124_v55 = vsel %vm1570_vm3, %v3094_v20, %v7493_v49 }
 0x2f3   : > { %7820 = vrot.lane.b32.xlu1 %v15174_v57, %s8822_s27  ;;  %v7487_v57 = vunpack.i.l.bf16 %v11316_v48 }
 0x2f4   : > { %v7541_v4 = vpop.permute.xlu1 %7540  ;;  %7840 = vrot.lane.b32.xlu0 %v7839_v47, %s14791_s15 }
 0x2f5   : > { %v7542_v50 = vunpack.i.l.bf16 %v7541_v4  ;;  %v3093_v32 = vsel %vm1537_vm2, %v10618_v29, %v7487_v57  ;;  %v3156_v29 = vsel %vm1603_vm4, %v3124_v55, %v7528_v36 }
 0x2f6   : > { %v11429_v22 = vpop.permute.xlu0 %7560  ;;  %v3123_v25 = vsel %vm1570_vm3, %v3093_v32, %v7492_v56  ;;  %v7543_v56 = vunpack.i.h.bf16 %v7541_v4 }
 0x2f7   : > { %7835 = vrot.lane.b32.xlu1 %v11125_v10, %s15089_s25  ;;  %v3282_v8 = vsel %vm1735_vm8, %v3250_v38, %v7542_v50  ;;  %v3155_v52 = vsel %vm1603_vm4, %v3123_v25, %v7527_v37  ;;  %v7517_v50 = vunpack.i.l.bf16 %v11391_v54  ;;  %v15178_v54 = vrot.slane %v11118_v30, 7 }
 0x2f8   : > { %v11438_v27 = vpop.permute.xlu1 %7555  ;;  %7845 = vrot.lane.b32.xlu0 %v11125_v10, %s15090_s17  ;;  %v3313_v48 = vpack.c.bf16 %v3282_v8, %v3281_v0  ;;  %v15177_v10 = vpack.c.bf16 %v10706_v17, %v10703_v53  ;;  %v3188_v17 = vsel %vm1636_vm5, %v3156_v29, %v7518_v34  ;;  %v7512_v30 = vunpack.i.l.bf16 %v11376_v9 }
 0x2f9   : > { %v3187_v53 = vsel %vm1636_vm5, %v3155_v52, %v7517_v50  ;;  %v3220_v49 = vsel %vm1669_vm6, %v3188_v17, %v7533_v41  ;;  %v11479_v8 = vsel %vm633_vm1, 0.0, %v15178_v54  ;;  %v7513_v25 = vunpack.i.h.bf16 %v11376_v9 }
 0x2fa   : > { %3494 = vmatmul.mubr.bf16.vlgmr.msra.gmra.mrb[0].mxu1 %v3313_v48  ;;  %v11446_v26 = vpop.permute.xlu0 %7565  ;;  %v3219_v19 = vsel %vm1669_vm6, %v3187_v53, %v7532_v1  ;;  %v7884_v4 = vpack.i.bf16 %v11177_v33, %v11479_v8  ;;  %v3095_v29 = vsel %vm1537_vm2, %v10695_v62, %v7512_v30  ;;  %v7562_v52 = vunpack.i.l.bf16 %v11429_v22 }
 0x2fb   : > { %7855 = vrot.lane.b32.xlu1 %v15176_v15, %s8822_s27  ;;  %6688 = vmatprep.mubr.msk.bf16.mxu1 %vm1537_vm2, %v15177_v10  ;;  %v7522_v10 = vunpack.i.l.bf16 %v11385_v3  ;;  %v15179_v41 = vpack.c.bf16 %v10748_v43, %v10745_v12  ;;  %v7523_v1 = vunpack.i.h.bf16 %v11385_v3  ;;  %v3096_v9 = vsel %vm1537_vm2, %v10656_v14, %v7513_v25 }
 0x2fc   : > { %v11460_v61 = vpop.permute.xlu1 %7575  ;;  %7850 = vrot.lane.b32.xlu0 %v7839_v47, %s15093_s16  ;;  %v7563_v50 = vunpack.i.h.bf16 %v11429_v22  ;;  %v7567_v43 = vunpack.i.l.bf16 %v11446_v26  ;;  %v7552_v53 = vunpack.i.l.bf16 %v11411_v51  ;;  %v7568_v22 = vunpack.i.h.bf16 %v11446_v26 }
 0x2fd   : > { %v7577_v47 = vunpack.i.l.bf16 %v11460_v61  ;;  %v3125_v62 = vsel %vm1570_vm3, %v3095_v29, %v7522_v10  ;;  %v3126_v3 = vsel %vm1570_vm3, %v3096_v9, %v7523_v1  ;;  %v7558_v25 = vunpack.i.h.bf16 %v11438_v27 }
 0x2fe   : > { %v7571_v42 = vpop.permute.xlu0 %7570  ;;  %v3157_v12 = vsel %vm1603_vm4, %v3125_v62, %v7562_v52  ;;  %v3158_v14 = vsel %vm1603_vm4, %v3126_v3, %v7563_v50  ;;  %v7557_v10 = vunpack.i.l.bf16 %v11438_v27  ;;  %v15182_v50 = vpack.i.bf16 %v11225_v21, %v11186_v16 }
 0x2ff   : > { %7860 = vrot.lane.b32.xlu1 %v11153_v23, %s14826_s19  ;;  %v7573_v57 = vunpack.i.h.bf16 %v7571_v42  ;;  %v7572_v38 = vunpack.i.l.bf16 %v7571_v42 }
 0x300   : > { %v11472_v0 = vpop.permute.xlu1 %7580  ;;  %7870 = vrot.lane.b32.xlu0 %v11172_v39, %s15089_s25 }
 0x301   : > { %v3251_v36 = vsel %vm1702_vm7, %v3219_v19, %v7572_v38  ;;  %v3252_v37 = vsel %vm1702_vm7, %v3220_v49, %v7573_v57  ;;  %v15180_v38 = vrot.slane %v11181_v63, 7  ;;  %v7553_v19 = vunpack.i.h.bf16 %v11411_v51 }
 0x302   : > { %v11483_v48 = vpop.permute.xlu0 %7590  ;;  %v3283_v32 = vsel %vm1735_vm8, %v3251_v36, %v7543_v56  ;;  %v3284_v20 = vsel %vm1735_vm8, %v3252_v37, %v7577_v47  ;;  %v3189_v49 = vsel %vm1636_vm5, %v3157_v12, %v7552_v53 }
 0x303   : > { %7865 = vrot.lane.b32.xlu1 %v11153_v23, %s14797_s24  ;;  %v3315_v55 = vpack.c.bf16 %v3284_v20, %v3283_v32  ;;  %v3221_v54 = vsel %vm1669_vm6, %v3189_v49, %v7567_v43  ;;  %v3190_v36 = vsel %vm1636_vm5, %v3158_v14, %v7553_v19  ;;  %v7578_v32 = vunpack.i.h.bf16 %v11460_v61 }
 0x304   : > { %v11492_v15 = vpop.permute.xlu1 %7585  ;;  %7885 = vrot.lane.b32.xlu0 %v7884_v4, %s15093_s16 }
 0x305   : > { %3502 = vmatmul.mubr.bf16.gmra.mrb[4].mxu1 %v3315_v55  ;;  %v7588_v16 = vunpack.i.h.bf16 %v11492_v15  ;;  %v7587_v53 = vunpack.i.l.bf16 %v11492_v15  ;;  %v15184_v15 = vrot.slane %v11225_v21, 7  ;;  %v7582_v21 = vunpack.i.l.bf16 %v11472_v0 }
 0x306   : > { %v7606_v23 = vpop.permute.xlu0 %7605  ;;  %6689 = vmatprep.mubr.msk.bf16.mxu1 %vm1537_vm2, %v15179_v41 }
 0x307   : > { %7875 = vrot.lane.b32.xlu1 %v7884_v4, %s14791_s15  ;;  %v7607_v17 = vunpack.i.l.bf16 %v7606_v23  ;;  %v7608_v56 = vunpack.i.h.bf16 %v7606_v23  ;;  %v3222_v4 = vsel %vm1669_vm6, %v3190_v36, %v7568_v22 }
 0x308   : > { %v7596_v34 = vpop.permute.xlu1 %7595  ;;  %7895 = vrot.lane.b32.xlu0 %v11203_v6, %s14826_s19 }
 0x309   : > { %v3253_v51 = vsel %vm1702_vm7, %v3221_v54, %v7607_v17  ;;  %v3254_v55 = vsel %vm1702_vm7, %v3222_v4, %v7608_v56  ;;  %v7598_v29 = vunpack.i.h.bf16 %v7596_v34  ;;  %v7597_v52 = vunpack.i.l.bf16 %v7596_v34 }
 0x30a   : > { %v11512_v42 = vpop.permute.xlu0 %7615  ;;  %v3285_v23 = vsel %vm1735_vm8, %v3253_v51, %v7578_v32 }
 0x30b   : > { %7880 = vrot.lane.b32.xlu1 %v11172_v39, %s15090_s17  ;;  %v11527_v39 = vsel %vm633_vm1, 0.0, %v15180_v38 }
 0x30c   : > { %v7601_v57 = vpop.permute.xlu1 %7600  ;;  %7900 = vrot.lane.b32.xlu0 %v11203_v6, %s14797_s24  ;;  %v15181_v6 = vpack.i.bf16 %v11181_v63, %v11129_v58  ;;  %v7909_v26 = vpack.i.bf16 %v11217_v7, %v11527_v39  ;;  %v7548_v63 = vunpack.i.h.bf16 %v11397_v35  ;;  %v7547_v58 = vunpack.i.l.bf16 %v11397_v35 }
 0x30d   : > { %v7603_v12 = vunpack.i.h.bf16 %v7601_v57  ;;  %v7602_v43 = vunpack.i.l.bf16 %v7601_v57 }
 0x30e   : > { %v11531_v47 = vpop.permute.xlu0 %7620  ;;  %v3097_v1 = vsel %vm1537_vm2, %v10770_v59, %v7547_v58  ;;  %v3098_v9 = vsel %vm1537_vm2, %v10698_v13, %v7548_v63  ;;  %v7583_v63 = vunpack.i.h.bf16 %v11472_v0  ;;  %v7592_v58 = vunpack.i.l.bf16 %v11483_v48 }
 0x30f   : > { %7890 = vrot.lane.b32.xlu1 %v15181_v6, %s8822_s27  ;;  %v3127_v34 = vsel %vm1570_vm3, %v3097_v1, %v7557_v10  ;;  %v3128_v62 = vsel %vm1570_vm3, %v3098_v9, %v7558_v25  ;;  %v11597_v6 = vsel %vm633_vm1, 0.0, %v15184_v15  ;;  %v15185_v25 = vld [vmem:[#allocation27_spill] sm:$0xff]  ;;  %v2264_v0 = vrot.slane %v11290_v11, 7 }
 0x310   : > { %7910 = vrot.lane.b32.xlu0 %v7909_v26, %s14791_s15  ;;  %v3160_v59 = vsel %vm1603_vm4, %v3128_v62, %v7598_v29  ;;  %v3159_v13 = vsel %vm1603_vm4, %v3127_v34, %v7597_v52  ;;  %v3099_v10 = vsel %vm1537_vm2, %v15185_v25, %v7582_v21  ;;  %v15187_v29 = vld [vmem:[#allocation26_spill] sm:$0xff]  ;;  %v15189_v9 = vld [vmem:[#allocation51_spill] sm:$0xff]  ;;  %v2263_v62 = vrot.slane %v11286_v46, 7 }
 0x311   : > { %v7611_v37 = vpop.permute.xlu1 %7610 }
 0x312   : > { %v7612_v20 = vunpack.i.l.bf16 %v7611_v37  ;;  %v11547_v30 = vpop.permute.xlu0 %7630  ;;  %v7613_v19 = vunpack.i.h.bf16 %v7611_v37  ;;  %v7954_v37 = vpack.i.bf16 %v11282_v60, %v11597_v6 }
 0x313   : > { %7905 = vrot.lane.b32.xlu1 %v11232_v28, %s15089_s25  ;;  %v7633_v34 = vunpack.i.h.bf16 %v11547_v30 }
 0x314   : > { %v3286_v61 = vsel %vm1735_vm8, %v3254_v55, %v7612_v20  ;;  %7915 = vrot.lane.b32.xlu0 %v11232_v28, %s15090_s17  ;;  %v15183_v28 = vpack.c.bf16 %v10807_v40, %v10804_v18  ;;  %v3191_v18 = vsel %vm1636_vm5, %v3159_v13, %v7587_v53  ;;  %v3192_v40 = vsel %vm1636_vm5, %v3160_v59, %v7588_v16 }
 0x315   : > { %v11556_v41 = vpop.permute.xlu1 %7625  ;;  %v3317_v35 = vpack.c.bf16 %v3286_v61, %v3285_v23  ;;  %v3223_v57 = vsel %vm1669_vm6, %v3191_v18, %v7602_v43  ;;  %v3224_v38 = vsel %vm1669_vm6, %v3192_v40, %v7603_v12  ;;  %v7964_v55 = vpack.i.bf16 %v11290_v11, %v11286_v46  ;;  %v15186_v61 = vld [vmem:[#allocation55_spill] sm:$0xff] }
 0x316   : > { %v11564_v27 = vpop.permute.xlu0 %7635  ;;  %v7632_v23 = vunpack.i.l.bf16 %v11547_v30  ;;  %v15188_v52 = vpack.c.bf16 %v15186_v61, %v15187_v29  ;;  %v11640_v12 = vsel %vm633_vm1, %v2263_v62, %v2264_v0  ;;  %v7622_v30 = vunpack.i.l.bf16 %v11531_v47 }
 0x317   : > { %3510 = vmatmul.mubr.bf16.gmra.mrb[8].mxu1 %v3317_v35  ;;  %7925 = vrot.lane.b32.xlu1 %v15182_v50, %s8822_s27  ;;  %v7593_v35 = vunpack.i.h.bf16 %v11483_v48  ;;  %v3100_v50 = vsel %vm1537_vm2, %v15189_v9, %v7583_v63  ;;  %v7637_v48 = vunpack.i.l.bf16 %v11564_v27  ;;  %v7638_v18 = vunpack.i.h.bf16 %v11564_v27 }
 0x318   : > { %6690 = vmatprep.mubr.msk.bf16.mxu1 %vm1537_vm2, %v15183_v28  ;;  %7920 = vrot.lane.b32.xlu0 %v7909_v26, %s15093_s16  ;;  %v3129_v28 = vsel %vm1570_vm3, %v3099_v10, %v7592_v58  ;;  %v7623_v40 = vunpack.i.h.bf16 %v11531_v47  ;;  %v15192_v47 = vld [vmem:[#allocation74_spill] sm:$0xff]  ;;  %v7617_v63 = vunpack.i.l.bf16 %v11512_v42  ;;  %v7627_v25 = vunpack.i.l.bf16 %v11556_v41 }
 0x319   : > { %v11578_v3 = vpop.permute.xlu1 %7645  ;;  %v3161_v13 = vsel %vm1603_vm4, %v3129_v28, %v7632_v23  ;;  %v3130_v43 = vsel %vm1570_vm3, %v3100_v50, %v7593_v35  ;;  %v15195_v35 = vld [vmem:[#allocation57_spill] sm:$0xff]  ;;  %v15197_v28 = vld [vmem:[#allocation100_spill] sm:$0xff] }
 0x31a   : > { %v7641_v17 = vpop.permute.xlu0 %7640  ;;  %v7647_v49 = vunpack.i.l.bf16 %v11578_v3 }
 0x31b   : > { %7930 = vrot.lane.b32.xlu1 %v11258_v2, %s14826_s19  ;;  %v7643_v14 = vunpack.i.h.bf16 %v7641_v17  ;;  %v7642_v22 = vunpack.i.l.bf16 %v7641_v17  ;;  %v3162_v17 = vsel %vm1603_vm4, %v3130_v43, %v7633_v34 }
 0x31c   : > { %7940 = vrot.lane.b32.xlu0 %v11277_v44, %s15089_s25  ;;  %v3194_v15 = vsel %vm1636_vm5, %v3162_v17, %v7623_v40 }
 0x31d   : > { %v11590_v56 = vpop.permute.xlu1 %7650  ;;  %v3255_v26 = vsel %vm1702_vm7, %v3223_v57, %v7642_v22  ;;  %v3256_v54 = vsel %vm1702_vm7, %v3224_v38, %v7643_v14  ;;  %v3193_v14 = vsel %vm1636_vm5, %v3161_v13, %v7622_v30  ;;  %v15190_v38 = vld [vmem:[#allocation113_spill] sm:$0xff] }
 0x31e   : > { %v11601_v36 = vpop.permute.xlu0 %7660  ;;  %v3287_v51 = vsel %vm1735_vm8, %v3255_v26, %v7613_v19  ;;  %v3288_v4 = vsel %vm1735_vm8, %v3256_v54, %v7647_v49  ;;  %v15191_v19 = vpack.i.bf16 %v11286_v46, %v15190_v38  ;;  %v3225_v27 = vsel %vm1669_vm6, %v3193_v14, %v7637_v48  ;;  %v15193_v54 = vld [vmem:[#allocation75_spill] sm:$0xff] }
 0x31f   : > { %7935 = vrot.lane.b32.xlu1 %v11258_v2, %s14797_s24  ;;  %v3319_v20 = vpack.c.bf16 %v3288_v4, %v3287_v51  ;;  %v3226_v4 = vsel %vm1669_vm6, %v3194_v15, %v7638_v18  ;;  %v7648_v46 = vunpack.i.h.bf16 %v11578_v3 }
 0x320   : > { %7955 = vrot.lane.b32.xlu0 %v7954_v37, %s15093_s16 }
 0x321   : > { %v11610_v32 = vpop.permute.xlu1 %7655  ;;  %3518 = vmatmul.mubr.bf16.gmra.mrb[12].mxu1 %v3319_v20  ;;  %v7618_v20 = vunpack.i.h.bf16 %v11512_v42 }
 0x322   : > { %v7676_v2 = vpop.permute.xlu0 %7675  ;;  %6691 = vmatprep.mubr.msk.bf16.mxu1 %vm1537_vm2, %v15188_v52  ;;  %v15194_v52 = vld [vmem:[#allocation118_spill] sm:$0xff]  ;;  %v7658_v17 = vunpack.i.h.bf16 %v11610_v32  ;;  %v7657_v18 = vunpack.i.l.bf16 %v11610_v32 }
 0x323   : > { %7945 = vrot.lane.b32.xlu1 %v7954_v37, %s14791_s15  ;;  %v7677_v16 = vunpack.i.l.bf16 %v7676_v2  ;;  %v7678_v22 = vunpack.i.h.bf16 %v7676_v2  ;;  %v7974_v37 = vpack.i.bf16 %v15193_v54, %v15192_v47  ;;  %v3101_v0 = vsel %vm1537_vm2, %v15194_v52, %v7617_v63 }
 0x324   : > { %7965 = vrot.lane.b32.xlu0 %v7964_v55, %s14826_s19  ;;  %v3102_v9 = vsel %vm1537_vm2, %v15195_v35, %v7618_v20  ;;  %v7652_v20 = vunpack.i.l.bf16 %v11590_v56 }
 0x325   : > { %v7666_v1 = vpop.permute.xlu1 %7665  ;;  %v3257_v51 = vsel %vm1702_vm7, %v3225_v27, %v7677_v16  ;;  %v3258_v2 = vsel %vm1702_vm7, %v3226_v4, %v7678_v22 }
 0x326   : > { %v11633_v59 = vpop.permute.xlu0 %7685  ;;  %v3289_v10 = vsel %vm1735_vm8, %v3257_v51, %v7648_v46  ;;  %v7668_v3 = vunpack.i.h.bf16 %v7666_v1  ;;  %v7667_v61 = vunpack.i.l.bf16 %v7666_v1 }
 0x327   : > { %7950 = vrot.lane.b32.xlu1 %v11277_v44, %s15090_s17  ;;  %v11648_v44 = vsel %vm633_vm1, 0.0, %v2263_v62  ;;  %v15196_v62 = vld [vmem:[#allocation109_spill] sm:$0xff] }
 0x328   : > { %7970 = vrot.lane.b32.xlu0 %v7964_v55, %s14797_s24  ;;  %v7979_v49 = vpack.i.bf16 %v11640_v12, %v11648_v44  ;;  %v7628_v55 = vunpack.i.h.bf16 %v11556_v41  ;;  %v3131_v41 = vsel %vm1570_vm3, %v3101_v0, %v7627_v25  ;;  %v15198_v1 = vpack.c.bf16 %v15196_v62, %v15197_v28 }
 0x329   : > { %v7671_v53 = vpop.permute.xlu1 %7670  ;;  %v3163_v48 = vsel %vm1603_vm4, %v3131_v41, %v7667_v61  ;;  %v15200_v61 = vld [vmem:[#allocation45_spill] sm:$0xff]  ;;  %v7663_v0 = vunpack.i.h.bf16 %v11601_v36 }
 0x32a   : > { %v11652_v57 = vpop.permute.xlu0 %7690  ;;  %v3132_v34 = vsel %vm1570_vm3, %v3102_v9, %v7628_v55  ;;  %v7673_v43 = vunpack.i.h.bf16 %v7671_v53  ;;  %v7672_v30 = vunpack.i.l.bf16 %v7671_v53  ;;  %v3195_v14 = vsel %vm1636_vm5, %v3163_v48, %v7657_v18  ;;  %v15203_v9 = vld [vmem:[#allocation56_spill] sm:$0xff] }
 0x32b   : > { %7960 = vrot.lane.b32.xlu1 %v15191_v19, %s8822_s27  ;;  %v3164_v13 = vsel %vm1603_vm4, %v3132_v34, %v7668_v3  ;;  %v7662_v55 = vunpack.i.l.bf16 %v11601_v36  ;;  %v7692_v48 = vunpack.i.l.bf16 %v11652_v57  ;;  %v7693_v18 = vunpack.i.h.bf16 %v11652_v57 }
 0x32c   : > { %7980 = vrot.lane.b32.xlu0 %v7979_v49, %s14791_s15  ;;  %v3196_v22 = vsel %vm1636_vm5, %v3164_v13, %v7658_v17  ;;  %v7687_v57 = vunpack.i.l.bf16 %v11633_v59  ;;  %s15232_s15 = smov 48  }
 0x32d   : > { %v7681_v26 = vpop.permute.xlu1 %7680  ;;  %v3228_v27 = vsel %vm1669_vm6, %v3196_v22, %v7673_v43 }
 0x32e   : > { %v7682_v21 = vunpack.i.l.bf16 %v7681_v26  ;;  %v11670_v58 = vpop.permute.xlu0 %7700  ;;  %v7683_v15 = vunpack.i.h.bf16 %v7681_v26  ;;  %v7653_v26 = vunpack.i.h.bf16 %v11590_v56 }
 0x32f   : > { %7975 = vrot.lane.b32.xlu1 %v7974_v37, %s15089_s25  ;;  %v7702_v3 = vunpack.i.l.bf16 %v11670_v58  ;;  %v7703_v41 = vunpack.i.h.bf16 %v11670_v58 }
 0x330   : > { %v3290_v23 = vsel %vm1735_vm8, %v3258_v2, %v7682_v21  ;;  %7985 = vrot.lane.b32.xlu0 %v7979_v49, %s15093_s16  ;;  %v3227_v49 = vsel %vm1669_vm6, %v3195_v14, %v7672_v30  ;;  %v3104_v56 = vsel %vm1537_vm2, %v15203_v9, %v7653_v26 }
 0x331   : > { %v11678_v29 = vpop.permute.xlu1 %7695  ;;  %v3321_v42 = vpack.c.bf16 %v3290_v23, %v3289_v10  ;;  %v15199_v10 = vld [vmem:[#allocation82_spill] sm:$0xff]  ;;  %v3134_v13 = vsel %vm1570_vm3, %v3104_v56, %v7663_v0  ;;  %v15207_v0 = vld [vmem:[#allocation111_spill] sm:$0xff] }
 0x332   : > { %v7706_v50 = vpop.permute.xlu0 %7705  ;;  %v3103_v23 = vsel %vm1537_vm2, %v15199_v10, %v7652_v20  ;;  %v3166_v36 = vsel %vm1603_vm4, %v3134_v13, %v7703_v41  ;;  %v15204_v10 = vld [vmem:[#allocation33_spill] sm:$0xff] }
 0x333   : > { %3526 = vmatmul.mubr.bf16.gmra.mrb[16].mxu1 %v3321_v42  ;;  %v15201_v42 = vld [vmem:[#allocation83_spill] sm:$0xff]  ;;  %v3133_v34 = vsel %vm1570_vm3, %v3103_v23, %v7662_v55  ;;  %v7708_v17 = vunpack.i.h.bf16 %v7706_v50 }
 0x334   : > { %6692 = vmatprep.mubr.msk.bf16.mxu1 %vm1537_vm2, %v15198_v1  ;;  %7990 = vrot.lane.b32.xlu0 %v7974_v37, %s15090_s17  ;;  %v15202_v52 = vpack.c.bf16 %v15200_v61, %v15201_v42  ;;  %v3165_v28 = vsel %vm1603_vm4, %v3133_v34, %v7702_v3  ;;  %v7707_v1 = vunpack.i.l.bf16 %v7706_v50  ;;  %v7688_v50 = vunpack.i.h.bf16 %v11633_v59  ;;  %v15205_v23 = vld [vmem:[#allocation63_spill] sm:$0xff] }
 0x335   : > { %v7716_v16 = vpop.permute.xlu1 %7715  ;;  %v3197_v58 = vsel %vm1636_vm5, %v3165_v28, %v7692_v48  ;;  %v3105_v59 = vsel %vm1537_vm2, %v15204_v10, %v7687_v57 }
 0x336   : > { %v7711_v40 = vpop.permute.xlu0 %7710  ;;  %v7717_v53 = vunpack.i.l.bf16 %v7716_v16  ;;  %v3229_v22 = vsel %vm1669_vm6, %v3197_v58, %v7707_v1  ;;  %v3106_v3 = vsel %vm1537_vm2, %v15205_v23, %v7688_v50 }
 0x337   : > { %v7713_v38 = vunpack.i.h.bf16 %v7711_v40  ;;  %v7712_v19 = vunpack.i.l.bf16 %v7711_v40 }
 0x339   : > { %v11700_v51 = vpop.permute.xlu1 %7720  ;;  %v3259_v37 = vsel %vm1702_vm7, %v3227_v49, %v7712_v19  ;;  %v3260_v4 = vsel %vm1702_vm7, %v3228_v27, %v7713_v38  ;;  %v3198_v38 = vsel %vm1636_vm5, %v3166_v36, %v7693_v18 }
 0x33a   : > { %v11704_v32 = vpop.permute.xlu0 %7730  ;;  %v3291_v46 = vsel %vm1735_vm8, %v3259_v37, %v7683_v15  ;;  %v3292_v21 = vsel %vm1735_vm8, %v3260_v4, %v7717_v53  ;;  %v3230_v27 = vsel %vm1669_vm6, %v3198_v38, %v7708_v17  ;;  %v7718_v15 = vunpack.i.h.bf16 %v7716_v16 }
 0x33b   : > { %v3323_v2 = vpack.c.bf16 %v3292_v21, %v3291_v46  ;;  %v7698_v46 = vunpack.i.h.bf16 %v11678_v29  ;;  %v7697_v21 = vunpack.i.l.bf16 %v11678_v29  ;;  %v7722_v50 = vunpack.i.l.bf16 %v11700_v51 }
 0x33d   : > { %v11709_v63 = vpop.permute.xlu1 %7725  ;;  %3534 = vmatmul.mubr.bf16.gmra.mrb[20].mxu1 %v3323_v2  ;;  %v3135_v42 = vsel %vm1570_vm3, %v3105_v59, %v7697_v21  ;;  %v3136_v29 = vsel %vm1570_vm3, %v3106_v3, %v7698_v46  ;;  %v7732_v46 = vunpack.i.l.bf16 %v11704_v32  ;;  %v7733_v59 = vunpack.i.h.bf16 %v11704_v32  ;;  %v15213_v3 = vld [vmem:[#allocation93_spill] sm:$0xff] }
 0x33e   : > { %v7746_v25 = vpop.permute.xlu0 %7745  ;;  %6693 = vmatprep.mubr.msk.bf16.mxu1 %vm1537_vm2, %v15202_v52  ;;  %v15206_v52 = vld [vmem:[#allocation31_spill] sm:$0xff]  ;;  %v7728_v1 = vunpack.i.h.bf16 %v11709_v63  ;;  %v7727_v13 = vunpack.i.l.bf16 %v11709_v63 }
 0x33f   : > { %v7747_v43 = vunpack.i.l.bf16 %v7746_v25  ;;  %v7748_v40 = vunpack.i.h.bf16 %v7746_v25  ;;  %v15208_v9 = vpack.c.bf16 %v15206_v52, %v15207_v0 }
 0x341   : > { %v7736_v35 = vpop.permute.xlu1 %7735  ;;  %v3261_v49 = vsel %vm1702_vm7, %v3229_v22, %v7747_v43  ;;  %v3262_v4 = vsel %vm1702_vm7, %v3230_v27, %v7748_v40 }
 0x342   : > { %v11725_v62 = vpop.permute.xlu0 %7755  ;;  %v3293_v20 = vsel %vm1735_vm8, %v3261_v49, %v7718_v15  ;;  %v7738_v26 = vunpack.i.h.bf16 %v7736_v35  ;;  %v7737_v55 = vunpack.i.l.bf16 %v7736_v35 }
 0x344   : > { %v3168_v35 = vsel %vm1603_vm4, %v3136_v29, %v7738_v26  ;;  %v3167_v56 = vsel %vm1603_vm4, %v3135_v42, %v7737_v55  ;;  %v15210_v55 = vld [vmem:[#allocation92_spill] sm:$0xff] }
 0x345   : > { %v7741_v30 = vpop.permute.xlu1 %7740  ;;  %v3199_v43 = vsel %vm1636_vm5, %v3167_v56, %v7727_v13  ;;  %v3200_v36 = vsel %vm1636_vm5, %v3168_v35, %v7728_v1 }
 0x346   : > { %v11733_v14 = vpop.permute.xlu0 %7760  ;;  %v7743_v41 = vunpack.i.h.bf16 %v7741_v30  ;;  %v7742_v34 = vunpack.i.l.bf16 %v7741_v30 }
 0x347   : > { %v7762_v56 = vunpack.i.l.bf16 %v11733_v14  ;;  %v7763_v13 = vunpack.i.h.bf16 %v11733_v14  ;;  %v7757_v14 = vunpack.i.l.bf16 %v11725_v62 }
 0x348   : > { %v3231_v58 = vsel %vm1669_vm6, %v3199_v43, %v7742_v34  ;;  %v3232_v40 = vsel %vm1669_vm6, %v3200_v36, %v7743_v41 }
 0x349   : > { %v7751_v19 = vpop.permute.xlu1 %7750 }
 0x34a   : > { %v7752_v53 = vunpack.i.l.bf16 %v7751_v19  ;;  %v11741_v37 = vpop.permute.xlu0 %7770  ;;  %v7753_v22 = vunpack.i.h.bf16 %v7751_v19  ;;  %v7723_v19 = vunpack.i.h.bf16 %v11700_v51 }
 0x34b   : > { %v7772_v26 = vunpack.i.l.bf16 %v11741_v37  ;;  %v7773_v42 = vunpack.i.h.bf16 %v11741_v37 }
 0x34c   : > { %v3294_v2 = vsel %vm1735_vm8, %v3262_v4, %v7752_v53  ;;  %v3108_v51 = vsel %vm1537_vm2, %v15213_v3, %v7723_v19 }
 0x34d   : > { %v11748_v16 = vpop.permute.xlu1 %7765  ;;  %v3325_v25 = vpack.c.bf16 %v3294_v2, %v3293_v20  ;;  %v15209_v20 = vld [vmem:[#allocation38_spill] sm:$0xff]  ;;  %v3138_v35 = vsel %vm1570_vm3, %v3108_v51, %v7733_v59  ;;  %v15217_v59 = vld [vmem:[#allocation101_spill] sm:$0xff] }
 0x34e   : > { %v7776_v61 = vpop.permute.xlu0 %7775  ;;  %v3107_v2 = vsel %vm1537_vm2, %v15209_v20, %v7722_v50  ;;  %v3170_v32 = vsel %vm1603_vm4, %v3138_v35, %v7773_v42  ;;  %v15214_v20 = vld [vmem:[#allocation94_spill] sm:$0xff] }
 0x34f   : > { %3542 = vmatmul.mubr.bf16.gmra.mrb[24].mxu1 %v3325_v25  ;;  %v15211_v25 = vld [vmem:[#allocation35_spill] sm:$0xff]  ;;  %v3137_v29 = vsel %vm1570_vm3, %v3107_v2, %v7732_v46  ;;  %v7778_v1 = vunpack.i.h.bf16 %v7776_v61  ;;  %v15215_v2 = vld [vmem:[#allocation102_spill] sm:$0xff] }
 0x350   : > { %6694 = vmatprep.mubr.msk.bf16.mxu1 %vm1537_vm2, %v15208_v9  ;;  %v15212_v10 = vpack.c.bf16 %v15210_v55, %v15211_v25  ;;  %v3169_v0 = vsel %vm1603_vm4, %v3137_v29, %v7772_v26  ;;  %v7777_v9 = vunpack.i.l.bf16 %v7776_v61  ;;  %v7758_v61 = vunpack.i.h.bf16 %v11725_v62 }
 0x351   : > { %v7786_v28 = vpop.permute.xlu1 %7785  ;;  %v3201_v37 = vsel %vm1636_vm5, %v3169_v0, %v7762_v56  ;;  %v3109_v62 = vsel %vm1537_vm2, %v15214_v20, %v7757_v14 }
 0x352   : > { %v7781_v48 = vpop.permute.xlu0 %7780  ;;  %v7787_v38 = vunpack.i.l.bf16 %v7786_v28  ;;  %v3233_v36 = vsel %vm1669_vm6, %v3201_v37, %v7777_v9  ;;  %v3110_v26 = vsel %vm1537_vm2, %v15215_v2, %v7758_v61 }
 0x353   : > { %v7783_v17 = vunpack.i.h.bf16 %v7781_v48  ;;  %v7782_v18 = vunpack.i.l.bf16 %v7781_v48 }
 0x355   : > { %v11768_v49 = vpop.permute.xlu1 %7790  ;;  %v3263_v30 = vsel %vm1702_vm7, %v3231_v58, %v7782_v18  ;;  %v3264_v27 = vsel %vm1702_vm7, %v3232_v40, %v7783_v17  ;;  %v3202_v17 = vsel %vm1636_vm5, %v3170_v32, %v7763_v13 }
 0x356   : > { %v11772_v63 = vpop.permute.xlu0 %7800  ;;  %v3295_v15 = vsel %vm1735_vm8, %v3263_v30, %v7753_v22  ;;  %v3296_v53 = vsel %vm1735_vm8, %v3264_v27, %v7787_v38  ;;  %v3234_v40 = vsel %vm1669_vm6, %v3202_v17, %v7778_v1  ;;  %v7788_v22 = vunpack.i.h.bf16 %v7786_v28 }
 0x357   : > { %v3327_v4 = vpack.c.bf16 %v3296_v53, %v3295_v15  ;;  %v7768_v15 = vunpack.i.h.bf16 %v11748_v16  ;;  %v7767_v53 = vunpack.i.l.bf16 %v11748_v16  ;;  %v7792_v61 = vunpack.i.l.bf16 %v11768_v49 }
 0x358   : > { %v7803_v20 = vunpack.i.h.bf16 %v11772_v63 }
 0x359   : > { %v11777_v57 = vpop.permute.xlu1 %7795  ;;  %3550 = vmatmul.mubr.bf16.gmra.mrb[28].mxu1 %v3327_v4  ;;  %v3139_v25 = vsel %vm1570_vm3, %v3109_v62, %v7767_v53  ;;  %v3140_v16 = vsel %vm1570_vm3, %v3110_v26, %v7768_v15  ;;  %v7802_v15 = vunpack.i.l.bf16 %v11772_v63 }
 0x35a   : > { %v7816_v21 = vpop.permute.xlu0 %7815  ;;  %6695 = vmatprep.mubr.msk.bf16.mxu1 %vm1537_vm2, %v15212_v10  ;;  %v15216_v10 = vld [vmem:[#allocation110_spill] sm:$0xff]  ;;  %v7798_v9 = vunpack.i.h.bf16 %v11777_v57  ;;  %v7797_v35 = vunpack.i.l.bf16 %v11777_v57 }
 0x35b   : > { %v7817_v41 = vunpack.i.l.bf16 %v7816_v21  ;;  %v7818_v48 = vunpack.i.h.bf16 %v7816_v21  ;;  %v15218_v3 = vpack.c.bf16 %v15216_v10, %v15217_v59 }
 0x35d   : > { %v7806_v23 = vpop.permute.xlu1 %7805  ;;  %v3265_v58 = vsel %vm1702_vm7, %v3233_v36, %v7817_v41  ;;  %v3266_v27 = vsel %vm1702_vm7, %v3234_v40, %v7818_v48 }
 0x35e   : > { %v11793_v52 = vpop.permute.xlu0 %7825  ;;  %v3297_v50 = vsel %vm1735_vm8, %v3265_v58, %v7788_v22  ;;  %v7808_v19 = vunpack.i.h.bf16 %v7806_v23  ;;  %v7807_v46 = vunpack.i.l.bf16 %v7806_v23 }
 0x360   : > { %v3172_v23 = vsel %vm1603_vm4, %v3140_v16, %v7808_v19  ;;  %v3171_v51 = vsel %vm1603_vm4, %v3139_v25, %v7807_v46  ;;  %v15219_v19 = vld [vmem:[#allocation46_spill] sm:$0xff]  ;;  %v15220_v46 = vld [vmem:[#allocation85_spill] sm:$0xff] }
 0x361   : > { %v7811_v34 = vpop.permute.xlu1 %7810  ;;  %v3203_v41 = vsel %vm1636_vm5, %v3171_v51, %v7797_v35  ;;  %v3204_v32 = vsel %vm1636_vm5, %v3172_v23, %v7798_v9 }
 0x362   : > { %v11801_v43 = vpop.permute.xlu0 %7830  ;;  %v7813_v42 = vunpack.i.h.bf16 %v7811_v34  ;;  %v7812_v29 = vunpack.i.l.bf16 %v7811_v34 }
 0x363   : > { %v7832_v59 = vunpack.i.l.bf16 %v11801_v43 }
 0x364   : > { %v3235_v37 = vsel %vm1669_vm6, %v3203_v41, %v7812_v29  ;;  %v3236_v48 = vsel %vm1669_vm6, %v3204_v32, %v7813_v42 }
 0x365   : > { %v7821_v18 = vpop.permute.xlu1 %7820 }
 0x366   : > { %v7822_v38 = vunpack.i.l.bf16 %v7821_v18  ;;  %v11809_v30 = vpop.permute.xlu0 %7840  ;;  %v7823_v36 = vunpack.i.h.bf16 %v7821_v18  ;;  %v7793_v18 = vunpack.i.h.bf16 %v11768_v49 }
 0x367   : > { %v7843_v2 = vunpack.i.h.bf16 %v11809_v30 }
 0x368   : > { %v3298_v4 = vsel %vm1735_vm8, %v3266_v27, %v7822_v38  ;;  %v3112_v49 = vsel %vm1537_vm2, %v11071_v45, %v7793_v18  ;;  %v7833_v45 = vunpack.i.h.bf16 %v11801_v43  ;;  %v7827_v43 = vunpack.i.l.bf16 %v11793_v52 }
 0x369   : > { %v11816_v28 = vpop.permute.xlu1 %7835  ;;  %v3329_v21 = vpack.c.bf16 %v3298_v4, %v3297_v50  ;;  %v3111_v50 = vsel %vm1537_vm2, %v11383_v31, %v7792_v61  ;;  %v7842_v4 = vunpack.i.l.bf16 %v11809_v30  ;;  %v3142_v10 = vsel %vm1570_vm3, %v3112_v49, %v7803_v20 }
 0x36a   : > { %v7846_v55 = vpop.permute.xlu0 %7845  ;;  %v3141_v26 = vsel %vm1570_vm3, %v3111_v50, %v7802_v15  ;;  %v3174_v63 = vsel %vm1603_vm4, %v3142_v10, %v7843_v2  ;;  %v15223_v50 = vld [vmem:[#allocation68_spill] sm:$0xff] }
 0x36b   : > { %3558 = vmatmul.mubr.bf16.gmra.mrb[32].mxu1 %v3329_v21  ;;  %v15221_v21 = vpack.c.bf16 %v15219_v19, %v15220_v46  ;;  %v3173_v31 = vsel %vm1603_vm4, %v3141_v26, %v7842_v4  ;;  %v7847_v16 = vunpack.i.l.bf16 %v7846_v55  ;;  %v7848_v51 = vunpack.i.h.bf16 %v7846_v55 }
 0x36c   : > { %6696 = vmatprep.mubr.msk.bf16.mxu1 %vm1537_vm2, %v15218_v3  ;;  %v3205_v30 = vsel %vm1636_vm5, %v3173_v31, %v7832_v59  ;;  %v3206_v35 = vsel %vm1636_vm5, %v3174_v63, %v7833_v45  ;;  %v7828_v55 = vunpack.i.h.bf16 %v11793_v52 }
 0x36d   : > { %v7856_v0 = vpop.permute.xlu1 %7855  ;;  %v3237_v9 = vsel %vm1669_vm6, %v3205_v30, %v7847_v16  ;;  %v3238_v32 = vsel %vm1669_vm6, %v3206_v35, %v7848_v51 }
 0x36e   : > { %v7851_v56 = vpop.permute.xlu0 %7850  ;;  %v7857_v17 = vunpack.i.l.bf16 %v7856_v0  ;;  %v3114_v52 = vsel %vm1537_vm2, %v11110_v24, %v7828_v55  ;;  %v15225_v55 = vld [vmem:[#allocation41_spill] sm:$0xff] }
 0x36f   : > { %v7853_v1 = vunpack.i.h.bf16 %v7851_v56  ;;  %v7852_v13 = vunpack.i.l.bf16 %v7851_v56 }
 0x371   : > { %v11836_v58 = vpop.permute.xlu1 %7860  ;;  %v3267_v34 = vsel %vm1702_vm7, %v3235_v37, %v7852_v13  ;;  %v3268_v40 = vsel %vm1702_vm7, %v3236_v48, %v7853_v1  ;;  %v7858_v1 = vunpack.i.h.bf16 %v7856_v0 }
 0x372   : > { %v11840_v57 = vpop.permute.xlu0 %7870  ;;  %v3299_v22 = vsel %vm1735_vm8, %v3267_v34, %v7823_v36  ;;  %v3300_v38 = vsel %vm1735_vm8, %v3268_v40, %v7857_v17  ;;  %v7838_v36 = vunpack.i.h.bf16 %v11816_v28  ;;  %v7837_v17 = vunpack.i.l.bf16 %v11816_v28 }
 0x373   : > { %v3331_v27 = vpack.c.bf16 %v3300_v38, %v3299_v22 }
 0x374   : > { %v3144_v28 = vsel %vm1570_vm3, %v3114_v52, %v7838_v36  ;;  %v7873_v36 = vunpack.i.h.bf16 %v11840_v57 }
 0x375   : > { %v11845_v14 = vpop.permute.xlu1 %7865  ;;  %3566 = vmatmul.mubr.bf16.gmra.mrb[36].mxu1 %v3331_v27  ;;  %v3113_v27 = vsel %vm1537_vm2, %v11408_v5, %v7827_v43  ;;  %v15226_v43 = vld [vmem:[#allocation84_spill] sm:$0xff] }
 0x376   : > { %v7886_v53 = vpop.permute.xlu0 %7885  ;;  %6697 = vmatprep.mubr.msk.bf16.mxu1 %vm1537_vm2, %v15221_v21  ;;  %v3143_v15 = vsel %vm1570_vm3, %v3113_v27, %v7837_v17  ;;  %v7868_v24 = vunpack.i.h.bf16 %v11845_v14 }
 0x377   : > { %v7887_v3 = vunpack.i.l.bf16 %v7886_v53  ;;  %v7888_v42 = vunpack.i.h.bf16 %v7886_v53  ;;  %v15222_v53 = vld [vmem:[#allocation104_spill] sm:$0xff] }
 0x378   : > { %v15224_v4 = vpack.c.bf16 %v15222_v53, %v15223_v50 }
 0x379   : > { %v7876_v62 = vpop.permute.xlu1 %7875  ;;  %v3269_v41 = vsel %vm1702_vm7, %v3237_v9, %v7887_v3  ;;  %v3270_v48 = vsel %vm1702_vm7, %v3238_v32, %v7888_v42  ;;  %v7862_v42 = vunpack.i.l.bf16 %v11836_v58  ;;  %v7872_v32 = vunpack.i.l.bf16 %v11840_v57 }
 0x37a   : > { %v11861_v25 = vpop.permute.xlu0 %7895  ;;  %v3301_v34 = vsel %vm1735_vm8, %v3269_v41, %v7858_v1  ;;  %v7878_v22 = vunpack.i.h.bf16 %v7876_v62  ;;  %v7877_v38 = vunpack.i.l.bf16 %v7876_v62  ;;  %v7867_v62 = vunpack.i.l.bf16 %v11845_v14 }
 0x37b   : > { %v3115_v1 = vsel %vm1537_vm2, %v11479_v8, %v7862_v42 }
 0x37c   : > { %v3176_v19 = vsel %vm1603_vm4, %v3144_v28, %v7878_v22  ;;  %v3175_v46 = vsel %vm1603_vm4, %v3143_v15, %v7877_v38  ;;  %v3145_v22 = vsel %vm1570_vm3, %v3115_v1, %v7872_v32 }
 0x37d   : > { %v7881_v23 = vpop.permute.xlu1 %7880  ;;  %v3207_v2 = vsel %vm1636_vm5, %v3175_v46, %v7867_v62  ;;  %v3208_v26 = vsel %vm1636_vm5, %v3176_v19, %v7868_v24 }
 0x37e   : > { %v11869_v29 = vpop.permute.xlu0 %7900  ;;  %v7883_v21 = vunpack.i.h.bf16 %v7881_v23  ;;  %v7882_v5 = vunpack.i.l.bf16 %v7881_v23 }
 0x37f   : > { %v7902_v27 = vunpack.i.l.bf16 %v11869_v29  ;;  %v7903_v53 = vunpack.i.h.bf16 %v11869_v29 }
 0x380   : > { %v3239_v10 = vsel %vm1669_vm6, %v3207_v2, %v7882_v5  ;;  %v3240_v59 = vsel %vm1669_vm6, %v3208_v26, %v7883_v21  ;;  %v15228_v2 = vpack.c.bf16 %v15193_v54, %v15192_v47 }
 0x381   : > { %v7891_v56 = vpop.permute.xlu1 %7890 }
 0x382   : > { %v7892_v13 = vunpack.i.l.bf16 %v7891_v56  ;;  %v7911_v37 = vpop.permute.xlu0 %7910  ;;  %v7893_v3 = vunpack.i.h.bf16 %v7891_v56  ;;  %v7863_v56 = vunpack.i.h.bf16 %v11836_v58 }
 0x383   : > { %v7913_v58 = vunpack.i.h.bf16 %v7911_v37 }
 0x384   : > { %v3302_v40 = vsel %vm1735_vm8, %v3270_v48, %v7892_v13  ;;  %v7912_v13 = vunpack.i.l.bf16 %v7911_v37  ;;  %v15227_v48 = vpack.c.bf16 %v15225_v55, %v15226_v43 }
 0x385   : > { %v11882_v61 = vpop.permute.xlu1 %7905  ;;  %v3333_v0 = vpack.c.bf16 %v3302_v40, %v3301_v34  ;;  %v3116_v34 = vsel %vm1537_vm2, %v11177_v33, %v7863_v56 }
 0x386   : > { %v7916_v18 = vpop.permute.xlu0 %7915  ;;  %v3177_v38 = vsel %vm1603_vm4, %v3145_v22, %v7912_v13  ;;  %v11991_v22 = vld [vmem:[%s14567_s8] ss:$0 sm:$0xff] }
 0x387   : > { %3574 = vmatmul.mubr.bf16.gmra.mrb[40].mxu1 %v3333_v0  ;;  %v7917_v8 = vunpack.i.l.bf16 %v7916_v18  ;;  %v3146_v0 = vsel %vm1570_vm3, %v3116_v34, %v7873_v36  ;;  %v7918_v28 = vunpack.i.h.bf16 %v7916_v18  ;;  %v3209_v33 = vsel %vm1636_vm5, %v3177_v38, %v7902_v27  ;;  %v15231_v34 = vld [vmem:[#allocation14_spill] sm:$0xff] }
 0x388   : > { %6698 = vmatprep.mubr.msk.bf16.mxu1 %vm1537_vm2, %v15224_v4  ;;  %v3178_v57 = vsel %vm1603_vm4, %v3146_v0, %v7913_v58  ;;  %v11984_v58 = vld [vmem:[%s14566_s7] ss:$0 sm:$0xff] }
 0x389   : > { %v7926_v20 = vpop.permute.xlu1 %7925  ;;  %v3241_v50 = vsel %vm1669_vm6, %v3209_v33, %v7917_v8  ;;  %v3210_v4 = vsel %vm1636_vm5, %v3178_v57, %v7903_v53  ;;  %v15233_v33 = vld [vmem:[#allocation16_spill] sm:$0xff] }
 0x38a   : > { %v7921_v49 = vpop.permute.xlu0 %7920  ;;  %v7927_v63 = vunpack.i.l.bf16 %v7926_v20  ;;  %v3242_v21 = vsel %vm1669_vm6, %v3210_v4, %v7918_v28  ;;  %v7928_v5 = vunpack.i.h.bf16 %v7926_v20  ;;  %v8673_v20 = vld [vmem:[%s14563_s4] ss:$0 sm:$0xff] }
 0x38b   : > { %v7923_v31 = vunpack.i.h.bf16 %v7921_v49  ;;  %v7922_v16 = vunpack.i.l.bf16 %v7921_v49 }
 0x38d   : > { %v11902_v51 = vpop.permute.xlu1 %7930  ;;  %v3271_v23 = vsel %vm1702_vm7, %v3239_v10, %v7922_v16  ;;  %v3272_v45 = vsel %vm1702_vm7, %v3240_v59, %v7923_v31  ;;  %v8674_v59 = vld [vmem:[%s14564_s5] ss:$0 sm:$0xff] }
 0x38e   : > { %v3303_v14 = vsel %vm1735_vm8, %v3271_v23, %v7893_v3  ;;  %v3304_v30 = vsel %vm1735_vm8, %v3272_v45, %v7927_v63  ;;  %v11909_v9 = vpop.permute.xlu0 %7940 }
 0x38f   : > { %v3335_v41 = vpack.c.bf16 %v3304_v30, %v3303_v14 }
 0x391   : > { %v11911_v35 = vpop.permute.xlu1 %7935  ;;  %3582 = vmatmul.mubr.bf16.gmra.mrb[44].mxu1 %v3335_v41 }
 0x392   : > { %6699 = vmatprep.mubr.msk.bf16.mxu1 %vm1537_vm2, %v15227_v48  ;;  %v7956_v40 = vpop.permute.xlu0 %7955 }
 0x393   : > { %v7957_v52 = vunpack.i.l.bf16 %v7956_v40  ;;  %v7958_v37 = vunpack.i.h.bf16 %v7956_v40 }
 0x395   : > { %v11922_v17 = vpop.permute.xlu1 %7945  ;;  %v3273_v46 = vsel %vm1702_vm7, %v3241_v50, %v7957_v52  ;;  %v3274_v18 = vsel %vm1702_vm7, %v3242_v21, %v7958_v37  ;;  %v15234_v50 = vmov 0.0  }
 0x396   : > { %v3305_v29 = vsel %vm1735_vm8, %v3273_v46, %v7928_v5 }
 0x399   : > { %v11930_v15 = vpop.permute.xlu1 %7950 }
 0x39d   : > { %v11937_v19 = vpop.permute.xlu1 %7960 }
 0x39e   : > { %v7962_v24 = vunpack.i.l.bf16 %v11937_v19 }
 0x3a0   : > { %v3306_v62 = vsel %vm1735_vm8, %v3274_v18, %v7962_v24 }
 0x3a1   : > { %v3337_v49 = vpack.c.bf16 %v3306_v62, %v3305_v29 }
 0x3a3   : > { %3590 = vmatmul.mubr.bf16.gmra.mrb[48].mxu1 %v3337_v49 }
 0x3a4   : > { %6700 = vmatprep.mubr.msk.bf16.mxu1 %vm1537_vm2, %v15228_v2 }
 0x3b5   : > { %v11949_v26 = vpop.f32.mrb[60].mxu0 }
 0x3b6   : > { %15229 = vst [vmem:[#allocation112_spill] sm:$0xff] %v11949_v26  ;;  %v2118_v31 = vmul.f32 %v8673_v20, %v11949_v26  ;;  %v2076_v16 = vpop.f32.mrb[61].mxu0 }
 0x3b7   : > { %v11955_v10 = vpop.f32.mrb[62].mxu0 }
 0x3b8   : > { %15230 = vst [vmem:[#allocation36_spill] sm:$0xff] %v11955_v10  ;;  %v2157_v3 = vadd.f32 %v8674_v59, %v2118_v31  ;;  %v2119_v47 = vmul.f32 %v8673_v20, %v11955_v10  ;;  %v2079_v54 = vpop.f32.mrb[63].mxu0 }
 0x3ba   : > { %v2189_v63 = vmax.f32 %v2157_v3, 0.0  ;;  %v2158_v23 = vadd.f32 %v8674_v59, %v2119_v47 }
 0x3bc   : > { %v2190_v45 = vmax.f32 %v2158_v23, 0.0  ;;  %v7994_v14 = vpack.i.bf16 %v2189_v63, %v11290_v11  ;;  %v2388_v30 = vrot.slane %v2189_v63, 7  ;;  %v2393_v42 = vrot.slane %v2189_v63, 1 }
 0x3be   : > { %v2389_v41 = vrot.slane %v2190_v45, 7  ;;  %7995 = vrot.lane.b32.xlu1 %v7994_v14, %s8822_s27  ;;  %3061 = vrot.lane.b32.xlu0 %v2190_v45, %s8822_s27  ;;  %v7999_v56 = vpack.i.bf16 %v2190_v45, %v2189_v63  ;;  %v2394_v32 = vrot.slane %v2190_v45, 1  ;;  %v2392_v13 = vsel %vm633_vm1, 0.0, %v2388_v30  ;;  %s14795_s27 = smov 56  }
 0x3c0   : > { %v2390_v1 = vsel %vm633_vm1, %v2388_v30, %v2389_v41  ;;  %v11967_v55 = vsel %vm729_vm0, %v2393_v42, %v2394_v32  ;;  %v11970_v43 = vsel %vm729_vm0, %v2394_v32, 0.0 }
 0x3c1   : > { %v8004_v11 = vpack.i.bf16 %v2390_v1, %v2392_v13  ;;  %v8014_v48 = vpack.i.bf16 %v11970_v43, %v11967_v55 }
 0x3c2   : > { %8000 = vrot.lane.b32.xlu1 %v7999_v56, %s14797_s24  ;;  %8020 = vrot.lane.b32.xlu0 %v15231_v34, %s14826_s19  ;;  %s15236_s24 = smov 56  }
 0x3c6   : > { %8005 = vrot.lane.b32.xlu1 %v8004_v11, %s15232_s15 }
 0x3ca   : > { %8010 = vrot.lane.b32.xlu1 %v8004_v11, %s15093_s16 }
 0x3cd   : > { %v11986_v40 = vpop.f32.mrb[0].mxu1 }
 0x3ce   : > { %v3629_v38 = vmul.f32 %v11984_v58, %v11986_v40  ;;  %v3497_v8 = vpop.f32.mrb[1].mxu1  ;;  %8015 = vrot.lane.b32.xlu1 %v8014_v48, %s15090_s17  ;;  %s14793_s17 = smov 8  }
 0x3cf   : > { %v11996_v0 = vpop.f32.mrb[2].mxu1 }
 0x3d0   : > { %v3668_v27 = vadd.f32 %v11991_v22, %v3629_v38  ;;  %v3630_v52 = vmul.f32 %v11984_v58, %v11996_v0  ;;  %v3500_v57 = vpop.f32.mrb[3].mxu1 }
 0x3d2   : > { %v3700_v28 = vmax.f32 %v3668_v27, 0.0  ;;  %v3669_v53 = vadd.f32 %v11991_v22, %v3630_v52  ;;  %8025 = vrot.lane.b32.xlu1 %v15233_v33, %s15232_s15  ;;  %v8667_v27 = vld [vmem:[%s14568_s9] sm:$0xff]  }
 0x3d3   : > { %6790 = vmatprep.subr.bf16.mxu0 %v8667_v27 }
 0x3d4   : > { %v3701_v37 = vmax.f32 %v3669_v53, 0.0  ;;  %v8029_v4 = vpack.i.bf16 %v3700_v28, %v15234_v50  ;;  %v3852_v46 = vrot.slane %v3700_v28, 1  ;;  %v3762_v18 = vrot.slane %v3700_v28, 7  ;;  %6791 = vmatpush3.bf16.msra.mxu0 %v8667_v27 }
 0x3d6   : > { %v3763_v21 = vrot.slane %v3701_v37, 7  ;;  %8030 = vrot.lane.b32.xlu0 %v8029_v4, %s14793_s17  ;;  %4604 = vrot.lane.b32.xlu1 %v15234_v50, %s14795_s27  ;;  %v8034_v5 = vpack.i.bf16 %v3701_v37, %v3700_v28  ;;  %v3853_v24 = vrot.slane %v3701_v37, 1  ;;  %v12022_v3 = vsel %vm633_vm1, 0.0, %v3762_v18 }
 0x3d8   : > { %v3854_v29 = vsel %vm729_vm0, %v3852_v46, %v3853_v24  ;;  %v3912_v62 = vsel %vm729_vm0, %v3853_v24, 0.0  ;;  %v12011_v49 = vsel %vm633_vm1, %v3762_v18, %v3763_v21  ;;  %v12013_v2 = vpop.f32.mrb[4].mxu1 }
 0x3d9   : > { %v8039_v20 = vpack.i.bf16 %v3912_v62, %v3854_v29  ;;  %v3631_v31 = vmul.f32 %v11984_v58, %v12013_v2  ;;  %v3505_v16 = vpop.f32.mrb[5].mxu1  ;;  %v8044_v23 = vpack.i.bf16 %v12011_v49, %v12022_v3 }
 0x3da   : > { %8035 = vrot.lane.b32.xlu0 %v8034_v5, %s15089_s25  ;;  %v12018_v59 = vpop.f32.mrb[6].mxu1  ;;  %v8669_v5 = vld [vmem:[%s14568_s9 + $0x10] sm:$0xff]   ;;  %v8670_v16 = vld [vmem:[%s14568_s9 + $0x18] sm:$0xff]  }
 0x3db   : > { %8040 = vrot.lane.b32.xlu1 %v8039_v20, %s14826_s19  ;;  %v3670_v47 = vadd.f32 %v11991_v22, %v3631_v31  ;;  %v3632_v54 = vmul.f32 %v11984_v58, %v12018_v59  ;;  %v3508_v63 = vpop.f32.mrb[7].mxu1 }
 0x3dd   : > { %v3702_v45 = vmax.f32 %v3670_v47, 0.0  ;;  %v3671_v14 = vadd.f32 %v11991_v22, %v3632_v54 }
 0x3de   : > { %8045 = vrot.lane.b32.xlu0 %v8044_v23, %s14799_s22 }
 0x3df   : > { %v3703_v30 = vmax.f32 %v3671_v14, 0.0  ;;  %v8054_v42 = vpack.i.bf16 %v3702_v45, %v3701_v37  ;;  %v3765_v56 = vrot.slane %v3702_v45, 7  ;;  %v3855_v1 = vrot.slane %v3702_v45, 1  ;;  %v8668_v37 = vld [vmem:[%s14568_s9 + $0x8] sm:$0xff]  }
 0x3e0   : > { %6792 = vmatprep.subr.bf16.mxu0 %v8668_v37 }
 0x3e1   : > { %8055 = vrot.lane.b32.xlu1 %v8054_v42, %s14793_s17  ;;  %v8059_v41 = vpack.i.bf16 %v3703_v30, %v3702_v45  ;;  %v3766_v32 = vrot.slane %v3703_v30, 7  ;;  %v3856_v13 = vrot.slane %v3703_v30, 1  ;;  %v12044_v52 = vsel %vm633_vm1, 0.0, %v3765_v56  ;;  %6793 = vmatpush3.bf16.msra.mxu0 %v8668_v37  ;;  %s15239_s17 = smov 24  }
 0x3e2   : > { %8050 = vrot.lane.b32.xlu0 %v8039_v20, %s14817_s23  ;;  %6794 = vmatprep.subr.bf16.mxu0 %v8669_v5 }
 0x3e3   : > { %v12034_v11 = vsel %vm633_vm1, %v3765_v56, %v3766_v32  ;;  %v3857_v48 = vsel %vm729_vm0, %v3855_v1, %v3856_v13  ;;  %v3913_v38 = vsel %vm729_vm0, %v3856_v13, 0.0  ;;  %v8671_v32 = vld [vmem:[%s14568_s9 + $0x20] ss:$0 sps:$4 sm:$0xff]  }
 0x3e4   : > { %v8069_v8 = vpack.i.bf16 %v3913_v38, %v3857_v48  ;;  %v8074_v57 = vpack.i.bf16 %v12034_v11, %v12044_v52 }
 0x3e5   : > { %8060 = vrot.lane.b32.xlu1 %v8059_v41, %s15089_s25  ;;  %6795 = vmatpush3.bf16.msra.mxu0 %v8669_v5 }
 0x3e6   : > { %8065 = vrot.lane.b32.xlu0 %v8059_v41, %s14795_s27  ;;  %6796 = vmatprep.subr.bf16.mxu0 %v8670_v16  ;;  %s15237_s27 = smov 8  }
 0x3e9   : > { %8075 = vrot.lane.b32.xlu1 %v8074_v57, %s14799_s22  ;;  %s15235_s22 = smov 64   ;;  %6797 = vmatpush3.bf16.msra.mxu0 %v8670_v16 }
 0x3ea   : > { %v12048_v28 = vpop.f32.mrb[8].mxu1  ;;  %8070 = vrot.lane.b32.xlu0 %v8069_v8, %s14826_s19  ;;  %6866 = vmatprep.subr.msk.bf16.mxu0 %vm5094_vm9, %v8671_v32 }
 0x3eb   : > { %v3633_v53 = vmul.f32 %v11984_v58, %v12048_v28  ;;  %v3513_v33 = vpop.f32.mrb[9].mxu1 }
 0x3ec   : > { %v12057_v50 = vpop.f32.mrb[10].mxu1 }
 0x3ed   : > { %v3672_v4 = vadd.f32 %v11991_v22, %v3633_v53  ;;  %v3634_v46 = vmul.f32 %v11984_v58, %v12057_v50  ;;  %v3516_v21 = vpop.f32.mrb[11].mxu1  ;;  %8080 = vrot.lane.b32.xlu1 %v8069_v8, %s14817_s23 }
 0x3ee   : > { %8085 = vrot.lane.b32.xlu0 %v8074_v57, %s15232_s15 }
 0x3ef   : > { %v3704_v24 = vmax.f32 %v3672_v4, 0.0  ;;  %v3673_v18 = vadd.f32 %v11991_v22, %v3634_v46 }
 0x3f1   : > { %v3705_v29 = vmax.f32 %v3673_v18, 0.0  ;;  %v8094_v62 = vpack.i.bf16 %v3704_v24, %v3703_v30  ;;  %v3858_v20 = vrot.slane %v3704_v24, 1  ;;  %v3768_v31 = vrot.slane %v3704_v24, 7 }
 0x3f2   : > { %8090 = vrot.lane.b32.xlu0 %v8069_v8, %s15235_s22  ;;  %v5096_v8 = vsel %vm5094_vm9, %v8671_v32, 0 }
 0x3f3   : > { %v8104_v47 = vpack.i.bf16 %v3705_v29, %v3704_v24  ;;  %v3859_v54 = vrot.slane %v3705_v29, 1  ;;  %v3769_v63 = vrot.slane %v3705_v29, 7  ;;  %v12093_v27 = vsel %vm633_vm1, 0.0, %v3768_v31  ;;  %6799 = vmatpush3.bf16.msra.mxu0 %v5096_v8 }
 0x3f4   : > { %v12078_v30 = vpop.f32.mrb[12].mxu1 }
 0x3f5   : > { %8105 = vrot.lane.b32.xlu1 %v8104_v47, %s15236_s24  ;;  %v3860_v23 = vsel %vm729_vm0, %v3858_v20, %v3859_v54  ;;  %v3914_v45 = vsel %vm729_vm0, %v3859_v54, 0.0  ;;  %v12076_v14 = vsel %vm633_vm1, %v3768_v31, %v3769_v63  ;;  %v3635_v41 = vmul.f32 %v11984_v58, %v12078_v30  ;;  %v3521_v56 = vpop.f32.mrb[13].mxu1 }
 0x3f6   : > { %v8109_v42 = vpack.i.bf16 %v3914_v45, %v3860_v23  ;;  %8095 = vrot.lane.b32.xlu0 %v8094_v62, %s15237_s27  ;;  %v12086_v1 = vpop.f32.mrb[14].mxu1  ;;  %v8119_v33 = vpack.i.bf16 %v12076_v14, %v12093_v27 }
 0x3f7   : > { %15238 = vst [vmem:[#allocation37_spill] sm:$0xff] %v12086_v1  ;;  %v3674_v13 = vadd.f32 %v11991_v22, %v3635_v41  ;;  %v3636_v48 = vmul.f32 %v11984_v58, %v12086_v1  ;;  %v3524_v38 = vpop.f32.mrb[15].mxu1 }
 0x3f9   : > { %8110 = vrot.lane.b32.xlu1 %v8109_v42, %s14826_s19  ;;  %v3706_v57 = vmax.f32 %v3674_v13, 0.0  ;;  %v3675_v53 = vadd.f32 %v11991_v22, %v3636_v48 }
 0x3fa   : > { %8100 = vrot.lane.b32.xlu0 %v8104_v47, %s15089_s25 }
 0x3fb   : > { %v3707_v37 = vmax.f32 %v3675_v53, 0.0  ;;  %v8134_v4 = vpack.i.bf16 %v3706_v57, %v3705_v29  ;;  %v3861_v46 = vrot.slane %v3706_v57, 1  ;;  %v3771_v21 = vrot.slane %v3706_v57, 7 }
 0x3fd   : > { %8120 = vrot.lane.b32.xlu1 %v8119_v33, %s15232_s15  ;;  %v8144_v5 = vpack.i.bf16 %v3707_v37, %v3706_v57  ;;  %v3862_v24 = vrot.slane %v3707_v37, 1  ;;  %v3772_v18 = vrot.slane %v3707_v37, 7 }
 0x3fe   : > { %8115 = vrot.lane.b32.xlu0 %v8119_v33, %s15239_s17 }
 0x3ff   : > { %v3863_v62 = vsel %vm729_vm0, %v3861_v46, %v3862_v24  ;;  %v3915_v20 = vsel %vm729_vm0, %v3862_v24, 0.0  ;;  %v12105_v31 = vsel %vm633_vm1, %v3771_v21, %v3772_v18 }
 0x400   : > { %v8149_v16 = vpack.i.bf16 %v3915_v20, %v3863_v62 }
 0x401   : > { %8125 = vrot.lane.b32.xlu1 %v8109_v42, %s15235_s22 }
 0x402   : > { %8130 = vrot.lane.b32.xlu0 %v8109_v42, %s14817_s23  ;;  %v12121_v42 = vsel %vm633_vm1, 0.0, %v3771_v21 }
 0x403   : > { %v8154_v13 = vpack.i.bf16 %v12105_v31, %v12121_v42 }
 0x405   : > { %8135 = vrot.lane.b32.xlu1 %v8134_v4, %s15237_s27 }
 0x406   : > { %v12109_v29 = vpop.f32.mrb[16].mxu1  ;;  %8145 = vrot.lane.b32.xlu0 %v8144_v5, %s15236_s24 }
 0x407   : > { %v3637_v47 = vmul.f32 %v11984_v58, %v12109_v29  ;;  %v3529_v54 = vpop.f32.mrb[17].mxu1 }
 0x408   : > { %v12114_v63 = vpop.f32.mrb[18].mxu1 }
 0x409   : > { %15240 = vst [vmem:[#allocation121_spill] sm:$0xff] %v12114_v63  ;;  %v3676_v23 = vadd.f32 %v11991_v22, %v3637_v47  ;;  %v3638_v45 = vmul.f32 %v11984_v58, %v12114_v63  ;;  %v3532_v41 = vpop.f32.mrb[19].mxu1  ;;  %8140 = vrot.lane.b32.xlu1 %v8144_v5, %s15089_s25 }
 0x40a   : > { %8150 = vrot.lane.b32.xlu0 %v8149_v16, %s14826_s19 }
 0x40b   : > { %v3708_v56 = vmax.f32 %v3676_v23, 0.0  ;;  %v3677_v32 = vadd.f32 %v11991_v22, %v3638_v45  ;;  %v12146_v45 = vpop.permute.xlu0 %7965 }
 0x40d   : > { %v3709_v48 = vmax.f32 %v3677_v32, 0.0  ;;  %8155 = vrot.lane.b32.xlu1 %v8154_v13, %s15239_s17  ;;  %v8174_v38 = vpack.i.bf16 %v3708_v56, %v3707_v37  ;;  %v3864_v8 = vrot.slane %v3708_v56, 1  ;;  %v3774_v57 = vrot.slane %v3708_v56, 7 }
 0x40e   : > { %8165 = vrot.lane.b32.xlu0 %v8154_v13, %s15232_s15 }
 0x40f   : > { %v8184_v53 = vpack.i.bf16 %v3709_v48, %v3708_v56  ;;  %v3865_v33 = vrot.slane %v3709_v48, 1  ;;  %v3775_v4 = vrot.slane %v3709_v48, 7 }
 0x410   : > { %v12135_v24 = vpop.f32.mrb[20].mxu1 }
 0x411   : > { %8160 = vrot.lane.b32.xlu1 %v8149_v16, %s14817_s23  ;;  %v3866_v46 = vsel %vm729_vm0, %v3864_v8, %v3865_v33  ;;  %v3916_v21 = vsel %vm729_vm0, %v3865_v33, 0.0  ;;  %v12133_v5 = vsel %vm633_vm1, %v3774_v57, %v3775_v4  ;;  %15241 = vst [vmem:[#allocation87_spill] sm:$0xff] %v12135_v24  ;;  %v3639_v37 = vmul.f32 %v11984_v58, %v12135_v24  ;;  %v3537_v62 = vpop.f32.mrb[21].mxu1 }
 0x412   : > { %v8189_v18 = vpack.i.bf16 %v3916_v21, %v3866_v46  ;;  %8170 = vrot.lane.b32.xlu0 %v8149_v16, %s15235_s22  ;;  %v12140_v20 = vpop.f32.mrb[22].mxu1  ;;  %v12154_v16 = vsel %vm633_vm1, 0.0, %v3774_v57 }
 0x413   : > { %15242 = vst [vmem:[#allocation90_spill] sm:$0xff] %v12140_v20  ;;  %v3678_v47 = vadd.f32 %v11991_v22, %v3639_v37  ;;  %v3640_v54 = vmul.f32 %v11984_v58, %v12140_v20  ;;  %v3540_v23 = vpop.f32.mrb[23].mxu1  ;;  %v8199_v8 = vpack.i.bf16 %v12133_v5, %v12154_v16  ;;  %v12162_v37 = vpop.permute.xlu0 %7970 }
 0x414   : > { %v7898_v23 = vunpack.i.h.bf16 %v11861_v25 }
 0x415   : > { %8185 = vrot.lane.b32.xlu1 %v8184_v53, %s15236_s24  ;;  %v3710_v41 = vmax.f32 %v3678_v47, 0.0  ;;  %v3679_v56 = vadd.f32 %v11991_v22, %v3640_v54 }
 0x416   : > { %8175 = vrot.lane.b32.xlu0 %v8174_v38, %s15237_s27 }
 0x417   : > { %v12150_v32 = vmax.f32 %v3679_v56, 0.0  ;;  %v8214_v13 = vpack.i.bf16 %v3710_v41, %v3709_v48  ;;  %v3867_v33 = vrot.slane %v3710_v41, 1  ;;  %v3777_v4 = vrot.slane %v3710_v41, 7  ;;  %v12179_v56 = vpop.permute.xlu0 %7980 }
 0x419   : > { %8190 = vrot.lane.b32.xlu1 %v8189_v18, %s14826_s19  ;;  %v8224_v46 = vpack.i.bf16 %v12150_v32, %v3710_v41  ;;  %v3868_v21 = vrot.slane %v12150_v32, 1  ;;  %v3778_v38 = vrot.slane %v12150_v32, 7  ;;  %v7907_v41 = vunpack.i.l.bf16 %v11882_v61 }
 0x41a   : > { %8180 = vrot.lane.b32.xlu0 %v8184_v53, %s15089_s25  ;;  %v7897_v53 = vunpack.i.l.bf16 %v11861_v25 }
 0x41b   : > { %v3869_v57 = vsel %vm729_vm0, %v3867_v33, %v3868_v21  ;;  %v3917_v48 = vsel %vm729_vm0, %v3868_v21, 0.0  ;;  %v12168_v62 = vsel %vm633_vm1, %v3777_v4, %v3778_v38  ;;  %v7933_v38 = vunpack.i.h.bf16 %v11902_v51 }
 0x41c   : > { %v12170_v47 = vpack.i.bf16 %v3917_v48, %v3869_v57  ;;  %v7932_v57 = vunpack.i.l.bf16 %v11902_v51 }
 0x41d   : > { %8200 = vrot.lane.b32.xlu1 %v8199_v8, %s15232_s15 }
 0x41e   : > { %8195 = vrot.lane.b32.xlu0 %v8199_v8, %s15239_s17  ;;  %v7908_v8 = vunpack.i.h.bf16 %v11882_v61  ;;  %v3118_v61 = vsel %vm1537_vm2, %v11217_v7, %v7898_v23  ;;  %v7938_v7 = vunpack.i.h.bf16 %v11911_v35 }
 0x421   : > { %8205 = vrot.lane.b32.xlu1 %v8189_v18, %s15235_s22 }
 0x422   : > { %v12175_v54 = vpop.f32.mrb[24].mxu1  ;;  %8210 = vrot.lane.b32.xlu0 %v8189_v18, %s14817_s23 }
 0x423   : > { %15243 = vst [vmem:[#allocation97_spill] sm:$0xff] %v12175_v54  ;;  %v3641_v33 = vmul.f32 %v11984_v58, %v12175_v54  ;;  %v3545_v21 = vpop.f32.mrb[25].mxu1 }
 0x424   : > { %v12187_v48 = vpop.f32.mrb[26].mxu1  ;;  %v3117_v21 = vsel %vm1537_vm2, %v11527_v39, %v7897_v53  ;;  %v7947_v39 = vunpack.i.l.bf16 %v11922_v17  ;;  %v7986_v53 = vpop.permute.xlu0 %7985 }
 0x425   : > { %15244 = vst [vmem:[#allocation73_spill] sm:$0xff] %v12187_v48  ;;  %v3680_v25 = vadd.f32 %v11991_v22, %v3641_v33  ;;  %v3642_v36 = vmul.f32 %v11984_v58, %v12187_v48  ;;  %v3548_v10 = vpop.f32.mrb[27].mxu1  ;;  %8215 = vrot.lane.b32.xlu1 %v8214_v13, %s15237_s27  ;;  %v3147_v18 = vsel %vm1570_vm3, %v3117_v21, %v7907_v41  ;;  %v7952_v21 = vunpack.i.l.bf16 %v11930_v15 }
 0x426   : > { %8225 = vrot.lane.b32.xlu0 %v8224_v46, %s15236_s24  ;;  %v3148_v33 = vsel %vm1570_vm3, %v3118_v61, %v7908_v8  ;;  %v3119_v10 = vsel %vm1537_vm2, %v11597_v6, %v7932_v57  ;;  %v3120_v13 = vsel %vm1537_vm2, %v11282_v60, %v7933_v38  ;;  %v7948_v6 = vunpack.i.h.bf16 %v11922_v17 }
 0x427   : > { %v12198_v26 = vmax.f32 %v3680_v25, 0.0  ;;  %v3681_v51 = vadd.f32 %v11991_v22, %v3642_v36  ;;  %v12213_v36 = vsel %vm633_vm1, 0.0, %v3777_v4  ;;  %v7937_v17 = vunpack.i.l.bf16 %v11911_v35 }
 0x428   : > { %v8234_v60 = vpack.i.bf16 %v12168_v62, %v12213_v36  ;;  %v3179_v25 = vsel %vm1603_vm4, %v3147_v18, %v7947_v39  ;;  %v7987_v61 = vunpack.i.l.bf16 %v7986_v53  ;;  %v3180_v35 = vsel %vm1603_vm4, %v3148_v33, %v7948_v6 }
 0x429   : > { %v12209_v23 = vmax.f32 %v3681_v51, 0.0  ;;  %8220 = vrot.lane.b32.xlu1 %v8224_v46, %s15089_s25  ;;  %v3870_v8 = vrot.slane %v12198_v26, 1  ;;  %v12233_v51 = vpop.permute.xlu1 %7975  ;;  %v15245_v48 = vrot.slane %v12198_v26, 7  ;;  %v7953_v18 = vunpack.i.h.bf16 %v11930_v15 }
 0x42a   : > { %8230 = vrot.lane.b32.xlu0 %v12170_v47, %s14826_s19  ;;  %v3211_v63 = vsel %vm1636_vm5, %v3179_v25, %v7937_v17  ;;  %v7988_v24 = vunpack.i.h.bf16 %v7986_v53  ;;  %v7967_v33 = vunpack.i.l.bf16 %v12146_v45 }
 0x42b   : > { %v12226_v46 = vpack.i.bf16 %v12209_v23, %v12198_v26  ;;  %v3871_v4 = vrot.slane %v12209_v23, 1  ;;  %v3781_v57 = vrot.slane %v12209_v23, 7  ;;  %v3243_v15 = vsel %vm1669_vm6, %v3211_v63, %v7952_v21 }
 0x42c   : > { %v12245_v39 = vpop.f32.mrb[28].mxu1  ;;  %v7963_v63 = vunpack.i.h.bf16 %v11937_v19  ;;  %v7983_v21 = vunpack.i.h.bf16 %v12179_v56 }
 0x42d   : > { %8235 = vrot.lane.b32.xlu1 %v8234_v60, %s15239_s17  ;;  %v3872_v41 = vsel %vm729_vm0, %v3870_v8, %v3871_v4  ;;  %v3918_v38 = vsel %vm729_vm0, %v3871_v4, 0.0  ;;  %v12241_v20 = vsel %vm633_vm1, %v15245_v48, %v3781_v57  ;;  %15246 = vst [vmem:[#allocation72_spill] sm:$0xff] %v12245_v39  ;;  %v3643_v8 = vmul.f32 %v11984_v58, %v12245_v39  ;;  %v3553_v4 = vpop.f32.mrb[29].mxu1 }
 0x42e   : > { %v12247_v54 = vpack.i.bf16 %v3918_v38, %v3872_v41  ;;  %8245 = vrot.lane.b32.xlu0 %v8234_v60, %s15232_s15  ;;  %v7943_v48 = vunpack.i.h.bf16 %v11909_v9  ;;  %v7942_v57 = vunpack.i.l.bf16 %v11909_v9  ;;  %v12257_v6 = vpop.f32.mrb[30].mxu1  ;;  %v3212_v41 = vsel %vm1636_vm5, %v3180_v35, %v7938_v7 }
 0x42f   : > { %15247 = vst [vmem:[#allocation106_spill] sm:$0xff] %v12257_v6  ;;  %v3682_v53 = vadd.f32 %v11991_v22, %v3643_v8  ;;  %v3644_v38 = vmul.f32 %v11984_v58, %v12257_v6  ;;  %v3556_v17 = vpop.f32.mrb[31].mxu1  ;;  %v3275_v9 = vsel %vm1702_vm7, %v3243_v15, %v7987_v61  ;;  %v3244_v60 = vsel %vm1669_vm6, %v3212_v41, %v7953_v18 }
 0x430   : > { %v12263_v25 = vpop.permute.xlu1 %7995  ;;  %v7982_v35 = vunpack.i.l.bf16 %v12179_v56  ;;  %v3276_v17 = vsel %vm1702_vm7, %v3244_v60, %v7988_v24  ;;  %v3149_v61 = vsel %vm1570_vm3, %v3119_v10, %v7942_v57  ;;  %v3307_v18 = vsel %vm1735_vm8, %v3275_v9, %v7963_v63 }
 0x431   : > { %8240 = vrot.lane.b32.xlu1 %v12170_v47, %s14817_s23  ;;  %v7997_v7 = vunpack.i.l.bf16 %v12263_v25  ;;  %v12273_v8 = vmax.f32 %v3682_v53, 0.0  ;;  %v3683_v4 = vadd.f32 %v11991_v22, %v3644_v38  ;;  %v3150_v15 = vsel %vm1570_vm3, %v3120_v13, %v7943_v48  ;;  %v7991_v48 = vpop.permute.xlu0 %7990 }
 0x432   : > { %8250 = vrot.lane.b32.xlu0 %v12170_v47, %s15235_s22  ;;  %v7968_v24 = vunpack.i.h.bf16 %v12146_v45  ;;  %v3121_v10 = vsel %vm1537_vm2, %v11648_v44, %v7967_v33  ;;  %v7973_v57 = vunpack.i.h.bf16 %v12162_v37  ;;  %v3182_v13 = vsel %vm1603_vm4, %v3150_v15, %v7983_v21 }
 0x433   : > { %v3308_v19 = vsel %vm1735_vm8, %v3276_v17, %v7997_v7  ;;  %v12283_v41 = vmax.f32 %v3683_v4, 0.0  ;;  %v8294_v47 = vpack.i.bf16 %v12273_v8, %v12209_v23  ;;  %v7972_v38 = vunpack.i.l.bf16 %v12162_v37 }
 0x434   : > { %v12285_v56 = vpop.permute.xlu1 %8000  ;;  %v3339_v53 = vpack.c.bf16 %v3308_v19, %v3307_v18  ;;  %v3181_v9 = vsel %vm1603_vm4, %v3149_v61, %v7982_v35  ;;  %v15248_v60 = vpack.i.bf16 %v12198_v26, %v12150_v32  ;;  %v7978_v44 = vunpack.i.h.bf16 %v12233_v51 }
 0x435   : > { %8265 = vrot.lane.b32.xlu1 %v12226_v46, %s15236_s24  ;;  %v12304_v45 = vpack.i.bf16 %v12283_v41, %v12273_v8  ;;  %v15249_v33 = vpack.c.bf16 %v11970_v43, %v11967_v55  ;;  %v3873_v37 = vrot.slane %v12273_v8, 1  ;;  %v3874_v63 = vrot.slane %v12283_v41, 1 }
 0x436   : > { %3598 = vmatmul.mubr.bf16.gmra.mrb[52].mxu1 %v3339_v53  ;;  %8255 = vrot.lane.b32.xlu0 %v15248_v60, %s15237_s27  ;;  %v3784_v21 = vrot.slane %v12283_v41, 7  ;;  %v7977_v32 = vunpack.i.l.bf16 %v12233_v51  ;;  %v7993_v7 = vunpack.i.h.bf16 %v7991_v48  ;;  %v15250_v4 = vrot.slane %v12198_v26, 7 }
 0x437   : > { %6701 = vmatprep.mubr.msk.bf16.mxu1 %vm1537_vm2, %v15249_v33  ;;  %v3783_v55 = vrot.slane %v12273_v8, 7  ;;  %v7992_v43 = vunpack.i.l.bf16 %v7991_v48  ;;  %v3875_v18 = vsel %vm729_vm0, %v3873_v37, %v3874_v63  ;;  %v3919_v51 = vsel %vm729_vm0, %v3874_v63, 0.0 }
 0x438   : > { %v8006_v35 = vpop.permute.xlu1 %8005  ;;  %v12320_v17 = vsel %vm633_vm1, 0.0, %v15250_v4  ;;  %v12329_v19 = vpack.i.bf16 %v3919_v51, %v3875_v18  ;;  %v3122_v15 = vsel %vm1537_vm2, %v11640_v12, %v7968_v24  ;;  %v3213_v53 = vsel %vm1636_vm5, %v3181_v9, %v7972_v38  ;;  %v3062_v38 = vpop.permute.xlu0 %3061 }
 0x439   : > { %8270 = vrot.lane.b32.xlu1 %v12247_v54, %s14826_s19  ;;  %v8279_v61 = vpack.i.bf16 %v12241_v20, %v12320_v17  ;;  %v12334_v26 = vsel %vm633_vm1, %v3783_v55, %v3784_v21  ;;  %v8008_v48 = vunpack.i.h.bf16 %v8006_v35  ;;  %v8007_v60 = vunpack.i.l.bf16 %v8006_v35 }
 0x43a   : > { %8260 = vrot.lane.b32.xlu0 %v12226_v46, %s15089_s25  ;;  %v3151_v33 = vsel %vm1570_vm3, %v3121_v10, %v7977_v32  ;;  %v3152_v37 = vsel %vm1570_vm3, %v3122_v15, %v7978_v44  ;;  %v3214_v46 = vsel %vm1636_vm5, %v3182_v13, %v7973_v57  ;;  %v3245_v4 = vsel %vm1669_vm6, %v3213_v53, %v7992_v43 }
 0x43b   : > { %v3246_v21 = vsel %vm1669_vm6, %v3214_v46, %v7993_v7  ;;  %v7998_v24 = vunpack.i.h.bf16 %v12263_v25  ;;  %v8003_v10 = vunpack.i.h.bf16 %v12285_v56  ;;  %v8002_v9 = vunpack.i.l.bf16 %v12285_v56 }
 0x43c   : > { %v8011_v63 = vpop.permute.xlu1 %8010  ;;  %v3184_v44 = vsel %vm1603_vm4, %v3152_v37, %v8008_v48  ;;  %v3183_v32 = vsel %vm1603_vm4, %v3151_v33, %v8007_v60 }
 0x43d   : > { %8280 = vrot.lane.b32.xlu1 %v8279_v61, %s15232_s15  ;;  %v8013_v18 = vunpack.i.h.bf16 %v8011_v63  ;;  %v8012_v51 = vunpack.i.l.bf16 %v8011_v63 }
 0x43e   : > { %v12345_v12 = vpop.f32.mrb[32].mxu1  ;;  %8275 = vrot.lane.b32.xlu0 %v8279_v61, %s15239_s17 }
 0x43f   : > { %15251 = vst [vmem:[#allocation115_spill] sm:$0xff] %v12345_v12  ;;  %v3645_v57 = vmul.f32 %v11984_v58, %v12345_v12  ;;  %v3561_v13 = vpop.f32.mrb[33].mxu1  ;;  %v3277_v35 = vsel %vm1702_vm7, %v3245_v4, %v8012_v51  ;;  %v3278_v25 = vsel %vm1702_vm7, %v3246_v21, %v8013_v18  ;;  %v3215_v4 = vsel %vm1636_vm5, %v3183_v32, %v8002_v9  ;;  %v12373_v18 = vpop.permute.xlu0 %8020 }
 0x440   : > { %v12355_v7 = vpop.f32.mrb[34].mxu1  ;;  %v8016_v61 = vpop.permute.xlu1 %8015  ;;  %v3309_v53 = vsel %vm1735_vm8, %v3277_v35, %v7998_v24  ;;  %v3310_v48 = vsel %vm1735_vm8, %v3278_v25, %v3062_v38  ;;  %v3216_v21 = vsel %vm1636_vm5, %v3184_v44, %v8003_v10  ;;  %v15254_v10 = vld [vmem:[#allocation48_spill] sm:$0xff]  ;;  %v15258_v25 = vld [vmem:[#allocation103_spill] sm:$0xff] }
 0x441   : > { %15252 = vst [vmem:[#allocation40_spill] sm:$0xff] %v12355_v7  ;;  %v3684_v43 = vadd.f32 %v11991_v22, %v3645_v57  ;;  %v3646_v56 = vmul.f32 %v11984_v58, %v12355_v7  ;;  %v3564_v15 = vpop.f32.mrb[35].mxu1  ;;  %8285 = vrot.lane.b32.xlu1 %v12247_v54, %s15235_s22  ;;  %v8018_v60 = vunpack.i.h.bf16 %v8016_v61  ;;  %v8017_v33 = vunpack.i.l.bf16 %v8016_v61 }
 0x442   : > { %v3341_v37 = vpack.c.bf16 %v3310_v48, %v3309_v53  ;;  %8290 = vrot.lane.b32.xlu0 %v12247_v54, %s14817_s23  ;;  %v15255_v54 = vld [vmem:[#allocation50_spill] sm:$0xff] }
 0x443   : > { %v12366_v46 = vmax.f32 %v3684_v43, 0.0  ;;  %v3685_v63 = vadd.f32 %v11991_v22, %v3646_v56  ;;  %v3247_v51 = vsel %vm1669_vm6, %v3215_v4, %v8017_v33  ;;  %v3248_v24 = vsel %vm1669_vm6, %v3216_v21, %v8018_v60 }
 0x444   : > { %3606 = vmatmul.mubr.bf16.gmra.mrb[56].mxu1 %v3341_v37  ;;  %v12383_v9 = vpop.permute.xlu1 %8025  ;;  %v15256_v57 = vunpack.i.l.bf16 %v15255_v54  ;;  %v15257_v44 = vunpack.i.h.bf16 %v15255_v54  ;;  %vm5986_vm6 = vcmask 1046534  }
 0x445   : > { %v12377_v38 = vmax.f32 %v3685_v63, 0.0  ;;  %8295 = vrot.lane.b32.xlu1 %v8294_v47, %s15237_s27  ;;  %15253 = vst [vmem:[#allocation42_spill] sm:$0xff] %v12383_v9  ;;  %6702 = vmatprep.mubr.msk.bf16.mxu1 %vm1537_vm2, %v15254_v10  ;;  %v8334_v35 = vpack.i.bf16 %v12366_v46, %v12283_v41  ;;  %v3876_v56 = vrot.slane %v12366_v46, 1  ;;  %v3786_v61 = vrot.slane %v12366_v46, 7 }
 0x446   : > { %v3279_v13 = vsel %vm1702_vm7, %v3247_v51, %v15256_v57  ;;  %v3280_v32 = vsel %vm1702_vm7, %v3248_v24, %v15257_v44  ;;  %8305 = vrot.lane.b32.xlu0 %v12304_v45, %s15236_s24  ;;  %v12420_v63 = vsel %vm633_vm1, 0.0, %v3783_v55 }
 0x447   : > { %v3311_v23 = vsel %vm1735_vm8, %v3279_v13, %v15258_v25  ;;  %v3312_v47 = vsel %vm1735_vm8, %v3280_v32, %v15258_v25  ;;  %v12403_v43 = vpack.i.bf16 %v12377_v38, %v12366_v46  ;;  %v3877_v15 = vrot.slane %v12377_v38, 1 }
 0x448   : > { %v3787_v41 = vrot.slane %v12377_v38, 7  ;;  %v12409_v53 = vpop.permute.xlu0 %8030  ;;  %v12415_v33 = vpop.f32.mrb[36].mxu1  ;;  %v3343_v37 = vpack.c.bf16 %v3312_v47, %v3311_v23  ;;  %v8314_v8 = vpack.i.bf16 %v12334_v26, %v12420_v63  ;;  %v15262_v47 = vld [vmem:[#allocation15_spill] sm:$0xff]  ;;  %vm5989_vm8 = vcmask 1047559  }
 0x449   : > { %8300 = vrot.lane.b32.xlu1 %v12304_v45, %s15089_s25  ;;  %v3878_v48 = vsel %vm729_vm0, %v3876_v56, %v3877_v15  ;;  %v3920_v60 = vsel %vm729_vm0, %v3877_v15, 0.0  ;;  %15259 = vst [vmem:[#allocation124_spill] sm:$0xff] %v12415_v33  ;;  %v3647_v45 = vmul.f32 %v11984_v58, %v12415_v33  ;;  %v3569_v21 = vpop.f32.mrb[37].mxu1  ;;  %v12429_v51 = vpop.permute.xlu1 %4604 }
 0x44a   : > { %v12422_v46 = vpack.i.bf16 %v3920_v60, %v3878_v48  ;;  %v12425_v4 = vsel %vm633_vm1, %v3786_v61, %v3787_v41  ;;  %15260 = vst [vmem:[#allocation86_spill] sm:$0xff] %v12429_v51  ;;  %8310 = vrot.lane.b32.xlu0 %v12329_v19, %s14826_s19  ;;  %v12435_v24 = vpop.f32.mrb[38].mxu1  ;;  %v8032_v60 = vunpack.i.l.bf16 %v12409_v53 }
 0x44b   : > { %15261 = vst [vmem:[#allocation59_spill] sm:$0xff] %v12435_v24  ;;  %v3686_v55 = vadd.f32 %v11991_v22, %v3647_v45  ;;  %v3648_v10 = vmul.f32 %v11984_v58, %v12435_v24  ;;  %v3572_v54 = vpop.f32.mrb[39].mxu1 }
 0x44c   : > { %3614 = vmatmul.mubr.bf16.gmra.mrb[60].mxu1 %v3343_v37  ;;  %v12440_v57 = vpop.permute.xlu0 %8035  ;;  %v8023_v54 = vunpack.i.h.bf16 %v12373_v18 }
 0x44d   : > { %8315 = vrot.lane.b32.xlu1 %v8314_v8, %s15239_s17  ;;  %v12443_v13 = vmax.f32 %v3686_v55, 0.0  ;;  %v3687_v44 = vadd.f32 %v11991_v22, %v3648_v10  ;;  %v12449_v25 = vpop.permute.xlu1 %8040  ;;  %v8037_v6 = vunpack.i.l.bf16 %v12440_v57 }
 0x44e   : > { %8325 = vrot.lane.b32.xlu0 %v8314_v8, %s15232_s15  ;;  %v8042_v7 = vunpack.i.l.bf16 %v12449_v25 }
 0x44f   : > { %v12447_v32 = vmax.f32 %v3687_v44, 0.0  ;;  %v3879_v56 = vrot.slane %v12443_v13, 1  ;;  %v14810_v8 = vrot.slane %v12443_v13, 7  ;;  %v8022_v44 = vunpack.i.l.bf16 %v12373_v18 }
 0x450   : > { %v8046_v23 = vpop.permute.xlu0 %8045  ;;  %v15269_v12 = vrot.slane %v12443_v13, 7 }
 0x451   : > { %8320 = vrot.lane.b32.xlu1 %v12329_v19, %s14817_s23  ;;  %v12460_v15 = vpack.i.bf16 %v12447_v32, %v12443_v13  ;;  %v3880_v41 = vrot.slane %v12447_v32, 1  ;;  %v3790_v48 = vrot.slane %v12447_v32, 7 }
 0x452   : > { %8330 = vrot.lane.b32.xlu0 %v12329_v19, %s15235_s22 }
 0x453   : > { %v12465_v37 = vpop.permute.xlu1 %8055  ;;  %v3881_v21 = vsel %vm729_vm0, %v3879_v56, %v3880_v41  ;;  %v3921_v19 = vsel %vm729_vm0, %v3880_v41, 0.0  ;;  %v12480_v10 = vsel %vm633_vm1, %v14810_v8, %v3790_v48  ;;  %v4734_v56 = vsel %vm4733_vm10, %v15262_v47, %v8032_v60  ;;  %v15263_v41 = vld [vmem:[#allocation71_spill] sm:$0xff] }
 0x454   : > { %v12467_v45 = vpop.permute.xlu0 %8050  ;;  %v12475_v55 = vpack.i.bf16 %v3921_v19, %v3881_v21  ;;  %v4735_v51 = vsel %vm4733_vm10, %v15263_v41, %v8032_v60  ;;  %v8048_v21 = vunpack.i.h.bf16 %v8046_v23  ;;  %v8047_v48 = vunpack.i.l.bf16 %v8046_v23 }
 0x455   : > { %8340 = vrot.lane.b32.xlu1 %v12403_v43, %s15236_s24  ;;  %v12497_v8 = vsel %vm633_vm1, 0.0, %v3786_v61  ;;  %v8033_v41 = vunpack.i.h.bf16 %v12409_v53  ;;  %v4766_v23 = vsel %vm1537_vm2, %v4734_v56, %v8022_v44  ;;  %v4767_v24 = vsel %vm1537_vm2, %v4735_v51, %v8023_v54 }
 0x456   : > { %8335 = vrot.lane.b32.xlu0 %v8334_v35, %s15237_s27  ;;  %v8359_v60 = vpack.i.bf16 %v12425_v4, %v12497_v8  ;;  %v4799_v53 = vsel %vm4798_vm11, %v4766_v23, %v8047_v48  ;;  %v4800_v44 = vsel %vm4798_vm11, %v4767_v24, %v8048_v21  ;;  %v8057_v51 = vunpack.i.l.bf16 %v12465_v37 }
 0x457   : > { %v12488_v9 = vpop.permute.xlu1 %8060  ;;  %v8052_v54 = vunpack.i.l.bf16 %v12467_v45  ;;  %v4736_v48 = vsel %vm4733_vm10, %v12022_v3, %v8033_v41  ;;  %v8043_v24 = vunpack.i.h.bf16 %v12449_v25  ;;  %v8053_v21 = vunpack.i.h.bf16 %v12467_v45 }
 0x458   : > { %v12490_v35 = vpop.permute.xlu0 %8065  ;;  %v4768_v23 = vsel %vm1537_vm2, %v4736_v48, %v8042_v7 }
 0x459   : > { %8350 = vrot.lane.b32.xlu1 %v12422_v46, %s14826_s19 }
 0x45a   : > { %v12494_v19 = vpop.f32.mrb[40].mxu1  ;;  %8345 = vrot.lane.b32.xlu0 %v12403_v43, %s15089_s25 }
 0x45b   : > { %15264 = vst [vmem:[#allocation96_spill] sm:$0xff] %v12494_v19  ;;  %v3649_v18 = vmul.f32 %v11984_v58, %v12494_v19  ;;  %v3577_v47 = vpop.f32.mrb[41].mxu1  ;;  %v12514_v43 = vpop.permute.xlu1 %8075 }
 0x45c   : > { %v12508_v61 = vpop.f32.mrb[42].mxu1  ;;  %v12521_v56 = vpop.permute.xlu0 %8070  ;;  %v8078_v48 = vunpack.i.h.bf16 %v12514_v43 }
 0x45d   : > { %15265 = vst [vmem:[#allocation78_spill] sm:$0xff] %v12508_v61  ;;  %v3688_v19 = vadd.f32 %v11991_v22, %v3649_v18  ;;  %v3650_v47 = vmul.f32 %v11984_v58, %v12508_v61  ;;  %v3580_v33 = vpop.f32.mrb[43].mxu1  ;;  %8360 = vrot.lane.b32.xlu1 %v8359_v60, %s15232_s15  ;;  %v8038_v18 = vunpack.i.h.bf16 %v12440_v57  ;;  %v4831_v61 = vsel %vm1570_vm3, %v4799_v53, %v8037_v6 }
 0x45e   : > { %8355 = vrot.lane.b32.xlu0 %v8359_v60, %s15239_s17  ;;  %v4864_v3 = vsel %vm4863_vm12, %v4831_v61, %v8052_v54  ;;  %v8068_v53 = vunpack.i.h.bf16 %v12490_v35 }
 0x45f   : > { %v12525_v58 = vmax.f32 %v3688_v19, 0.0  ;;  %v3689_v33 = vadd.f32 %v11991_v22, %v3650_v47  ;;  %v4832_v57 = vsel %vm1570_vm3, %v4800_v44, %v8038_v18  ;;  %v4737_v22 = vsel %vm4733_vm10, %v12011_v49, %v8057_v51  ;;  %v12546_v6 = vpop.permute.xlu1 %8080 }
 0x460   : > { %v8086_v25 = vpop.permute.xlu0 %8085  ;;  %v4865_v61 = vsel %vm4863_vm12, %v4832_v57, %v8053_v21  ;;  %v8067_v44 = vunpack.i.l.bf16 %v12490_v35 }
 0x461   : > { %v12536_v19 = vmax.f32 %v3689_v33, 0.0  ;;  %8365 = vrot.lane.b32.xlu1 %v12422_v46, %s15235_s22  ;;  %v3882_v7 = vrot.slane %v12525_v58, 1  ;;  %v8088_v60 = vunpack.i.h.bf16 %v8086_v25  ;;  %v8087_v41 = vunpack.i.l.bf16 %v8086_v25 }
 0x462   : > { %8370 = vrot.lane.b32.xlu0 %v12422_v46, %s14817_s23  ;;  %v15266_v46 = vpack.i.bf16 %v12443_v13, %v12377_v38  ;;  %v14820_v35 = vrot.slane %v12525_v58, 7  ;;  %v12577_v38 = vld [vmem:[%s14566_s7] ss:$0 sm:$0xff]  ;;  %v8062_v13 = vunpack.i.l.bf16 %v12488_v9  ;;  %s15270_s23 = smov 40  }
 0x463   : > { %v12552_v47 = vpack.i.bf16 %v12536_v19, %v12525_v58  ;;  %v3883_v49 = vrot.slane %v12536_v19, 1  ;;  %v4896_v51 = vsel %vm1603_vm4, %v4864_v3, %v8087_v41  ;;  %v4897_v54 = vsel %vm1603_vm4, %v4865_v61, %v8088_v60 }
 0x464   : > { %v12567_v21 = vpop.f32.mrb[44].mxu1  ;;  %v8091_v57 = vpop.permute.xlu0 %8090  ;;  %v3793_v3 = vrot.slane %v12536_v19, 7  ;;  %v8077_v60 = vunpack.i.l.bf16 %v12514_v43 }
 0x465   : > { %8375 = vrot.lane.b32.xlu1 %v15266_v46, %s15237_s27  ;;  %v3884_v18 = vsel %vm729_vm0, %v3882_v7, %v3883_v49  ;;  %v3922_v33 = vsel %vm729_vm0, %v3883_v49, 0.0  ;;  %15267 = vst [vmem:[#allocation79_spill] sm:$0xff] %v12567_v21  ;;  %v3651_v7 = vmul.f32 %v12577_v38, %v12567_v21  ;;  %v8093_v41 = vunpack.i.h.bf16 %v8091_v57  ;;  %v3585_v61 = vpop.f32.mrb[45].mxu1 }
 0x466   : > { %v12569_v25 = vpack.i.bf16 %v3922_v33, %v3884_v18  ;;  %v8092_v49 = vunpack.i.l.bf16 %v8091_v57  ;;  %8385 = vrot.lane.b32.xlu0 %v12460_v15, %s15236_s24  ;;  %v4929_v18 = vsel %vm4928_vm13, %v4896_v51, %v8067_v44  ;;  %v4930_v33 = vsel %vm4928_vm13, %v4897_v54, %v8068_v53  ;;  %v12585_v43 = vpop.f32.mrb[46].mxu1  ;;  %v12595_v57 = vld [vmem:[%s14567_s8] ss:$0 sm:$0xff] }
 0x467   : > { %v8106_v46 = vpop.permute.xlu1 %8105  ;;  %15268 = vst [vmem:[#allocation105_spill] sm:$0xff] %v12585_v43  ;;  %v12590_v45 = vsel %vm633_vm1, %v14820_v35, %v3793_v3  ;;  %v3690_v61 = vadd.f32 %v12595_v57, %v3651_v7  ;;  %v4962_v44 = vsel %vm1636_vm5, %v4930_v33, %v8093_v41  ;;  %v3652_v53 = vmul.f32 %v12577_v38, %v12585_v43  ;;  %v3588_v51 = vpop.f32.mrb[47].mxu1 }
 0x468   : > { %v4961_v21 = vsel %vm1636_vm5, %v4929_v18, %v8092_v49  ;;  %v4769_v54 = vsel %vm1537_vm2, %v4737_v22, %v8043_v24  ;;  %v12605_v3 = vpop.permute.xlu0 %8095  ;;  %v12610_v7 = vsel %vm633_vm1, 0.0, %v15269_v12  ;;  %v4801_v49 = vsel %vm4798_vm11, %v4768_v23, %v8077_v60 }
 0x469   : > { %8380 = vrot.lane.b32.xlu1 %v12460_v15, %s15089_s25  ;;  %v4993_v35 = vpack.c.bf16 %v4962_v44, %v4961_v21  ;;  %v12613_v41 = vmax.f32 %v3690_v61, 0.0  ;;  %v3691_v18 = vadd.f32 %v12595_v57, %v3652_v53  ;;  %v8394_v24 = vpack.i.bf16 %v12480_v10, %v12610_v7 }
 0x46a   : > { %8390 = vrot.lane.b32.xlu0 %v12475_v55, %s14826_s19  ;;  %v8063_v22 = vunpack.i.h.bf16 %v12488_v9  ;;  %v4802_v12 = vsel %vm4798_vm11, %v4769_v54, %v8078_v48  ;;  %v8083_v23 = vunpack.i.h.bf16 %v12546_v6  ;;  %v8082_v21 = vunpack.i.l.bf16 %v12546_v6 }
 0x46b   : > { %v12618_v15 = vpop.permute.xlu1 %8110  ;;  %6800 = vmatprep.mubr.msk.bf16.mxu0 %vm5045_vm14, %v4993_v35  ;;  %v12628_v60 = vmax.f32 %v3691_v18, 0.0  ;;  %v4833_v61 = vsel %vm1570_vm3, %v4801_v49, %v8062_v13  ;;  %v3885_v6 = vrot.slane %v12613_v41, 1  ;;  %v8108_v39 = vunpack.i.h.bf16 %v8106_v46 }
 0x46c   : > { %v12634_v44 = vpop.permute.xlu0 %8100  ;;  %v4834_v9 = vsel %vm1570_vm3, %v4802_v12, %v8063_v22  ;;  %v4866_v49 = vsel %vm4863_vm12, %v4833_v61, %v8082_v21  ;;  %v8107_v1 = vunpack.i.l.bf16 %v8106_v46 }
 0x46d   : > { %8395 = vrot.lane.b32.xlu1 %v8394_v24, %s15239_s17  ;;  %v12640_v35 = vpack.i.bf16 %v12628_v60, %v12613_v41  ;;  %v3886_v54 = vrot.slane %v12628_v60, 1  ;;  %v3796_v18 = vrot.slane %v12628_v60, 7  ;;  %v4867_v13 = vsel %vm4863_vm12, %v4834_v9, %v8083_v23 }
 0x46e   : > { %8405 = vrot.lane.b32.xlu0 %v8394_v24, %s15232_s15  ;;  %v14825_v24 = vrot.slane %v12613_v41, 7 }
 0x46f   : > { %v8121_v48 = vpop.permute.xlu1 %8120  ;;  %v3923_v43 = vsel %vm729_vm0, %v3886_v54, 0.0 }
 0x470   : > { %v8123_v53 = vunpack.i.h.bf16 %v8121_v48  ;;  %v8122_v51 = vunpack.i.l.bf16 %v8121_v48  ;;  %v8116_v33 = vpop.permute.xlu0 %8115  ;;  %v3887_v48 = vsel %vm729_vm0, %v3885_v6, %v3886_v54 }
 0x471   : > { %8400 = vrot.lane.b32.xlu1 %v12475_v55, %s15270_s23  ;;  %v12656_v9 = vpack.i.bf16 %v3923_v43, %v3887_v48  ;;  %v8058_v48 = vunpack.i.h.bf16 %v12465_v37 }
 0x472   : > { %v4898_v22 = vsel %vm1603_vm4, %v4866_v49, %v8122_v51  ;;  %v4899_v12 = vsel %vm1603_vm4, %v4867_v13, %v8123_v53  ;;  %8410 = vrot.lane.b32.xlu0 %v12475_v55, %s15235_s22  ;;  %v12661_v51 = vsel %vm633_vm1, %v14825_v24, %v3796_v18 }
 0x473   : > { %v8126_v23 = vpop.permute.xlu1 %8125  ;;  %v4931_v53 = vsel %vm4928_vm13, %v4898_v22, %v8107_v1  ;;  %v4932_v6 = vsel %vm4928_vm13, %v4899_v12, %v8108_v39  ;;  %v15271_v1 = vpack.i.bf16 %v12525_v58, %v12447_v32  ;;  %v8097_v22 = vunpack.i.l.bf16 %v12605_v3 }
 0x474   : > { %v8128_v21 = vunpack.i.h.bf16 %v8126_v23  ;;  %v8127_v61 = vunpack.i.l.bf16 %v8126_v23  ;;  %v8131_v54 = vpop.permute.xlu0 %8130  ;;  %v15272_v32 = vrot.slane %v12525_v58, 7  ;;  %v4738_v58 = vsel %vm4733_vm10, %v12044_v52, %v8058_v48 }
 0x475   : > { %8420 = vrot.lane.b32.xlu1 %v12552_v47, %s15236_s24  ;;  %v8102_v52 = vunpack.i.l.bf16 %v12634_v44  ;;  %v8103_v48 = vunpack.i.h.bf16 %v12634_v44 }
 0x476   : > { %v4963_v46 = vsel %vm1636_vm5, %v4931_v53, %v8127_v61  ;;  %v4964_v55 = vsel %vm1636_vm5, %v4932_v6, %v8128_v21  ;;  %v12669_v49 = vpop.f32.mrb[48].mxu1  ;;  %8415 = vrot.lane.b32.xlu0 %v15271_v1, %s15237_s27  ;;  %v8072_v61 = vunpack.i.l.bf16 %v12521_v56  ;;  %v12691_v6 = vsel %vm633_vm1, 0.0, %v15272_v32 }
 0x477   : > { %v4994_v43 = vpack.c.bf16 %v4964_v55, %v4963_v46  ;;  %v3653_v13 = vmul.f32 %v12577_v38, %v12669_v49  ;;  %v3593_v18 = vpop.f32.mrb[49].mxu1  ;;  %v12677_v39 = vpop.permute.xlu1 %8135  ;;  %v8117_v46 = vunpack.i.l.bf16 %v8116_v33  ;;  %v8073_v1 = vunpack.i.h.bf16 %v12521_v56 }
 0x478   : > { %v12680_v12 = vpop.f32.mrb[50].mxu1  ;;  %v8146_v53 = vpop.permute.xlu0 %8145  ;;  %v4739_v18 = vsel %vm4733_vm10, %v12034_v11, %v8097_v22  ;;  %v8132_v22 = vunpack.i.l.bf16 %v8131_v54 }
 0x479   : > { %v3692_v23 = vadd.f32 %v12595_v57, %v3653_v13  ;;  %v3596_v21 = vpop.f32.mrb[51].mxu1  ;;  %8430 = vrot.lane.b32.xlu1 %v12569_v25, %s14826_s19  ;;  %6801 = vmatmul.mubr.msk.bf16.vlgmr.msra.gmra.mrb[64].mxu0 %vm5045_vm14, %v4994_v43  ;;  %v8439_v13 = vpack.i.bf16 %v12590_v45, %v12691_v6  ;;  %v8118_v43 = vunpack.i.h.bf16 %v8116_v33  ;;  %v4771_v32 = vsel %vm1537_vm2, %v4739_v18, %v8073_v1 }
 0x47a   : > { %8425 = vrot.lane.b32.xlu0 %v12552_v47, %s15089_s25  ;;  %v4770_v47 = vsel %vm1537_vm2, %v4738_v58, %v8072_v61  ;;  %v8133_v33 = vunpack.i.h.bf16 %v8131_v54  ;;  %v8098_v54 = vunpack.i.h.bf16 %v12605_v3  ;;  %v8112_v3 = vunpack.i.l.bf16 %v12618_v15 }
 0x47b   : > { %v12693_v55 = vmax.f32 %v3692_v23, 0.0  ;;  %v12697_v37 = vpop.permute.xlu1 %8140  ;;  %v4803_v24 = vsel %vm4798_vm11, %v4770_v47, %v8117_v46  ;;  %v4804_v56 = vsel %vm4798_vm11, %v4771_v32, %v8118_v43  ;;  %v3654_v46 = vmul.f32 %v12577_v38, %v12680_v12 }
 0x47c   : > { %v12710_v21 = vpop.permute.xlu0 %8150  ;;  %v4835_v61 = vsel %vm1570_vm3, %v4803_v24, %v8102_v52  ;;  %v4836_v18 = vsel %vm1570_vm3, %v4804_v56, %v8103_v48  ;;  %v8137_v24 = vunpack.i.l.bf16 %v12677_v39  ;;  %v15273_v38 = vpack.i.bf16 %v12613_v41, %v12536_v19 }
 0x47d   : > { %8440 = vrot.lane.b32.xlu1 %v8439_v13, %s15232_s15  ;;  %v8494_v23 = vpack.i.bf16 %v12693_v55, %v12628_v60  ;;  %v4868_v44 = vsel %vm4863_vm12, %v4835_v61, %v8132_v22  ;;  %v4869_v47 = vsel %vm4863_vm12, %v4836_v18, %v8133_v33  ;;  %v8148_v56 = vunpack.i.h.bf16 %v8146_v53 }
 0x47e   : > { %8435 = vrot.lane.b32.xlu0 %v8439_v13, %s15239_s17  ;;  %v3693_v22 = vadd.f32 %v12595_v57, %v3654_v46  ;;  %v4740_v18 = vsel %vm4733_vm10, %v12093_v27, %v8098_v54  ;;  %v4741_v19 = vsel %vm4733_vm10, %v12076_v14, %v8137_v24  ;;  %v15274_v14 = vrot.slane %v12613_v41, 7 }
 0x47f   : > { %v8156_v11 = vpop.permute.xlu1 %8155 }
 0x480   : > { %v8166_v58 = vpop.permute.xlu0 %8165  ;;  %v12756_v54 = vsel %vm633_vm1, 0.0, %v15274_v14  ;;  %v12758_v24 = vmax.f32 %v3693_v22, 0.0  ;;  %v8142_v22 = vunpack.i.l.bf16 %v12697_v37 }
 0x481   : > { %8445 = vrot.lane.b32.xlu1 %v12569_v25, %s15235_s22  ;;  %v8168_v13 = vunpack.i.h.bf16 %v8166_v58  ;;  %v8167_v1 = vunpack.i.l.bf16 %v8166_v58 }
 0x482   : > { %8450 = vrot.lane.b32.xlu0 %v12569_v25, %s15270_s23  ;;  %v8147_v25 = vunpack.i.l.bf16 %v8146_v53 }
 0x483   : > { %v8161_v43 = vpop.permute.xlu1 %8160  ;;  %v4900_v32 = vsel %vm1603_vm4, %v4868_v44, %v8167_v1  ;;  %v4901_v52 = vsel %vm1603_vm4, %v4869_v47, %v8168_v13  ;;  %v8158_v1 = vunpack.i.h.bf16 %v8156_v11  ;;  %v8157_v44 = vunpack.i.l.bf16 %v8156_v11 }
 0x484   : > { %v8171_v48 = vpop.permute.xlu0 %8170  ;;  %v4933_v13 = vsel %vm4928_vm13, %v4900_v32, %v8147_v25  ;;  %v4934_v53 = vsel %vm4928_vm13, %v4901_v52, %v8148_v56  ;;  %v8113_v47 = vunpack.i.h.bf16 %v12618_v15  ;;  %v4772_v15 = vsel %vm1537_vm2, %v4740_v18, %v8112_v3 }
 0x485   : > { %8455 = vrot.lane.b32.xlu1 %v15273_v38, %s15237_s27  ;;  %v8173_v61 = vunpack.i.h.bf16 %v8171_v48  ;;  %v8172_v33 = vunpack.i.l.bf16 %v8171_v48  ;;  %v4805_v41 = vsel %vm4798_vm11, %v4772_v15, %v8157_v44  ;;  %v8163_v56 = vunpack.i.h.bf16 %v8161_v43 }
 0x486   : > { %8465 = vrot.lane.b32.xlu0 %v12640_v35, %s15236_s24  ;;  %v4773_v32 = vsel %vm1537_vm2, %v4741_v19, %v8113_v47  ;;  %v8162_v25 = vunpack.i.l.bf16 %v8161_v43  ;;  %v8143_v48 = vunpack.i.h.bf16 %v12697_v37  ;;  %v4837_v18 = vsel %vm1570_vm3, %v4805_v41, %v8142_v22 }
 0x487   : > { %v8186_v58 = vpop.permute.xlu1 %8185  ;;  %v4965_v57 = vsel %vm1636_vm5, %v4933_v13, %v8172_v33  ;;  %v4966_v46 = vsel %vm1636_vm5, %v4934_v53, %v8173_v61  ;;  %v4806_v52 = vsel %vm4798_vm11, %v4773_v32, %v8158_v1  ;;  %v3889_v33 = vrot.slane %v12758_v24, 1 }
 0x488   : > { %v12751_v38 = vpop.permute.xlu0 %8175  ;;  %v4995_v27 = vpack.c.bf16 %v4966_v46, %v4965_v57  ;;  %v4838_v19 = vsel %vm1570_vm3, %v4806_v52, %v8143_v48  ;;  %v4870_v43 = vsel %vm4863_vm12, %v4837_v18, %v8162_v25  ;;  %v3888_v46 = vrot.slane %v12693_v55, 1 }
 0x489   : > { %8460 = vrot.lane.b32.xlu1 %v12640_v35, %s15089_s25  ;;  %v8474_v35 = vpack.i.bf16 %v12661_v51, %v12756_v54  ;;  %v4871_v1 = vsel %vm4863_vm12, %v4838_v19, %v8163_v56  ;;  %v8188_v47 = vunpack.i.h.bf16 %v8186_v58  ;;  %v3799_v15 = vrot.slane %v12758_v24, 7 }
 0x48a   : > { %8470 = vrot.lane.b32.xlu0 %v12656_v9, %s14826_s19  ;;  %6804 = vmatprep.mubr.msk.bf16.mxu0 %vm5045_vm14, %v4995_v27  ;;  %v8187_v27 = vunpack.i.l.bf16 %v8186_v58  ;;  %v3890_v52 = vsel %vm729_vm0, %v3888_v46, %v3889_v33  ;;  %v3924_v56 = vsel %vm729_vm0, %v3889_v33, 0.0  ;;  %v8177_v18 = vunpack.i.l.bf16 %v12751_v38 }
 0x48b   : > { %v12762_v11 = vpop.permute.xlu1 %8190  ;;  %v8509_v19 = vpack.i.bf16 %v3924_v56, %v3890_v52  ;;  %v8178_v60 = vunpack.i.h.bf16 %v12751_v38 }
 0x48c   : > { %v12774_v61 = vpop.permute.xlu0 %8180  ;;  %v8192_v56 = vunpack.i.l.bf16 %v12762_v11 }
 0x48d   : > { %8475 = vrot.lane.b32.xlu1 %v8474_v35, %s15239_s17  ;;  %v4744_v52 = vsel %vm4733_vm10, %v12154_v16, %v8178_v60 }
 0x48e   : > { %8485 = vrot.lane.b32.xlu0 %v8474_v35, %s15232_s15  ;;  %v8499_v35 = vpack.i.bf16 %v12758_v24, %v12693_v55 }
 0x48f   : > { %v8201_v3 = vpop.permute.xlu1 %8200 }
 0x490   : > { %v8203_v13 = vunpack.i.h.bf16 %v8201_v3  ;;  %v8202_v53 = vunpack.i.l.bf16 %v8201_v3  ;;  %v12786_v57 = vpop.permute.xlu0 %8195  ;;  %v3798_v3 = vrot.slane %v12693_v55, 7 }
 0x491   : > { %8480 = vrot.lane.b32.xlu1 %v12656_v9, %s15270_s23 }
 0x492   : > { %v4902_v37 = vsel %vm1603_vm4, %v4870_v43, %v8202_v53  ;;  %v4903_v44 = vsel %vm1603_vm4, %v4871_v1, %v8203_v13  ;;  %8490 = vrot.lane.b32.xlu0 %v12656_v9, %s15235_s22  ;;  %v8138_v53 = vunpack.i.h.bf16 %v12677_v39  ;;  %v12813_v43 = vsel %vm633_vm1, %v3798_v3, %v3799_v15  ;;  %v12818_v1 = vld [vmem:[%s14569_s10] ss:$0 sm:$0xff] }
 0x493   : > { %v8206_v14 = vpop.permute.xlu1 %8205  ;;  %v4935_v25 = vsel %vm4928_vm13, %v4902_v37, %v8187_v27  ;;  %v4936_v48 = vsel %vm4928_vm13, %v4903_v44, %v8188_v47  ;;  %v8152_v37 = vunpack.i.l.bf16 %v12710_v21  ;;  %v12827_v39 = vsel %vm633_vm1, 0.0, %v3798_v3  ;;  %v8677_v27 = vld [vmem:[%s9007_s18 + $0x18] sm:$0xff]  ;;  %v8680_v3 = vld [vmem:[%s9007_s18 + $0x8] sm:$0xff] }
 0x494   : > { %v8208_v32 = vunpack.i.h.bf16 %v8206_v14  ;;  %v8207_v41 = vunpack.i.l.bf16 %v8206_v14  ;;  %v12801_v22 = vpop.permute.xlu0 %8210  ;;  %v8197_v44 = vunpack.i.l.bf16 %v12786_v57  ;;  %v8519_v47 = vpack.i.bf16 %v12813_v43, %v12827_v39 }
 0x495   : > { %8500 = vrot.lane.b32.xlu1 %v8499_v35, %s15236_s24  ;;  %v5269_v38 = vmul.f32 %v8677_v27, %v12818_v1  ;;  %v4742_v14 = vsel %vm4733_vm10, %v12121_v42, %v8138_v53  ;;  %v8153_v15 = vunpack.i.h.bf16 %v12710_v21  ;;  %v8672_v21 = vld [vmem:[%s14571_s12] sm:$0xff]  }
 0x496   : > { %v4967_v9 = vsel %vm1636_vm5, %v4935_v25, %v8207_v41  ;;  %v4968_v58 = vsel %vm1636_vm5, %v4936_v48, %v8208_v32  ;;  %8495 = vrot.lane.b32.xlu0 %v8494_v23, %s15237_s27  ;;  %v4743_v23 = vsel %vm4733_vm10, %v12105_v31, %v8177_v18  ;;  %v8198_v31 = vunpack.i.h.bf16 %v12786_v57  ;;  %v8678_v32 = vld [vmem:[%s9007_s18 + $0x10] sm:$0xff]  ;;  %6832 = vmatprep.subr.bf16.mxu1 %v8672_v21 }
 0x497   : > { %v12809_v33 = vpop.permute.xlu1 %8215  ;;  %v4996_v13 = vpack.c.bf16 %v4968_v58, %v4967_v9  ;;  %v4774_v41 = vsel %vm1537_vm2, %v4742_v14, %v8152_v37  ;;  %v4775_v42 = vsel %vm1537_vm2, %v4743_v23, %v8153_v15  ;;  %v8212_v48 = vunpack.i.l.bf16 %v12801_v22  ;;  %v8679_v58 = vld [vmem:[%s9007_s18] sm:$0xff]  ;;  %6833 = vmatpush3.bf16.msra.mxu1 %v8672_v21 }
 0x498   : > { %v12824_v55 = vpop.permute.xlu0 %8225  ;;  %v4807_v57 = vsel %vm4798_vm11, %v4774_v41, %v8197_v44  ;;  %v5266_v16 = vmul.f32 %v8679_v58, %v12818_v1  ;;  %v5267_v18 = vmul.f32 %v8680_v3, %v12818_v1  ;;  %v4808_v53 = vsel %vm4798_vm11, %v4775_v42, %v8198_v31  ;;  %v12872_v23 = vld [vmem:[%s14570_s11] ss:$0 sm:$0xff] }
 0x499   : > { %8510 = vrot.lane.b32.xlu1 %v8509_v19, %s15275_s0  ;;  %6805 = vmatmul.mubr.msk.bf16.gmra.mrb[68].mxu0 %vm5045_vm14, %v4996_v13  ;;  %v8182_v13 = vunpack.i.l.bf16 %v12774_v61  ;;  %v8213_v37 = vunpack.i.h.bf16 %v12801_v22  ;;  %v8217_v60 = vunpack.i.l.bf16 %v12809_v33  ;;  %v8193_v44 = vunpack.i.h.bf16 %v12762_v11 }
 0x49a   : > { %8505 = vrot.lane.b32.xlu0 %v8499_v35, %s15089_s25  ;;  %v5268_v35 = vmul.f32 %v8678_v32, %v12818_v1  ;;  %v5305_v27 = vadd.f32 %v12872_v23, %v5266_v16  ;;  %v5306_v14 = vadd.f32 %v12872_v23, %v5267_v18  ;;  %v4776_v22 = vsel %vm1537_vm2, %v4744_v52, %v8192_v56 }
 0x49b   : > { %v12833_v46 = vpop.permute.xlu1 %8220  ;;  %v4839_v15 = vsel %vm1570_vm3, %v4807_v57, %v8182_v13  ;;  %v5308_v41 = vadd.f32 %v12872_v23, %v5269_v38  ;;  %v4745_v52 = vsel %vm4733_vm10, %v12133_v5, %v8217_v60  ;;  %v8228_v18 = vunpack.i.h.bf16 %v12824_v55 }
 0x49c   : > { %v12851_v25 = vpop.permute.xlu0 %8230  ;;  %v5307_v32 = vadd.f32 %v12872_v23, %v5268_v35  ;;  %v5337_v56 = vmax.f32 %v5305_v27, 0.0  ;;  %v5338_v57 = vmax.f32 %v5306_v14, 0.0 }
 0x49d   : > { %8520 = vrot.lane.b32.xlu1 %v8519_v47, %s15232_s15 }
 0x49e   : > { %8515 = vrot.lane.b32.xlu0 %v8519_v47, %s15239_s17  ;;  %v8183_v47 = vunpack.i.h.bf16 %v12774_v61  ;;  %v4872_v61 = vsel %vm4863_vm12, %v4839_v15, %v8212_v48  ;;  %v5339_v3 = vmax.f32 %v5307_v32, 0.0  ;;  %v5340_v48 = vmax.f32 %v5308_v41, 0.0  ;;  %v8681_v32 = vld [vmem:[%s9007_s18 + $0x20] sm:$0xff]  ;;  %v8682_v41 = vld [vmem:[%s9007_s18 + $0x28] sm:$0xff] }
 0x49f   : > { %v12859_v9 = vpop.permute.xlu1 %8235  ;;  %v5369_v27 = vpack.c.bf16 %v5338_v57, %v5337_v56  ;;  %v4777_v57 = vsel %vm1537_vm2, %v4745_v52, %v8193_v44 }
 0x4a0   : > { %v8246_v31 = vpop.permute.xlu0 %8245  ;;  %v4840_v11 = vsel %vm1570_vm3, %v4808_v53, %v8183_v47  ;;  %v8238_v13 = vunpack.i.h.bf16 %v12859_v9  ;;  %v8237_v53 = vunpack.i.l.bf16 %v12859_v9  ;;  %v5370_v14 = vpack.c.bf16 %v5340_v48, %v5339_v3 }
 0x4a1   : > { %8525 = vrot.lane.b32.xlu1 %v8509_v19, %s15235_s22  ;;  %v8248_v42 = vunpack.i.h.bf16 %v8246_v31  ;;  %v8247_v58 = vunpack.i.l.bf16 %v8246_v31  ;;  %v4873_v16 = vsel %vm4863_vm12, %v4840_v11, %v8213_v37  ;;  %v5271_v11 = vmul.f32 %v8682_v41, %v12818_v1  ;;  %6834 = vmatprep.mubr.msk.bf16.mxu1 %vm1537_vm2, %v5369_v27 }
 0x4a2   : > { %8530 = vrot.lane.b32.xlu0 %v8509_v19, %s15270_s23  ;;  %v8227_v19 = vunpack.i.l.bf16 %v12824_v55  ;;  %v5270_v55 = vmul.f32 %v8681_v32, %v12818_v1  ;;  %6835 = vmatmul.mubr.msk.bf16.vlgmr.msra.gmra.mrb[64].mxu1 %vm1537_vm2, %v5370_v14  ;;  %v4809_v44 = vsel %vm4798_vm11, %v4776_v22, %v8237_v53  ;;  %v4810_v52 = vsel %vm4798_vm11, %v4777_v57, %v8238_v13 }
 0x4a3   : > { %v12886_v21 = vpop.permute.xlu1 %8240  ;;  %v4904_v35 = vsel %vm1603_vm4, %v4872_v61, %v8247_v58  ;;  %v4905_v38 = vsel %vm1603_vm4, %v4873_v16, %v8248_v42  ;;  %v8683_v42 = vld [vmem:[%s9007_s18 + $0x30] sm:$0xff]  ;;  %v8684_v16 = vld [vmem:[%s9007_s18 + $0x38] sm:$0xff]  ;;  %v5310_v48 = vadd.f32 %v12872_v23, %v5271_v11 }
 0x4a4   : > { %v8251_v5 = vpop.permute.xlu0 %8250  ;;  %v4937_v15 = vsel %vm4928_vm13, %v4904_v35, %v8227_v19  ;;  %v4938_v31 = vsel %vm4928_vm13, %v4905_v38, %v8228_v18  ;;  %v5272_v58 = vmul.f32 %v8683_v42, %v12818_v1  ;;  %v5273_v56 = vmul.f32 %v8684_v16, %v12818_v1 }
 0x4a5   : > { %v8253_v37 = vunpack.i.h.bf16 %v8251_v5  ;;  %v8252_v60 = vunpack.i.l.bf16 %v8251_v5  ;;  %v5309_v3 = vadd.f32 %v12872_v23, %v5270_v55  ;;  %v8223_v18 = vunpack.i.h.bf16 %v12833_v46 }
 0x4a6   : > { %v8222_v19 = vunpack.i.l.bf16 %v12833_v46  ;;  %v5342_v14 = vmax.f32 %v5310_v48, 0.0  ;;  %v8242_v46 = vunpack.i.l.bf16 %v12886_v21 }
 0x4a7   : > { %v12897_v47 = vpop.permute.xlu1 %8265  ;;  %v4969_v9 = vsel %vm1636_vm5, %v4937_v15, %v8252_v60  ;;  %v4970_v61 = vsel %vm1636_vm5, %v4938_v31, %v8253_v37  ;;  %v5311_v37 = vadd.f32 %v12872_v23, %v5272_v58  ;;  %v5312_v60 = vadd.f32 %v12872_v23, %v5273_v56  ;;  %v8687_v56 = vld [vmem:[%s9007_s18 + $0x50] sm:$0xff] }
 0x4a8   : > { %v12913_v35 = vpop.permute.xlu0 %8255  ;;  %v4997_v38 = vpack.c.bf16 %v4970_v61, %v4969_v9  ;;  %v5341_v27 = vmax.f32 %v5309_v3, 0.0  ;;  %v8243_v15 = vunpack.i.h.bf16 %v12886_v21  ;;  %v4841_v11 = vsel %vm1570_vm3, %v4809_v44, %v8222_v19  ;;  %v8685_v9 = vld [vmem:[%s9007_s18 + $0x40] sm:$0xff]  ;;  %v8686_v21 = vld [vmem:[%s9007_s18 + $0x48] sm:$0xff] }
 0x4a9   : > { %v5343_v31 = vmax.f32 %v5311_v37, 0.0  ;;  %v5344_v32 = vmax.f32 %v5312_v60, 0.0  ;;  %v4842_v22 = vsel %vm1570_vm3, %v4810_v52, %v8223_v18  ;;  %v5274_v61 = vmul.f32 %v8685_v9, %v12818_v1  ;;  %v8688_v18 = vld [vmem:[%s9007_s18 + $0x58] sm:$0xff] }
 0x4aa   : > { %6808 = vmatprep.mubr.msk.bf16.mxu0 %vm5045_vm14, %v4997_v38  ;;  %v5371_v41 = vpack.c.bf16 %v5342_v14, %v5341_v27  ;;  %v5275_v16 = vmul.f32 %v8686_v21, %v12818_v1  ;;  %v5276_v57 = vmul.f32 %v8687_v56, %v12818_v1  ;;  %v4874_v38 = vsel %vm4863_vm12, %v4841_v11, %v8242_v46 }
 0x4ab   : > { %v12920_v5 = vpop.permute.xlu1 %8270  ;;  %v5372_v53 = vpack.c.bf16 %v5344_v32, %v5343_v31  ;;  %v4875_v3 = vsel %vm4863_vm12, %v4842_v22, %v8243_v15  ;;  %v5313_v48 = vadd.f32 %v12872_v23, %v5274_v61  ;;  %v5277_v19 = vmul.f32 %v8688_v18, %v12818_v1 }
 0x4ac   : > { %v12929_v55 = vpop.permute.xlu0 %8260  ;;  %6838 = vmatprep.mubr.msk.bf16.mxu1 %vm1537_vm2, %v5371_v41  ;;  %v5314_v52 = vadd.f32 %v12872_v23, %v5275_v16  ;;  %v5315_v27 = vadd.f32 %v12872_v23, %v5276_v57  ;;  %v8268_v14 = vunpack.i.h.bf16 %v12897_v47  ;;  %v8267_v15 = vunpack.i.l.bf16 %v12897_v47 }
 0x4ad   : > { %6839 = vmatmul.mubr.msk.bf16.gmra.mrb[68].mxu1 %vm1537_vm2, %v5372_v53  ;;  %v5345_v41 = vmax.f32 %v5313_v48, 0.0  ;;  %v5316_v9 = vadd.f32 %v12872_v23, %v5277_v19  ;;  %v8257_v56 = vunpack.i.l.bf16 %v12913_v35 }
 0x4ae   : > { %v5346_v11 = vmax.f32 %v5314_v52, 0.0 }
 0x4af   : > { %v8281_v13 = vpop.permute.xlu1 %8280  ;;  %v5348_v57 = vmax.f32 %v5316_v9, 0.0 }
 0x4b0   : > { %v8283_v42 = vunpack.i.h.bf16 %v8281_v13  ;;  %v8282_v58 = vunpack.i.l.bf16 %v8281_v13  ;;  %v8276_v44 = vpop.permute.xlu0 %8275  ;;  %v5373_v16 = vpack.c.bf16 %v5346_v11, %v5345_v41  ;;  %v8262_v41 = vunpack.i.l.bf16 %v12929_v55 }
 0x4b1   : > { %v8277_v19 = vunpack.i.l.bf16 %v8276_v44  ;;  %v8278_v52 = vunpack.i.h.bf16 %v8276_v44 }
 0x4b2   : > { %v4906_v37 = vsel %vm1603_vm4, %v4874_v38, %v8282_v58  ;;  %v4907_v60 = vsel %vm1603_vm4, %v4875_v3, %v8283_v42  ;;  %v5347_v58 = vmax.f32 %v5315_v27, 0.0  ;;  %v8218_v38 = vunpack.i.h.bf16 %v12809_v33  ;;  %6842 = vmatprep.mubr.msk.bf16.mxu1 %vm1537_vm2, %v5373_v16 }
 0x4b3   : > { %v8286_v46 = vpop.permute.xlu1 %8285  ;;  %v4939_v22 = vsel %vm4928_vm13, %v4906_v37, %v8267_v15  ;;  %v4940_v13 = vsel %vm4928_vm13, %v4907_v60, %v8268_v14  ;;  %v8232_v3 = vunpack.i.l.bf16 %v12851_v25  ;;  %v4747_v60 = vsel %vm4733_vm10, %v12168_v62, %v8257_v56 }
 0x4b4   : > { %v8288_v31 = vunpack.i.h.bf16 %v8286_v46  ;;  %v8287_v32 = vunpack.i.l.bf16 %v8286_v46  ;;  %v8291_v42 = vpop.permute.xlu0 %8290  ;;  %v5374_v18 = vpack.c.bf16 %v5348_v57, %v5347_v58  ;;  %v4746_v33 = vsel %vm4733_vm10, %v12213_v36, %v8218_v38 }
 0x4b5   : > { %v8233_v27 = vunpack.i.h.bf16 %v12851_v25  ;;  %v4778_v14 = vsel %vm1537_vm2, %v4746_v33, %v8232_v3  ;;  %v8293_v44 = vunpack.i.h.bf16 %v8291_v42  ;;  %v8292_v11 = vunpack.i.l.bf16 %v8291_v42 }
 0x4b6   : > { %v4971_v53 = vsel %vm1636_vm5, %v4939_v22, %v8287_v32  ;;  %v4972_v61 = vsel %vm1636_vm5, %v4940_v13, %v8288_v31  ;;  %6843 = vmatmul.mubr.msk.bf16.gmra.mrb[72].mxu1 %vm1537_vm2, %v5374_v18  ;;  %v4811_v31 = vsel %vm4798_vm11, %v4778_v14, %v8277_v19  ;;  %v8263_v22 = vunpack.i.h.bf16 %v12929_v55 }
 0x4b7   : > { %v12957_v21 = vpop.permute.xlu1 %8295  ;;  %v4998_v47 = vpack.c.bf16 %v4972_v61, %v4971_v53  ;;  %v4779_v46 = vsel %vm1537_vm2, %v4747_v60, %v8233_v27  ;;  %v8258_v36 = vunpack.i.h.bf16 %v12913_v35  ;;  %v4843_v25 = vsel %vm1570_vm3, %v4811_v31, %v8262_v41 }
 0x4b8   : > { %v8306_v48 = vpop.permute.xlu0 %8305  ;;  %v4812_v62 = vsel %vm4798_vm11, %v4779_v46, %v8278_v52  ;;  %v8297_v53 = vunpack.i.l.bf16 %v12957_v21  ;;  %v4876_v16 = vsel %vm4863_vm12, %v4843_v25, %v8292_v11  ;;  %v8273_v35 = vunpack.i.h.bf16 %v12920_v5 }
 0x4b9   : > { %6809 = vmatmul.mubr.msk.bf16.gmra.mrb[72].mxu0 %vm5045_vm14, %v4998_v47  ;;  %v4844_v9 = vsel %vm1570_vm3, %v4812_v62, %v8263_v22  ;;  %v8272_v57 = vunpack.i.l.bf16 %v12920_v5  ;;  %v8308_v38 = vunpack.i.h.bf16 %v8306_v48  ;;  %v8307_v3 = vunpack.i.l.bf16 %v8306_v48 }
 0x4ba   : > { %v4877_v56 = vsel %vm4863_vm12, %v4844_v9, %v8293_v44  ;;  %v4748_v19 = vsel %vm4733_vm10, %v12320_v17, %v8258_v36  ;;  %v4749_v60 = vsel %vm4733_vm10, %v12241_v20, %v8297_v53  ;;  %v8689_v36 = vld [vmem:[%s9007_s18 + $0x60] sm:$0xff] }
 0x4bb   : > { %v12964_v37 = vpop.permute.xlu1 %8300  ;;  %v4780_v17 = vsel %vm1537_vm2, %v4748_v19, %v8272_v57  ;;  %v4781_v20 = vsel %vm1537_vm2, %v4749_v60, %v8273_v35  ;;  %v5278_v25 = vmul.f32 %v8689_v36, %v12818_v1 }
 0x4bc   : > { %v12973_v15 = vpop.permute.xlu0 %8310  ;;  %v8303_v11 = vunpack.i.h.bf16 %v12964_v37 }
 0x4bd   : > { %v5317_v35 = vadd.f32 %v12872_v23, %v5278_v25 }
 0x4bf   : > { %v8316_v32 = vpop.permute.xlu1 %8315 }
 0x4c0   : > { %v8326_v13 = vpop.permute.xlu0 %8325  ;;  %v8318_v14 = vunpack.i.h.bf16 %v8316_v32  ;;  %v8317_v46 = vunpack.i.l.bf16 %v8316_v32  ;;  %v8302_v32 = vunpack.i.l.bf16 %v12964_v37 }
 0x4c1   : > { %v8328_v61 = vunpack.i.h.bf16 %v8326_v13  ;;  %v8327_v58 = vunpack.i.l.bf16 %v8326_v13  ;;  %v8690_v13 = vld [vmem:[%s9007_s18 + $0x68] sm:$0xff] }
 0x4c2   : > { %v5279_v9 = vmul.f32 %v8690_v13, %v12818_v1  ;;  %v4813_v53 = vsel %vm4798_vm11, %v4780_v17, %v8317_v46 }
 0x4c3   : > { %v8321_v47 = vpop.permute.xlu1 %8320  ;;  %v4908_v42 = vsel %vm1603_vm4, %v4876_v16, %v8327_v58  ;;  %v4909_v55 = vsel %vm1603_vm4, %v4877_v56, %v8328_v61  ;;  %v4814_v61 = vsel %vm4798_vm11, %v4781_v20, %v8318_v14  ;;  %v8691_v58 = vld [vmem:[%s9007_s18 + $0x70] sm:$0xff]  ;;  %v8692_v56 = vld [vmem:[%s9007_s18 + $0x78] sm:$0xff]  ;;  %v4845_v19 = vsel %vm1570_vm3, %v4813_v53, %v8302_v32 }
 0x4c4   : > { %v8331_v18 = vpop.permute.xlu0 %8330  ;;  %v4941_v31 = vsel %vm4928_vm13, %v4908_v42, %v8307_v3  ;;  %v4942_v5 = vsel %vm4928_vm13, %v4909_v55, %v8308_v38  ;;  %v5280_v16 = vmul.f32 %v8691_v58, %v12818_v1  ;;  %v5281_v37 = vmul.f32 %v8692_v56, %v12818_v1 }
 0x4c5   : > { %v8333_v52 = vunpack.i.h.bf16 %v8331_v18  ;;  %v8332_v33 = vunpack.i.l.bf16 %v8331_v18  ;;  %v8323_v42 = vunpack.i.h.bf16 %v8321_v47  ;;  %v8322_v55 = vunpack.i.l.bf16 %v8321_v47 }
 0x4c6   : > { %v5318_v57 = vadd.f32 %v12872_v23, %v5279_v9  ;;  %v5319_v3 = vadd.f32 %v12872_v23, %v5280_v16  ;;  %v5320_v18 = vadd.f32 %v12872_v23, %v5281_v37  ;;  %v4846_v60 = vsel %vm1570_vm3, %v4814_v61, %v8303_v11 }
 0x4c7   : > { %v8341_v27 = vpop.permute.xlu1 %8340  ;;  %v4973_v48 = vsel %vm1636_vm5, %v4941_v31, %v8332_v33  ;;  %v4974_v41 = vsel %vm1636_vm5, %v4942_v5, %v8333_v52  ;;  %v5349_v33 = vmax.f32 %v5317_v35, 0.0  ;;  %v8298_v35 = vunpack.i.h.bf16 %v12957_v21 }
 0x4c8   : > { %v13000_v62 = vpop.permute.xlu0 %8335  ;;  %v4999_v44 = vpack.c.bf16 %v4974_v41, %v4973_v48  ;;  %v5350_v14 = vmax.f32 %v5318_v57, 0.0  ;;  %v5351_v5 = vmax.f32 %v5319_v3, 0.0  ;;  %v5352_v47 = vmax.f32 %v5320_v18, 0.0 }
 0x4c9   : > { %v4878_v48 = vsel %vm4863_vm12, %v4845_v19, %v8322_v55  ;;  %v4879_v41 = vsel %vm4863_vm12, %v4846_v60, %v8323_v42  ;;  %v8343_v25 = vunpack.i.h.bf16 %v8341_v27  ;;  %v8342_v11 = vunpack.i.l.bf16 %v8341_v27 }
 0x4ca   : > { %6812 = vmatprep.mubr.msk.bf16.mxu0 %vm5045_vm14, %v4999_v44  ;;  %v5375_v17 = vpack.c.bf16 %v5350_v14, %v5349_v33  ;;  %v5376_v32 = vpack.c.bf16 %v5352_v47, %v5351_v5  ;;  %v8337_v27 = vunpack.i.l.bf16 %v13000_v62  ;;  %v8312_v57 = vunpack.i.l.bf16 %v12973_v15 }
 0x4cb   : > { %v13004_v22 = vpop.permute.xlu1 %8350  ;;  %v4750_v33 = vsel %vm4733_vm10, %v12420_v63, %v8298_v35  ;;  %v8313_v14 = vunpack.i.h.bf16 %v12973_v15 }
 0x4cc   : > { %v8346_v38 = vpop.permute.xlu0 %8345  ;;  %6846 = vmatprep.mubr.msk.bf16.mxu1 %vm1537_vm2, %v5375_v17  ;;  %v4751_v60 = vsel %vm4733_vm10, %v12334_v26, %v8337_v27 }
 0x4cd   : > { %6847 = vmatmul.mubr.msk.bf16.gmra.mrb[76].mxu1 %vm1537_vm2, %v5376_v32 }
 0x4cf   : > { %v8361_v52 = vpop.permute.xlu1 %8360 }
 0x4d0   : > { %v8363_v46 = vunpack.i.h.bf16 %v8361_v52  ;;  %v8362_v31 = vunpack.i.l.bf16 %v8361_v52  ;;  %v8356_v36 = vpop.permute.xlu0 %8355 }
 0x4d1   : > { %v8357_v18 = vunpack.i.l.bf16 %v8356_v36  ;;  %v8358_v52 = vunpack.i.h.bf16 %v8356_v36 }
 0x4d2   : > { %v4910_v20 = vsel %vm1603_vm4, %v4878_v48, %v8362_v31  ;;  %v4911_v44 = vsel %vm1603_vm4, %v4879_v41, %v8363_v46  ;;  %v4782_v46 = vsel %vm1537_vm2, %v4750_v33, %v8312_v57  ;;  %v4783_v31 = vsel %vm1537_vm2, %v4751_v60, %v8313_v14 }
 0x4d3   : > { %v8366_v13 = vpop.permute.xlu1 %8365  ;;  %v4943_v61 = vsel %vm4928_vm13, %v4910_v20, %v8342_v11  ;;  %v4944_v58 = vsel %vm4928_vm13, %v4911_v44, %v8343_v25  ;;  %v4815_v5 = vsel %vm4798_vm11, %v4782_v46, %v8357_v18  ;;  %v8347_v48 = vunpack.i.l.bf16 %v8346_v38 }
 0x4d4   : > { %v8368_v9 = vunpack.i.h.bf16 %v8366_v13  ;;  %v8367_v53 = vunpack.i.l.bf16 %v8366_v13  ;;  %v8371_v37 = vpop.permute.xlu0 %8370  ;;  %v4816_v41 = vsel %vm4798_vm11, %v4783_v31, %v8358_v52  ;;  %v8348_v20 = vunpack.i.h.bf16 %v8346_v38 }
 0x4d5   : > { %v8373_v17 = vunpack.i.h.bf16 %v8371_v37  ;;  %v8372_v26 = vunpack.i.l.bf16 %v8371_v37  ;;  %v8338_v44 = vunpack.i.h.bf16 %v13000_v62  ;;  %v4847_v63 = vsel %vm1570_vm3, %v4815_v5, %v8347_v48 }
 0x4d6   : > { %v4975_v16 = vsel %vm1636_vm5, %v4943_v61, %v8367_v53  ;;  %v4976_v56 = vsel %vm1636_vm5, %v4944_v58, %v8368_v9  ;;  %v4848_v36 = vsel %vm1570_vm3, %v4816_v41, %v8348_v20  ;;  %v8353_v62 = vunpack.i.h.bf16 %v13004_v22  ;;  %v8693_v41 = vld [vmem:[%s9007_s18 + $0x80] sm:$0xff] }
 0x4d7   : > { %v13033_v42 = vpop.permute.xlu1 %8375  ;;  %v5000_v55 = vpack.c.bf16 %v4976_v56, %v4975_v16  ;;  %v4880_v9 = vsel %vm4863_vm12, %v4847_v63, %v8372_v26  ;;  %v4881_v53 = vsel %vm4863_vm12, %v4848_v36, %v8373_v17  ;;  %v8352_v58 = vunpack.i.l.bf16 %v13004_v22  ;;  %v8694_v26 = vld [vmem:[%s9007_s18 + $0x88] sm:$0xff] }
 0x4d8   : > { %v8386_v3 = vpop.permute.xlu0 %8385  ;;  %v8377_v32 = vunpack.i.l.bf16 %v13033_v42  ;;  %v5282_v17 = vmul.f32 %v8693_v41, %v12818_v1  ;;  %v5283_v20 = vmul.f32 %v8694_v26, %v12818_v1 }
 0x4d9   : > { %6813 = vmatmul.mubr.msk.bf16.gmra.mrb[76].mxu0 %vm5045_vm14, %v5000_v55  ;;  %v8388_v16 = vunpack.i.h.bf16 %v8386_v3  ;;  %v8387_v56 = vunpack.i.l.bf16 %v8386_v3  ;;  %v4752_v55 = vsel %vm4733_vm10, %v12497_v8, %v8338_v44 }
 0x4da   : > { %v4753_v27 = vsel %vm4733_vm10, %v12425_v4, %v8377_v32  ;;  %v4784_v8 = vsel %vm1537_vm2, %v4752_v55, %v8352_v58  ;;  %v8696_v32 = vld [vmem:[%s9007_s18 + $0x98] sm:$0xff] }
 0x4db   : > { %v13039_v19 = vpop.permute.xlu1 %8380  ;;  %v4785_v4 = vsel %vm1537_vm2, %v4753_v27, %v8353_v62 }
 0x4dc   : > { %v13047_v21 = vpop.permute.xlu0 %8390  ;;  %v8383_v5 = vunpack.i.h.bf16 %v13039_v19 }
 0x4df   : > { %v8396_v47 = vpop.permute.xlu1 %8395 }
 0x4e0   : > { %v8406_v15 = vpop.permute.xlu0 %8405  ;;  %v8398_v60 = vunpack.i.h.bf16 %v8396_v47  ;;  %v8397_v52 = vunpack.i.l.bf16 %v8396_v47  ;;  %v8382_v47 = vunpack.i.l.bf16 %v13039_v19  ;;  %v5285_v19 = vmul.f32 %v8696_v32, %v12818_v1 }
 0x4e1   : > { %v8408_v25 = vunpack.i.h.bf16 %v8406_v15  ;;  %v8407_v11 = vunpack.i.l.bf16 %v8406_v15  ;;  %v8695_v15 = vld [vmem:[%s9007_s18 + $0x90] sm:$0xff]  ;;  %v8378_v32 = vunpack.i.h.bf16 %v13033_v42 }
 0x4e2   : > { %v4817_v44 = vsel %vm4798_vm11, %v4784_v8, %v8397_v52  ;;  %v4818_v63 = vsel %vm4798_vm11, %v4785_v4, %v8398_v60  ;;  %v5284_v36 = vmul.f32 %v8695_v15, %v12818_v1  ;;  %v5324_v62 = vadd.f32 %v12872_v23, %v5285_v19 }
 0x4e3   : > { %v8401_v13 = vpop.permute.xlu1 %8400  ;;  %v4912_v61 = vsel %vm1603_vm4, %v4880_v9, %v8407_v11  ;;  %v4913_v38 = vsel %vm1603_vm4, %v4881_v53, %v8408_v25  ;;  %v5321_v9 = vadd.f32 %v12872_v23, %v5282_v17  ;;  %v5322_v53 = vadd.f32 %v12872_v23, %v5283_v20 }
 0x4e4   : > { %v8411_v37 = vpop.permute.xlu0 %8410  ;;  %v4945_v33 = vsel %vm4928_vm13, %v4912_v61, %v8387_v56  ;;  %v4946_v22 = vsel %vm4928_vm13, %v4913_v38, %v8388_v16  ;;  %v8403_v25 = vunpack.i.h.bf16 %v8401_v13  ;;  %v8402_v11 = vunpack.i.l.bf16 %v8401_v13 }
 0x4e5   : > { %v8413_v35 = vunpack.i.h.bf16 %v8411_v37  ;;  %v8412_v57 = vunpack.i.l.bf16 %v8411_v37  ;;  %v5323_v38 = vadd.f32 %v12872_v23, %v5284_v36  ;;  %v4849_v58 = vsel %vm1570_vm3, %v4817_v44, %v8382_v47 }
 0x4e6   : > { %v4850_v16 = vsel %vm1570_vm3, %v4818_v63, %v8383_v5  ;;  %v5353_v37 = vmax.f32 %v5321_v9, 0.0  ;;  %v5354_v55 = vmax.f32 %v5322_v53, 0.0  ;;  %v5356_v13 = vmax.f32 %v5324_v62, 0.0 }
 0x4e7   : > { %v8421_v18 = vpop.permute.xlu1 %8420  ;;  %v4977_v3 = vsel %vm1636_vm5, %v4945_v33, %v8412_v57  ;;  %v4978_v14 = vsel %vm1636_vm5, %v4946_v22, %v8413_v35  ;;  %v5355_v57 = vmax.f32 %v5323_v38, 0.0  ;;  %v4882_v60 = vsel %vm4863_vm12, %v4849_v58, %v8402_v11 }
 0x4e8   : > { %v13072_v46 = vpop.permute.xlu0 %8415  ;;  %v5001_v31 = vpack.c.bf16 %v4978_v14, %v4977_v3  ;;  %v4883_v52 = vsel %vm4863_vm12, %v4850_v16, %v8403_v25  ;;  %v5377_v33 = vpack.c.bf16 %v5354_v55, %v5353_v37  ;;  %v8423_v4 = vunpack.i.h.bf16 %v8421_v18 }
 0x4e9   : > { %v5378_v8 = vpack.c.bf16 %v5356_v13, %v5355_v57  ;;  %v8392_v19 = vunpack.i.l.bf16 %v13047_v21  ;;  %v4754_v62 = vsel %vm4733_vm10, %v12610_v7, %v8378_v32  ;;  %v8393_v58 = vunpack.i.h.bf16 %v13047_v21 }
 0x4ea   : > { %6816 = vmatprep.mubr.msk.bf16.mxu0 %vm5045_vm14, %v5001_v31  ;;  %v8422_v31 = vunpack.i.l.bf16 %v8421_v18  ;;  %6850 = vmatprep.mubr.msk.bf16.mxu1 %vm1537_vm2, %v5377_v33  ;;  %v8417_v18 = vunpack.i.l.bf16 %v13072_v46 }
 0x4eb   : > { %v13076_v48 = vpop.permute.xlu1 %8430  ;;  %6851 = vmatmul.mubr.msk.bf16.gmra.mrb[80].mxu1 %vm1537_vm2, %v5378_v8  ;;  %v4786_v16 = vsel %vm1537_vm2, %v4754_v62, %v8392_v19 }
 0x4ec   : > { %v8426_v61 = vpop.permute.xlu0 %8425  ;;  %v4755_v53 = vsel %vm4733_vm10, %v12480_v10, %v8417_v18 }
 0x4ed   : > { %v8428_v13 = vunpack.i.h.bf16 %v8426_v61 }
 0x4ef   : > { %v8441_v56 = vpop.permute.xlu1 %8440 }
 0x4f0   : > { %v8443_v27 = vunpack.i.h.bf16 %v8441_v56  ;;  %v8442_v35 = vunpack.i.l.bf16 %v8441_v56  ;;  %v8436_v14 = vpop.permute.xlu0 %8435  ;;  %v4787_v56 = vsel %vm1537_vm2, %v4755_v53, %v8393_v58 }
 0x4f1   : > { %v8437_v11 = vunpack.i.l.bf16 %v8436_v14  ;;  %v8438_v38 = vunpack.i.h.bf16 %v8436_v14 }
 0x4f2   : > { %v4914_v22 = vsel %vm1603_vm4, %v4882_v60, %v8442_v35  ;;  %v4915_v3 = vsel %vm1603_vm4, %v4883_v52, %v8443_v27  ;;  %v8427_v27 = vunpack.i.l.bf16 %v8426_v61  ;;  %v8418_v60 = vunpack.i.h.bf16 %v13072_v46 }
 0x4f3   : > { %v8446_v5 = vpop.permute.xlu1 %8445  ;;  %v4947_v17 = vsel %vm4928_vm13, %v4914_v22, %v8422_v31  ;;  %v4948_v26 = vsel %vm4928_vm13, %v4915_v3, %v8423_v4  ;;  %v4819_v37 = vsel %vm4798_vm11, %v4786_v16, %v8437_v11  ;;  %v4820_v35 = vsel %vm4798_vm11, %v4787_v56, %v8438_v38  ;;  %v13152_v16 = vld [vmem:[%s14566_s7] ss:$0 sm:$0xff] }
 0x4f4   : > { %v8448_v47 = vunpack.i.h.bf16 %v8446_v5  ;;  %v8447_v41 = vunpack.i.l.bf16 %v8446_v5  ;;  %v8451_v63 = vpop.permute.xlu0 %8450  ;;  %v4851_v7 = vsel %vm1570_vm3, %v4819_v37, %v8427_v27  ;;  %v4852_v52 = vsel %vm1570_vm3, %v4820_v35, %v8428_v13 }
 0x4f5   : > { %v8453_v57 = vunpack.i.h.bf16 %v8451_v63  ;;  %v8452_v10 = vunpack.i.l.bf16 %v8451_v63  ;;  %v8432_v46 = vunpack.i.l.bf16 %v13076_v48 }
 0x4f6   : > { %v4979_v20 = vsel %vm1636_vm5, %v4947_v17, %v8447_v41  ;;  %v4980_v44 = vsel %vm1636_vm5, %v4948_v26, %v8448_v47  ;;  %v4756_v17 = vsel %vm4733_vm10, %v12691_v6, %v8418_v60  ;;  %v8699_v60 = vld [vmem:[%s9007_s18 + $0xa8] sm:$0xff] }
 0x4f7   : > { %v13105_v15 = vpop.permute.xlu1 %8455  ;;  %v5002_v36 = vpack.c.bf16 %v4980_v44, %v4979_v20  ;;  %v4884_v8 = vsel %vm4863_vm12, %v4851_v7, %v8452_v10  ;;  %v4885_v4 = vsel %vm4863_vm12, %v4852_v52, %v8453_v57  ;;  %v4788_v53 = vsel %vm1537_vm2, %v4756_v17, %v8432_v46 }
 0x4f8   : > { %v8466_v25 = vpop.permute.xlu0 %8465  ;;  %v8457_v33 = vunpack.i.l.bf16 %v13105_v15  ;;  %v5287_v7 = vmul.f32 %v8699_v60, %v12818_v1 }
 0x4f9   : > { %6817 = vmatmul.mubr.msk.bf16.gmra.mrb[80].mxu0 %vm5045_vm14, %v5002_v36  ;;  %v8468_v5 = vunpack.i.h.bf16 %v8466_v25  ;;  %v8467_v47 = vunpack.i.l.bf16 %v8466_v25  ;;  %v8433_v25 = vunpack.i.h.bf16 %v13076_v48 }
 0x4fa   : > { %v4757_v26 = vsel %vm4733_vm10, %v12590_v45, %v8457_v33  ;;  %v13171_v33 = vld [vmem:[%s14567_s8] ss:$0 sm:$0xff] }
 0x4fb   : > { %v13111_v9 = vpop.permute.xlu1 %8460  ;;  %v4789_v58 = vsel %vm1537_vm2, %v4757_v26, %v8433_v25 }
 0x4fc   : > { %v13119_v42 = vpop.permute.xlu0 %8470  ;;  %v8463_v62 = vunpack.i.h.bf16 %v13111_v9  ;;  %v8462_v35 = vunpack.i.l.bf16 %v13111_v9 }
 0x4ff   : > { %v8476_v55 = vpop.permute.xlu1 %8475 }
 0x500   : > { %v8486_v21 = vpop.permute.xlu0 %8485  ;;  %v8478_v36 = vunpack.i.h.bf16 %v8476_v55  ;;  %v8477_v18 = vunpack.i.l.bf16 %v8476_v55  ;;  %v8698_v55 = vld [vmem:[%s9007_s18 + $0xa0] sm:$0xff] }
 0x501   : > { %v8488_v22 = vunpack.i.h.bf16 %v8486_v21  ;;  %v8487_v3 = vunpack.i.l.bf16 %v8486_v21  ;;  %v5286_v27 = vmul.f32 %v8698_v55, %v12818_v1 }
 0x502   : > { %v4821_v57 = vsel %vm4798_vm11, %v4788_v53, %v8477_v18  ;;  %v4822_v10 = vsel %vm4798_vm11, %v4789_v58, %v8478_v36 }
 0x503   : > { %v8481_v14 = vpop.permute.xlu1 %8480  ;;  %v4916_v31 = vsel %vm1603_vm4, %v4884_v8, %v8487_v3  ;;  %v4917_v61 = vsel %vm1603_vm4, %v4885_v4, %v8488_v22  ;;  %v5325_v8 = vadd.f32 %v12872_v23, %v5286_v27  ;;  %v5326_v4 = vadd.f32 %v12872_v23, %v5287_v7 }
 0x504   : > { %v8491_v41 = vpop.permute.xlu0 %8490  ;;  %v4949_v32 = vsel %vm4928_vm13, %v4916_v31, %v8467_v47  ;;  %v4950_v19 = vsel %vm4928_vm13, %v4917_v61, %v8468_v5  ;;  %v8483_v21 = vunpack.i.h.bf16 %v8481_v14  ;;  %v8482_v52 = vunpack.i.l.bf16 %v8481_v14 }
 0x505   : > { %v8493_v20 = vunpack.i.h.bf16 %v8491_v41  ;;  %v8492_v44 = vunpack.i.l.bf16 %v8491_v41  ;;  %v4853_v31 = vsel %vm1570_vm3, %v4821_v57, %v8462_v35  ;;  %v4854_v61 = vsel %vm1570_vm3, %v4822_v10, %v8463_v62 }
 0x506   : > { %v5357_v17 = vmax.f32 %v5325_v8, 0.0  ;;  %v5358_v26 = vmax.f32 %v5326_v4, 0.0 }
 0x507   : > { %v13137_v63 = vpop.permute.xlu1 %8500  ;;  %v4981_v11 = vsel %vm1636_vm5, %v4949_v32, %v8492_v44  ;;  %v4982_v6 = vsel %vm1636_vm5, %v4950_v19, %v8493_v20  ;;  %v4886_v20 = vsel %vm4863_vm12, %v4853_v31, %v8482_v52  ;;  %v4887_v44 = vsel %vm4863_vm12, %v4854_v61, %v8483_v21  ;;  %v8701_v21 = vld [vmem:[%s9007_s18 + $0xb0] sm:$0xff] }
 0x508   : > { %v5003_v38 = vpack.c.bf16 %v4982_v6, %v4981_v11  ;;  %v5379_v25 = vpack.c.bf16 %v5358_v26, %v5357_v17  ;;  %v8503_v11 = vunpack.i.h.bf16 %v13137_v63  ;;  %v8502_v6 = vunpack.i.l.bf16 %v13137_v63 }
 0x509   : > { %v13145_v45 = vpop.f32.mrb[52].mxu1  ;;  %v5288_v52 = vmul.f32 %v8701_v21, %v12818_v1 }
 0x50a   : > { %v3655_v48 = vmul.f32 %v13152_v16, %v13145_v45  ;;  %v3601_v56 = vpop.f32.mrb[53].mxu1  ;;  %6820 = vmatprep.mubr.msk.bf16.mxu0 %vm5045_vm14, %v5003_v38  ;;  %6854 = vmatprep.mubr.msk.bf16.mxu1 %vm1537_vm2, %v5379_v25 }
 0x50b   : > { %v13156_v37 = vpop.permute.xlu1 %8510  ;;  %v13164_v13 = vpop.f32.mrb[54].mxu1  ;;  %v5327_v17 = vadd.f32 %v12872_v23, %v5288_v52 }
 0x50c   : > { %v3694_v9 = vadd.f32 %v13171_v33, %v3655_v48  ;;  %v3656_v22 = vmul.f32 %v13152_v16, %v13164_v13  ;;  %v3604_v3 = vpop.f32.mrb[55].mxu1 }
 0x50e   : > { %v3726_v14 = vmax.f32 %v3694_v9, 0.0  ;;  %v3695_v46 = vadd.f32 %v13171_v33, %v3656_v22  ;;  %v8702_v9 = vld [vmem:[%s9007_s18 + $0xb8] sm:$0xff] }
 0x50f   : > { %v8521_v5 = vpop.permute.xlu1 %8520  ;;  %v5289_v22 = vmul.f32 %v8702_v9, %v12818_v1 }
 0x510   : > { %v8523_v47 = vunpack.i.h.bf16 %v8521_v5  ;;  %v8522_v41 = vunpack.i.l.bf16 %v8521_v5  ;;  %v13183_v36 = vmax.f32 %v3695_v46, 0.0  ;;  %v8534_v18 = vpack.i.bf16 %v3726_v14, %v12758_v24 }
 0x511   : > { %v3891_v38 = vrot.slane %v3726_v14, 1  ;;  %v3801_v62 = vrot.slane %v3726_v14, 7  ;;  %v5328_v26 = vadd.f32 %v12872_v23, %v5289_v22 }
 0x512   : > { %v4918_v32 = vsel %vm1603_vm4, %v4886_v20, %v8522_v41  ;;  %v4919_v19 = vsel %vm1603_vm4, %v4887_v44, %v8523_v47  ;;  %8535 = vrot.lane.b32.xlu1 %v8534_v18, %s15237_s27  ;;  %v8544_v24 = vpack.i.bf16 %v13183_v36, %v3726_v14  ;;  %v3892_v27 = vrot.slane %v13183_v36, 1 }
 0x513   : > { %v8526_v53 = vpop.permute.xlu1 %8525  ;;  %v4951_v56 = vsel %vm4928_vm13, %v4918_v32, %v8502_v6  ;;  %v4952_v55 = vsel %vm4928_vm13, %v4919_v19, %v8503_v11  ;;  %v3802_v63 = vrot.slane %v13183_v36, 7  ;;  %v13217_v46 = vsel %vm633_vm1, 0.0, %v3801_v62 }
 0x514   : > { %v8528_v58 = vunpack.i.h.bf16 %v8526_v53  ;;  %v8527_v48 = vunpack.i.l.bf16 %v8526_v53  ;;  %8545 = vrot.lane.b32.xlu0 %v8544_v24, %s15236_s24  ;;  %v3893_v60 = vsel %vm729_vm0, %v3891_v38, %v3892_v27  ;;  %v3925_v7 = vsel %vm729_vm0, %v3892_v27, 0.0 }
 0x515   : > { %v8549_v4 = vpack.i.bf16 %v3925_v7, %v3893_v60  ;;  %v13212_v61 = vsel %vm633_vm1, %v3801_v62, %v3802_v63  ;;  %v5359_v18 = vmax.f32 %v5327_v17, 0.0  ;;  %v5360_v32 = vmax.f32 %v5328_v26, 0.0 }
 0x516   : > { %v4983_v35 = vsel %vm1636_vm5, %v4951_v56, %v8527_v48  ;;  %v4984_v57 = vsel %vm1636_vm5, %v4952_v55, %v8528_v58  ;;  %8540 = vrot.lane.b32.xlu1 %v8544_v24, %s15089_s25  ;;  %v8554_v41 = vpack.i.bf16 %v13212_v61, %v13217_v46 }
 0x517   : > { %v13201_v10 = vpop.f32.mrb[56].mxu1  ;;  %v5004_v31 = vpack.c.bf16 %v4984_v57, %v4983_v35  ;;  %v5380_v53 = vpack.c.bf16 %v5360_v32, %v5359_v18  ;;  %v15284_v18 = vld [vmem:[#allocation106_spill] sm:$0xff]  ;;  %v15285_v32 = vld [vmem:[#allocation124_spill] sm:$0xff] }
 0x518   : > { %v3657_v3 = vmul.f32 %v13152_v16, %v13201_v10  ;;  %v3609_v8 = vpop.f32.mrb[57].mxu1  ;;  %8550 = vrot.lane.b32.xlu0 %v8549_v4, %s15275_s0 }
 0x519   : > { %v13214_v14 = vpop.f32.mrb[58].mxu1  ;;  %6821 = vmatmul.mubr.msk.bf16.gmra.mrb[84].mxu0 %vm5045_vm14, %v5004_v31  ;;  %6855 = vmatmul.mubr.msk.bf16.gmra.mrb[84].mxu1 %vm1537_vm2, %v5380_v53 }
 0x51a   : > { %v3696_v5 = vadd.f32 %v13171_v33, %v3657_v3  ;;  %v3658_v1 = vmul.f32 %v13152_v16, %v13214_v14  ;;  %v3612_v47 = vpop.f32.mrb[59].mxu1  ;;  %8555 = vrot.lane.b32.xlu1 %v8554_v41, %s15239_s17 }
 0x51c   : > { %v3728_v20 = vmax.f32 %v3696_v5, 0.0  ;;  %v3697_v44 = vadd.f32 %v13171_v33, %v3658_v1  ;;  %8565 = vrot.lane.b32.xlu0 %v8554_v41, %s15232_s15 }
 0x51e   : > { %v3729_v19 = vmax.f32 %v3697_v44, 0.0  ;;  %v8574_v25 = vpack.i.bf16 %v3728_v20, %v13183_v36  ;;  %v3894_v6 = vrot.slane %v3728_v20, 1  ;;  %8560 = vrot.lane.b32.xlu1 %v8549_v4, %s15270_s23  ;;  %v3804_v24 = vrot.slane %v3728_v20, 7  ;;  %v15283_v44 = vld [vmem:[#allocation115_spill] sm:$0xff] }
 0x51f   : > { %v13232_v11 = vpop.f32.mrb[60].mxu1 }
 0x520   : > { %v3659_v23 = vmul.f32 %v13152_v16, %v13232_v11  ;;  %v3617_v38 = vpop.f32.mrb[61].mxu1  ;;  %v8579_v62 = vpack.i.bf16 %v3729_v19, %v3728_v20  ;;  %v3895_v58 = vrot.slane %v3729_v19, 1  ;;  %v3805_v56 = vrot.slane %v3729_v19, 7  ;;  %8570 = vrot.lane.b32.xlu0 %v8549_v4, %s15235_s22 }
 0x521   : > { %v13237_v48 = vpop.f32.mrb[62].mxu1  ;;  %v13255_v4 = vsel %vm633_vm1, 0.0, %v3804_v24  ;;  %v15289_v38 = vld [vmem:[#allocation79_spill] sm:$0xff] }
 0x522   : > { %v3698_v36 = vadd.f32 %v13171_v33, %v3659_v23  ;;  %v3660_v55 = vmul.f32 %v13152_v16, %v13237_v48  ;;  %v3620_v27 = vpop.f32.mrb[63].mxu1  ;;  %v3896_v63 = vsel %vm729_vm0, %v3894_v6, %v3895_v58  ;;  %v3926_v35 = vsel %vm729_vm0, %v3895_v58, 0.0  ;;  %3999 = vrot.lane.b32.xlu1 %v3729_v19, %s15237_s27  ;;  %v15286_v19 = vld [vmem:[#allocation40_spill] sm:$0xff]  ;;  %v15288_v6 = vld [vmem:[#allocation59_spill] sm:$0xff] }
 0x523   : > { %v8589_v57 = vpack.i.bf16 %v3926_v35, %v3896_v63  ;;  %v13247_v60 = vsel %vm633_vm1, %v3804_v24, %v3805_v56  ;;  %v15290_v24 = vld [vmem:[#allocation78_spill] sm:$0xff]  ;;  %v13324_v56 = vpop.permute.xlu0 %8495 }
 0x524   : > { %v3730_v7 = vmax.f32 %v3698_v36, 0.0  ;;  %v3699_v21 = vadd.f32 %v13171_v33, %v3660_v55  ;;  %8575 = vrot.lane.b32.xlu0 %v8574_v25, %s15237_s27  ;;  %v8594_v41 = vpack.i.bf16 %v13247_v60, %v13255_v4  ;;  %v15287_v25 = vld [vmem:[#allocation96_spill] sm:$0xff]  ;;  %v15291_v36 = vld [vmem:[#allocation105_spill] sm:$0xff] }
 0x526   : > { %v3731_v52 = vmax.f32 %v3699_v21, 0.0  ;;  %v3929_v9 = vrot.slane %v3730_v7, 7  ;;  %8580 = vrot.lane.b32.xlu1 %v8579_v62, %s15236_s24  ;;  %v3934_v3 = vrot.slane %v3730_v7, 1  ;;  %v8472_v21 = vunpack.i.l.bf16 %v13119_v42 }
 0x527   : > { %v8506_v55 = vpop.permute.xlu0 %8505 }
 0x528   : > { %v3930_v22 = vrot.slane %v3731_v52, 7  ;;  %v8619_v16 = vpack.i.bf16 %v3731_v52, %v3730_v7  ;;  %v3935_v8 = vrot.slane %v3731_v52, 1  ;;  %8585 = vrot.lane.b32.xlu0 %v8579_v62, %s15089_s25  ;;  %v3933_v33 = vsel %vm633_vm1, 0.0, %v3929_v9 }
 0x52a   : > { %v3931_v31 = vsel %vm633_vm1, %v3929_v9, %v3930_v22  ;;  %v3936_v1 = vsel %vm729_vm0, %v3934_v3, %v3935_v8  ;;  %v3938_v47 = vsel %vm729_vm0, %v3935_v8, 0.0  ;;  %8590 = vrot.lane.b32.xlu1 %v8589_v57, %s15275_s0  ;;  %v8473_v8 = vunpack.i.h.bf16 %v13119_v42 }
 0x52b   : > { %v8634_v5 = vpack.i.bf16 %v3931_v31, %v3933_v33  ;;  %v8639_v17 = vpack.i.bf16 %v3938_v47, %v3936_v1  ;;  %v8516_v63 = vpop.permute.xlu0 %8515  ;;  %vm5974_vm0 = vcmask 1042434   ;;  %vm5977_vm1 = vcmask 1043459  }
 0x52c   : > { %8595 = vrot.lane.b32.xlu0 %v8594_v41, %s15239_s17  ;;  %v8518_v22 = vunpack.i.h.bf16 %v8516_v63 }
 0x52e   : > { %8600 = vrot.lane.b32.xlu1 %v8594_v41, %s15232_s15 }
 0x530   : > { %8610 = vrot.lane.b32.xlu0 %v8589_v57, %s15270_s23 }
 0x532   : > { %8605 = vrot.lane.b32.xlu1 %v8589_v57, %s15235_s22 }
 0x534   : > { %8620 = vrot.lane.b32.xlu0 %v8619_v16, %s15236_s24 }
 0x536   : > { %8615 = vrot.lane.b32.xlu1 %v8619_v16, %s15089_s25  ;;  %v8517_v16 = vunpack.i.l.bf16 %v8516_v63  ;;  %v8707_v63 = vld [vmem:[%s9007_s18 + $0xd0] sm:$0xff] }
 0x538   : > { %8635 = vrot.lane.b32.xlu0 %v8634_v5, %s15232_s15 }
 0x53a   : > { %8625 = vrot.lane.b32.xlu1 %v8634_v5, %s15239_s17 }
 0x53c   : > { %8640 = vrot.lane.b32.xlu0 %v8639_v17, %s15235_s22 }
 0x53e   : > { %8630 = vrot.lane.b32.xlu1 %v8639_v17, %s15270_s23 }
 0x540   : > { %5634 = vrot.lane.b32.xlu0 %v11986_v40, %s15275_s0 }
 0x542   : > { %8645 = vrot.lane.b32.xlu1 %v15231_v34, %s15235_s22 }
 0x544   : > { %5638 = vrot.lane.b32.xlu0 %v12013_v2, %s15275_s0  ;;  %v15277_v2 = vld [vmem:[#allocation87_spill] sm:$0xff] }
 0x546   : > { %5636 = vrot.lane.b32.xlu1 %v11996_v0, %s15275_s0  ;;  %v15276_v0 = vld [vmem:[#allocation37_spill] sm:$0xff] }
 0x548   : > { %5642 = vrot.lane.b32.xlu0 %v12048_v28, %s15275_s0  ;;  %v15279_v28 = vld [vmem:[#allocation97_spill] sm:$0xff] }
 0x54a   : > { %5640 = vrot.lane.b32.xlu1 %v12018_v59, %s15275_s0  ;;  %v15278_v59 = vld [vmem:[#allocation121_spill] sm:$0xff] }
 0x54c   : > { %v6802_v26 = vpop.f32.mrb[64].mxu0  ;;  %5646 = vrot.lane.b32.xlu0 %v12078_v30, %s15275_s0  ;;  %v15280_v30 = vld [vmem:[#allocation90_spill] sm:$0xff] }
 0x54d   : > { %v5132_v40 = vpop.f32.mrb[65].mxu0 }
 0x54e   : > { %v6803_v20 = vpop.f32.mrb[66].mxu0  ;;  %5644 = vrot.lane.b32.xlu1 %v12057_v50, %s15275_s0  ;;  %v15281_v50 = vld [vmem:[#allocation72_spill] sm:$0xff] }
 0x54f   : > { %v5135_v34 = vpop.f32.mrb[67].mxu0 }
 0x550   : > { %5650 = vrot.lane.b32.xlu0 %v12109_v29, %s15275_s0  ;;  %v15282_v29 = vld [vmem:[#allocation73_spill] sm:$0xff] }
 0x552   : > { %5648 = vrot.lane.b32.xlu1 %v15276_v0, %s15275_s0 }
 0x554   : > { %5654 = vrot.lane.b32.xlu0 %v15277_v2, %s15275_s0 }
 0x556   : > { %5652 = vrot.lane.b32.xlu1 %v15278_v59, %s15275_s0 }
 0x558   : > { %5658 = vrot.lane.b32.xlu0 %v15279_v28, %s15275_s0 }
 0x55a   : > { %5656 = vrot.lane.b32.xlu1 %v15280_v30, %s15275_s0 }
 0x55c   : > { %5662 = vrot.lane.b32.xlu0 %v15281_v50, %s15275_s0  ;;  %v8703_v50 = vld [vmem:[%s9007_s18 + $0xc0] sm:$0xff] }
 0x55e   : > { %5660 = vrot.lane.b32.xlu1 %v15282_v29, %s15275_s0  ;;  %v13401_v29 = vld [vmem:[%s14569_s10] ss:$0 sm:$0xff] }
 0x560   : > { %5666 = vrot.lane.b32.xlu0 %v15283_v44, %s15275_s0  ;;  %v5290_v44 = vmul.f32 %v13401_v29, %v8703_v50 }
 0x562   : > { %5664 = vrot.lane.b32.xlu1 %v15284_v18, %s15275_s0  ;;  %v8705_v18 = vld [vmem:[%s9007_s18 + $0xc8] sm:$0xff] }
 0x564   : > { %5670 = vrot.lane.b32.xlu0 %v15285_v32, %s15275_s0  ;;  %v5291_v32 = vmul.f32 %v8705_v18, %v13401_v29  ;;  %v8512_v18 = vunpack.i.l.bf16 %v13156_v37 }
 0x566   : > { %5668 = vrot.lane.b32.xlu1 %v15286_v19, %s15275_s0 }
 0x568   : > { %5674 = vrot.lane.b32.xlu0 %v15287_v25, %s15275_s0 }
 0x56a   : > { %5672 = vrot.lane.b32.xlu1 %v15288_v6, %s15275_s0 }
 0x56c   : > { %v6806_v53 = vpop.f32.mrb[68].mxu0  ;;  %5678 = vrot.lane.b32.xlu0 %v15289_v38, %s15275_s0 }
 0x56d   : > { %v5148_v23 = vpop.f32.mrb[69].mxu0 }
 0x56e   : > { %v6807_v62 = vpop.f32.mrb[70].mxu0  ;;  %5676 = vrot.lane.b32.xlu1 %v15290_v24, %s15275_s0  ;;  %v13418_v24 = vld [vmem:[%s14570_s11] ss:$0 sm:$0xff] }
 0x56f   : > { %v13320_v58 = vpop.f32.mrb[71].mxu0 }
 0x570   : > { %5682 = vrot.lane.b32.xlu0 %v12669_v49, %s15275_s0 }
 0x572   : > { %5680 = vrot.lane.b32.xlu1 %v15291_v36, %s15275_s0  ;;  %v5329_v36 = vadd.f32 %v13418_v24, %v5290_v44 }
 0x574   : > { %5686 = vrot.lane.b32.xlu0 %v13145_v45, %s15275_s0  ;;  %v8531_v45 = vpop.permute.xlu0 %8530 }
 0x575   : > { %v13338_v27 = vpop.f32.mrb[64].mxu1  ;;  %v8533_v42 = vunpack.i.h.bf16 %v8531_v45  ;;  %v8532_v41 = vunpack.i.l.bf16 %v8531_v45  ;;  %v5292_v45 = vmul.f32 %v8707_v63, %v13401_v29 }
 0x576   : > { %5684 = vrot.lane.b32.xlu1 %v12680_v12, %s15275_s0  ;;  %v13342_v49 = vpop.f32.mrb[65].mxu1 }
 0x577   : > { %v13344_v35 = vpop.f32.mrb[66].mxu1 }
 0x578   : > { %5690 = vrot.lane.b32.xlu0 %v13201_v10, %s15275_s0  ;;  %v13348_v12 = vpop.f32.mrb[67].mxu1 }
 0x57a   : > { %5688 = vrot.lane.b32.xlu1 %v13164_v13, %s15275_s0  ;;  %v8497_v13 = vunpack.i.l.bf16 %v13324_v56 }
 0x57c   : > { %5694 = vrot.lane.b32.xlu0 %v13232_v11, %s15275_s0  ;;  %v4759_v9 = vsel %vm4733_vm10, %v12661_v51, %v8497_v13  ;;  %v8708_v13 = vld [vmem:[%s9007_s18 + $0xd8] sm:$0xff] }
 0x57d   : > { %v4791_v33 = vsel %vm1537_vm2, %v4759_v9, %v8473_v8 }
 0x57e   : > { %5692 = vrot.lane.b32.xlu1 %v13214_v14, %s15275_s0  ;;  %v8458_v14 = vunpack.i.h.bf16 %v13105_v15  ;;  %v4824_v47 = vsel %vm4798_vm11, %v4791_v33, %v8518_v22 }
 0x580   : > { %5766 = vrot.lane.b32.xlu0 %v6802_v26, %s15239_s17  ;;  %v13356_v11 = vpop.f32.mrb[68].mxu1  ;;  %v4758_v15 = vsel %vm4733_vm10, %v12756_v54, %v8458_v14  ;;  %v8508_v26 = vunpack.i.h.bf16 %v8506_v55  ;;  %v8507_v54 = vunpack.i.l.bf16 %v8506_v55  ;;  %v5330_v55 = vadd.f32 %v13418_v24, %v5291_v32 }
 0x581   : > { %v13359_v57 = vpop.f32.mrb[69].mxu1  ;;  %v4790_v31 = vsel %vm1537_vm2, %v4758_v15, %v8472_v21  ;;  %v5293_v14 = vmul.f32 %v8708_v13, %v13401_v29  ;;  %v5361_v15 = vmax.f32 %v5329_v36, 0.0 }
 0x582   : > { %5696 = vrot.lane.b32.xlu1 %v13237_v48, %s15275_s0  ;;  %v13362_v7 = vpop.f32.mrb[70].mxu1  ;;  %v4823_v1 = vsel %vm4798_vm11, %v4790_v31, %v8517_v16  ;;  %v4856_v59 = vsel %vm1570_vm3, %v4824_v47, %v8508_v26  ;;  %v5362_v31 = vmax.f32 %v5330_v55, 0.0  ;;  %v5331_v26 = vadd.f32 %v13418_v24, %v5292_v45  ;;  %s6554_s0 = scalar_lea.sflag [#allocation4], %s9003_s30 }
 0x583   : > { %v13368_v48 = vpop.f32.mrb[71].mxu1  ;;  %v4855_v2 = vsel %vm1570_vm3, %v4823_v1, %v8507_v54  ;;  %v4889_v25 = vsel %vm4863_vm12, %v4856_v59, %v8533_v42  ;;  %v8498_v54 = vunpack.i.h.bf16 %v13324_v56  ;;  %v8513_v55 = vunpack.i.h.bf16 %v13156_v37 }
 0x584   : > { %v13354_v10 = vpop.permute.xlu1 %8535  ;;  %5762 = vrot.lane.b32.xlu0 %v5132_v40, %s15239_s17  ;;  %v4888_v19 = vsel %vm4863_vm12, %v4855_v2, %v8532_v41  ;;  %v5381_v41 = vpack.c.bf16 %v5362_v31, %v5361_v15 }
 0x585   : > { %v8537_v59 = vunpack.i.l.bf16 %v13354_v10 }
 0x586   : > { %v13365_v52 = vpop.permute.xlu0 %8545  ;;  %5768 = vrot.lane.b32.xlu1 %v6803_v20, %s15239_s17  ;;  %6858 = vmatprep.mubr.msk.bf16.mxu1 %vm1537_vm2, %v5381_v41 }
 0x587   : > { %v8547_v21 = vunpack.i.l.bf16 %v13365_v52  ;;  %v8548_v16 = vunpack.i.h.bf16 %v13365_v52  ;;  %v5332_v52 = vadd.f32 %v13418_v24, %v5293_v14 }
 0x588   : > { %v13372_v3 = vpop.permute.xlu1 %8540  ;;  %5774 = vrot.lane.b32.xlu0 %v6806_v53, %s15239_s17 }
 0x589   : > { %v5364_v44 = vmax.f32 %v5332_v52, 0.0  ;;  %v8542_v14 = vunpack.i.l.bf16 %v13372_v3 }
 0x58a   : > { %v13380_v5 = vpop.permute.xlu0 %8550  ;;  %5764 = vrot.lane.b32.xlu1 %v5135_v34, %s15239_s17  ;;  %v13390_v34 = vpop.f32.mrb[72].mxu1 }
 0x58b   : > { %v13395_v30 = vpop.f32.mrb[73].mxu1  ;;  %v8553_v15 = vunpack.i.h.bf16 %v13380_v5 }
 0x58c   : > { %v6810_v51 = vpop.f32.mrb[72].mxu0  ;;  %v13385_v40 = vpop.permute.xlu1 %8555  ;;  %5770 = vrot.lane.b32.xlu0 %v5148_v23, %s15239_s17 }
 0x58d   : > { %v5164_v17 = vpop.f32.mrb[73].mxu0  ;;  %v13408_v23 = vpop.f32.mrb[74].mxu1 }
 0x58e   : > { %v6811_v20 = vpop.f32.mrb[74].mxu0  ;;  %v8566_v28 = vpop.permute.xlu0 %8565  ;;  %5776 = vrot.lane.b32.xlu1 %v6807_v62, %s15239_s17 }
 0x58f   : > { %v13388_v0 = vpop.f32.mrb[75].mxu0  ;;  %v8568_v6 = vunpack.i.h.bf16 %v8566_v28  ;;  %v8567_v53 = vunpack.i.l.bf16 %v8566_v28  ;;  %v13413_v62 = vpop.f32.mrb[75].mxu1 }
 0x590   : > { %v13410_v38 = vpop.permute.xlu1 %8560  ;;  %5782 = vrot.lane.b32.xlu0 %v6810_v51, %s15239_s17 }
 0x591   : > { %v4920_v9 = vsel %vm1603_vm4, %v4888_v19, %v8567_v53  ;;  %v4921_v22 = vsel %vm1603_vm4, %v4889_v25, %v8568_v6  ;;  %v4760_v19 = vsel %vm4733_vm10, %v12827_v39, %v8498_v54  ;;  %v8557_v25 = vunpack.i.l.bf16 %v13385_v40 }
 0x592   : > { %v8571_v8 = vpop.permute.xlu0 %8570  ;;  %5772 = vrot.lane.b32.xlu1 %v13320_v58, %s15239_s17  ;;  %v4953_v1 = vsel %vm4928_vm13, %v4920_v9, %v8547_v21  ;;  %v4954_v47 = vsel %vm4928_vm13, %v4921_v22, %v8548_v16  ;;  %v8538_v6 = vunpack.i.h.bf16 %v13354_v10  ;;  %v8558_v53 = vunpack.i.h.bf16 %v13385_v40  ;;  %v15292_v22 = vld [vmem:[#allocation42_spill] sm:$0xff] }
 0x593   : > { %v8573_v33 = vunpack.i.h.bf16 %v8571_v8  ;;  %v8572_v51 = vunpack.i.l.bf16 %v8571_v8  ;;  %v8552_v39 = vunpack.i.l.bf16 %v13380_v5  ;;  %v4792_v63 = vsel %vm1537_vm2, %v4760_v19, %v8512_v18 }
 0x594   : > { %v4000_v42 = vpop.permute.xlu1 %3999  ;;  %5778 = vrot.lane.b32.xlu0 %v5164_v17, %s15239_s17  ;;  %v5363_v17 = vmax.f32 %v5331_v26, 0.0  ;;  %v4825_v40 = vsel %vm4798_vm11, %v4792_v63, %v8557_v25  ;;  %v8562_v13 = vunpack.i.l.bf16 %v13410_v38  ;;  %v8563_v21 = vunpack.i.h.bf16 %v13410_v38  ;;  %v8710_v63 = vld [vmem:[%s9007_s18 + $0xe8] sm:$0xff] }
 0x595   : > { %v4985_v58 = vsel %vm1636_vm5, %v4953_v1, %v8572_v51  ;;  %v4986_v2 = vsel %vm1636_vm5, %v4954_v47, %v8573_v33  ;;  %v8028_v16 = vunpack.i.h.bf16 %v15292_v22  ;;  %v8543_v8 = vunpack.i.h.bf16 %v13372_v3 }
 0x596   : > { %v13441_v28 = vpop.permute.xlu0 %8575  ;;  %5784 = vrot.lane.b32.xlu1 %v6811_v20, %s15239_s17  ;;  %v5005_v50 = vpack.c.bf16 %v4986_v2, %v4985_v58  ;;  %v5382_v32 = vpack.c.bf16 %v5364_v44, %v5363_v17  ;;  %v4761_v20 = vsel %vm4733_vm10, %v12813_v43, %v8537_v59  ;;  %v4857_v33 = vsel %vm1570_vm3, %v4825_v40, %v8542_v14 }
 0x597   : > { %v8577_v10 = vunpack.i.l.bf16 %v13441_v28  ;;  %v4793_v43 = vsel %vm1537_vm2, %v4761_v20, %v8513_v55  ;;  %v4890_v38 = vsel %vm4863_vm12, %v4857_v33, %v8562_v13  ;;  %v13485_v5 = vsel %vm4733_vm10, %v13247_v60, %v4000_v42  ;;  %v8709_v55 = vld [vmem:[%s9007_s18 + $0xe0] sm:$0xff]  ;;  %v8712_v13 = vld [vmem:[%s9007_s18 + $0xf8] sm:$0xff] }
 0x598   : > { %6824 = vmatprep.mubr.msk.bf16.mxu0 %vm5045_vm14, %v5005_v50  ;;  %v8581_v56 = vpop.permute.xlu1 %8580  ;;  %6859 = vmatmul.mubr.msk.bf16.gmra.mrb[88].mxu1 %vm1537_vm2, %v5382_v32  ;;  %v4826_v37 = vsel %vm4798_vm11, %v4793_v43, %v8558_v53  ;;  %v8578_v54 = vunpack.i.h.bf16 %v13441_v28  ;;  %v8711_v43 = vld [vmem:[%s9007_s18 + $0xf0] sm:$0xff]  ;;  %s6648_s18 = sshll.u32 %s9003_s30, 6 }
 0x599   : > { %v4858_v41 = vsel %vm1570_vm3, %v4826_v37, %v8543_v8  ;;  %v8583_v58 = vunpack.i.h.bf16 %v8581_v56  ;;  %v5296_v40 = vmul.f32 %v8711_v43, %v13401_v29 }
 0x59a   : > { %v13454_v36 = vpop.permute.xlu0 %8585  ;;  %5780 = vrot.lane.b32.xlu1 %v13388_v0, %s15239_s17  ;;  %v4762_v0 = vsel %vm4733_vm10, %v13217_v46, %v8538_v6  ;;  %v4763_v46 = vsel %vm4733_vm10, %v13212_v61, %v8577_v10  ;;  %v4891_v3 = vsel %vm4863_vm12, %v4858_v41, %v8563_v21  ;;  %v8582_v61 = vunpack.i.l.bf16 %v8581_v56 }
 0x59b   : > { %v4794_v31 = vsel %vm1537_vm2, %v4762_v0, %v8552_v39  ;;  %v4795_v59 = vsel %vm1537_vm2, %v4763_v46, %v8553_v15  ;;  %v8587_v44 = vunpack.i.l.bf16 %v13454_v36  ;;  %v5294_v39 = vmul.f32 %v8709_v55, %v13401_v29 }
 0x59c   : > { %v13463_v45 = vpop.permute.xlu1 %8590  ;;  %v5295_v10 = vmul.f32 %v8710_v63, %v13401_v29  ;;  %v5297_v0 = vmul.f32 %v8712_v13, %v13401_v29  ;;  %v4764_v29 = vsel %vm4733_vm10, %v13255_v4, %v8578_v54 }
 0x59d   : > { %v8592_v18 = vunpack.i.l.bf16 %v13463_v45  ;;  %v5333_v46 = vadd.f32 %v13418_v24, %v5294_v39  ;;  %v8593_v41 = vunpack.i.h.bf16 %v13463_v45 }
 0x59e   : > { %v8596_v9 = vpop.permute.xlu0 %8595 }
 0x59f   : > { %v8598_v51 = vunpack.i.h.bf16 %v8596_v9  ;;  %v8597_v1 = vunpack.i.l.bf16 %v8596_v9  ;;  %v4796_v45 = vsel %vm1537_vm2, %v4764_v29, %v8592_v18  ;;  %v4797_v55 = vsel %vm1537_vm2, %v13485_v5, %v8593_v41 }
 0x5a0   : > { %v8601_v47 = vpop.permute.xlu1 %8600  ;;  %v13497_v6 = vpop.f32.mrb[76].mxu1 }
 0x5a1   : > { %v8603_v26 = vunpack.i.h.bf16 %v8601_v47  ;;  %v8602_v52 = vunpack.i.l.bf16 %v8601_v47  ;;  %v4828_v60 = vsel %vm4798_vm11, %v4795_v59, %v8598_v51  ;;  %v4827_v42 = vsel %vm4798_vm11, %v4794_v31, %v8597_v1  ;;  %v13501_v53 = vpop.f32.mrb[77].mxu1 }
 0x5a2   : > { %v8611_v2 = vpop.permute.xlu0 %8610  ;;  %v13513_v8 = vpop.f32.mrb[78].mxu1  ;;  %v5334_v51 = vadd.f32 %v13418_v24, %v5295_v10  ;;  %v5335_v1 = vadd.f32 %v13418_v24, %v5296_v40  ;;  %v8588_v47 = vunpack.i.h.bf16 %v13454_v36 }
 0x5a3   : > { %v4923_v50 = vsel %vm1603_vm4, %v4891_v3, %v8603_v26  ;;  %v4922_v17 = vsel %vm1603_vm4, %v4890_v38, %v8602_v52  ;;  %v8613_v14 = vunpack.i.h.bf16 %v8611_v2  ;;  %v8612_v37 = vunpack.i.l.bf16 %v8611_v2  ;;  %v13515_v33 = vpop.f32.mrb[79].mxu1 }
 0x5a4   : > { %v8606_v28 = vpop.permute.xlu1 %8605  ;;  %v4955_v19 = vsel %vm4928_vm13, %v4922_v17, %v8582_v61  ;;  %v4956_v25 = vsel %vm4928_vm13, %v4923_v50, %v8583_v58  ;;  %v5336_v38 = vadd.f32 %v13418_v24, %v5297_v0  ;;  %v4859_v26 = vsel %vm1570_vm3, %v4827_v42, %v8587_v44 }
 0x5a5   : > { %v8608_v56 = vunpack.i.h.bf16 %v8606_v28  ;;  %v8607_v32 = vunpack.i.l.bf16 %v8606_v28  ;;  %v5365_v58 = vmax.f32 %v5333_v46, 0.0  ;;  %v5366_v2 = vmax.f32 %v5334_v51, 0.0 }
 0x5a6   : > { %v13499_v20 = vpop.permute.xlu0 %8620  ;;  %v5367_v61 = vmax.f32 %v5335_v1, 0.0  ;;  %v4860_v59 = vsel %vm1570_vm3, %v4828_v60, %v8588_v47  ;;  %v5368_v36 = vmax.f32 %v5336_v38, 0.0  ;;  %v4892_v24 = vsel %vm4863_vm12, %v4859_v26, %v8612_v37 }
 0x5a7   : > { %v4987_v21 = vsel %vm1636_vm5, %v4955_v19, %v8607_v32  ;;  %v4988_v9 = vsel %vm1636_vm5, %v4956_v25, %v8608_v56  ;;  %v4893_v54 = vsel %vm4863_vm12, %v4860_v59, %v8613_v14  ;;  %v5383_v28 = vpack.c.bf16 %v5366_v2, %v5365_v58 }
 0x5a8   : > { %v5006_v15 = vpack.c.bf16 %v4988_v9, %v4987_v21  ;;  %v8616_v31 = vpop.permute.xlu1 %8615  ;;  %v8623_v18 = vunpack.i.h.bf16 %v13499_v20  ;;  %v8622_v39 = vunpack.i.l.bf16 %v13499_v20  ;;  %v5384_v10 = vpack.c.bf16 %v5368_v36, %v5367_v61 }
 0x5a9   : > { %6862 = vmatprep.mubr.msk.bf16.mxu1 %vm1537_vm2, %v5383_v28  ;;  %v8618_v14 = vunpack.i.h.bf16 %v8616_v31  ;;  %v8617_v37 = vunpack.i.l.bf16 %v8616_v31  ;;  %v8027_v1 = vunpack.i.l.bf16 %v15292_v22  ;;  %v15296_v28 = vld [vmem:[#allocation18_spill] sm:$0xff] }
 0x5aa   : > { %6825 = vmatmul.mubr.msk.bf16.gmra.mrb[88].mxu0 %vm5045_vm14, %v5006_v15  ;;  %v8636_v52 = vpop.permute.xlu0 %8635  ;;  %6863 = vmatmul.mubr.msk.bf16.gmra.mrb[92].mxu1 %vm1537_vm2, %v5384_v10 }
 0x5ab   : > { %v8638_v50 = vunpack.i.h.bf16 %v8636_v52  ;;  %v8637_v17 = vunpack.i.l.bf16 %v8636_v52  ;;  %v15293_v52 = vld [vmem:[#allocation17_spill] sm:$0xff] }
 0x5ac   : > { %v6814_v3 = vpop.f32.mrb[76].mxu0  ;;  %v8626_v44 = vpop.permute.xlu1 %8625 }
 0x5ad   : > { %5790 = vrot.lane.b32.xlu0 %v6814_v3, %s15239_s17  ;;  %v5180_v4 = vpop.f32.mrb[77].mxu0  ;;  %v4925_v56 = vsel %vm1603_vm4, %v4893_v54, %v8638_v50  ;;  %v4924_v32 = vsel %vm1603_vm4, %v4892_v24, %v8637_v17  ;;  %v8628_v60 = vunpack.i.h.bf16 %v8626_v44  ;;  %v8627_v19 = vunpack.i.l.bf16 %v8626_v44  ;;  %v15294_v17 = vld [vmem:[#allocation86_spill] sm:$0xff]  ;;  %v15295_v44 = vld [vmem:[#allocation47_spill] sm:$0xff] }
 0x5ae   : > { %v6815_v42 = vpop.f32.mrb[78].mxu0  ;;  %v8641_v63 = vpop.permute.xlu0 %8640  ;;  %v4957_v5 = vsel %vm4928_vm13, %v4924_v32, %v8622_v39  ;;  %v4958_v21 = vsel %vm4928_vm13, %v4925_v56, %v8623_v18 }
 0x5af   : > { %5792 = vrot.lane.b32.xlu1 %v6815_v42, %s15239_s17  ;;  %v5183_v25 = vpop.f32.mrb[79].mxu0  ;;  %v4830_v43 = vsel %vm4798_vm11, %v4797_v55, %v8628_v60  ;;  %v4829_v40 = vsel %vm4798_vm11, %v4796_v45, %v8627_v19  ;;  %v8643_v13 = vunpack.i.h.bf16 %v8641_v63  ;;  %v8642_v0 = vunpack.i.l.bf16 %v8641_v63  ;;  %v15297_v60 = vld [vmem:[#allocation20_spill] sm:$0xff]  ;;  %v15298_v55 = vld [vmem:[#allocation19_spill] sm:$0xff]  ;;  %v15299_v63 = vld [vmem:[#allocation53_spill] sm:$0xff] }
 0x5b0   : > { %v8631_v9 = vpop.permute.xlu1 %8630  ;;  %v4861_v31 = vsel %vm1570_vm3, %v4829_v40, %v8617_v37  ;;  %v4862_v47 = vsel %vm1570_vm3, %v4830_v43, %v8618_v14  ;;  %v15300_v40 = vld [vmem:[#allocation54_spill] sm:$0xff] }
 0x5b1   : > { %5786 = vrot.lane.b32.xlu0 %v5180_v4, %s15239_s17  ;;  %v4989_v20 = vsel %vm1636_vm5, %v4957_v5, %v8642_v0  ;;  %v4990_v15 = vsel %vm1636_vm5, %v4958_v21, %v8643_v13  ;;  %v8633_v46 = vunpack.i.h.bf16 %v8631_v9  ;;  %v8632_v51 = vunpack.i.l.bf16 %v8631_v9  ;;  %v15301_v14 = vld [vmem:[#allocation22_spill] sm:$0xff]  ;;  %v15302_v21 = vld [vmem:[#allocation21_spill] sm:$0xff] }
 0x5b2   : > { %v5007_v29 = vpack.c.bf16 %v4990_v15, %v4989_v20  ;;  %v5635_v41 = vpop.permute.xlu0 %5634 }
 0x5b3   : > { %5788 = vrot.lane.b32.xlu1 %v5183_v25, %s15239_s17  ;;  %v4894_v38 = vsel %vm4863_vm12, %v4861_v31, %v8632_v51  ;;  %v4895_v26 = vsel %vm4863_vm12, %v4862_v47, %v8633_v46  ;;  %v13556_v3 = vsel %vm1537_vm2, %v15293_v52, %v5635_v41  ;;  %v15303_v51 = vld [vmem:[#allocation23_spill] sm:$0xff]  ;;  %v15304_v41 = vld [vmem:[#allocation52_spill] sm:$0xff] }
 0x5b4   : > { %v4926_v58 = vsel %vm1603_vm4, %v4894_v38, %v8027_v1  ;;  %v4927_v2 = vsel %vm1603_vm4, %v4895_v26, %v8028_v16  ;;  %6828 = vmatprep.mubr.msk.bf16.mxu0 %vm5045_vm14, %v5007_v29  ;;  %v8646_v61 = vpop.permute.xlu1 %8645  ;;  %vm5983_vm4 = vcmask 1045509  }
 0x5b5   : > { %v8648_v59 = vunpack.i.h.bf16 %v8646_v61  ;;  %v8647_v50 = vunpack.i.l.bf16 %v8646_v61  ;;  %v4959_v4 = vsel %vm4928_vm13, %v4926_v58, %v15294_v17  ;;  %v4960_v36 = vsel %vm4928_vm13, %v4927_v2, %v15294_v17  ;;  %v15305_v58 = vld [vmem:[#allocation58_spill] sm:$0xff]  ;;  %v15306_v17 = vld [vmem:[#allocation24_spill] sm:$0xff] }
 0x5b6   : > { %v5639_v45 = vpop.permute.xlu0 %5638 }
 0x5b7   : > { %v4991_v24 = vsel %vm1636_vm5, %v4959_v4, %v8647_v50  ;;  %v4992_v54 = vsel %vm1636_vm5, %v4960_v36, %v8648_v59  ;;  %v13571_v22 = vsel %vm1537_vm2, %v15295_v44, %v5639_v45 }
 0x5b8   : > { %v5008_v16 = vpack.c.bf16 %v4992_v54, %v4991_v24  ;;  %v5637_v42 = vpop.permute.xlu1 %5636  ;;  %v15307_v54 = vld [vmem:[#allocation25_spill] sm:$0xff] }
 0x5b9   : > { %v13575_v56 = vsel %vm1537_vm2, %v15296_v28, %v5637_v42  ;;  %v15308_v42 = vld [vmem:[#allocation29_spill] sm:$0xff] }
 0x5ba   : > { %v5643_v32 = vpop.permute.xlu0 %5642  ;;  %6829 = vmatmul.mubr.msk.bf16.gmra.mrb[92].mxu0 %vm5045_vm14, %v5008_v16 }
 0x5bb   : > { %v13580_v19 = vsel %vm1537_vm2, %v15297_v60, %v5643_v32 }
 0x5bc   : > { %v5641_v25 = vpop.permute.xlu1 %5640 }
 0x5bd   : > { %v13584_v18 = vsel %vm1537_vm2, %v15298_v55, %v5641_v25  ;;  %v15309_v25 = vld [vmem:[#allocation61_spill] sm:$0xff] }
 0x5be   : > { %v5647_v39 = vpop.permute.xlu0 %5646  ;;  %v13602_v20 = vpop.f32.mrb[80].mxu1 }
 0x5bf   : > { %v13588_v10 = vsel %vm1537_vm2, %v15299_v63, %v5647_v39  ;;  %v13604_v46 = vpop.f32.mrb[81].mxu1  ;;  %v15310_v63 = vld [vmem:[#allocation30_spill] sm:$0xff] }
 0x5c0   : > { %v5645_v43 = vpop.permute.xlu1 %5644  ;;  %v13610_v29 = vpop.f32.mrb[82].mxu1 }
 0x5c1   : > { %v13592_v13 = vsel %vm1537_vm2, %v15300_v40, %v5645_v43  ;;  %v13612_v47 = vpop.f32.mrb[83].mxu1 }
 0x5c2   : > { %v5651_v0 = vpop.permute.xlu0 %5650 }
 0x5c3   : > { %v13596_v37 = vsel %vm1537_vm2, %v15301_v14, %v5651_v0  ;;  %v15311_v0 = vld [vmem:[#allocation32_spill] sm:$0xff] }
 0x5c4   : > { %v5649_v5 = vpop.permute.xlu1 %5648 }
 0x5c5   : > { %v13600_v9 = vsel %vm1537_vm2, %v15302_v21, %v5649_v5  ;;  %v15312_v21 = vld [vmem:[#allocation60_spill] sm:$0xff] }
 0x5c6   : > { %v5655_v15 = vpop.permute.xlu0 %5654 }
 0x5c7   : > { %v13608_v1 = vsel %vm1537_vm2, %v15303_v51, %v5655_v15 }
 0x5c8   : > { %v5653_v31 = vpop.permute.xlu1 %5652 }
 0x5c9   : > { %v13616_v38 = vsel %vm1537_vm2, %v15304_v41, %v5653_v31  ;;  %v15313_v31 = vld [vmem:[#allocation69_spill] sm:$0xff] }
 0x5ca   : > { %v5659_v26 = vpop.permute.xlu0 %5658 }
 0x5cb   : > { %v13620_v2 = vsel %vm1537_vm2, %v15305_v58, %v5659_v26 }
 0x5cc   : > { %v6818_v52 = vpop.f32.mrb[80].mxu0  ;;  %v5657_v59 = vpop.permute.xlu1 %5656 }
 0x5cd   : > { %5798 = vrot.lane.b32.xlu0 %v6818_v52, %s15239_s17  ;;  %v5196_v61 = vpop.f32.mrb[81].mxu0  ;;  %v13625_v4 = vsel %vm1537_vm2, %v15306_v17, %v5657_v59  ;;  %v15314_v52 = vld [vmem:[#allocation120_spill] sm:$0xff]  ;;  %v15316_v59 = vld [vmem:[#allocation34_spill] sm:$0xff] }
 0x5ce   : > { %v6819_v50 = vpop.f32.mrb[82].mxu0  ;;  %v5663_v45 = vpop.permute.xlu0 %5662 }
 0x5cf   : > { %5800 = vrot.lane.b32.xlu1 %v6819_v50, %s15239_s17  ;;  %v5199_v36 = vpop.f32.mrb[83].mxu0 }
 0x5d0   : > { %v5661_v24 = vpop.permute.xlu1 %5660 }
 0x5d1   : > { %5794 = vrot.lane.b32.xlu0 %v5196_v61, %s15239_s17  ;;  %v13631_v44 = vsel %vm1537_vm2, %v15307_v54, %v5661_v24 }
 0x5d2   : > { %v5667_v16 = vpop.permute.xlu0 %5666 }
 0x5d3   : > { %5796 = vrot.lane.b32.xlu1 %v5199_v36, %s15239_s17  ;;  %v13636_v28 = vsel %vm1537_vm2, %v15308_v42, %v5667_v16  ;;  %v15318_v36 = vld [vmem:[#allocation70_spill] sm:$0xff]  ;;  %v15319_v16 = vld [vmem:[#allocation95_spill] sm:$0xff] }
 0x5d4   : > { %v5665_v32 = vpop.permute.xlu1 %5664 }
 0x5d6   : > { %v5671_v60 = vpop.permute.xlu0 %5670 }
 0x5d7   : > { %v13640_v55 = vsel %vm1537_vm2, %v15309_v25, %v5671_v60  ;;  %v15321_v25 = vld [vmem:[#allocation119_spill] sm:$0xff] }
 0x5d8   : > { %v5669_v39 = vpop.permute.xlu1 %5668 }
 0x5d9   : > { %v13644_v43 = vsel %vm1537_vm2, %v15310_v63, %v5669_v39 }
 0x5da   : > { %v5675_v40 = vpop.permute.xlu0 %5674 }
 0x5db   : > { %v13648_v14 = vsel %vm1537_vm2, %v15311_v0, %v5675_v40  ;;  %v15323_v40 = vld [vmem:[#allocation39_spill] sm:$0xff] }
 0x5dc   : > { %v5673_v5 = vpop.permute.xlu1 %5672 }
 0x5dd   : > { %v13652_v15 = vsel %vm1537_vm2, %v15312_v21, %v5673_v5 }
 0x5de   : > { %v5679_v51 = vpop.permute.xlu0 %5678 }
 0x5df   : > { %v13656_v41 = vsel %vm1537_vm2, %v15313_v31, %v5679_v51  ;;  %v15325_v31 = vld [vmem:[#allocation67_spill] sm:$0xff] }
 0x5e0   : > { %v5677_v26 = vpop.permute.xlu1 %5676 }
 0x5e1   : > { %v13660_v58 = vsel %vm1537_vm2, %v15314_v52, %v5677_v26 }
 0x5e2   : > { %15315 = vst [vmem:[#allocation114_spill] sm:$0xff] %v13660_v58  ;;  %v5683_v61 = vpop.permute.xlu0 %5682 }
 0x5e3   : > { %v13664_v50 = vsel %vm1537_vm2, %v15316_v59, %v5683_v61 }
 0x5e4   : > { %15317 = vst [vmem:[#allocation43_spill] sm:$0xff] %v13664_v50  ;;  %v5681_v17 = vpop.permute.xlu1 %5680 }
 0x5e5   : > { %v13668_v24 = vsel %vm1537_vm2, %v15318_v36, %v5681_v17  ;;  %v15327_v17 = vld [vmem:[#allocation112_spill] sm:$0xff] }
 0x5e6   : > { %v5687_v54 = vpop.permute.xlu0 %5686 }
 0x5e7   : > { %v13672_v42 = vsel %vm1537_vm2, %v15319_v16, %v5687_v54  ;;  %v15329_v16 = vld [vmem:[#allocation122_spill] sm:$0xff] }
 0x5e8   : > { %15320 = vst [vmem:[#allocation44_spill] sm:$0xff] %v13672_v42  ;;  %v5685_v60 = vpop.permute.xlu1 %5684 }
 0x5e9   : > { %v13676_v39 = vsel %vm1537_vm2, %v15321_v25, %v5685_v60 }
 0x5ea   : > { %15322 = vst [vmem:[#allocation123_spill] sm:$0xff] %v13676_v39  ;;  %v5691_v63 = vpop.permute.xlu0 %5690 }
 0x5eb   : > { %v13680_v0 = vsel %vm1537_vm2, %v15323_v40, %v5691_v63 }
 0x5ec   : > { %15324 = vst [vmem:[#allocation89_spill] sm:$0xff] %v13680_v0  ;;  %v6822_v5 = vpop.f32.mrb[84].mxu0  ;;  %v5689_v21 = vpop.permute.xlu1 %5688 }
 0x5ed   : > { %5806 = vrot.lane.b32.xlu0 %v6822_v5, %s15239_s17  ;;  %v5212_v51 = vpop.f32.mrb[85].mxu0  ;;  %v13685_v26 = vsel %vm1537_vm2, %v15325_v31, %v5689_v21  ;;  %v13698_v63 = vpop.f32.mrb[84].mxu1 }
 0x5ee   : > { %15326 = vst [vmem:[#allocation91_spill] sm:$0xff] %v13685_v26  ;;  %v6823_v52 = vpop.f32.mrb[86].mxu0  ;;  %v5695_v61 = vpop.permute.xlu0 %5694 }
 0x5ef   : > { %5808 = vrot.lane.b32.xlu1 %v6823_v52, %s15239_s17  ;;  %v5215_v59 = vpop.f32.mrb[87].mxu0  ;;  %v13690_v36 = vsel %vm1537_vm2, %v15327_v17, %v5695_v61  ;;  %v13702_v5 = vpop.f32.mrb[85].mxu1 }
 0x5f0   : > { %15328 = vst [vmem:[#allocation99_spill] sm:$0xff] %v13690_v36  ;;  %v5693_v54 = vpop.permute.xlu1 %5692  ;;  %15331 = vst [vmem:[#allocation108_spill] sm:$0xff] %v13702_v5  ;;  %v13707_v52 = vpop.f32.mrb[86].mxu1 }
 0x5f1   : > { %5802 = vrot.lane.b32.xlu0 %v5212_v51, %s15239_s17  ;;  %v13695_v60 = vsel %vm1537_vm2, %v15329_v16, %v5693_v54  ;;  %v15332_v51 = vld [vmem:[#allocation36_spill] sm:$0xff]  ;;  %v13713_v17 = vpop.f32.mrb[87].mxu1 }
 0x5f2   : > { %15330 = vst [vmem:[#allocation77_spill] sm:$0xff] %v13695_v60  ;;  %v5767_v25 = vpop.permute.xlu0 %5766  ;;  %15334 = vst [vmem:[#allocation117_spill] sm:$0xff] %v13713_v17  ;;  %v15335_v54 = vld [vmem:[#allocation28_spill] sm:$0xff] }
 0x5f3   : > { %5804 = vrot.lane.b32.xlu1 %v5215_v59, %s15239_s17  ;;  %v5892_v40 = vsel %vm4798_vm11, %v13571_v22, %v5767_v25  ;;  %v13717_v16 = vsel %vm1537_vm2, %v15335_v54, %v5663_v45  ;;  %v15336_v22 = vld [vmem:[#allocation62_spill] sm:$0xff] }
 0x5f4   : > { %v13705_v21 = vadd.f32 %v13338_v27, %v5892_v40  ;;  %v5697_v31 = vpop.permute.xlu1 %5696  ;;  %v13721_v25 = vsel %vm1537_vm2, %v15336_v22, %v5665_v32 }
 0x5f5   : > { %v13711_v61 = vsel %vm1537_vm2, %v15332_v51, %v5697_v31  ;;  %vm5980_vm2 = vcmask 1044484  }
 0x5f6   : > { %15333 = vst [vmem:[#allocation76_spill] sm:$0xff] %v13711_v61  ;;  %v5763_v59 = vpop.permute.xlu0 %5762  ;;  %v6174_v40 = vrot.slane %v13705_v21, 5  ;;  %v6140_v61 = vrot.slane %v13705_v21, 4  ;;  %v6042_v36 = vrot.slane %v13705_v21, 1  ;;  %v6076_v45 = vrot.slane %v13705_v21, 2 }
 0x5f7   : > { %v5890_v27 = vsel %vm4798_vm11, %v13556_v3, %v5763_v59  ;;  %v6208_v54 = vrot.slane %v13705_v21, 6 }
 0x5f8   : > { %v13727_v31 = vadd.f32 %v5890_v27, %v13342_v49  ;;  %v5769_v51 = vpop.permute.xlu1 %5768 }
 0x5f9   : > { %v5893_v32 = vsel %vm4798_vm11, %v13584_v18, %v5769_v51 }
 0x5fa   : > { %v13738_v49 = vadd.f32 %v13344_v35, %v5893_v32  ;;  %v5775_v22 = vpop.permute.xlu0 %5774  ;;  %v6173_v27 = vrot.slane %v13727_v31, 6  ;;  %v6007_v60 = vrot.slane %v13727_v31, 1  ;;  %v6139_v0 = vrot.slane %v13727_v31, 5 }
 0x5fb   : > { %v5896_v39 = vsel %vm4798_vm11, %v13588_v10, %v5775_v22  ;;  %v6041_v18 = vrot.slane %v13727_v31, 2  ;;  %v6075_v51 = vrot.slane %v13727_v31, 3  ;;  %v6207_v59 = vrot.slane %v13727_v31, 7 }
 0x5fc   : > { %v13749_v35 = vadd.f32 %v13356_v11, %v5896_v39  ;;  %v5765_v32 = vpop.permute.xlu1 %5764  ;;  %v6175_v3 = vsel %vm5971_vm15, %v6174_v40, %v6173_v27  ;;  %v6008_v50 = vsel %vm5971_vm15, %v13705_v21, %v6007_v60  ;;  %v6141_v26 = vsel %vm5971_vm15, %v6140_v61, %v6139_v0 }
 0x5fd   : > { %v5891_v10 = vsel %vm4798_vm11, %v13575_v56, %v5765_v32  ;;  %v6043_v22 = vsel %vm5971_vm15, %v6042_v36, %v6041_v18  ;;  %v6454_v42 = vrot.slane %v13738_v49, 5  ;;  %v6077_v17 = vsel %vm5971_vm15, %v6076_v45, %v6075_v51 }
 0x5fe   : > { %v13761_v11 = vadd.f32 %v5891_v10, %v13348_v12  ;;  %v5771_v39 = vpop.permute.xlu0 %5770  ;;  %v6178_v40 = vrot.slane %v13749_v35, 3  ;;  %v6011_v27 = vrot.slane %v13749_v35, 6  ;;  %v6144_v60 = vrot.slane %v13749_v35, 2 }
 0x5ff   : > { %v5894_v0 = vsel %vm4798_vm11, %v13580_v19, %v5771_v39  ;;  %v6045_v56 = vrot.slane %v13749_v35, 7  ;;  %v6209_v36 = vsel %vm5971_vm15, %v6208_v54, %v6207_v59 }
 0x600   : > { %v13772_v45 = vadd.f32 %v5894_v0, %v13359_v57  ;;  %v5777_v12 = vpop.permute.xlu1 %5776  ;;  %v6453_v18 = vrot.slane %v13761_v11, 6  ;;  %v6287_v51 = vrot.slane %v13761_v11, 1 }
 0x601   : > { %v5897_v10 = vsel %vm4798_vm11, %v13600_v9, %v5777_v12 }
 0x602   : > { %v13783_v59 = vadd.f32 %v13362_v7, %v5897_v10  ;;  %v5783_v57 = vpop.permute.xlu0 %5782  ;;  %v6176_v0 = vrot.slane %v13772_v45, 4  ;;  %v6009_v61 = vrot.slane %v13772_v45, 7  ;;  %v6142_v58 = vrot.slane %v13772_v45, 3 }
 0x603   : > { %v5900_v32 = vsel %vm4798_vm11, %v13608_v1, %v5783_v57  ;;  %v6044_v9 = vsel %vm5974_vm0, %v13772_v45, %v6043_v22  ;;  %v6455_v12 = vsel %vm5971_vm15, %v6454_v42, %v6453_v18  ;;  %v6078_v54 = vrot.slane %v13772_v45, 1 }
 0x604   : > { %v13795_v7 = vadd.f32 %v13390_v34, %v5900_v32  ;;  %v5773_v10 = vpop.permute.xlu1 %5772  ;;  %v6177_v39 = vsel %vm5974_vm0, %v6176_v0, %v6175_v3  ;;  %v6010_v19 = vsel %vm5974_vm0, %v6009_v61, %v6008_v50  ;;  %v6143_v5 = vsel %vm5974_vm0, %v6142_v58, %v6141_v26 }
 0x605   : > { %v5895_v1 = vsel %vm4798_vm11, %v13592_v13, %v5773_v10  ;;  %v6179_v22 = vsel %vm5977_vm1, %v6178_v40, %v6177_v39  ;;  %v6012_v42 = vsel %vm5977_vm1, %v6011_v27, %v6010_v19  ;;  %v6145_v18 = vsel %vm5977_vm1, %v6144_v60, %v6143_v5 }
 0x606   : > { %v13806_v34 = vadd.f32 %v5895_v1, %v13368_v48  ;;  %v5779_v32 = vpop.permute.xlu0 %5778  ;;  %v6182_v57 = vrot.slane %v13795_v7, 1  ;;  %v6015_v3 = vrot.slane %v13795_v7, 4  ;;  %v6046_v50 = vsel %vm5977_vm1, %v6045_v56, %v6044_v9 }
 0x607   : > { %v5898_v58 = vsel %vm4798_vm11, %v13596_v37, %v5779_v32  ;;  %v6049_v13 = vrot.slane %v13795_v7, 5  ;;  %v6458_v26 = vrot.slane %v13783_v59, 3  ;;  %v6079_v40 = vsel %vm5974_vm0, %v6078_v54, %v6077_v17 }
 0x608   : > { %v13817_v5 = vadd.f32 %v5898_v58, %v13395_v30  ;;  %v5785_v48 = vpop.permute.xlu1 %5784  ;;  %v6456_v27 = vrot.slane %v13806_v34, 4  ;;  %v6080_v60 = vsel %vm5977_vm1, %v13749_v35, %v6079_v40  ;;  %v6083_v56 = vrot.slane %v13795_v7, 6 }
 0x609   : > { %v5901_v37 = vsel %vm4798_vm11, %v13625_v4, %v5785_v48  ;;  %v6210_v61 = vrot.slane %v13772_v45, 5  ;;  %v6216_v19 = vrot.slane %v13795_v7, 2  ;;  %v6288_v17 = vsel %vm5971_vm15, %v13738_v49, %v6287_v51 }
 0x60a   : > { %v13830_v30 = vadd.f32 %v13408_v23, %v5901_v37  ;;  %v6180_v39 = vrot.slane %v13817_v5, 2  ;;  %v6013_v54 = vrot.slane %v13817_v5, 5  ;;  %v6146_v0 = vrot.slane %v13817_v5, 1 }
 0x60b   : > { %v6047_v9 = vrot.slane %v13817_v5, 6  ;;  %v6457_v4 = vsel %vm5974_vm0, %v6456_v27, %v6455_v12  ;;  %v6081_v10 = vrot.slane %v13817_v5, 7  ;;  %v6211_v1 = vsel %vm5974_vm0, %v6210_v61, %v6209_v36 }
 0x60c   : > { %v5781_v32 = vpop.permute.xlu1 %5780  ;;  %v6181_v51 = vsel %vm5980_vm2, %v6180_v39, %v6179_v22  ;;  %v6014_v23 = vsel %vm5980_vm2, %v6013_v54, %v6012_v42  ;;  %v6147_v58 = vsel %vm5980_vm2, %v6146_v0, %v6145_v18  ;;  %v6459_v40 = vsel %vm5977_vm1, %v6458_v26, %v6457_v4 }
 0x60d   : > { %v5899_v48 = vsel %vm4798_vm11, %v13616_v38, %v5781_v32  ;;  %v13846_v37 = vsel %vm5983_vm4, %v6182_v57, %v6181_v51  ;;  %v13849_v12 = vsel %vm5983_vm4, %v6015_v3, %v6014_v23  ;;  %v13853_v36 = vsel %vm5983_vm4, %v13795_v7, %v6147_v58 }
 0x60e   : > { %v13856_v22 = vadd.f32 %v5899_v48, %v13413_v62  ;;  %v6048_v42 = vsel %vm5980_vm2, %v6047_v9, %v6046_v50  ;;  %v6462_v18 = vrot.slane %v13830_v30, 1  ;;  %v6082_v26 = vsel %vm5980_vm2, %v6081_v10, %v6080_v60 }
 0x60f   : > { %v13862_v38 = vsel %vm5983_vm4, %v6049_v13, %v6048_v42  ;;  %v13865_v57 = vsel %vm5983_vm4, %v6083_v56, %v6082_v26  ;;  %v15337_v3 = vrot.slane %v13749_v35, 4  ;;  %v6214_v61 = vrot.slane %v13817_v5, 3 }
 0x610   : > { %v6460_v62 = vrot.slane %v13856_v22, 2  ;;  %v6289_v50 = vrot.slane %v13806_v34, 7  ;;  %v6291_v39 = vrot.slane %v13783_v59, 6  ;;  %v6293_v60 = vrot.slane %v13856_v22, 5 }
 0x611   : > { %v6213_v27 = vsel %vm5977_vm1, %v15337_v3, %v6211_v1  ;;  %v6295_v54 = vrot.slane %v13830_v30, 4  ;;  %v15338_v56 = vrot.slane %v13761_v11, 5  ;;  %v15339_v0 = vrot.slane %v13738_v49, 4 }
 0x612   : > { %v6215_v13 = vsel %vm5980_vm2, %v6214_v61, %v6213_v27  ;;  %v6422_v4 = vrot.slane %v13806_v34, 3  ;;  %v6461_v10 = vsel %vm5980_vm2, %v6460_v62, %v6459_v40  ;;  %v6290_v32 = vsel %vm5974_vm0, %v6289_v50, %v6288_v17 }
 0x613   : > { %v6421_v9 = vsel %vm5971_vm15, %v15339_v0, %v15338_v56  ;;  %v13885_v1 = vsel %vm5983_vm4, %v6216_v19, %v6215_v13  ;;  %v6424_v51 = vrot.slane %v13783_v59, 2  ;;  %v13890_v23 = vsel %vm5983_vm4, %v6462_v18, %v6461_v10 }
 0x614   : > { %v6292_v58 = vsel %vm5977_vm1, %v6291_v39, %v6290_v32  ;;  %v6423_v48 = vsel %vm5974_vm0, %v6422_v4, %v6421_v9  ;;  %v6426_v42 = vrot.slane %v13856_v22, 1  ;;  %v15340_v19 = vrot.slane %v13761_v11, 2 }
 0x615   : > { %v6294_v26 = vsel %vm5980_vm2, %v6293_v60, %v6292_v58  ;;  %v6425_v40 = vsel %vm5977_vm1, %v6424_v51, %v6423_v48  ;;  %v15341_v3 = vrot.slane %v13738_v49, 1  ;;  %v6325_v27 = vrot.slane %v13783_v59, 7 }
 0x616   : > { %v13904_v18 = vsel %vm5983_vm4, %v6295_v54, %v6294_v26  ;;  %v6427_v61 = vsel %vm5980_vm2, %v6426_v42, %v6425_v40  ;;  %v6327_v50 = vrot.slane %v13856_v22, 6  ;;  %v6329_v13 = vrot.slane %v13830_v30, 5 }
 0x617   : > { %v6323_v17 = vsel %vm5971_vm15, %v15341_v3, %v15340_v19  ;;  %v13912_v39 = vsel %vm5983_vm4, %v13830_v30, %v6427_v61  ;;  %v6355_v56 = vrot.slane %v13761_v11, 3  ;;  %v6356_v0 = vrot.slane %v13738_v49, 2 }
 0x618   : > { %v6324_v62 = vsel %vm5974_vm0, %v13806_v34, %v6323_v17  ;;  %v6358_v9 = vrot.slane %v13806_v34, 1  ;;  %v6361_v4 = vrot.slane %v13856_v22, 7  ;;  %v6363_v32 = vrot.slane %v13830_v30, 6 }
 0x619   : > { %v6326_v60 = vsel %vm5977_vm1, %v6325_v27, %v6324_v62  ;;  %v6487_v51 = vrot.slane %v13761_v11, 7  ;;  %v6488_v58 = vrot.slane %v13738_v49, 6  ;;  %v6357_v48 = vsel %vm5971_vm15, %v6356_v0, %v6355_v56 }
 0x61a   : > { %v6328_v54 = vsel %vm5980_vm2, %v6327_v50, %v6326_v60  ;;  %v6490_v42 = vrot.slane %v13806_v34, 5  ;;  %v6492_v26 = vrot.slane %v13783_v59, 4  ;;  %v6494_v40 = vrot.slane %v13856_v22, 3 }
 0x61b   : > { %v13922_v10 = vsel %vm5983_vm4, %v6329_v13, %v6328_v54  ;;  %v6359_v19 = vsel %vm5974_vm0, %v6358_v9, %v6357_v48  ;;  %v6489_v3 = vsel %vm5971_vm15, %v6488_v58, %v6487_v51  ;;  %v6496_v17 = vrot.slane %v13830_v30, 2 }
 0x61c   : > { %v15342_v27 = vrot.slane %v13705_v21, 7  ;;  %v6360_v62 = vsel %vm5977_vm1, %v13783_v59, %v6359_v19  ;;  %v6491_v50 = vsel %vm5974_vm0, %v6490_v42, %v6489_v3  ;;  %v5973_v60 = vrot.slane %v13772_v45, 6 }
 0x61d   : > { %v5976_v13 = vrot.slane %v13749_v35, 5  ;;  %v6362_v56 = vsel %vm5980_vm2, %v6361_v4, %v6360_v62  ;;  %v6493_v54 = vsel %vm5977_vm1, %v6492_v26, %v6491_v50  ;;  %v5979_v0 = vrot.slane %v13817_v5, 4 }
 0x61e   : > { %v5972_v61 = vsel %vm5971_vm15, %v15342_v27, %v13727_v31  ;;  %v5982_v9 = vrot.slane %v13795_v7, 3  ;;  %v13948_v58 = vsel %vm5983_vm4, %v6363_v32, %v6362_v56  ;;  %v6495_v48 = vsel %vm5980_vm2, %v6494_v40, %v6493_v54 }
 0x61f   : > { %v5791_v51 = vpop.permute.xlu0 %5790  ;;  %v5975_v42 = vsel %vm5974_vm0, %v5973_v60, %v5972_v61  ;;  %v6109_v19 = vrot.slane %v13727_v31, 4  ;;  %v13956_v4 = vsel %vm5983_vm4, %v6496_v17, %v6495_v48  ;;  %v6112_v27 = vrot.slane %v13772_v45, 2 }
 0x620   : > { %v5904_v3 = vsel %vm4798_vm11, %v13717_v16, %v5791_v51  ;;  %v5978_v26 = vsel %vm5977_vm1, %v5976_v13, %v5975_v42  ;;  %v15343_v61 = vrot.slane %v13705_v21, 3  ;;  %v6114_v50 = vrot.slane %v13749_v35, 1 }
 0x621   : > { %v13961_v62 = vadd.f32 %v13497_v6, %v5904_v3  ;;  %v5793_v32 = vpop.permute.xlu1 %5792  ;;  %v5981_v40 = vsel %vm5980_vm2, %v5979_v0, %v5978_v26  ;;  %v6117_v45 = vrot.slane %v13795_v7, 7 }
 0x622   : > { %v6111_v31 = vsel %vm5971_vm15, %v15343_v61, %v6109_v19  ;;  %v5905_v16 = vsel %vm4798_vm11, %v13721_v25, %v5793_v32  ;;  %v5984_v17 = vsel %vm5983_vm4, %v5982_v9, %v5981_v40 }
 0x623   : > { %v6113_v60 = vsel %vm5974_vm0, %v6112_v27, %v6111_v31  ;;  %v13974_v6 = vadd.f32 %v13513_v8, %v5905_v16  ;;  %v5787_v13 = vpop.permute.xlu0 %5786  ;;  %v6185_v56 = vrot.slane %v13961_v62, 7  ;;  %v6019_v21 = vrot.slane %v13961_v62, 2 }
 0x624   : > { %v6151_v54 = vrot.slane %v13961_v62, 6  ;;  %v5902_v35 = vsel %vm4798_vm11, %v13620_v2, %v5787_v13  ;;  %v6053_v25 = vrot.slane %v13961_v62, 3  ;;  %v6087_v0 = vrot.slane %v13961_v62, 4 }
 0x625   : > { %v5988_v9 = vrot.slane %v13961_v62, 1  ;;  %v5934_v7 = vadd.f32 %v5902_v35, %v13501_v53  ;;  %v5789_v8 = vpop.permute.xlu1 %5788  ;;  %v6465_v51 = vrot.slane %v13974_v6, 7  ;;  %v6299_v48 = vrot.slane %v13974_v6, 2 }
 0x626   : > { %v6431_v42 = vrot.slane %v13974_v6, 6  ;;  %v5903_v19 = vsel %vm4798_vm11, %v13631_v44, %v5789_v8  ;;  %v6333_v2 = vrot.slane %v13974_v6, 3  ;;  %v6367_v3 = vrot.slane %v13974_v6, 4 }
 0x627   : > { %v6115_v26 = vsel %vm5977_vm1, %v6114_v50, %v6113_v60  ;;  %v13994_v27 = vadd.f32 %v5903_v19, %v13515_v33  ;;  %v6184_v53 = vsel %vm5986_vm6, %v5934_v7, %v13846_v37  ;;  %v6017_v32 = vrot.slane %v5934_v7, 3 }
 0x628   : > { %v6149_v40 = vrot.slane %v5934_v7, 7  ;;  %v13999_v61 = vsel %vm5989_vm8, %v6185_v56, %v6184_v53  ;;  %v6051_v31 = vrot.slane %v5934_v7, 4  ;;  %v6085_v16 = vrot.slane %v5934_v7, 5 }
 0x629   : > { %v6218_v44 = vrot.slane %v5934_v7, 1  ;;  %v6018_v13 = vsel %vm5986_vm6, %v6017_v32, %v13849_v12  ;;  %v6464_v33 = vsel %vm5986_vm6, %v13994_v27, %v13890_v23  ;;  %v6297_v37 = vrot.slane %v13994_v27, 3 }
 0x62a   : > { %v6150_v50 = vsel %vm5986_vm6, %v6149_v40, %v13853_v36  ;;  %v14010_v60 = vsel %vm5989_vm8, %v6019_v21, %v6018_v13  ;;  %v6052_v35 = vsel %vm5986_vm6, %v6051_v31, %v13862_v38  ;;  %v14018_v12 = vsel %vm5989_vm8, %v6465_v51, %v6464_v33 }
 0x62b   : > { %v14013_v56 = vsel %vm5989_vm8, %v6151_v54, %v6150_v50  ;;  %v14021_v36 = vsel %vm5989_vm8, %v6053_v25, %v6052_v35  ;;  %v6086_v23 = vsel %vm5986_vm6, %v6085_v16, %v13865_v57  ;;  %v6219_v8 = vsel %vm5986_vm6, %v6218_v44, %v13885_v1 }
 0x62c   : > { %v6298_v21 = vsel %vm5986_vm6, %v6297_v37, %v13904_v18  ;;  %v14030_v54 = vsel %vm5989_vm8, %v6087_v0, %v6086_v23  ;;  %v14034_v38 = vsel %vm5989_vm8, %v13961_v62, %v6219_v8  ;;  %v6429_v25 = vrot.slane %v13994_v27, 7 }
 0x62d   : > { %v14037_v51 = vsel %vm5989_vm8, %v6299_v48, %v6298_v21  ;;  %v6331_v57 = vrot.slane %v13994_v27, 4  ;;  %v6365_v19 = vrot.slane %v13994_v27, 5  ;;  %v6498_v1 = vrot.slane %v13994_v27, 1 }
 0x62e   : > { %v5985_v53 = vrot.slane %v5934_v7, 2  ;;  %v6430_v18 = vsel %vm5986_vm6, %v6429_v25, %v13912_v39  ;;  %v6116_v0 = vsel %vm5980_vm2, %v13817_v5, %v6115_v26  ;;  %v6119_v32 = vrot.slane %v5934_v7, 6 }
 0x62f   : > { %v6121_v40 = vrot.slane %v13961_v62, 5  ;;  %v14049_v48 = vsel %vm5989_vm8, %v6431_v42, %v6430_v18  ;;  %v6332_v31 = vsel %vm5986_vm6, %v6331_v57, %v13922_v10  ;;  %v6366_v16 = vsel %vm5986_vm6, %v6365_v19, %v13948_v58 }
 0x630   : > { %v6499_v44 = vsel %vm5986_vm6, %v6498_v1, %v13956_v4  ;;  %v14058_v39 = vsel %vm5989_vm8, %v6333_v2, %v6332_v31  ;;  %v14061_v5 = vsel %vm5989_vm8, %v6367_v3, %v6366_v16  ;;  %v5987_v7 = vsel %vm5986_vm6, %v5985_v53, %v5984_v17 }
 0x631   : > { %v14065_v62 = vsel %vm5989_vm8, %v13974_v6, %v6499_v44  ;;  %v14069_v10 = vsel %vm5989_vm8, %v5988_v9, %v5987_v7  ;;  %v6118_v58 = vsel %vm5983_vm4, %v6117_v45, %v6116_v0  ;;  %v6257_v42 = vrot.slane %v13738_v49, 7 }
 0x632   : > { %v6259_v4 = vrot.slane %v13806_v34, 6  ;;  %v6120_v2 = vsel %vm5986_vm6, %v6119_v32, %v6118_v58  ;;  %v6263_v3 = vrot.slane %v13856_v22, 4  ;;  %v6261_v17 = vrot.slane %v13783_v59, 5 }
 0x633   : > { %v14077_v26 = vsel %vm5989_vm8, %v6121_v40, %v6120_v2  ;;  %v6258_v13 = vsel %vm5971_vm15, %v6257_v42, %v13761_v11  ;;  %v6267_v9 = vrot.slane %v13994_v27, 2  ;;  %v6389_v50 = vrot.slane %v13761_v11, 4 }
 0x634   : > { %v6260_v45 = vsel %vm5974_vm0, %v6259_v4, %v6258_v13  ;;  %v6390_v33 = vrot.slane %v13738_v49, 3  ;;  %v6392_v37 = vrot.slane %v13806_v34, 2  ;;  %v6265_v23 = vrot.slane %v13830_v30, 3 }
 0x635   : > { %v6262_v35 = vsel %vm5977_vm1, %v6261_v17, %v6260_v45  ;;  %v6394_v25 = vrot.slane %v13783_v59, 1  ;;  %v6269_v19 = vrot.slane %v13974_v6, 1  ;;  %v6399_v49 = vrot.slane %v13994_v27, 6 }
 0x636   : > { %v6264_v8 = vsel %vm5980_vm2, %v6263_v3, %v6262_v35  ;;  %v6391_v21 = vsel %vm5971_vm15, %v6390_v33, %v6389_v50  ;;  %v6397_v53 = vrot.slane %v13830_v30, 7  ;;  %v6401_v32 = vrot.slane %v13974_v6, 5 }
 0x637   : > { %v6266_v57 = vsel %vm5983_vm4, %v6265_v23, %v6264_v8  ;;  %v6393_v11 = vsel %vm5974_vm0, %v6392_v37, %v6391_v21 }
 0x638   : > { %v6268_v34 = vsel %vm5986_vm6, %v6267_v9, %v6266_v57  ;;  %v6395_v1 = vsel %vm5977_vm1, %v6394_v25, %v6393_v11 }
 0x639   : > { %v14100_v18 = vsel %vm5989_vm8, %v6269_v19, %v6268_v34  ;;  %v6396_v59 = vsel %vm5980_vm2, %v13856_v22, %v6395_v1 }
 0x63a   : > { %v6398_v0 = vsel %vm5983_vm4, %v6397_v53, %v6396_v59 }
 0x63b   : > { %v6400_v40 = vsel %vm5986_vm6, %v6399_v49, %v6398_v0 }
 0x63c   : > { %v14108_v27 = vsel %vm5989_vm8, %v6401_v32, %v6400_v40 }
 0x63f   : > { %v5799_v31 = vpop.permute.xlu0 %5798 }
 0x640   : > { %v5908_v16 = vsel %vm4798_vm11, %v13640_v55, %v5799_v31 }
 0x641   : > { %v5940_v30 = vadd.f32 %v13602_v20, %v5908_v16  ;;  %v5801_v44 = vpop.permute.xlu1 %5800 }
 0x642   : > { %v5909_v7 = vsel %vm4798_vm11, %v13652_v15, %v5801_v44 }
 0x643   : > { %v5941_v22 = vadd.f32 %v13610_v29, %v5909_v7  ;;  %v5795_v58 = vpop.permute.xlu0 %5794  ;;  %v6188_v42 = vrot.slane %v5940_v30, 5  ;;  %v6154_v6 = vrot.slane %v5940_v30, 4  ;;  %v6056_v4 = vrot.slane %v5940_v30, 1 }
 0x644   : > { %v5906_v2 = vsel %vm4798_vm11, %v13636_v28, %v5795_v58  ;;  %v6090_v3 = vrot.slane %v5940_v30, 2  ;;  %v6222_v13 = vrot.slane %v5940_v30, 6  ;;  %v5991_v17 = vrot.slane %v5940_v30, 7 }
 0x645   : > { %v5938_v55 = vadd.f32 %v5906_v2, %v13604_v46  ;;  %v5797_v9 = vpop.permute.xlu1 %5796  ;;  %v6468_v20 = vrot.slane %v5941_v22, 5  ;;  %v6434_v45 = vrot.slane %v5941_v22, 4  ;;  %v6336_v50 = vrot.slane %v5941_v22, 1 }
 0x646   : > { %v5907_v15 = vsel %vm4798_vm11, %v13644_v43, %v5797_v9  ;;  %v6370_v29 = vrot.slane %v5941_v22, 2  ;;  %v6502_v33 = vrot.slane %v5941_v22, 6  ;;  %v6124_v37 = vrot.slane %v5940_v30, 3 }
 0x647   : > { %v5939_v35 = vadd.f32 %v5907_v15, %v13612_v47  ;;  %v6187_v23 = vrot.slane %v5938_v55, 6  ;;  %v6021_v8 = vrot.slane %v5938_v55, 1  ;;  %v6153_v28 = vrot.slane %v5938_v55, 5 }
 0x648   : > { %v6055_v21 = vrot.slane %v5938_v55, 2  ;;  %v6089_v25 = vrot.slane %v5938_v55, 3  ;;  %v6221_v57 = vrot.slane %v5938_v55, 7  ;;  %v14123_v46 = vsel %vm5971_vm15, %v5991_v17, %v5938_v55 }
 0x649   : > { %v6189_v19 = vsel %vm5971_vm15, %v6188_v42, %v6187_v23  ;;  %v6022_v11 = vsel %vm5971_vm15, %v5940_v30, %v6021_v8  ;;  %v6155_v43 = vsel %vm5971_vm15, %v6154_v6, %v6153_v28  ;;  %v6467_v49 = vrot.slane %v5939_v35, 6 }
 0x64a   : > { %v6057_v34 = vsel %vm5971_vm15, %v6056_v4, %v6055_v21  ;;  %v6091_v47 = vsel %vm5971_vm15, %v6090_v3, %v6089_v25  ;;  %v6223_v1 = vsel %vm5971_vm15, %v6222_v13, %v6221_v57  ;;  %v6301_v53 = vrot.slane %v5939_v35, 1  ;;  %v15345_v57 = vld [vmem:[#allocation114_spill] sm:$0xff] }
 0x64b   : > { %v6469_v59 = vsel %vm5971_vm15, %v6468_v20, %v6467_v49  ;;  %v6433_v0 = vrot.slane %v5939_v35, 5  ;;  %v6335_v32 = vrot.slane %v5939_v35, 2  ;;  %v6369_v40 = vrot.slane %v5939_v35, 3 }
 0x64c   : > { %v6302_v31 = vsel %vm5971_vm15, %v5941_v22, %v6301_v53  ;;  %v6501_v16 = vrot.slane %v5939_v35, 7  ;;  %v6123_v44 = vrot.slane %v5938_v55, 4  ;;  %v6271_v30 = vrot.slane %v5941_v22, 7 }
 0x64d   : > { %v6435_v7 = vsel %vm5971_vm15, %v6434_v45, %v6433_v0  ;;  %v6337_v58 = vsel %vm5971_vm15, %v6336_v50, %v6335_v32  ;;  %v14136_v42 = vsel %vm5971_vm15, %v6370_v29, %v6369_v40  ;;  %v6403_v6 = vrot.slane %v5939_v35, 4  ;;  %v15346_v32 = vld [vmem:[#allocation117_spill] sm:$0xff] }
 0x64e   : > { %v14139_v4 = vsel %vm5971_vm15, %v6502_v33, %v6501_v16  ;;  %v14142_v2 = vsel %vm5971_vm15, %v6124_v37, %v6123_v44  ;;  %v14145_v3 = vsel %vm5971_vm15, %v6271_v30, %v5939_v35  ;;  %v6404_v13 = vrot.slane %v5941_v22, 3 }
 0x650   : > { %v14148_v17 = vsel %vm5971_vm15, %v6404_v13, %v6403_v6 }
 0x65f   : > { %v5807_v55 = vpop.permute.xlu0 %5806 }
 0x660   : > { %v5912_v9 = vsel %vm4798_vm11, %v13656_v41, %v5807_v55 }
 0x661   : > { %v14153_v20 = vadd.f32 %v13698_v63, %v5912_v9  ;;  %v5809_v45 = vpop.permute.xlu1 %5808 }
 0x662   : > { %v5913_v50 = vsel %vm4798_vm11, %v13668_v24, %v5809_v45  ;;  %v15344_v24 = vld [vmem:[#allocation108_spill] sm:$0xff] }
 0x663   : > { %v14158_v15 = vadd.f32 %v13707_v52, %v5913_v50  ;;  %v5803_v29 = vpop.permute.xlu0 %5802  ;;  %v6192_v22 = vrot.slane %v14153_v20, 3  ;;  %v6025_v33 = vrot.slane %v14153_v20, 6  ;;  %v6158_v37 = vrot.slane %v14153_v20, 2 }
 0x664   : > { %v5910_v41 = vsel %vm4798_vm11, %v13648_v14, %v5803_v29  ;;  %v6059_v63 = vrot.slane %v14153_v20, 7  ;;  %v6226_v35 = vrot.slane %v14153_v20, 4  ;;  %v5995_v23 = vrot.slane %v14153_v20, 5 }
 0x665   : > { %v5942_v8 = vadd.f32 %v5910_v41, %v15344_v24  ;;  %v5805_v52 = vpop.permute.xlu1 %5804  ;;  %v6472_v28 = vrot.slane %v14158_v15, 3  ;;  %v6305_v21 = vrot.slane %v14158_v15, 6  ;;  %v6438_v25 = vrot.slane %v14158_v15, 2 }
 0x666   : > { %v5911_v49 = vsel %vm4798_vm11, %v15345_v57, %v5805_v52  ;;  %v6339_v14 = vrot.slane %v14158_v15, 7  ;;  %v6506_v53 = vrot.slane %v14158_v15, 4  ;;  %v6128_v0 = vrot.slane %v14153_v20, 1 }
 0x667   : > { %v5943_v40 = vadd.f32 %v5911_v49, %v15346_v32  ;;  %v6190_v16 = vrot.slane %v5942_v8, 4  ;;  %v6023_v44 = vrot.slane %v5942_v8, 7  ;;  %v6156_v30 = vrot.slane %v5942_v8, 3 }
 0x668   : > { %v6058_v6 = vsel %vm5974_vm0, %v5942_v8, %v6057_v34  ;;  %v6092_v13 = vrot.slane %v5942_v8, 1  ;;  %v6224_v55 = vrot.slane %v5942_v8, 5  ;;  %v5993_v9 = vrot.slane %v5942_v8, 6 }
 0x669   : > { %v6191_v45 = vsel %vm5974_vm0, %v6190_v16, %v6189_v19  ;;  %v6024_v50 = vsel %vm5974_vm0, %v6023_v44, %v6022_v11  ;;  %v6157_v29 = vsel %vm5974_vm0, %v6156_v30, %v6155_v43  ;;  %v14183_v41 = vsel %vm5977_vm1, %v6059_v63, %v6058_v6 }
 0x66a   : > { %v14186_v24 = vsel %vm5977_vm1, %v6192_v22, %v6191_v45  ;;  %v14189_v52 = vsel %vm5977_vm1, %v6025_v33, %v6024_v50  ;;  %v14192_v34 = vsel %vm5977_vm1, %v6158_v37, %v6157_v29  ;;  %v6470_v57 = vrot.slane %v5943_v40, 4 }
 0x66b   : > { %v6093_v49 = vsel %vm5974_vm0, %v6092_v13, %v6091_v47  ;;  %v6225_v19 = vsel %vm5974_vm0, %v6224_v55, %v6223_v1  ;;  %v6303_v11 = vrot.slane %v5943_v40, 7  ;;  %v6436_v32 = vrot.slane %v5943_v40, 3  ;;  %v6860_v6 = vpop.f32.mrb[88].mxu1 }
 0x66c   : > { %v6471_v43 = vsel %vm5974_vm0, %v6470_v57, %v6469_v59  ;;  %v14199_v63 = vsel %vm5977_vm1, %v14153_v20, %v6093_v49  ;;  %v14202_v22 = vsel %vm5977_vm1, %v6226_v35, %v6225_v19  ;;  %v6338_v33 = vsel %vm5974_vm0, %v5943_v40, %v6337_v58 }
 0x66d   : > { %v14206_v37 = vsel %vm5977_vm1, %v6472_v28, %v6471_v43  ;;  %v6304_v47 = vsel %vm5974_vm0, %v6303_v11, %v6302_v31  ;;  %v6437_v1 = vsel %vm5974_vm0, %v6436_v32, %v6435_v7  ;;  %v14211_v16 = vsel %vm5977_vm1, %v6339_v14, %v6338_v33 }
 0x66e   : > { %v14214_v59 = vsel %vm5977_vm1, %v6305_v21, %v6304_v47  ;;  %v14217_v20 = vsel %vm5977_vm1, %v6438_v25, %v6437_v1  ;;  %v6372_v35 = vrot.slane %v5943_v40, 1  ;;  %v6504_v44 = vrot.slane %v5943_v40, 5 }
 0x66f   : > { %v5994_v58 = vsel %vm5974_vm0, %v5993_v9, %v14123_v46  ;;  %v6126_v28 = vrot.slane %v5942_v8, 2  ;;  %v6273_v30 = vrot.slane %v5943_v40, 6  ;;  %v6275_v31 = vrot.slane %v14158_v15, 5  ;;  %v5571_v9 = vpop.f32.mrb[89].mxu1 }
 0x670   : > { %v6373_v7 = vsel %vm5974_vm0, %v6372_v35, %v14136_v42  ;;  %v6505_v14 = vsel %vm5974_vm0, %v6504_v44, %v14139_v4  ;;  %v14227_v21 = vsel %vm5977_vm1, %v5995_v23, %v5994_v58  ;;  %v6406_v25 = vrot.slane %v5943_v40, 2 }
 0x671   : > { %v14231_v13 = vsel %vm5977_vm1, %v14158_v15, %v6373_v7  ;;  %v14234_v46 = vsel %vm5977_vm1, %v6506_v53, %v6505_v14  ;;  %v6127_v8 = vsel %vm5974_vm0, %v6126_v28, %v14142_v2  ;;  %v6274_v42 = vsel %vm5974_vm0, %v6273_v30, %v14145_v3  ;;  %v6861_v53 = vpop.f32.mrb[90].mxu1  ;;  %v15350_v14 = vld [vmem:[#allocation123_spill] sm:$0xff] }
 0x672   : > { %v14241_v4 = vsel %vm5977_vm1, %v6128_v0, %v6127_v8  ;;  %v14244_v23 = vsel %vm5977_vm1, %v6275_v31, %v6274_v42  ;;  %v6407_v40 = vsel %vm5974_vm0, %v6406_v25, %v14148_v17  ;;  %v6408_v55 = vrot.slane %v14158_v15, 1  ;;  %v5574_v2 = vpop.f32.mrb[91].mxu1 }
 0x674   : > { %v14250_v45 = vsel %vm5977_vm1, %v6408_v55, %v6407_v40 }
 0x67d   : > { %v6826_v50 = vpop.f32.mrb[88].mxu0  ;;  %v14255_v57 = vpop.f32.mrb[92].mxu1 }
 0x67e   : > { %5814 = vrot.lane.b32.xlu0 %v6826_v50, %s15239_s17  ;;  %v5228_v3 = vpop.f32.mrb[89].mxu0  ;;  %v14258_v17 = vpop.f32.mrb[93].mxu1 }
 0x67f   : > { %v6827_v0 = vpop.f32.mrb[90].mxu0  ;;  %v14260_v15 = vpop.f32.mrb[94].mxu1 }
 0x680   : > { %5816 = vrot.lane.b32.xlu1 %v6827_v0, %s15239_s17  ;;  %v5231_v29 = vpop.f32.mrb[91].mxu0  ;;  %v14262_v49 = vpop.f32.mrb[95].mxu1 }
 0x682   : > { %5810 = vrot.lane.b32.xlu0 %v5228_v3, %s15239_s17 }
 0x684   : > { %5812 = vrot.lane.b32.xlu1 %v5231_v29, %s15239_s17 }
 0x68d   : > { %v6830_v19 = vpop.f32.mrb[92].mxu0 }
 0x68e   : > { %v5244_v11 = vpop.f32.mrb[93].mxu0 }
 0x68f   : > { %5818 = vrot.lane.b32.xlu0 %v5244_v11, %s15239_s17  ;;  %v6831_v32 = vpop.f32.mrb[94].mxu0 }
 0x690   : > { %v5247_v43 = vpop.f32.mrb[95].mxu0 }
 0x691   : > { %5820 = vrot.lane.b32.xlu1 %v5247_v43, %s15239_s17 }
 0x693   : > { %5822 = vrot.lane.b32.xlu0 %v6830_v19, %s15239_s17 }
 0x695   : > { %5824 = vrot.lane.b32.xlu1 %v6831_v32, %s15239_s17  ;;  %s14466_s17 = scalar_lea.vmem [#allocation5], %s6648_s18 }
 0x697   : > { %6201 = vrot.lane.b32.xlu0 %v13999_v61, %s15235_s22 }
 0x69b   : > { %6035 = vrot.lane.b32.xlu0 %v14010_v60, %s15089_s25  ;;  %v15347_v60 = vld [vmem:[#allocation44_spill] sm:$0xff] }
 0x69f   : > { %6167 = vrot.lane.b32.xlu0 %v14013_v56, %s15089_s25 }
 0x6a3   : > { %6069 = vrot.lane.b32.xlu0 %v14021_v36, %s15235_s22 }
 0x6a7   : > { %6481 = vrot.lane.b32.xlu0 %v14018_v12, %s15235_s22 }
 0x6ab   : > { %6103 = vrot.lane.b32.xlu0 %v14030_v54, %s15093_s16  ;;  %v15348_v54 = vld [vmem:[#allocation91_spill] sm:$0xff] }
 0x6af   : > { %6235 = vrot.lane.b32.xlu0 %v14034_v38, %s15093_s16 }
 0x6b3   : > { %6315 = vrot.lane.b32.xlu0 %v14037_v51, %s15089_s25 }
 0x6b7   : > { %6447 = vrot.lane.b32.xlu0 %v14049_v48, %s15089_s25 }
 0x6bb   : > { %6349 = vrot.lane.b32.xlu0 %v14058_v39, %s15235_s22 }
 0x6bf   : > { %6383 = vrot.lane.b32.xlu0 %v14061_v5, %s15093_s16 }
 0x6c3   : > { %6515 = vrot.lane.b32.xlu0 %v14065_v62, %s15093_s16  ;;  %v15349_v62 = vld [vmem:[#allocation43_spill] sm:$0xff] }
 0x6f0   : > { %v5815_v61 = vpop.permute.xlu0 %5814 }
 0x6f1   : > { %v5916_v56 = vsel %vm4798_vm11, %v15347_v60, %v5815_v61 }
 0x6f2   : > { %v14294_v12 = vadd.f32 %v6860_v6, %v5916_v56  ;;  %v5817_v36 = vpop.permute.xlu1 %5816 }
 0x6f3   : > { %v5917_v38 = vsel %vm4798_vm11, %v15348_v54, %v5817_v36 }
 0x6f4   : > { %v14298_v51 = vadd.f32 %v6861_v53, %v5917_v38  ;;  %v5811_v48 = vpop.permute.xlu0 %5810  ;;  %v6196_v39 = vrot.slane %v14294_v12, 1  ;;  %v6029_v5 = vrot.slane %v14294_v12, 4  ;;  %v6063_v33 = vrot.slane %v14294_v12, 5 }
 0x6f5   : > { %v5914_v47 = vsel %vm4798_vm11, %v15349_v62, %v5811_v48  ;;  %v6097_v1 = vrot.slane %v14294_v12, 6  ;;  %v6230_v35 = vrot.slane %v14294_v12, 2  ;;  %v5999_v44 = vrot.slane %v14294_v12, 3 }
 0x6f6   : > { %v5946_v58 = vadd.f32 %v5914_v47, %v5571_v9  ;;  %v5813_v28 = vpop.permute.xlu1 %5812  ;;  %v6476_v30 = vrot.slane %v14298_v51, 1  ;;  %v6309_v31 = vrot.slane %v14298_v51, 4  ;;  %v6343_v7 = vrot.slane %v14298_v51, 5 }
 0x6f7   : > { %v5915_v25 = vsel %vm4798_vm11, %v15350_v14, %v5813_v28  ;;  %v6377_v6 = vrot.slane %v14298_v51, 6  ;;  %v6510_v8 = vrot.slane %v14298_v51, 2  ;;  %v6131_v42 = vrot.slane %v14294_v12, 7 }
 0x6f8   : > { %v5947_v40 = vadd.f32 %v5915_v25, %v5574_v2  ;;  %v6194_v55 = vrot.slane %v5946_v58, 2  ;;  %v6027_v53 = vrot.slane %v5946_v58, 5  ;;  %v6160_v9 = vrot.slane %v5946_v58, 1 }
 0x6f9   : > { %v6061_v50 = vrot.slane %v5946_v58, 6  ;;  %v6095_v3 = vrot.slane %v5946_v58, 7  ;;  %v6228_v0 = vrot.slane %v5946_v58, 3  ;;  %v5997_v29 = vrot.slane %v5946_v58, 4 }
 0x6fa   : > { %v6195_v19 = vsel %vm5980_vm2, %v6194_v55, %v14186_v24  ;;  %v6028_v11 = vsel %vm5980_vm2, %v6027_v53, %v14189_v52  ;;  %v6161_v32 = vsel %vm5980_vm2, %v6160_v9, %v14192_v34  ;;  %v6474_v43 = vrot.slane %v5947_v40, 2 }
 0x6fb   : > { %v6197_v61 = vsel %vm5983_vm4, %v6196_v39, %v6195_v19  ;;  %v6030_v2 = vsel %vm5983_vm4, %v6029_v5, %v6028_v11  ;;  %v6162_v60 = vsel %vm5983_vm4, %v14294_v12, %v6161_v32  ;;  %v6062_v56 = vsel %vm5980_vm2, %v6061_v50, %v14183_v41  ;;  %v15354_v32 = vld [vmem:[#allocation76_spill] sm:$0xff] }
 0x6fc   : > { %v6064_v36 = vsel %vm5983_vm4, %v6063_v33, %v6062_v56  ;;  %v6475_v24 = vsel %vm5980_vm2, %v6474_v43, %v14206_v37  ;;  %v6096_v52 = vsel %vm5980_vm2, %v6095_v3, %v14199_v63  ;;  %v6229_v34 = vsel %vm5980_vm2, %v6228_v0, %v14202_v22 }
 0x6fd   : > { %v6477_v54 = vsel %vm5983_vm4, %v6476_v30, %v6475_v24  ;;  %v6098_v38 = vsel %vm5983_vm4, %v6097_v1, %v6096_v52  ;;  %v6231_v12 = vsel %vm5983_vm4, %v6230_v35, %v6229_v34  ;;  %v6307_v48 = vrot.slane %v5947_v40, 5 }
 0x6fe   : > { %v6440_v39 = vrot.slane %v5947_v40, 1  ;;  %v6341_v41 = vrot.slane %v5947_v40, 6  ;;  %v6375_v5 = vrot.slane %v5947_v40, 7  ;;  %v6508_v33 = vrot.slane %v5947_v40, 3 }
 0x6ff   : > { %v6308_v37 = vsel %vm5980_vm2, %v6307_v48, %v14214_v59  ;;  %v5998_v63 = vsel %vm5980_vm2, %v5997_v29, %v14227_v21  ;;  %v6130_v22 = vsel %vm5980_vm2, %v5946_v58, %v14241_v4  ;;  %v6277_v62 = vrot.slane %v5947_v40, 4 }
 0x700   : > { %v6310_v47 = vsel %vm5983_vm4, %v6309_v31, %v6308_v37  ;;  %v6441_v1 = vsel %vm5980_vm2, %v6440_v39, %v14217_v20  ;;  %v6342_v35 = vsel %vm5980_vm2, %v6341_v41, %v14211_v16  ;;  %v6376_v28 = vsel %vm5980_vm2, %v6375_v5, %v14231_v13  ;;  %v15351_v31 = vld [vmem:[#allocation89_spill] sm:$0xff] }
 0x701   : > { %v5819_v30 = vpop.permute.xlu0 %5818  ;;  %v6442_v59 = vsel %vm5983_vm4, %v14298_v51, %v6441_v1  ;;  %v6344_v21 = vsel %vm5983_vm4, %v6343_v7, %v6342_v35  ;;  %v14355_v4 = vsel %vm5983_vm4, %v6377_v6, %v6376_v28  ;;  %v6509_v58 = vsel %vm5980_vm2, %v6508_v33, %v14234_v46 }
 0x702   : > { %v5918_v20 = vsel %vm4798_vm11, %v15351_v31, %v5819_v30  ;;  %v14362_v16 = vsel %vm5983_vm4, %v6510_v8, %v6509_v58  ;;  %v14365_v13 = vsel %vm5983_vm4, %v5999_v44, %v5998_v63  ;;  %v14368_v14 = vsel %vm5983_vm4, %v6131_v42, %v6130_v22  ;;  %v15352_v8 = vld [vmem:[#allocation77_spill] sm:$0xff] }
 0x703   : > { %v14371_v7 = vadd.f32 %v5918_v20, %v14258_v17  ;;  %v5821_v25 = vpop.permute.xlu1 %5820  ;;  %v14375_v6 = vsel %vm5980_vm2, %v6277_v62, %v14244_v23  ;;  %v14379_v46 = vsel %vm5980_vm2, %v5947_v40, %v14250_v45  ;;  %v15353_v23 = vld [vmem:[#allocation99_spill] sm:$0xff]  ;;  %v6279_v20 = vrot.slane %v14298_v51, 3 }
 0x704   : > { %v5919_v55 = vsel %vm4798_vm11, %v15352_v8, %v5821_v25 }
 0x705   : > { %v14384_v44 = vadd.f32 %v5919_v55, %v14262_v49  ;;  %v5823_v42 = vpop.permute.xlu0 %5822  ;;  %v6198_v17 = vsel %vm5986_vm6, %v14371_v7, %v6197_v61  ;;  %v6031_v53 = vrot.slane %v14371_v7, 3  ;;  %v6163_v9 = vrot.slane %v14371_v7, 7 }
 0x706   : > { %v5920_v50 = vsel %vm4798_vm11, %v15353_v23, %v5823_v42  ;;  %v6065_v45 = vrot.slane %v14371_v7, 4  ;;  %v6099_v40 = vrot.slane %v14371_v7, 5  ;;  %v6232_v3 = vrot.slane %v14371_v7, 1 }
 0x707   : > { %v5952_v49 = vadd.f32 %v14255_v57, %v5920_v50  ;;  %v5825_v0 = vpop.permute.xlu1 %5824  ;;  %v6032_v29 = vsel %vm5986_vm6, %v6031_v53, %v6030_v2  ;;  %v6164_v19 = vsel %vm5986_vm6, %v6163_v9, %v6162_v60  ;;  %v6478_v11 = vsel %vm5986_vm6, %v14384_v44, %v6477_v54 }
 0x708   : > { %v5921_v43 = vsel %vm4798_vm11, %v15354_v32, %v5825_v0  ;;  %v6066_v61 = vsel %vm5986_vm6, %v6065_v45, %v6064_v36  ;;  %v6100_v56 = vsel %vm5986_vm6, %v6099_v40, %v6098_v38  ;;  %v6233_v24 = vsel %vm5986_vm6, %v6232_v3, %v6231_v12 }
 0x709   : > { %v5953_v52 = vadd.f32 %v14260_v15, %v5921_v43  ;;  %v14406_v57 = vpop.permute.xlu0 %6201  ;;  %v6199_v34 = vrot.slane %v5952_v49, 7  ;;  %v6033_v2 = vrot.slane %v5952_v49, 2  ;;  %v6165_v48 = vrot.slane %v5952_v49, 6 }
 0x70a   : > { %v6067_v60 = vrot.slane %v5952_v49, 3  ;;  %v6101_v39 = vrot.slane %v5952_v49, 4  ;;  %v14409_v54 = vsel %vm5989_vm8, %v5952_v49, %v6233_v24  ;;  %v6311_v41 = vrot.slane %v14384_v44, 3 }
 0x70b   : > { %v6200_v36 = vsel %vm5989_vm8, %v6199_v34, %v6198_v17  ;;  %v6034_v38 = vsel %vm5989_vm8, %v6033_v2, %v6032_v29  ;;  %v6166_v12 = vsel %vm5989_vm8, %v6165_v48, %v6164_v19  ;;  %v6479_v5 = vrot.slane %v5953_v52, 7 }
 0x70c   : > { %6203 = vrot.lane.b32.xlu1 %v6200_v36, %s15235_s22  ;;  %v6068_v15 = vsel %vm5989_vm8, %v6067_v60, %v6066_v61  ;;  %v6102_v33 = vsel %vm5989_vm8, %v6101_v39, %v6100_v56  ;;  %v6312_v37 = vsel %vm5986_vm6, %v6311_v41, %v6310_v47  ;;  %v6313_v63 = vrot.slane %v5953_v52, 2 }
 0x70d   : > { %v6036_v22 = vpop.permute.xlu0 %6035  ;;  %v6480_v62 = vsel %vm5989_vm8, %v6479_v5, %v6478_v11  ;;  %v6443_v1 = vrot.slane %v14384_v44, 7  ;;  %v6445_v35 = vrot.slane %v5953_v52, 6  ;;  %v6345_v28 = vrot.slane %v14384_v44, 4 }
 0x70e   : > { %v6314_v30 = vsel %vm5989_vm8, %v6313_v63, %v6312_v37  ;;  %v6347_v58 = vrot.slane %v5953_v52, 3  ;;  %v6379_v31 = vrot.slane %v14384_v44, 5  ;;  %v6381_v8 = vrot.slane %v5953_v52, 4 }
 0x70f   : > { %v6444_v25 = vsel %vm5986_vm6, %v6443_v1, %v6442_v59  ;;  %v6346_v47 = vsel %vm5986_vm6, %v6345_v28, %v6344_v21  ;;  %v6512_v55 = vrot.slane %v14384_v44, 1  ;;  %v6001_v9 = vrot.slane %v14371_v7, 2 }
 0x710   : > { %6037 = vrot.lane.b32.xlu1 %v6034_v38, %s15089_s25  ;;  %v6446_v42 = vsel %vm5989_vm8, %v6445_v35, %v6444_v25  ;;  %v6348_v17 = vsel %vm5989_vm8, %v6347_v58, %v6346_v47  ;;  %v6380_v53 = vsel %vm5986_vm6, %v6379_v31, %v14355_v4  ;;  %v6003_v21 = vrot.slane %v5952_v49, 1 }
 0x711   : > { %v6168_v23 = vpop.permute.xlu0 %6167  ;;  %v6382_v50 = vsel %vm5989_vm8, %v6381_v8, %v6380_v53  ;;  %v6513_v59 = vsel %vm5986_vm6, %v6512_v55, %v14362_v16  ;;  %v6133_v45 = vrot.slane %v14371_v7, 6  ;;  %v6002_v3 = vsel %vm5986_vm6, %v6001_v9, %v14365_v13 }
 0x712   : > { %v6514_v40 = vsel %vm5989_vm8, %v5953_v52, %v6513_v59  ;;  %v6135_v0 = vrot.slane %v5952_v49, 5  ;;  %v6411_v29 = vrot.slane %v14298_v51, 7  ;;  %v6004_v4 = vsel %vm5989_vm8, %v6003_v21, %v6002_v3 }
 0x713   : > { %v6134_v19 = vsel %vm5986_vm6, %v6133_v45, %v14368_v14  ;;  %v6280_v16 = vsel %vm5983_vm4, %v6279_v20, %v14375_v6  ;;  %v6281_v11 = vrot.slane %v14384_v44, 2  ;;  %v6283_v32 = vrot.slane %v5953_v52, 1 }
 0x714   : > { %6169 = vrot.lane.b32.xlu1 %v6166_v12, %s15089_s25  ;;  %v6136_v7 = vsel %vm5989_vm8, %v6135_v0, %v6134_v19  ;;  %v6412_v13 = vsel %vm5983_vm4, %v6411_v29, %v14379_v46  ;;  %v6413_v49 = vrot.slane %v14384_v44, 6  ;;  %v6415_v43 = vrot.slane %v5953_v52, 5 }
 0x715   : > { %v6070_v51 = vpop.permute.xlu0 %6069  ;;  %v6282_v14 = vsel %vm5986_vm6, %v6281_v11, %v6280_v16  ;;  %v6521_v34 = vsel %vm1570_vm3, %v14069_v10, %v6036_v22  ;;  %v6527_v52 = vsel %vm1570_vm3, %v14077_v26, %v6168_v23 }
 0x716   : > { %v6284_v61 = vsel %vm5989_vm8, %v6283_v32, %v6282_v14  ;;  %v6414_v6 = vsel %vm5986_vm6, %v6413_v49, %v6412_v13  ;;  %v6523_v46 = vsel %vm1636_vm5, %v6521_v34, %v6070_v51  ;;  %v6529_v10 = vsel %vm1636_vm5, %v6527_v52, %v14406_v57 }
 0x717   : > { %v6416_v56 = vsel %vm5989_vm8, %v6415_v43, %v6414_v6 }
 0x718   : > { %6071 = vrot.lane.b32.xlu1 %v6068_v15, %s15235_s22 }
 0x719   : > { %v6482_v24 = vpop.permute.xlu0 %6481 }
 0x71c   : > { %6483 = vrot.lane.b32.xlu1 %v6480_v62, %s15235_s22 }
 0x71d   : > { %v6104_v44 = vpop.permute.xlu0 %6103 }
 0x71e   : > { %v6525_v2 = vsel %vm1702_vm7, %v6523_v46, %v6104_v44 }
 0x71f   : > { %6545 = vst [vmem:[%s14466_s17] sm:$0xff] %v6525_v2 }
 0x720   : > { %6105 = vrot.lane.b32.xlu1 %v6102_v33, %s15093_s16 }
 0x721   : > { %v6236_v48 = vpop.permute.xlu0 %6235 }
 0x722   : > { %v6531_v60 = vsel %vm1702_vm7, %v6529_v10, %v6236_v48 }
 0x723   : > { %6546 = vst [vmem:[%s14466_s17 + $0x8] sm:$0xff] %v6531_v60 }
 0x724   : > { %6237 = vrot.lane.b32.xlu1 %v14409_v54, %s15093_s16 }
 0x725   : > { %v6316_v26 = vpop.permute.xlu0 %6315 }
 0x726   : > { %v6533_v36 = vsel %vm1570_vm3, %v14100_v18, %v6316_v26 }
 0x728   : > { %6317 = vrot.lane.b32.xlu1 %v6314_v30, %s15089_s25 }
 0x729   : > { %v6448_v39 = vpop.permute.xlu0 %6447 }
 0x72a   : > { %v6539_v12 = vsel %vm1570_vm3, %v14108_v27, %v6448_v39 }
 0x72b   : > { %v6541_v5 = vsel %vm1636_vm5, %v6539_v12, %v6482_v24 }
 0x72c   : > { %6449 = vrot.lane.b32.xlu1 %v6446_v42, %s15089_s25 }
 0x72d   : > { %v6350_v41 = vpop.permute.xlu0 %6349 }
 0x72e   : > { %v6535_v57 = vsel %vm1636_vm5, %v6533_v36, %v6350_v41 }
 0x730   : > { %6351 = vrot.lane.b32.xlu1 %v6348_v17, %s15235_s22  ;;  %s6751_s22 = sshll.u32 %s8920_s29, 10  ;;  %s8827_s29 = smov [#allocation5]  }
 0x731   : > { %v6384_v38 = vpop.permute.xlu0 %6383  ;;  %s14512_s14 = scalar_lea.hbm %s14572_s13, %s6751_s22  ;;  %s8747_s24 = sshll.u32 %s8827_s29, 4  ;;  %s8748_s24 = int_to_ptr.vmem [resolvable:$false] %s8747_s24 }
 0x732   : > { %v6537_v54 = vsel %vm1702_vm7, %v6535_v57, %v6384_v38  ;;  %s8749_s27 = scalar_lea.vmem %s8748_s24, 2048 }
 0x733   : > { %6547 = vst [vmem:[%s14466_s17 + $0x10] sm:$0xff] %v6537_v54 }
 0x734   : > { %6385 = vrot.lane.b32.xlu1 %v6382_v50, %s15093_s16 }
 0x735   : > { %v6516_v15 = vpop.permute.xlu0 %6515 }
 0x736   : > { %v6543_v33 = vsel %vm1702_vm7, %v6541_v5, %v6516_v15 }
 0x737   : > { %6548 = vst [vmem:[%s14466_s17 + $0x18] sm:$0xff] %v6543_v33 }
 0x738   : > { %6517 = vrot.lane.b32.xlu1 %v6514_v40, %s15093_s16  ;;  %s6567_s16 = sshll.u32 %s14466_s17, 4  ;;  %s14506_s16 = int_to_ptr.vmem [resolvable:$true] %s6567_s16 }
 0x739   : > { %s8743_s15 = scalar_lea.vmem %s14506_s16, 1024  ;;  %p8750_p8 = scmp.lt.s32.totalorder %s14506_s16, %s8748_s24 }
 0x73a   : > { %p8744_p6 = scmp.ne.s32.totalorder %s14506_s16, %s8743_s15  ;;  %p8751_p10 = scmp.lt.s32.totalorder %s8749_s27, %s8743_s15 }
 0x73c   : > { %p8745_p12 = pnand %p8744_p6, %p15355_p11  ;;  %p8752_p0 = por %p8751_p10, %p8750_p8 }
 0x73e   : > { %p8746_p13 = pneg %p8745_p12 }
 0x740   : > { %p8753_p2 = pnand %p8752_p0, %p8746_p13 }
 0x77e   : > { %v6204_v18 = vpop.permute.xlu1 %6203 }
 0x782   : > { %v6038_v37 = vpop.permute.xlu1 %6037 }
 0x783   : > { %v6522_v62 = vsel %vm1570_vm3, %v6004_v4, %v6038_v37 }
 0x786   : > { %v6170_v63 = vpop.permute.xlu1 %6169 }
 0x787   : > { %v6528_v28 = vsel %vm1570_vm3, %v6136_v7, %v6170_v63 }
 0x788   : > { %v6530_v58 = vsel %vm1636_vm5, %v6528_v28, %v6204_v18 }
 0x78a   : > { %v6072_v22 = vpop.permute.xlu1 %6071 }
 0x78b   : > { %v6524_v1 = vsel %vm1636_vm5, %v6522_v62, %v6072_v22 }
 0x78e   : > { %v6484_v27 = vpop.permute.xlu1 %6483 }
 0x792   : > { %v6106_v35 = vpop.permute.xlu1 %6105 }
 0x793   : > { %v6526_v30 = vsel %vm1702_vm7, %v6524_v1, %v6106_v35 }
 0x794   : > { %6549 = vst [vmem:[%s14466_s17 + $0x20] sm:$0xff] %v6526_v30 }
 0x796   : > { %v6238_v31 = vpop.permute.xlu1 %6237 }
 0x797   : > { %v6532_v20 = vsel %vm1702_vm7, %v6530_v58, %v6238_v31 }
 0x798   : > { %6550 = vst [vmem:[%s14466_s17 + $0x28] sm:$0xff] %v6532_v20 }
 0x79a   : > { %v6318_v25 = vpop.permute.xlu1 %6317 }
 0x79b   : > { %v6534_v55 = vsel %vm1570_vm3, %v6284_v61, %v6318_v25 }
 0x79e   : > { %v6450_v47 = vpop.permute.xlu1 %6449 }
 0x79f   : > { %v6540_v53 = vsel %vm1570_vm3, %v6416_v56, %v6450_v47 }
 0x7a0   : > { %v6542_v23 = vsel %vm1636_vm5, %v6540_v53, %v6484_v27 }
 0x7a2   : > { %v6352_v8 = vpop.permute.xlu1 %6351 }
 0x7a3   : > { %v6536_v42 = vsel %vm1636_vm5, %v6534_v55, %v6352_v8 }
 0x7a6   : > { %v6386_v17 = vpop.permute.xlu1 %6385 }
 0x7a7   : > { %v6538_v9 = vsel %vm1702_vm7, %v6536_v42, %v6386_v17 }
 0x7a8   : > { %6551 = vst [vmem:[%s14466_s17 + $0x30] sm:$0xff] %v6538_v9 }
 0x7aa   : > { %v6518_v50 = vpop.permute.xlu1 %6517 }
 0x7ab   : > { %v6544_v59 = vsel %vm1702_vm7, %v6542_v23, %v6518_v50 }
 0x7ac   : > { %6552 = vst [vmem:[%s14466_s17 + $0x38] sm:$0xff] %v6544_v59 }
 0x7ad   : > { %8756 = shalt.err (!%p8753_p2)
}
 0x7ae   : > { %s8757_s18 = scalar_lea.hbm %s14512_s14, 1024  ;;  %s8761_s23 = scalar_lea.hbm %s14572_s13, 2048 }
 0x7af   : > { %p8758_p4 = scmp.ne.s32.totalorder %s14512_s14, %s8757_s18  ;;  %p8762_p9 = scmp.lt.u32.totalorder %s14512_s14, %s14572_s13 }
 0x7b0   : > { %p8763_p1 = scmp.lt.u32.totalorder %s8761_s23, %s8757_s18  ;;  %p8765_p6 = scmp.lt.u32.totalorder %s8757_s18, %s14512_s14 }
 0x7b1   : > { %p8759_p5 = pnand %p8758_p4, %p15355_p11 }
 0x7b2   : > { %p8764_p3 = por %p8763_p1, %p8762_p9 }
 0x7b3   : > { %p8760_p7 = pneg %p8759_p5 }
 0x7b4   : > { %p8766_p12 = por %p8765_p6, %p8764_p3 }
 0x7b6   : > { %p8767_p13 = pnand %p8766_p12, %p8760_p7 }
 0x7b8   : > { %8770 = shalt.err (!%p8767_p13)
}
 0x7b9   : > { %s8828_s15 = smov 512  }
 0x7ba   : > { %6869 = dma.vmem_to_hbm [thread:$0]  (%p15355_p11), %s14506_s16, 1024, %s14512_s14, %s6554_s0, %s8828_s15, %s8828_s15, %s15089_s25  }
 0x7bb PF: > { %s15356_s24 = sld [smem:[#allocation8_spill]]  ;;  %p15357_p8 = scmp.ne.s32.totalorder %s14836_s21, 0 }
 0x7bc   : > { %p15358_p10 = scmp.ge.s32.totalorder %s8809_s28, 2 }
 0x7be   : > { %p6876_p0 = pnand %p15358_p10, %p15357_p8 }
 0x7c1   : > { %s6582_s27 = sand.u32 1, %s15356_s24  }
 0x7c2   : > { %s6583_s18 = scalar_lea.sflag [#allocation4], %s6582_s27 }
 0x7c3   : > { %8792 = dma.done.wait (!%p6876_p0), %s6583_s18, 1024  }
 0x7c4   : > { %8794 = vsyncadd (!%p6876_p0), %s6583_s18, 4294966272  ;;  %s15359_s28 = sld [smem:[#allocation10_spill]]  ;;  %s15360_s20 = sld [smem:[#allocation9_spill]] }
 0x7c5   : > { %s15361_s27 = sld [smem:[#allocation11_spill]]  ;;  %s15362_s25 = smov %s8801_s26 }
 0x7ca   : > { %p26_p2 = scmp.ge.s32.totalorder %s15359_s28, 4   ;;  %s15363_s26 = smov %s15360_s20 }
 0x7cc   :  { %28 = sbr.rel (!%p26_p2) target bundleno = 7 (0x7), region = 117 }
 0x7d3   :  { %6588 = vsyncpa [#allocation3], 1 }
 0x7d4   :  { %6590 = vsyncpa [#allocation3 + $0x1], 1 }
 0x7d5   :  { %6591 = vsyncpa [#allocation4], 1 }
 0x7d6   :  { %6593 = vsyncpa [#allocation4 + $0x1], 1 }

</bundles_post_ra>
